<compile_context>
chip_gen: v7x
topology: tpu7x:2x2x1
jax: 0.10.0
libtpu: 0.0.40
codegen_flags: <defaults>
</compile_context>

<pallas_src>
import functools
import math

import jax
import jax.numpy as jnp
from jax import lax
from jax.experimental import pallas as pl
from jax.experimental.pallas import tpu as pltpu


# --------------------------------------------------------------------------- #
# Pallas matmul kernel with fused bias (+ optional ReLU) epilogue
# --------------------------------------------------------------------------- #
def _round_up(x, m):
    return (x + m - 1) // m * m


def _k_pad(K):
    """Padded K so a large tk divides it with <=12.5% zero-padding overhead."""
    for tk in (512, 256, 128):
        Kp = _round_up(K, tk)
        if (Kp - K) * 8 <= K:
            return Kp
    return _round_up(K, 128)


def _n_pad(N):
    for tn in (256, 128):
        Np = _round_up(N, tn)
        if (Np - N) * 8 <= N:
            return Np
    return _round_up(N, 128)


def _largest_divisor(d, candidates):
    for c in candidates:
        if d % c == 0:
            return c
    return candidates[-1]


def _matmul_bias_kernel(a_ref, b_ref, bias_ref, o_ref, acc_ref, *, apply_relu):
    @pl.when(pl.program_id(2) == 0)
    def _():
        acc_ref[...] = jnp.zeros_like(acc_ref)

    # bf16 x bf16 -> f32 accumulation on the MXU.
    acc_ref[...] += jnp.dot(a_ref[...], b_ref[...],
                            preferred_element_type=jnp.float32)

    @pl.when(pl.program_id(2) == pl.num_programs(2) - 1)
    def _():
        res = acc_ref[...] + bias_ref[...]
        if apply_relu:
            res = jnp.maximum(res, 0.0)
        o_ref[...] = res


def _pallas_matmul_fused(a, w_pad, bias_pad, K, Nw, apply_relu):
    """a: (M, K) f32/bf16; w_pad: (Kp, Np) bf16 pre-padded; bias_pad: (1, Np)."""
    M = a.shape[0]
    Kp, Np = w_pad.shape
    tk = _largest_divisor(Kp, (512, 256, 128))
    tn = _largest_divisor(Np, (256, 128))
    tm = 256 if M >= 256 else 128
    Mp = _round_up(M, tm)
    a_p = jnp.pad(a.astype(jnp.bfloat16), ((0, Mp - M), (0, Kp - K)))

    out = pl.pallas_call(
        functools.partial(_matmul_bias_kernel, apply_relu=apply_relu),
        out_shape=jax.ShapeDtypeStruct((Mp, Np), jnp.float32),
        grid_spec=pltpu.PrefetchScalarGridSpec(
            num_scalar_prefetch=0,
            grid=(Mp // tm, Np // tn, Kp // tk),
            in_specs=[pl.BlockSpec((tm, tk), lambda i, j, k: (i, k)),
                      pl.BlockSpec((tk, tn), lambda i, j, k: (k, j)),
                      pl.BlockSpec((1, tn), lambda i, j, k: (0, j))],
            out_specs=pl.BlockSpec((tm, tn), lambda i, j, k: (i, j)),
            scratch_shapes=[pltpu.VMEM((tm, tn), jnp.float32)],
        ),
        compiler_params=pltpu.CompilerParams(
            dimension_semantics=("parallel", "parallel", "arbitrary"),
            vmem_limit_bytes=32 * 1024 * 1024),
    )(a_p, w_pad, bias_pad)
    return out[:M, :Nw]


def matmul_bias(a, p, apply_relu=False):
    """(M, K) @ packed weight dict -> (M, N) f32, bias(+ReLU) fused."""
    M, K = a.shape
    Kp, Np = p['wmat'].shape
    Nw = p['bias'].shape[0]
    if M >= 64 and Nw >= 64 and K >= 128:
        bias_pad = jnp.pad(p['bias'], (0, Np - Nw)).reshape(1, Np)
        return _pallas_matmul_fused(a, p['wmat'], bias_pad, K, Nw, apply_relu)
    # Skinny GEMV-like shapes (M<=8, N in {1,16,32}, tiny K): XLA handles these
    # better than 128x128 Pallas tiles.
    a_p = jnp.pad(a.astype(jnp.bfloat16), ((0, 0), (0, Kp - K)))
    y = jnp.dot(a_p, p['wmat'], preferred_element_type=jnp.float32)[:, :Nw]
    y = y + p['bias'][None, :]
    if apply_relu:
        y = jnp.maximum(y, 0.0)
    return y


# --------------------------------------------------------------------------- #
# Parameter packing (pre-reshaped, pre-padded bf16 weight matrices)
# --------------------------------------------------------------------------- #
def pack_matmul(wmat_f32, bias_f32):
    K, N = wmat_f32.shape
    Kp, Np = _k_pad(K), _n_pad(N)
    wp = jnp.pad(wmat_f32.astype(jnp.bfloat16), ((0, Kp - K), (0, Np - N)))
    return {'wmat': wp, 'bias': bias_f32.astype(jnp.float32)}


def pack_conv(w, b):
    # w: (O, C, kh, kw) -> (kh*kw*C, O), matching the NHWC im2col (i, j, c) order.
    O, C, kh, kw = w.shape
    wmat = w.transpose(2, 3, 1, 0).reshape(kh * kw * C, O)
    return pack_matmul(wmat, b)


def pack_linear(w, b):
    # w: (out, in) -> (in, out)
    return pack_matmul(w.T, b)


class ParamGen:
    def __init__(self, seed=0):
        self.key = jax.random.PRNGKey(seed)

    def _next(self):
        self.key, k = jax.random.split(self.key)
        return k

    def conv_raw(self, o, c, kh, kw, std=None):
        if std is None:
            std = math.sqrt(2.0 / (c * kh * kw))
        w = jax.random.normal(self._next(), (o, c, kh, kw), jnp.float32) * std
        b = jnp.zeros((o,), jnp.float32)
        return w, b

    def conv(self, o, c, kh, kw, bias=True, std=None):
        w, b = self.conv_raw(o, c, kh, kw, std)
        return pack_conv(w, b)          # bias=False convs simply keep zero bias

    def linear_raw(self, in_f, out_f):
        w = jax.random.normal(self._next(), (out_f, in_f), jnp.float32) * \
            math.sqrt(1.0 / in_f)
        b = jnp.zeros((out_f,), jnp.float32)
        return w, b

    def linear(self, in_f, out_f):
        return pack_linear(*self.linear_raw(in_f, out_f))

    def sn_linear(self, in_f, out_f, iters=20):
        # TODO(synk): repo's SpectralNorm class not provided; approximate with
        # power-iteration spectral normalisation applied once at init.
        w, b = self.linear_raw(in_f, out_f)
        u = jnp.ones((w.shape[0],), jnp.float32)
        u = u / jnp.linalg.norm(u)
        v = None
        for _ in range(iters):
            v = w.T @ u
            v = v / (jnp.linalg.norm(v) + 1e-12)
            u = w @ v
            u = u / (jnp.linalg.norm(u) + 1e-12)
        sigma = u @ (w @ v)
        return pack_linear(w / sigma, b)


def ffb_params(pg, ch):
    return {'rcu1': {'c1': pg.conv(ch, ch, 3, 3), 'c2': pg.conv(ch, ch, 3, 3)},
            'rcu2': {'c1': pg.conv(ch, ch, 3, 3), 'c2': pg.conv(ch, ch, 3, 3)}}


def classifier_params(pg, out_ch, in_ch, dilations=(6, 12, 18, 24)):
    # 4 dilated 3x3 convs fused into one K-stacked weight matrix.
    wmats, bsum = [], jnp.zeros((out_ch,), jnp.float32)
    for _ in dilations:
        w, b = pg.conv_raw(out_ch, in_ch, 3, 3, std=0.01)
        wmats.append(w.transpose(2, 3, 1, 0).reshape(9 * in_ch, out_ch))
        bsum = bsum + b
    return pack_matmul(jnp.concatenate(wmats, axis=0), bsum)


def build_params(channel):
    pg = ParamGen(0)
    P = {}
    # ---- RGB encoder (B2_ResNet stand-in) ----
    # TODO(synk): B2_ResNet definition not provided; each ResNet50 stage is
    # stood in by one conv+BN+ReLU with matching channels / strides.
    P['res_conv1'] = pg.conv(64, 3, 7, 7, bias=False)
    P['res_layer1'] = pg.conv(256, 64, 3, 3, bias=False)
    P['res_layer2'] = pg.conv(512, 256, 3, 3, bias=False)
    P['res_layer3_1'] = pg.conv(1024, 512, 3, 3, bias=False)
    P['res_layer4_1'] = pg.conv(2048, 1024, 3, 3, bias=False)
    P['res_layer3_2'] = pg.conv(1024, 512, 3, 3, bias=False)
    P['res_layer4_2'] = pg.conv(2048, 1024, 3, 3, bias=False)
    # ---- Depth encoder (B2_VGG stand-in) ----
    # TODO(synk): B2_VGG definition not provided; one conv+ReLU per stage.
    P['vgg_conv1'] = pg.conv(64, 3, 3, 3)
    P['vgg_conv2'] = pg.conv(128, 64, 3, 3)
    P['vgg_conv3'] = pg.conv(256, 128, 3, 3)
    P['vgg_conv4_1'] = pg.conv(512, 256, 3, 3)
    P['vgg_conv5_1'] = pg.conv(512, 512, 3, 3)
    P['vgg_conv4_2'] = pg.conv(512, 256, 3, 3)
    P['vgg_conv5_2'] = pg.conv(512, 512, 3, 3)
    # ---- Res50_Decoder ----
    rd = {'conv4': pg.conv(channel, 2048, 3, 3),
          'conv3': pg.conv(channel, 1024, 3, 3),
          'conv2': pg.conv(channel, 512, 3, 3),
          'conv1': pg.conv(channel, 256, 3, 3)}
    for name in ('path4', 'path3', 'path2', 'path1'):
        rd[name] = ffb_params(pg, channel)
    rd['out0'] = pg.conv(128, channel, 3, 3)
    rd['out1'] = pg.conv(32, 128, 3, 3)
    rd['out2'] = pg.conv(1, 32, 1, 1)
    P['rgb_decoder'] = rd
    # ---- VGG_Decoder ----
    vd = {'conv5': classifier_params(pg, channel, 512),
          'conv4': classifier_params(pg, channel, 512),
          'conv3': classifier_params(pg, channel, 256),
          'conv2': classifier_params(pg, channel, 128),
          'conv1': classifier_params(pg, channel, 64)}
    for name in ('path5', 'path4', 'path3', 'path2', 'path1'):
        vd[name] = ffb_params(pg, channel)
    vd['out0'] = pg.conv(128, channel, 3, 3)
    vd['out1'] = pg.conv(32, 128, 3, 3)
    vd['out2'] = pg.conv(1, 32, 1, 1)
    P['depth_decoder'] = vd
    # ---- Fusion_mix (BasicConv2d = conv(no bias) + BN) ----
    P['fusion'] = [pg.conv(64, 64 + 256, 3, 3, bias=False),
                   pg.conv(128, 128 + 512, 3, 3, bias=False),
                   pg.conv(256, 256 + 1024, 3, 3, bias=False),
                   pg.conv(512, 512 + 2048, 3, 3, bias=False),
                   pg.conv(512, 512 + 2048, 3, 3, bias=False)]
    # ---- Mutual_info_reg ----
    latent, feat = 10, 40
    P['mi'] = {'fc1_rgb1': pg.linear(channel * feat * feat, latent * 10),
               'fc1_depth1': pg.linear(channel * feat * feat, latent * 10),
               'fc1_mu1': pg.sn_linear(latent * 10, latent * 2),
               'fc1_mu2': pg.sn_linear(latent * 2, latent * 10),
               'fc1_logvar1': pg.sn_linear(latent * 10, latent * 2),
               'fc1_logvar2': pg.sn_linear(latent * 2, latent * 10)}
    return P


# --------------------------------------------------------------------------- #
# NN building blocks (all activations NHWC f32)
# --------------------------------------------------------------------------- #
def relu(x):
    return jnp.maximum(x, 0.0)


def sigmoid(x):
    return jax.nn.sigmoid(x)


def conv2d(x, p, k, stride=1, padding=0, dilation=1, apply_relu=False):
    """NHWC conv via channel-concat im2col + fused Pallas matmul."""
    N, H, W, C = x.shape
    if k == 1 and stride == 1 and padding == 0 and dilation == 1:
        col = x.reshape(N * H * W, C)
        out_h, out_w = H, W
    else:
        xp = jnp.pad(x, ((0, 0), (padding, padding), (padding, padding), (0, 0)))
        Hp, Wp = H + 2 * padding, W + 2 * padding
        out_h = (Hp - (dilation * (k - 1) + 1)) // stride + 1
        out_w = (Wp - (dilation * (k - 1) + 1)) // stride + 1
        cols = []
        for i in range(k):
            for j in range(k):
                hs, ws = i * dilation, j * dilation
                cols.append(xp[:, hs:hs + stride * (out_h - 1) + 1:stride,
                                  ws:ws + stride * (out_w - 1) + 1:stride, :])
        col = jnp.concatenate(cols, axis=-1).reshape(N * out_h * out_w, k * k * C)
    y = matmul_bias(col, p, apply_relu=apply_relu)
    O = p['bias'].shape[0]
    return y.reshape(N, out_h, out_w, O)


def classifier_module(x, p, dilations=(6, 12, 18, 24)):
    """Classifier_Module: 4 dilated 3x3 convs over the same input, fused into
    a single K-stacked matmul (branch sum folds into the K reduction)."""
    N, H, W, C = x.shape
    cols = []
    for d in dilations:
        xp = jnp.pad(x, ((0, 0), (d, d), (d, d), (0, 0)))
        for i in range(3):
            for j in range(3):
                hs, ws = i * d, j * d
                cols.append(xp[:, hs:hs + H, ws:ws + W, :])
    col = jnp.concatenate(cols, axis=-1).reshape(N * H * W, len(dilations) * 9 * C)
    y = matmul_bias(col, p)
    return y.reshape(N, H, W, p['bias'].shape[0])


def linear(x, p, apply_relu=False):
    return matmul_bias(x, p, apply_relu=apply_relu)


def batchnorm(x, eps=1e-5):
    # train-mode BatchNorm2d with default affine params (gamma=1, beta=0)
    mean = x.mean(axis=(0, 1, 2), keepdims=True)
    var = x.var(axis=(0, 1, 2), keepdims=True)
    return (x - mean) / jnp.sqrt(var + eps)


def maxpool(x, k, stride, padding=0):
    return lax.reduce_window(
        x, -jnp.inf, lax.max,
        (1, k, k, 1), (1, stride, stride, 1),
        [(0, 0), (padding, padding), (padding, padding), (0, 0)])


def _lin_matrix(in_size, out_size, align_corners):
    if out_size == in_size:
        return jnp.eye(in_size, dtype=jnp.float32)
    if out_size == 1:
        return jnp.zeros((1, in_size), jnp.float32).at[0, 0].set(1.0)
    d = jnp.arange(out_size, dtype=jnp.float32)
    if align_corners:
        src = d * (in_size - 1) / (out_size - 1)
    else:
        src = (d + 0.5) * (in_size / out_size) - 0.5
        src = jnp.clip(src, 0.0, in_size - 1)
    i0 = jnp.clip(jnp.floor(src).astype(jnp.int32), 0, in_size - 1)
    i1 = jnp.minimum(i0 + 1, in_size - 1)
    frac = src - i0.astype(jnp.float32)
    Wm = jnp.zeros((out_size, in_size), jnp.float32)
    Wm = Wm.at[jnp.arange(out_size), i0].add(1.0 - frac)
    Wm = Wm.at[jnp.arange(out_size), i1].add(frac)
    return Wm


def resize_bilinear(x, out_h, out_w, align_corners=True):
    # NHWC bilinear resize as two small einsums.
    Wh = _lin_matrix(x.shape[1], out_h, align_corners)
    Ww = _lin_matrix(x.shape[2], out_w, align_corners)
    y = jnp.einsum('oh,nhwc->nowc', Wh, x)
    y = jnp.einsum('pw,nowc->nopc', Ww, y)
    return y


def upsample(x, scale, align_corners=True):
    oh = int(math.floor(x.shape[1] * scale + 1e-9))
    ow = int(math.floor(x.shape[2] * scale + 1e-9))
    return resize_bilinear(x, oh, ow, align_corners)


# --------------------------------------------------------------------------- #
# Module forward functions
# --------------------------------------------------------------------------- #
def rcu(x, p):
    out = relu(x)
    out = conv2d(out, p['c1'], 3, padding=1, apply_relu=True)
    out = conv2d(out, p['c2'], 3, padding=1)
    return out + x


def ffb(p, *xs, interp=True):
    out = xs[0]
    if len(xs) == 2:
        out = out + rcu(xs[1], p['rcu1'])
    out = rcu(out, p['rcu2'])
    if interp:
        out = resize_bilinear(out, out.shape[1] * 2, out.shape[2] * 2,
                              align_corners=True)
    return out


def res50_encoder(x, P):
    x = conv2d(x, P['res_conv1'], 7, stride=2, padding=3)
    x = relu(batchnorm(x))
    x = maxpool(x, 3, 2, 1)
    x1 = relu(batchnorm(conv2d(x, P['res_layer1'], 3, padding=1)))
    x2 = relu(batchnorm(conv2d(x1, P['res_layer2'], 3, stride=2, padding=1)))
    x3 = relu(batchnorm(conv2d(x2, P['res_layer3_1'], 3, stride=2, padding=1)))
    x4 = relu(batchnorm(conv2d(x3, P['res_layer4_1'], 3, stride=2, padding=1)))
    return [x1, x2, x3, x4]


def vgg_encoder(x, P):
    x1 = conv2d(x, P['vgg_conv1'], 3, padding=1, apply_relu=True)
    x2 = conv2d(maxpool(x1, 2, 2), P['vgg_conv2'], 3, padding=1, apply_relu=True)
    x3 = conv2d(maxpool(x2, 2, 2), P['vgg_conv3'], 3, padding=1, apply_relu=True)
    x4 = conv2d(maxpool(x3, 2, 2), P['vgg_conv4_1'], 3, padding=1, apply_relu=True)
    x5 = conv2d(maxpool(x4, 2, 2), P['vgg_conv5_1'], 3, padding=1, apply_relu=True)
    return [x1, x2, x3, x4, x5]


def res50_decoder(x_fea, P):
    x1, x2, x3, x4 = x_fea
    c1 = conv2d(x1, P['conv1'], 3, padding=1)
    c2 = conv2d(x2, P['conv2'], 3, padding=1)
    c3 = conv2d(x3, P['conv3'], 3, padding=1)
    c4 = conv2d(x4, P['conv4'], 3, padding=1)
    conv4_feat = ffb(P['path4'], c4)
    conv43 = ffb(P['path3'], conv4_feat, c3)
    conv432 = ffb(P['path2'], conv43, c2)
    conv4321 = ffb(P['path1'], conv432, c1)
    y = conv2d(conv4321, P['out0'], 3, padding=1)
    y = resize_bilinear(y, y.shape[1] * 2, y.shape[2] * 2, align_corners=False)
    y = conv2d(y, P['out1'], 3, padding=1, apply_relu=True)
    pred = conv2d(y, P['out2'], 1)
    return pred, conv432, conv4_feat


def vgg_decoder(x1, x2, x3, x4, x5, P):
    c1 = classifier_module(x1, P['conv1'])
    c2 = classifier_module(x2, P['conv2'])
    c3 = classifier_module(x3, P['conv3'])
    c4 = classifier_module(x4, P['conv4'])
    c5 = classifier_module(x5, P['conv5'])
    conv5_feat = ffb(P['path5'], c5)
    conv54 = ffb(P['path4'], conv5_feat, c4)
    conv543 = ffb(P['path3'], conv54, c3)
    conv5432 = ffb(P['path2'], conv543, c2)
    conv54321 = ffb(P['path1'], conv5432, c1, interp=False)
    y = conv2d(conv54321, P['out0'], 3, padding=1)
    y = conv2d(y, P['out1'], 3, padding=1, apply_relu=True)
    pred = conv2d(y, P['out2'], 1)
    return pred, conv5432, conv5_feat


def fusion_mix(x_fea, plist):
    return [batchnorm(conv2d(x, p, 3, padding=1)) for x, p in zip(x_fea, plist)]


def holistic_attention(attention, x):
    # TODO(synk): HA module definition not provided (Gaussian-blur holistic
    # attention); implemented as elementwise attention gating.
    return x * attention


def harefine_resnet(P, x2, initial_sal):
    att = sigmoid(upsample(initial_sal, 0.125, align_corners=True))
    x2_2 = holistic_attention(att, x2)
    x3_2 = relu(batchnorm(conv2d(x2_2, P['res_layer3_2'], 3, stride=2, padding=1)))
    x4_2 = relu(batchnorm(conv2d(x3_2, P['res_layer4_2'], 3, stride=2, padding=1)))
    return x2_2, x3_2, x4_2


def harefine_vgg(P, x3, initial_sal):
    att = sigmoid(upsample(initial_sal, 0.25, align_corners=True))
    x3_2 = holistic_attention(att, x3)
    x4_2 = conv2d(maxpool(x3_2, 2, 2), P['vgg_conv4_2'], 3, padding=1,
                  apply_relu=True)
    x5_2 = conv2d(maxpool(x4_2, 2, 2), P['vgg_conv5_2'], 3, padding=1,
                  apply_relu=True)
    return x3_2, x4_2, x5_2


def concate(x1_list, x2_list):
    out = []
    for a, b in zip(x1_list, x2_list):
        # Original uses a square (H, H) target; (H, W) is equivalent here and
        # robust to non-square maps.
        temp = resize_bilinear(a, b.shape[1], b.shape[2], align_corners=True)
        out.append(jnp.concatenate([temp, b], axis=-1))
    return out


def l2_normalize(x, eps=1e-12):
    n = jnp.sqrt(jnp.sum(x * x, axis=1, keepdims=True))
    return x / jnp.maximum(n, eps)


def mutual_info_reg(rgb_feat, depth_feat, P, channel, feat_size):
    N = rgb_feat.shape[0]
    # flatten in NCHW order to mirror torch .view(-1, C*H*W)
    rgb = rgb_feat.transpose(0, 3, 1, 2).reshape(N, channel * feat_size * feat_size)
    dep = depth_feat.transpose(0, 3, 1, 2).reshape(N, channel * feat_size * feat_size)
    rgb = linear(rgb, P['fc1_rgb1'])
    dep = linear(dep, P['fc1_depth1'])
    rgb = l2_normalize(rgb)
    dep = l2_normalize(dep)
    mu_rgb = linear(linear(rgb, P['fc1_mu1'], apply_relu=True), P['fc1_mu2'])
    logvar_rgb = jnp.tanh(linear(linear(rgb, P['fc1_logvar1'], apply_relu=True),
                                 P['fc1_logvar2']))
    # TODO(synk): torch.randperm is nondeterministic; use a fixed-key permutation.
    perm = jax.random.permutation(jax.random.PRNGKey(1), N)
    positive = -(mu_rgb - dep) ** 2 / jnp.exp(logvar_rgb)
    negative = -(mu_rgb - dep[perm, :]) ** 2 / jnp.exp(logvar_rgb)
    upper = (positive.sum(axis=-1) - negative.sum(axis=-1)).mean()
    return upper / 2.0


def generator2_forward(P, x, depth, channel):
    # NCHW (module interface) -> NHWC (internal layout)
    x = x.transpose(0, 2, 3, 1)
    depth = depth.transpose(0, 2, 3, 1)

    # RGB branch
    x_rgb = res50_encoder(x, P)
    x1, x2, x3, x4 = x_rgb
    rgb_pred, rgb_fea_init, _ = res50_decoder(x_rgb, P['rgb_decoder'])
    x2_2, x3_2, x4_2 = harefine_resnet(P, x2, rgb_pred)
    x_rgb_ref = [x1, x2_2, x3_2, x4_2]
    rgb_ref_pred, rgb_fea_ref, _ = res50_decoder(x_rgb_ref, P['rgb_decoder'])

    # Depth / RGBD branch
    x_rgbd_init = vgg_encoder(depth, P)
    x_nr = [x1, x2_2, x3_2, x4_2, x4_2]
    x_rgbd = concate(x_nr, x_rgbd_init)
    x_rgbd = fusion_mix(x_rgbd, P['fusion'])
    x1_r, x2_r, x3_r, x4_r, x5_r = x_rgbd
    rgbd_pred, rgbd_fea_init, _ = vgg_decoder(x1_r, x2_r, x3_r, x4_r, x5_r,
                                              P['depth_decoder'])
    x3_2_r, x4_2_r, x5_2_r = harefine_vgg(P, x3_r, rgbd_pred)
    rgbd_ref_pred, rgbd_fea_ref, _ = vgg_decoder(x1_r, x2_r, x3_2_r, x4_2_r,
                                                 x5_2_r, P['depth_decoder'])

    # Mutual information regulariser
    rs40 = lambda t: resize_bilinear(t, 40, 40, align_corners=True)
    mi1 = mutual_info_reg(rs40(rgb_fea_ref), rs40(rgbd_fea_ref),
                          P['mi'], channel, 40)
    mi2 = mutual_info_reg(rs40(rgb_fea_init), rs40(rgbd_fea_init),
                          P['mi'], channel, 40)
    mi_min_loss = 0.5 * (mi1 + mi2)

    to_nchw = lambda t: t.transpose(0, 3, 1, 2)
    return (to_nchw(rgbd_pred), to_nchw(rgbd_ref_pred),
            to_nchw(rgbd_fea_init), to_nchw(rgbd_fea_ref),
            to_nchw(rgb_pred), to_nchw(rgb_ref_pred),
            to_nchw(rgb_fea_init), to_nchw(rgb_fea_ref), mi_min_loss)


# --------------------------------------------------------------------------- #
if __name__ == "__main__":
    CHANNEL = 16          # Generator2(channel=16)  -- decoder feature width
    B, H, W = 2, 32, 32   # small but /32-compatible input resolution

    key = jax.random.PRNGKey(0)
    kx, kd = jax.random.split(key)
    x = jax.random.normal(kx, (B, 3, H, W), jnp.float32)
    depth = jax.random.normal(kd, (B, 3, H, W), jnp.float32)

    params = build_params(CHANNEL)

    # One end-to-end jit over the whole forward pass.
    fwd = jax.jit(functools.partial(generator2_forward, channel=CHANNEL))
    outs = fwd(params, x, depth)
    outs = jax.block_until_ready(outs)

    # sanity: predictions are full-resolution single-channel maps
    assert outs[0].shape == (B, 1, H, W)   # rgbd_pred
    assert outs[4].shape == (B, 1, H, W)   # rgb_pred
    assert outs[8].shape == ()             # mi_min_loss scalar
    print("KERNEL_OK")
</pallas_src>

<mosaic_0001>
module attributes {stable_mosaic.version = 11 : i64} {
  func.func private @main(%arg0: i32) attributes {dimension_semantics = [#tpu.dimension_semantics<core_parallel>], iteration_bounds = array<i64: 2>, tpu.core_type = #tpu.core_type<sc_scalar_subcore>, window_params = []} {
    return
  }
}

module attributes {stable_mosaic.version = 11 : i64} {
  func.func private @main(%arg0: i32) attributes {dimension_semantics = [#tpu.dimension_semantics<core_parallel>], iteration_bounds = array<i64: 2>, tpu.core_type = #tpu.core_type<sc_scalar_subcore>, window_params = []} {
    return
  }
}

module attributes {stable_mosaic.version = 11 : i64} {
  func.func @_matmul_bias_kernel(%arg0: i32, %arg1: i32, %arg2: i32, %arg3: memref<256x256xbf16, #tpu.memory_space<vmem>>, %arg4: memref<256x128xbf16, #tpu.memory_space<vmem>>, %arg5: memref<1x128xf32, #tpu.memory_space<vmem>>, %arg6: memref<256x128xf32, #tpu.memory_space<vmem>>, %arg7: memref<256x128xf32, #tpu.memory_space<vmem>>) attributes {dimension_semantics = [#tpu.dimension_semantics<parallel>, #tpu.dimension_semantics<parallel>, #tpu.dimension_semantics<arbitrary>], iteration_bounds = array<i64: 2, 1, 1>, scalar_prefetch = 0 : i64, scratch_operands = 1 : i64, tpu.core_type = #tpu.core_type<tc>, window_params = [{transform_indices = @transform_0, window_bounds = array<i64: 256, 256>}, {transform_indices = @transform_1, window_bounds = array<i64: 256, 128>}, {transform_indices = @transform_2, window_bounds = array<i64: 1, 128>}, {transform_indices = @transform_3, window_bounds = array<i64: 256, 128>}]} {
    %c0_i32 = arith.constant 0 : i32
    %0 = arith.cmpi eq, %arg2, %c0_i32 : i32
    %1 = arith.extui %0 : i1 to i32
    %c0_i32_0 = arith.constant 0 : i32
    %2 = arith.cmpi ne, %1, %c0_i32_0 : i32
    scf.if %2 {
      %cst_10 = arith.constant 0.000000e+00 : f32
      %12 = vector.broadcast %cst_10 : f32 to vector<256x128xf32>
      %c0_11 = arith.constant 0 : index
      %c0_12 = arith.constant 0 : index
      %13 = vector.load %arg7[%c0_11, %c0_12] : memref<256x128xf32, #tpu.memory_space<vmem>>, vector<256x128xf32>
      tpu.vector_store %arg7[%c0_11, %c0_12], %12 {strides = array<i32>} : memref<256x128xf32, #tpu.memory_space<vmem>>, vector<256x128xf32>,
    } else {
    }
    %c0 = arith.constant 0 : index
    %c0_1 = arith.constant 0 : index
    %3 = vector.load %arg7[%c0, %c0_1] : memref<256x128xf32, #tpu.memory_space<vmem>>, vector<256x128xf32>
    %c0_2 = arith.constant 0 : index
    %c0_3 = arith.constant 0 : index
    %4 = vector.load %arg3[%c0_2, %c0_3] : memref<256x256xbf16, #tpu.memory_space<vmem>>, vector<256x256xbf16>
    %c0_4 = arith.constant 0 : index
    %c0_5 = arith.constant 0 : index
    %5 = vector.load %arg4[%c0_4, %c0_5] : memref<256x128xbf16, #tpu.memory_space<vmem>>, vector<256x128xbf16>
    %cst = arith.constant dense<0.000000e+00> : vector<256x128xf32>
    %6 = tpu.matmul %4, %5, %cst {dimension_numbers = #tpu.dot_dimension_numbers<[1], [0], [0], [1], [0, 0, 1, 1], [], []>} : vector<256x256xbf16>, vector<256x128xbf16>, vector<256x128xf32> -> vector<256x128xf32>
    %7 = arith.addf %3, %6 : vector<256x128xf32>
    %c0_6 = arith.constant 0 : index
    %c0_7 = arith.constant 0 : index
    %8 = vector.load %arg7[%c0_6, %c0_7] : memref<256x128xf32, #tpu.memory_space<vmem>>, vector<256x128xf32>
    tpu.vector_store %arg7[%c0_6, %c0_7], %7 {strides = array<i32>} : memref<256x128xf32, #tpu.memory_space<vmem>>, vector<256x128xf32>,
    %c0_i32_8 = arith.constant 0 : i32
    %9 = arith.cmpi eq, %arg2, %c0_i32_8 : i32
    %10 = arith.extui %9 : i1 to i32
    %c0_i32_9 = arith.constant 0 : i32
    %11 = arith.cmpi ne, %10, %c0_i32_9 : i32
    scf.if %11 {
      %c0_10 = arith.constant 0 : index
      %c0_11 = arith.constant 0 : index
      %12 = vector.load %arg7[%c0_10, %c0_11] : memref<256x128xf32, #tpu.memory_space<vmem>>, vector<256x128xf32>
      %c0_12 = arith.constant 0 : index
      %c0_13 = arith.constant 0 : index
      %13 = vector.load %arg5[%c0_12, %c0_13] : memref<1x128xf32, #tpu.memory_space<vmem>>, vector<1x128xf32>
      %14 = vector.broadcast %13 : vector<1x128xf32> to vector<256x128xf32>
      %15 = arith.addf %12, %14 : vector<256x128xf32>
      %c0_14 = arith.constant 0 : index
      %c0_15 = arith.constant 0 : index
      %16 = vector.load %arg6[%c0_14, %c0_15] : memref<256x128xf32, #tpu.memory_space<vmem>>, vector<256x128xf32>
      tpu.vector_store %arg6[%c0_14, %c0_15], %15 {strides = array<i32>} : memref<256x128xf32, #tpu.memory_space<vmem>>, vector<256x128xf32>,
    } else {
    }
    return
  }
  func.func @transform_0(%arg0: i32, %arg1: i32, %arg2: i32) -> (i32, i32) {
    %c0_i32 = arith.constant 0 : i32
    return %arg0, %arg2 : i32, i32
  }
  func.func @transform_1(%arg0: i32, %arg1: i32, %arg2: i32) -> (i32, i32) {
    %c0_i32 = arith.constant 0 : i32
    return %arg2, %arg1 : i32, i32
  }
  func.func @transform_2(%arg0: i32, %arg1: i32, %arg2: i32) -> (i32, i32) {
    %c0_i32 = arith.constant 0 : i32
    %c0_i32_0 = arith.constant 0 : i32
    return %c0_i32, %arg1 : i32, i32
  }
  func.func @transform_3(%arg0: i32, %arg1: i32, %arg2: i32) -> (i32, i32) {
    %c0_i32 = arith.constant 0 : i32
    return %arg0, %arg1 : i32, i32
  }
}

module attributes {stable_mosaic.version = 11 : i64} {
  func.func @_matmul_bias_kernel(%arg0: i32, %arg1: i32, %arg2: i32, %arg3: memref<128x128xbf16, #tpu.memory_space<vmem>>, %arg4: memref<128x256xbf16, #tpu.memory_space<vmem>>, %arg5: memref<1x256xf32, #tpu.memory_space<vmem>>, %arg6: memref<128x256xf32, #tpu.memory_space<vmem>>, %arg7: memref<128x256xf32, #tpu.memory_space<vmem>>) attributes {dimension_semantics = [#tpu.dimension_semantics<parallel>, #tpu.dimension_semantics<parallel>, #tpu.dimension_semantics<arbitrary>], iteration_bounds = array<i64: 1, 1, 5>, scalar_prefetch = 0 : i64, scratch_operands = 1 : i64, tpu.core_type = #tpu.core_type<tc>, window_params = [{transform_indices = @transform_0, window_bounds = array<i64: 128, 128>}, {transform_indices = @transform_1, window_bounds = array<i64: 128, 256>}, {transform_indices = @transform_2, window_bounds = array<i64: 1, 256>}, {transform_indices = @transform_3, window_bounds = array<i64: 128, 256>}]} {
    %c0_i32 = arith.constant 0 : i32
    %0 = arith.cmpi eq, %arg2, %c0_i32 : i32
    %1 = arith.extui %0 : i1 to i32
    %c0_i32_0 = arith.constant 0 : i32
    %2 = arith.cmpi ne, %1, %c0_i32_0 : i32
    scf.if %2 {
      %cst_9 = arith.constant 0.000000e+00 : f32
      %12 = vector.broadcast %cst_9 : f32 to vector<128x256xf32>
      %c0_10 = arith.constant 0 : index
      %c0_11 = arith.constant 0 : index
      %13 = vector.load %arg7[%c0_10, %c0_11] : memref<128x256xf32, #tpu.memory_space<vmem>>, vector<128x256xf32>
      tpu.vector_store %arg7[%c0_10, %c0_11], %12 {strides = array<i32>} : memref<128x256xf32, #tpu.memory_space<vmem>>, vector<128x256xf32>,
    } else {
    }
    %c0 = arith.constant 0 : index
    %c0_1 = arith.constant 0 : index
    %3 = vector.load %arg7[%c0, %c0_1] : memref<128x256xf32, #tpu.memory_space<vmem>>, vector<128x256xf32>
    %c0_2 = arith.constant 0 : index
    %c0_3 = arith.constant 0 : index
    %4 = vector.load %arg3[%c0_2, %c0_3] : memref<128x128xbf16, #tpu.memory_space<vmem>>, vector<128x128xbf16>
    %c0_4 = arith.constant 0 : index
    %c0_5 = arith.constant 0 : index
    %5 = vector.load %arg4[%c0_4, %c0_5] : memref<128x256xbf16, #tpu.memory_space<vmem>>, vector<128x256xbf16>
    %cst = arith.constant dense<0.000000e+00> : vector<128x256xf32>
    %6 = tpu.matmul %4, %5, %cst {dimension_numbers = #tpu.dot_dimension_numbers<[1], [0], [0], [1], [0, 0, 1, 1], [], []>} : vector<128x128xbf16>, vector<128x256xbf16>, vector<128x256xf32> -> vector<128x256xf32>
    %7 = arith.addf %3, %6 : vector<128x256xf32>
    %c0_6 = arith.constant 0 : index
    %c0_7 = arith.constant 0 : index
    %8 = vector.load %arg7[%c0_6, %c0_7] : memref<128x256xf32, #tpu.memory_space<vmem>>, vector<128x256xf32>
    tpu.vector_store %arg7[%c0_6, %c0_7], %7 {strides = array<i32>} : memref<128x256xf32, #tpu.memory_space<vmem>>, vector<128x256xf32>,
    %c4_i32 = arith.constant 4 : i32
    %9 = arith.cmpi eq, %arg2, %c4_i32 : i32
    %10 = arith.extui %9 : i1 to i32
    %c0_i32_8 = arith.constant 0 : i32
    %11 = arith.cmpi ne, %10, %c0_i32_8 : i32
    scf.if %11 {
      %c0_9 = arith.constant 0 : index
      %c0_10 = arith.constant 0 : index
      %12 = vector.load %arg7[%c0_9, %c0_10] : memref<128x256xf32, #tpu.memory_space<vmem>>, vector<128x256xf32>
      %c0_11 = arith.constant 0 : index
      %c0_12 = arith.constant 0 : index
      %13 = vector.load %arg5[%c0_11, %c0_12] : memref<1x256xf32, #tpu.memory_space<vmem>>, vector<1x256xf32>
      %14 = vector.broadcast %13 : vector<1x256xf32> to vector<128x256xf32>
      %15 = arith.addf %12, %14 : vector<128x256xf32>
      %c0_13 = arith.constant 0 : index
      %c0_14 = arith.constant 0 : index
      %16 = vector.load %arg6[%c0_13, %c0_14] : memref<128x256xf32, #tpu.memory_space<vmem>>, vector<128x256xf32>
      tpu.vector_store %arg6[%c0_13, %c0_14], %15 {strides = array<i32>} : memref<128x256xf32, #tpu.memory_space<vmem>>, vector<128x256xf32>,
    } else {
    }
    return
  }
  func.func @transform_0(%arg0: i32, %arg1: i32, %arg2: i32) -> (i32, i32) {
    %c0_i32 = arith.constant 0 : i32
    return %arg0, %arg2 : i32, i32
  }
  func.func @transform_1(%arg0: i32, %arg1: i32, %arg2: i32) -> (i32, i32) {
    %c0_i32 = arith.constant 0 : i32
    return %arg2, %arg1 : i32, i32
  }
  func.func @transform_2(%arg0: i32, %arg1: i32, %arg2: i32) -> (i32, i32) {
    %c0_i32 = arith.constant 0 : i32
    %c0_i32_0 = arith.constant 0 : i32
    return %c0_i32, %arg1 : i32, i32
  }
  func.func @transform_3(%arg0: i32, %arg1: i32, %arg2: i32) -> (i32, i32) {
    %c0_i32 = arith.constant 0 : i32
    return %arg0, %arg1 : i32, i32
  }
}

module attributes {stable_mosaic.version = 11 : i64} {
  func.func @_matmul_bias_kernel(%arg0: i32, %arg1: i32, %arg2: i32, %arg3: memref<256x128xbf16, #tpu.memory_space<vmem>>, %arg4: memref<128x128xbf16, #tpu.memory_space<vmem>>, %arg5: memref<1x128xf32, #tpu.memory_space<vmem>>, %arg6: memref<256x128xf32, #tpu.memory_space<vmem>>, %arg7: memref<256x128xf32, #tpu.memory_space<vmem>>) attributes {dimension_semantics = [#tpu.dimension_semantics<parallel>, #tpu.dimension_semantics<parallel>, #tpu.dimension_semantics<arbitrary>], iteration_bounds = array<i64: 2, 1, 5>, scalar_prefetch = 0 : i64, scratch_operands = 1 : i64, tpu.core_type = #tpu.core_type<tc>, window_params = [{transform_indices = @transform_0, window_bounds = array<i64: 256, 128>}, {transform_indices = @transform_1, window_bounds = array<i64: 128, 128>}, {transform_indices = @transform_2, window_bounds = array<i64: 1, 128>}, {transform_indices = @transform_3, window_bounds = array<i64: 256, 128>}]} {
    %c0_i32 = arith.constant 0 : i32
    %0 = arith.cmpi eq, %arg2, %c0_i32 : i32
    %1 = arith.extui %0 : i1 to i32
    %c0_i32_0 = arith.constant 0 : i32
    %2 = arith.cmpi ne, %1, %c0_i32_0 : i32
    scf.if %2 {
      %cst_9 = arith.constant 0.000000e+00 : f32
      %12 = vector.broadcast %cst_9 : f32 to vector<256x128xf32>
      %c0_10 = arith.constant 0 : index
      %c0_11 = arith.constant 0 : index
      %13 = vector.load %arg7[%c0_10, %c0_11] : memref<256x128xf32, #tpu.memory_space<vmem>>, vector<256x128xf32>
      tpu.vector_store %arg7[%c0_10, %c0_11], %12 {strides = array<i32>} : memref<256x128xf32, #tpu.memory_space<vmem>>, vector<256x128xf32>,
    } else {
    }
    %c0 = arith.constant 0 : index
    %c0_1 = arith.constant 0 : index
    %3 = vector.load %arg7[%c0, %c0_1] : memref<256x128xf32, #tpu.memory_space<vmem>>, vector<256x128xf32>
    %c0_2 = arith.constant 0 : index
    %c0_3 = arith.constant 0 : index
    %4 = vector.load %arg3[%c0_2, %c0_3] : memref<256x128xbf16, #tpu.memory_space<vmem>>, vector<256x128xbf16>
    %c0_4 = arith.constant 0 : index
    %c0_5 = arith.constant 0 : index
    %5 = vector.load %arg4[%c0_4, %c0_5] : memref<128x128xbf16, #tpu.memory_space<vmem>>, vector<128x128xbf16>
    %cst = arith.constant dense<0.000000e+00> : vector<256x128xf32>
    %6 = tpu.matmul %4, %5, %cst {dimension_numbers = #tpu.dot_dimension_numbers<[1], [0], [0], [1], [0, 0, 1, 1], [], []>} : vector<256x128xbf16>, vector<128x128xbf16>, vector<256x128xf32> -> vector<256x128xf32>
    %7 = arith.addf %3, %6 : vector<256x128xf32>
    %c0_6 = arith.constant 0 : index
    %c0_7 = arith.constant 0 : index
    %8 = vector.load %arg7[%c0_6, %c0_7] : memref<256x128xf32, #tpu.memory_space<vmem>>, vector<256x128xf32>
    tpu.vector_store %arg7[%c0_6, %c0_7], %7 {strides = array<i32>} : memref<256x128xf32, #tpu.memory_space<vmem>>, vector<256x128xf32>,
    %c4_i32 = arith.constant 4 : i32
    %9 = arith.cmpi eq, %arg2, %c4_i32 : i32
    %10 = arith.extui %9 : i1 to i32
    %c0_i32_8 = arith.constant 0 : i32
    %11 = arith.cmpi ne, %10, %c0_i32_8 : i32
    scf.if %11 {
      %c0_9 = arith.constant 0 : index
      %c0_10 = arith.constant 0 : index
      %12 = vector.load %arg7[%c0_9, %c0_10] : memref<256x128xf32, #tpu.memory_space<vmem>>, vector<256x128xf32>
      %c0_11 = arith.constant 0 : index
      %c0_12 = arith.constant 0 : index
      %13 = vector.load %arg5[%c0_11, %c0_12] : memref<1x128xf32, #tpu.memory_space<vmem>>, vector<1x128xf32>
      %14 = vector.broadcast %13 : vector<1x128xf32> to vector<256x128xf32>
      %15 = arith.addf %12, %14 : vector<256x128xf32>
      %cst_13 = arith.constant 0.000000e+00 : f32
      %16 = vector.broadcast %cst_13 : f32 to vector<256x128xf32>
      %17 = arith.maximumf %15, %16 : vector<256x128xf32>
      %c0_14 = arith.constant 0 : index
      %c0_15 = arith.constant 0 : index
      %18 = vector.load %arg6[%c0_14, %c0_15] : memref<256x128xf32, #tpu.memory_space<vmem>>, vector<256x128xf32>
      tpu.vector_store %arg6[%c0_14, %c0_15], %17 {strides = array<i32>} : memref<256x128xf32, #tpu.memory_space<vmem>>, vector<256x128xf32>,
    } else {
    }
    return
  }
  func.func @transform_0(%arg0: i32, %arg1: i32, %arg2: i32) -> (i32, i32) {
    %c0_i32 = arith.constant 0 : i32
    return %arg0, %arg2 : i32, i32
  }
  func.func @transform_1(%arg0: i32, %arg1: i32, %arg2: i32) -> (i32, i32) {
    %c0_i32 = arith.constant 0 : i32
    return %arg2, %arg1 : i32, i32
  }
  func.func @transform_2(%arg0: i32, %arg1: i32, %arg2: i32) -> (i32, i32) {
    %c0_i32 = arith.constant 0 : i32
    %c0_i32_0 = arith.constant 0 : i32
    return %c0_i32, %arg1 : i32, i32
  }
  func.func @transform_3(%arg0: i32, %arg1: i32, %arg2: i32) -> (i32, i32) {
    %c0_i32 = arith.constant 0 : i32
    return %arg0, %arg1 : i32, i32
  }
}

module attributes {stable_mosaic.version = 11 : i64} {
  func.func @_matmul_bias_kernel(%arg0: i32, %arg1: i32, %arg2: i32, %arg3: memref<128x256xbf16, #tpu.memory_space<vmem>>, %arg4: memref<256x256xbf16, #tpu.memory_space<vmem>>, %arg5: memref<1x256xf32, #tpu.memory_space<vmem>>, %arg6: memref<128x256xf32, #tpu.memory_space<vmem>>, %arg7: memref<128x256xf32, #tpu.memory_space<vmem>>) attributes {dimension_semantics = [#tpu.dimension_semantics<parallel>, #tpu.dimension_semantics<parallel>, #tpu.dimension_semantics<arbitrary>], iteration_bounds = array<i64: 1, 1, 5>, scalar_prefetch = 0 : i64, scratch_operands = 1 : i64, tpu.core_type = #tpu.core_type<tc>, window_params = [{transform_indices = @transform_0, window_bounds = array<i64: 128, 256>}, {transform_indices = @transform_1, window_bounds = array<i64: 256, 256>}, {transform_indices = @transform_2, window_bounds = array<i64: 1, 256>}, {transform_indices = @transform_3, window_bounds = array<i64: 128, 256>}]} {
    %c0_i32 = arith.constant 0 : i32
    %0 = arith.cmpi eq, %arg2, %c0_i32 : i32
    %1 = arith.extui %0 : i1 to i32
    %c0_i32_0 = arith.constant 0 : i32
    %2 = arith.cmpi ne, %1, %c0_i32_0 : i32
    scf.if %2 {
      %cst_9 = arith.constant 0.000000e+00 : f32
      %12 = vector.broadcast %cst_9 : f32 to vector<128x256xf32>
      %c0_10 = arith.constant 0 : index
      %c0_11 = arith.constant 0 : index
      %13 = vector.load %arg7[%c0_10, %c0_11] : memref<128x256xf32, #tpu.memory_space<vmem>>, vector<128x256xf32>
      tpu.vector_store %arg7[%c0_10, %c0_11], %12 {strides = array<i32>} : memref<128x256xf32, #tpu.memory_space<vmem>>, vector<128x256xf32>,
    } else {
    }
    %c0 = arith.constant 0 : index
    %c0_1 = arith.constant 0 : index
    %3 = vector.load %arg7[%c0, %c0_1] : memref<128x256xf32, #tpu.memory_space<vmem>>, vector<128x256xf32>
    %c0_2 = arith.constant 0 : index
    %c0_3 = arith.constant 0 : index
    %4 = vector.load %arg3[%c0_2, %c0_3] : memref<128x256xbf16, #tpu.memory_space<vmem>>, vector<128x256xbf16>
    %c0_4 = arith.constant 0 : index
    %c0_5 = arith.constant 0 : index
    %5 = vector.load %arg4[%c0_4, %c0_5] : memref<256x256xbf16, #tpu.memory_space<vmem>>, vector<256x256xbf16>
    %cst = arith.constant dense<0.000000e+00> : vector<128x256xf32>
    %6 = tpu.matmul %4, %5, %cst {dimension_numbers = #tpu.dot_dimension_numbers<[1], [0], [0], [1], [0, 0, 1, 1], [], []>} : vector<128x256xbf16>, vector<256x256xbf16>, vector<128x256xf32> -> vector<128x256xf32>
    %7 = arith.addf %3, %6 : vector<128x256xf32>
    %c0_6 = arith.constant 0 : index
    %c0_7 = arith.constant 0 : index
    %8 = vector.load %arg7[%c0_6, %c0_7] : memref<128x256xf32, #tpu.memory_space<vmem>>, vector<128x256xf32>
    tpu.vector_store %arg7[%c0_6, %c0_7], %7 {strides = array<i32>} : memref<128x256xf32, #tpu.memory_space<vmem>>, vector<128x256xf32>,
    %c4_i32 = arith.constant 4 : i32
    %9 = arith.cmpi eq, %arg2, %c4_i32 : i32
    %10 = arith.extui %9 : i1 to i32
    %c0_i32_8 = arith.constant 0 : i32
    %11 = arith.cmpi ne, %10, %c0_i32_8 : i32
    scf.if %11 {
      %c0_9 = arith.constant 0 : index
      %c0_10 = arith.constant 0 : index
      %12 = vector.load %arg7[%c0_9, %c0_10] : memref<128x256xf32, #tpu.memory_space<vmem>>, vector<128x256xf32>
      %c0_11 = arith.constant 0 : index
      %c0_12 = arith.constant 0 : index
      %13 = vector.load %arg5[%c0_11, %c0_12] : memref<1x256xf32, #tpu.memory_space<vmem>>, vector<1x256xf32>
      %14 = vector.broadcast %13 : vector<1x256xf32> to vector<128x256xf32>
      %15 = arith.addf %12, %14 : vector<128x256xf32>
      %cst_13 = arith.constant 0.000000e+00 : f32
      %16 = vector.broadcast %cst_13 : f32 to vector<128x256xf32>
      %17 = arith.maximumf %15, %16 : vector<128x256xf32>
      %c0_14 = arith.constant 0 : index
      %c0_15 = arith.constant 0 : index
      %18 = vector.load %arg6[%c0_14, %c0_15] : memref<128x256xf32, #tpu.memory_space<vmem>>, vector<128x256xf32>
      tpu.vector_store %arg6[%c0_14, %c0_15], %17 {strides = array<i32>} : memref<128x256xf32, #tpu.memory_space<vmem>>, vector<128x256xf32>,
    } else {
    }
    return
  }
  func.func @transform_0(%arg0: i32, %arg1: i32, %arg2: i32) -> (i32, i32) {
    %c0_i32 = arith.constant 0 : i32
    return %arg0, %arg2 : i32, i32
  }
  func.func @transform_1(%arg0: i32, %arg1: i32, %arg2: i32) -> (i32, i32) {
    %c0_i32 = arith.constant 0 : i32
    return %arg2, %arg1 : i32, i32
  }
  func.func @transform_2(%arg0: i32, %arg1: i32, %arg2: i32) -> (i32, i32) {
    %c0_i32 = arith.constant 0 : i32
    %c0_i32_0 = arith.constant 0 : i32
    return %c0_i32, %arg1 : i32, i32
  }
  func.func @transform_3(%arg0: i32, %arg1: i32, %arg2: i32) -> (i32, i32) {
    %c0_i32 = arith.constant 0 : i32
    return %arg0, %arg1 : i32, i32
  }
}

module attributes {stable_mosaic.version = 11 : i64} {
  func.func @_matmul_bias_kernel(%arg0: i32, %arg1: i32, %arg2: i32, %arg3: memref<256x512xbf16, #tpu.memory_space<vmem>>, %arg4: memref<512x128xbf16, #tpu.memory_space<vmem>>, %arg5: memref<1x128xf32, #tpu.memory_space<vmem>>, %arg6: memref<256x128xf32, #tpu.memory_space<vmem>>, %arg7: memref<256x128xf32, #tpu.memory_space<vmem>>) attributes {dimension_semantics = [#tpu.dimension_semantics<parallel>, #tpu.dimension_semantics<parallel>, #tpu.dimension_semantics<arbitrary>], iteration_bounds = array<i64: 8, 1, 6>, scalar_prefetch = 0 : i64, scratch_operands = 1 : i64, tpu.core_type = #tpu.core_type<tc>, window_params = [{transform_indices = @transform_0, window_bounds = array<i64: 256, 512>}, {transform_indices = @transform_1, window_bounds = array<i64: 512, 128>}, {transform_indices = @transform_2, window_bounds = array<i64: 1, 128>}, {transform_indices = @transform_3, window_bounds = array<i64: 256, 128>}]} {
    %c0_i32 = arith.constant 0 : i32
    %0 = arith.cmpi eq, %arg2, %c0_i32 : i32
    %1 = arith.extui %0 : i1 to i32
    %c0_i32_0 = arith.constant 0 : i32
    %2 = arith.cmpi ne, %1, %c0_i32_0 : i32
    scf.if %2 {
      %cst_9 = arith.constant 0.000000e+00 : f32
      %12 = vector.broadcast %cst_9 : f32 to vector<256x128xf32>
      %c0_10 = arith.constant 0 : index
      %c0_11 = arith.constant 0 : index
      %13 = vector.load %arg7[%c0_10, %c0_11] : memref<256x128xf32, #tpu.memory_space<vmem>>, vector<256x128xf32>
      tpu.vector_store %arg7[%c0_10, %c0_11], %12 {strides = array<i32>} : memref<256x128xf32, #tpu.memory_space<vmem>>, vector<256x128xf32>,
    } else {
    }
    %c0 = arith.constant 0 : index
    %c0_1 = arith.constant 0 : index
    %3 = vector.load %arg7[%c0, %c0_1] : memref<256x128xf32, #tpu.memory_space<vmem>>, vector<256x128xf32>
    %c0_2 = arith.constant 0 : index
    %c0_3 = arith.constant 0 : index
    %4 = vector.load %arg3[%c0_2, %c0_3] : memref<256x512xbf16, #tpu.memory_space<vmem>>, vector<256x512xbf16>
    %c0_4 = arith.constant 0 : index
    %c0_5 = arith.constant 0 : index
    %5 = vector.load %arg4[%c0_4, %c0_5] : memref<512x128xbf16, #tpu.memory_space<vmem>>, vector<512x128xbf16>
    %cst = arith.constant dense<0.000000e+00> : vector<256x128xf32>
    %6 = tpu.matmul %4, %5, %cst {dimension_numbers = #tpu.dot_dimension_numbers<[1], [0], [0], [1], [0, 0, 1, 1], [], []>} : vector<256x512xbf16>, vector<512x128xbf16>, vector<256x128xf32> -> vector<256x128xf32>
    %7 = arith.addf %3, %6 : vector<256x128xf32>
    %c0_6 = arith.constant 0 : index
    %c0_7 = arith.constant 0 : index
    %8 = vector.load %arg7[%c0_6, %c0_7] : memref<256x128xf32, #tpu.memory_space<vmem>>, vector<256x128xf32>
    tpu.vector_store %arg7[%c0_6, %c0_7], %7 {strides = array<i32>} : memref<256x128xf32, #tpu.memory_space<vmem>>, vector<256x128xf32>,
    %c5_i32 = arith.constant 5 : i32
    %9 = arith.cmpi eq, %arg2, %c5_i32 : i32
    %10 = arith.extui %9 : i1 to i32
    %c0_i32_8 = arith.constant 0 : i32
    %11 = arith.cmpi ne, %10, %c0_i32_8 : i32
    scf.if %11 {
      %c0_9 = arith.constant 0 : index
      %c0_10 = arith.constant 0 : index
      %12 = vector.load %arg7[%c0_9, %c0_10] : memref<256x128xf32, #tpu.memory_space<vmem>>, vector<256x128xf32>
      %c0_11 = arith.constant 0 : index
      %c0_12 = arith.constant 0 : index
      %13 = vector.load %arg5[%c0_11, %c0_12] : memref<1x128xf32, #tpu.memory_space<vmem>>, vector<1x128xf32>
      %14 = vector.broadcast %13 : vector<1x128xf32> to vector<256x128xf32>
      %15 = arith.addf %12, %14 : vector<256x128xf32>
      %c0_13 = arith.constant 0 : index
      %c0_14 = arith.constant 0 : index
      %16 = vector.load %arg6[%c0_13, %c0_14] : memref<256x128xf32, #tpu.memory_space<vmem>>, vector<256x128xf32>
      tpu.vector_store %arg6[%c0_13, %c0_14], %15 {strides = array<i32>} : memref<256x128xf32, #tpu.memory_space<vmem>>, vector<256x128xf32>,
    } else {
    }
    return
  }
  func.func @transform_0(%arg0: i32, %arg1: i32, %arg2: i32) -> (i32, i32) {
    %c0_i32 = arith.constant 0 : i32
    return %arg0, %arg2 : i32, i32
  }
  func.func @transform_1(%arg0: i32, %arg1: i32, %arg2: i32) -> (i32, i32) {
    %c0_i32 = arith.constant 0 : i32
    return %arg2, %arg1 : i32, i32
  }
  func.func @transform_2(%arg0: i32, %arg1: i32, %arg2: i32) -> (i32, i32) {
    %c0_i32 = arith.constant 0 : i32
    %c0_i32_0 = arith.constant 0 : i32
    return %c0_i32, %arg1 : i32, i32
  }
  func.func @transform_3(%arg0: i32, %arg1: i32, %arg2: i32) -> (i32, i32) {
    %c0_i32 = arith.constant 0 : i32
    return %arg0, %arg1 : i32, i32
  }
}

module attributes {stable_mosaic.version = 11 : i64} {
  func.func @_matmul_bias_kernel(%arg0: i32, %arg1: i32, %arg2: i32, %arg3: memref<256x256xbf16, #tpu.memory_space<vmem>>, %arg4: memref<256x128xbf16, #tpu.memory_space<vmem>>, %arg5: memref<1x128xf32, #tpu.memory_space<vmem>>, %arg6: memref<256x128xf32, #tpu.memory_space<vmem>>, %arg7: memref<256x128xf32, #tpu.memory_space<vmem>>) attributes {dimension_semantics = [#tpu.dimension_semantics<parallel>, #tpu.dimension_semantics<parallel>, #tpu.dimension_semantics<arbitrary>], iteration_bounds = array<i64: 2, 1, 1>, scalar_prefetch = 0 : i64, scratch_operands = 1 : i64, tpu.core_type = #tpu.core_type<tc>, window_params = [{transform_indices = @transform_0, window_bounds = array<i64: 256, 256>}, {transform_indices = @transform_1, window_bounds = array<i64: 256, 128>}, {transform_indices = @transform_2, window_bounds = array<i64: 1, 128>}, {transform_indices = @transform_3, window_bounds = array<i64: 256, 128>}]} {
    %c0_i32 = arith.constant 0 : i32
    %0 = arith.cmpi eq, %arg2, %c0_i32 : i32
    %1 = arith.extui %0 : i1 to i32
    %c0_i32_0 = arith.constant 0 : i32
    %2 = arith.cmpi ne, %1, %c0_i32_0 : i32
    scf.if %2 {
      %cst_10 = arith.constant 0.000000e+00 : f32
      %12 = vector.broadcast %cst_10 : f32 to vector<256x128xf32>
      %c0_11 = arith.constant 0 : index
      %c0_12 = arith.constant 0 : index
      %13 = vector.load %arg7[%c0_11, %c0_12] : memref<256x128xf32, #tpu.memory_space<vmem>>, vector<256x128xf32>
      tpu.vector_store %arg7[%c0_11, %c0_12], %12 {strides = array<i32>} : memref<256x128xf32, #tpu.memory_space<vmem>>, vector<256x128xf32>,
    } else {
    }
    %c0 = arith.constant 0 : index
    %c0_1 = arith.constant 0 : index
    %3 = vector.load %arg7[%c0, %c0_1] : memref<256x128xf32, #tpu.memory_space<vmem>>, vector<256x128xf32>
    %c0_2 = arith.constant 0 : index
    %c0_3 = arith.constant 0 : index
    %4 = vector.load %arg3[%c0_2, %c0_3] : memref<256x256xbf16, #tpu.memory_space<vmem>>, vector<256x256xbf16>
    %c0_4 = arith.constant 0 : index
    %c0_5 = arith.constant 0 : index
    %5 = vector.load %arg4[%c0_4, %c0_5] : memref<256x128xbf16, #tpu.memory_space<vmem>>, vector<256x128xbf16>
    %cst = arith.constant dense<0.000000e+00> : vector<256x128xf32>
    %6 = tpu.matmul %4, %5, %cst {dimension_numbers = #tpu.dot_dimension_numbers<[1], [0], [0], [1], [0, 0, 1, 1], [], []>} : vector<256x256xbf16>, vector<256x128xbf16>, vector<256x128xf32> -> vector<256x128xf32>
    %7 = arith.addf %3, %6 : vector<256x128xf32>
    %c0_6 = arith.constant 0 : index
    %c0_7 = arith.constant 0 : index
    %8 = vector.load %arg7[%c0_6, %c0_7] : memref<256x128xf32, #tpu.memory_space<vmem>>, vector<256x128xf32>
    tpu.vector_store %arg7[%c0_6, %c0_7], %7 {strides = array<i32>} : memref<256x128xf32, #tpu.memory_space<vmem>>, vector<256x128xf32>,
    %c0_i32_8 = arith.constant 0 : i32
    %9 = arith.cmpi eq, %arg2, %c0_i32_8 : i32
    %10 = arith.extui %9 : i1 to i32
    %c0_i32_9 = arith.constant 0 : i32
    %11 = arith.cmpi ne, %10, %c0_i32_9 : i32
    scf.if %11 {
      %c0_10 = arith.constant 0 : index
      %c0_11 = arith.constant 0 : index
      %12 = vector.load %arg7[%c0_10, %c0_11] : memref<256x128xf32, #tpu.memory_space<vmem>>, vector<256x128xf32>
      %c0_12 = arith.constant 0 : index
      %c0_13 = arith.constant 0 : index
      %13 = vector.load %arg5[%c0_12, %c0_13] : memref<1x128xf32, #tpu.memory_space<vmem>>, vector<1x128xf32>
      %14 = vector.broadcast %13 : vector<1x128xf32> to vector<256x128xf32>
      %15 = arith.addf %12, %14 : vector<256x128xf32>
      %c0_14 = arith.constant 0 : index
      %c0_15 = arith.constant 0 : index
      %16 = vector.load %arg6[%c0_14, %c0_15] : memref<256x128xf32, #tpu.memory_space<vmem>>, vector<256x128xf32>
      tpu.vector_store %arg6[%c0_14, %c0_15], %15 {strides = array<i32>} : memref<256x128xf32, #tpu.memory_space<vmem>>, vector<256x128xf32>,
    } else {
    }
    return
  }
  func.func @transform_0(%arg0: i32, %arg1: i32, %arg2: i32) -> (i32, i32) {
    %c0_i32 = arith.constant 0 : i32
    return %arg0, %arg2 : i32, i32
  }
  func.func @transform_1(%arg0: i32, %arg1: i32, %arg2: i32) -> (i32, i32) {
    %c0_i32 = arith.constant 0 : i32
    return %arg2, %arg1 : i32, i32
  }
  func.func @transform_2(%arg0: i32, %arg1: i32, %arg2: i32) -> (i32, i32) {
    %c0_i32 = arith.constant 0 : i32
    %c0_i32_0 = arith.constant 0 : i32
    return %c0_i32, %arg1 : i32, i32
  }
  func.func @transform_3(%arg0: i32, %arg1: i32, %arg2: i32) -> (i32, i32) {
    %c0_i32 = arith.constant 0 : i32
    return %arg0, %arg1 : i32, i32
  }
}

module attributes {stable_mosaic.version = 11 : i64} {
  func.func @_matmul_bias_kernel(%arg0: i32, %arg1: i32, %arg2: i32, %arg3: memref<256x512xbf16, #tpu.memory_space<vmem>>, %arg4: memref<512x128xbf16, #tpu.memory_space<vmem>>, %arg5: memref<1x128xf32, #tpu.memory_space<vmem>>, %arg6: memref<256x128xf32, #tpu.memory_space<vmem>>, %arg7: memref<256x128xf32, #tpu.memory_space<vmem>>) attributes {dimension_semantics = [#tpu.dimension_semantics<parallel>, #tpu.dimension_semantics<parallel>, #tpu.dimension_semantics<arbitrary>], iteration_bounds = array<i64: 2, 1, 12>, scalar_prefetch = 0 : i64, scratch_operands = 1 : i64, tpu.core_type = #tpu.core_type<tc>, window_params = [{transform_indices = @transform_0, window_bounds = array<i64: 256, 512>}, {transform_indices = @transform_1, window_bounds = array<i64: 512, 128>}, {transform_indices = @transform_2, window_bounds = array<i64: 1, 128>}, {transform_indices = @transform_3, window_bounds = array<i64: 256, 128>}]} {
    %c0_i32 = arith.constant 0 : i32
    %0 = arith.cmpi eq, %arg2, %c0_i32 : i32
    %1 = arith.extui %0 : i1 to i32
    %c0_i32_0 = arith.constant 0 : i32
    %2 = arith.cmpi ne, %1, %c0_i32_0 : i32
    scf.if %2 {
      %cst_9 = arith.constant 0.000000e+00 : f32
      %12 = vector.broadcast %cst_9 : f32 to vector<256x128xf32>
      %c0_10 = arith.constant 0 : index
      %c0_11 = arith.constant 0 : index
      %13 = vector.load %arg7[%c0_10, %c0_11] : memref<256x128xf32, #tpu.memory_space<vmem>>, vector<256x128xf32>
      tpu.vector_store %arg7[%c0_10, %c0_11], %12 {strides = array<i32>} : memref<256x128xf32, #tpu.memory_space<vmem>>, vector<256x128xf32>,
    } else {
    }
    %c0 = arith.constant 0 : index
    %c0_1 = arith.constant 0 : index
    %3 = vector.load %arg7[%c0, %c0_1] : memref<256x128xf32, #tpu.memory_space<vmem>>, vector<256x128xf32>
    %c0_2 = arith.constant 0 : index
    %c0_3 = arith.constant 0 : index
    %4 = vector.load %arg3[%c0_2, %c0_3] : memref<256x512xbf16, #tpu.memory_space<vmem>>, vector<256x512xbf16>
    %c0_4 = arith.constant 0 : index
    %c0_5 = arith.constant 0 : index
    %5 = vector.load %arg4[%c0_4, %c0_5] : memref<512x128xbf16, #tpu.memory_space<vmem>>, vector<512x128xbf16>
    %cst = arith.constant dense<0.000000e+00> : vector<256x128xf32>
    %6 = tpu.matmul %4, %5, %cst {dimension_numbers = #tpu.dot_dimension_numbers<[1], [0], [0], [1], [0, 0, 1, 1], [], []>} : vector<256x512xbf16>, vector<512x128xbf16>, vector<256x128xf32> -> vector<256x128xf32>
    %7 = arith.addf %3, %6 : vector<256x128xf32>
    %c0_6 = arith.constant 0 : index
    %c0_7 = arith.constant 0 : index
    %8 = vector.load %arg7[%c0_6, %c0_7] : memref<256x128xf32, #tpu.memory_space<vmem>>, vector<256x128xf32>
    tpu.vector_store %arg7[%c0_6, %c0_7], %7 {strides = array<i32>} : memref<256x128xf32, #tpu.memory_space<vmem>>, vector<256x128xf32>,
    %c11_i32 = arith.constant 11 : i32
    %9 = arith.cmpi eq, %arg2, %c11_i32 : i32
    %10 = arith.extui %9 : i1 to i32
    %c0_i32_8 = arith.constant 0 : i32
    %11 = arith.cmpi ne, %10, %c0_i32_8 : i32
    scf.if %11 {
      %c0_9 = arith.constant 0 : index
      %c0_10 = arith.constant 0 : index
      %12 = vector.load %arg7[%c0_9, %c0_10] : memref<256x128xf32, #tpu.memory_space<vmem>>, vector<256x128xf32>
      %c0_11 = arith.constant 0 : index
      %c0_12 = arith.constant 0 : index
      %13 = vector.load %arg5[%c0_11, %c0_12] : memref<1x128xf32, #tpu.memory_space<vmem>>, vector<1x128xf32>
      %14 = vector.broadcast %13 : vector<1x128xf32> to vector<256x128xf32>
      %15 = arith.addf %12, %14 : vector<256x128xf32>
      %c0_13 = arith.constant 0 : index
      %c0_14 = arith.constant 0 : index
      %16 = vector.load %arg6[%c0_13, %c0_14] : memref<256x128xf32, #tpu.memory_space<vmem>>, vector<256x128xf32>
      tpu.vector_store %arg6[%c0_13, %c0_14], %15 {strides = array<i32>} : memref<256x128xf32, #tpu.memory_space<vmem>>, vector<256x128xf32>,
    } else {
    }
    return
  }
  func.func @transform_0(%arg0: i32, %arg1: i32, %arg2: i32) -> (i32, i32) {
    %c0_i32 = arith.constant 0 : i32
    return %arg0, %arg2 : i32, i32
  }
  func.func @transform_1(%arg0: i32, %arg1: i32, %arg2: i32) -> (i32, i32) {
    %c0_i32 = arith.constant 0 : i32
    return %arg2, %arg1 : i32, i32
  }
  func.func @transform_2(%arg0: i32, %arg1: i32, %arg2: i32) -> (i32, i32) {
    %c0_i32 = arith.constant 0 : i32
    %c0_i32_0 = arith.constant 0 : i32
    return %c0_i32, %arg1 : i32, i32
  }
  func.func @transform_3(%arg0: i32, %arg1: i32, %arg2: i32) -> (i32, i32) {
    %c0_i32 = arith.constant 0 : i32
    return %arg0, %arg1 : i32, i32
  }
}

module attributes {stable_mosaic.version = 11 : i64} {
  func.func @_matmul_bias_kernel(%arg0: i32, %arg1: i32, %arg2: i32, %arg3: memref<128x512xbf16, #tpu.memory_space<vmem>>, %arg4: memref<512x256xbf16, #tpu.memory_space<vmem>>, %arg5: memref<1x256xf32, #tpu.memory_space<vmem>>, %arg6: memref<128x256xf32, #tpu.memory_space<vmem>>, %arg7: memref<128x256xf32, #tpu.memory_space<vmem>>) attributes {dimension_semantics = [#tpu.dimension_semantics<parallel>, #tpu.dimension_semantics<parallel>, #tpu.dimension_semantics<arbitrary>], iteration_bounds = array<i64: 1, 1, 23>, scalar_prefetch = 0 : i64, scratch_operands = 1 : i64, tpu.core_type = #tpu.core_type<tc>, window_params = [{transform_indices = @transform_0, window_bounds = array<i64: 128, 512>}, {transform_indices = @transform_1, window_bounds = array<i64: 512, 256>}, {transform_indices = @transform_2, window_bounds = array<i64: 1, 256>}, {transform_indices = @transform_3, window_bounds = array<i64: 128, 256>}]} {
    %c0_i32 = arith.constant 0 : i32
    %0 = arith.cmpi eq, %arg2, %c0_i32 : i32
    %1 = arith.extui %0 : i1 to i32
    %c0_i32_0 = arith.constant 0 : i32
    %2 = arith.cmpi ne, %1, %c0_i32_0 : i32
    scf.if %2 {
      %cst_9 = arith.constant 0.000000e+00 : f32
      %12 = vector.broadcast %cst_9 : f32 to vector<128x256xf32>
      %c0_10 = arith.constant 0 : index
      %c0_11 = arith.constant 0 : index
      %13 = vector.load %arg7[%c0_10, %c0_11] : memref<128x256xf32, #tpu.memory_space<vmem>>, vector<128x256xf32>
      tpu.vector_store %arg7[%c0_10, %c0_11], %12 {strides = array<i32>} : memref<128x256xf32, #tpu.memory_space<vmem>>, vector<128x256xf32>,
    } else {
    }
    %c0 = arith.constant 0 : index
    %c0_1 = arith.constant 0 : index
    %3 = vector.load %arg7[%c0, %c0_1] : memref<128x256xf32, #tpu.memory_space<vmem>>, vector<128x256xf32>
    %c0_2 = arith.constant 0 : index
    %c0_3 = arith.constant 0 : index
    %4 = vector.load %arg3[%c0_2, %c0_3] : memref<128x512xbf16, #tpu.memory_space<vmem>>, vector<128x512xbf16>
    %c0_4 = arith.constant 0 : index
    %c0_5 = arith.constant 0 : index
    %5 = vector.load %arg4[%c0_4, %c0_5] : memref<512x256xbf16, #tpu.memory_space<vmem>>, vector<512x256xbf16>
    %cst = arith.constant dense<0.000000e+00> : vector<128x256xf32>
    %6 = tpu.matmul %4, %5, %cst {dimension_numbers = #tpu.dot_dimension_numbers<[1], [0], [0], [1], [0, 0, 1, 1], [], []>} : vector<128x512xbf16>, vector<512x256xbf16>, vector<128x256xf32> -> vector<128x256xf32>
    %7 = arith.addf %3, %6 : vector<128x256xf32>
    %c0_6 = arith.constant 0 : index
    %c0_7 = arith.constant 0 : index
    %8 = vector.load %arg7[%c0_6, %c0_7] : memref<128x256xf32, #tpu.memory_space<vmem>>, vector<128x256xf32>
    tpu.vector_store %arg7[%c0_6, %c0_7], %7 {strides = array<i32>} : memref<128x256xf32, #tpu.memory_space<vmem>>, vector<128x256xf32>,
    %c22_i32 = arith.constant 22 : i32
    %9 = arith.cmpi eq, %arg2, %c22_i32 : i32
    %10 = arith.extui %9 : i1 to i32
    %c0_i32_8 = arith.constant 0 : i32
    %11 = arith.cmpi ne, %10, %c0_i32_8 : i32
    scf.if %11 {
      %c0_9 = arith.constant 0 : index
      %c0_10 = arith.constant 0 : index
      %12 = vector.load %arg7[%c0_9, %c0_10] : memref<128x256xf32, #tpu.memory_space<vmem>>, vector<128x256xf32>
      %c0_11 = arith.constant 0 : index
      %c0_12 = arith.constant 0 : index
      %13 = vector.load %arg5[%c0_11, %c0_12] : memref<1x256xf32, #tpu.memory_space<vmem>>, vector<1x256xf32>
      %14 = vector.broadcast %13 : vector<1x256xf32> to vector<128x256xf32>
      %15 = arith.addf %12, %14 : vector<128x256xf32>
      %c0_13 = arith.constant 0 : index
      %c0_14 = arith.constant 0 : index
      %16 = vector.load %arg6[%c0_13, %c0_14] : memref<128x256xf32, #tpu.memory_space<vmem>>, vector<128x256xf32>
      tpu.vector_store %arg6[%c0_13, %c0_14], %15 {strides = array<i32>} : memref<128x256xf32, #tpu.memory_space<vmem>>, vector<128x256xf32>,
    } else {
    }
    return
  }
  func.func @transform_0(%arg0: i32, %arg1: i32, %arg2: i32) -> (i32, i32) {
    %c0_i32 = arith.constant 0 : i32
    return %arg0, %arg2 : i32, i32
  }
  func.func @transform_1(%arg0: i32, %arg1: i32, %arg2: i32) -> (i32, i32) {
    %c0_i32 = arith.constant 0 : i32
    return %arg2, %arg1 : i32, i32
  }
  func.func @transform_2(%arg0: i32, %arg1: i32, %arg2: i32) -> (i32, i32) {
    %c0_i32 = arith.constant 0 : i32
    %c0_i32_0 = arith.constant 0 : i32
    return %c0_i32, %arg1 : i32, i32
  }
  func.func @transform_3(%arg0: i32, %arg1: i32, %arg2: i32) -> (i32, i32) {
    %c0_i32 = arith.constant 0 : i32
    return %arg0, %arg1 : i32, i32
  }
}

module attributes {stable_mosaic.version = 11 : i64} {
  func.func @_matmul_bias_kernel(%arg0: i32, %arg1: i32, %arg2: i32, %arg3: memref<256x256xbf16, #tpu.memory_space<vmem>>, %arg4: memref<256x128xbf16, #tpu.memory_space<vmem>>, %arg5: memref<1x128xf32, #tpu.memory_space<vmem>>, %arg6: memref<256x128xf32, #tpu.memory_space<vmem>>, %arg7: memref<256x128xf32, #tpu.memory_space<vmem>>) attributes {dimension_semantics = [#tpu.dimension_semantics<parallel>, #tpu.dimension_semantics<parallel>, #tpu.dimension_semantics<arbitrary>], iteration_bounds = array<i64: 8, 1, 1>, scalar_prefetch = 0 : i64, scratch_operands = 1 : i64, tpu.core_type = #tpu.core_type<tc>, window_params = [{transform_indices = @transform_0, window_bounds = array<i64: 256, 256>}, {transform_indices = @transform_1, window_bounds = array<i64: 256, 128>}, {transform_indices = @transform_2, window_bounds = array<i64: 1, 128>}, {transform_indices = @transform_3, window_bounds = array<i64: 256, 128>}]} {
    %c0_i32 = arith.constant 0 : i32
    %0 = arith.cmpi eq, %arg2, %c0_i32 : i32
    %1 = arith.extui %0 : i1 to i32
    %c0_i32_0 = arith.constant 0 : i32
    %2 = arith.cmpi ne, %1, %c0_i32_0 : i32
    scf.if %2 {
      %cst_10 = arith.constant 0.000000e+00 : f32
      %12 = vector.broadcast %cst_10 : f32 to vector<256x128xf32>
      %c0_11 = arith.constant 0 : index
      %c0_12 = arith.constant 0 : index
      %13 = vector.load %arg7[%c0_11, %c0_12] : memref<256x128xf32, #tpu.memory_space<vmem>>, vector<256x128xf32>
      tpu.vector_store %arg7[%c0_11, %c0_12], %12 {strides = array<i32>} : memref<256x128xf32, #tpu.memory_space<vmem>>, vector<256x128xf32>,
    } else {
    }
    %c0 = arith.constant 0 : index
    %c0_1 = arith.constant 0 : index
    %3 = vector.load %arg7[%c0, %c0_1] : memref<256x128xf32, #tpu.memory_space<vmem>>, vector<256x128xf32>
    %c0_2 = arith.constant 0 : index
    %c0_3 = arith.constant 0 : index
    %4 = vector.load %arg3[%c0_2, %c0_3] : memref<256x256xbf16, #tpu.memory_space<vmem>>, vector<256x256xbf16>
    %c0_4 = arith.constant 0 : index
    %c0_5 = arith.constant 0 : index
    %5 = vector.load %arg4[%c0_4, %c0_5] : memref<256x128xbf16, #tpu.memory_space<vmem>>, vector<256x128xbf16>
    %cst = arith.constant dense<0.000000e+00> : vector<256x128xf32>
    %6 = tpu.matmul %4, %5, %cst {dimension_numbers = #tpu.dot_dimension_numbers<[1], [0], [0], [1], [0, 0, 1, 1], [], []>} : vector<256x256xbf16>, vector<256x128xbf16>, vector<256x128xf32> -> vector<256x128xf32>
    %7 = arith.addf %3, %6 : vector<256x128xf32>
    %c0_6 = arith.constant 0 : index
    %c0_7 = arith.constant 0 : index
    %8 = vector.load %arg7[%c0_6, %c0_7] : memref<256x128xf32, #tpu.memory_space<vmem>>, vector<256x128xf32>
    tpu.vector_store %arg7[%c0_6, %c0_7], %7 {strides = array<i32>} : memref<256x128xf32, #tpu.memory_space<vmem>>, vector<256x128xf32>,
    %c0_i32_8 = arith.constant 0 : i32
    %9 = arith.cmpi eq, %arg2, %c0_i32_8 : i32
    %10 = arith.extui %9 : i1 to i32
    %c0_i32_9 = arith.constant 0 : i32
    %11 = arith.cmpi ne, %10, %c0_i32_9 : i32
    scf.if %11 {
      %c0_10 = arith.constant 0 : index
      %c0_11 = arith.constant 0 : index
      %12 = vector.load %arg7[%c0_10, %c0_11] : memref<256x128xf32, #tpu.memory_space<vmem>>, vector<256x128xf32>
      %c0_12 = arith.constant 0 : index
      %c0_13 = arith.constant 0 : index
      %13 = vector.load %arg5[%c0_12, %c0_13] : memref<1x128xf32, #tpu.memory_space<vmem>>, vector<1x128xf32>
      %14 = vector.broadcast %13 : vector<1x128xf32> to vector<256x128xf32>
      %15 = arith.addf %12, %14 : vector<256x128xf32>
      %c0_14 = arith.constant 0 : index
      %c0_15 = arith.constant 0 : index
      %16 = vector.load %arg6[%c0_14, %c0_15] : memref<256x128xf32, #tpu.memory_space<vmem>>, vector<256x128xf32>
      tpu.vector_store %arg6[%c0_14, %c0_15], %15 {strides = array<i32>} : memref<256x128xf32, #tpu.memory_space<vmem>>, vector<256x128xf32>,
    } else {
    }
    return
  }
  func.func @transform_0(%arg0: i32, %arg1: i32, %arg2: i32) -> (i32, i32) {
    %c0_i32 = arith.constant 0 : i32
    return %arg0, %arg2 : i32, i32
  }
  func.func @transform_1(%arg0: i32, %arg1: i32, %arg2: i32) -> (i32, i32) {
    %c0_i32 = arith.constant 0 : i32
    return %arg2, %arg1 : i32, i32
  }
  func.func @transform_2(%arg0: i32, %arg1: i32, %arg2: i32) -> (i32, i32) {
    %c0_i32 = arith.constant 0 : i32
    %c0_i32_0 = arith.constant 0 : i32
    return %c0_i32, %arg1 : i32, i32
  }
  func.func @transform_3(%arg0: i32, %arg1: i32, %arg2: i32) -> (i32, i32) {
    %c0_i32 = arith.constant 0 : i32
    return %arg0, %arg1 : i32, i32
  }
}

</mosaic_0001>

<bundles_post_ra>
// kernel: generator2_forward.11
= control target key start
LH: loop header
LB: loop body
LE: loop exit
PB: predicated region body
PF: predicated region fallthrough
CT: control target
= control target key end

     0   :  { %8 = vsyncpa [#allocation4], 0  ;;  %s1466_s12 = smov 0   ;;  %s1468_s13 = smov 0   ;;  %s1653_s0 = inlined_call_operand.vmem [shape: bf16[512,256], index: 0, kind: input, shape index: {}]   ;;  %s1654_s1 = inlined_call_operand.hbm [shape: bf16[256,128], index: 1, kind: input, shape index: {}]   ;;  %s1655_s2 = inlined_call_operand.vmem [shape: f32[1,128], index: 2, kind: input, shape index: {}]   ;;  %s1656_s3 = inlined_call_operand.vmem [shape: f32[512,128], index: 3, kind: output, shape index: {}]  }
   0x1   :  { %s1470_s14 = smov 0  }
   0x2 LB: > { %s1093_s15 = sadd.s32 4294967295, %s1441_s14   ;;  %s33_s16 = sadd.s32 1, %s1437_s13  ;;  %s1441_s14 = sphi %s1470_s14, %s14_s14   ;;  %s1437_s13 = sphi %s1468_s13, %s1666_s13   ;;  %s1433_s12 = sphi %s1466_s12, %s1665_s12  }
   0x3   : > { %p35_p0 = scmp.ge.s32.totalorder %s33_s16, 2  ;;  %p1095_p1 = scmp.ge.s32.totalorder %s1441_s14, 1 }
   0x4   : > { %p148_p2 = scmp.lt.s32.totalorder %s1441_s14, 3  ;;  %p1491_p4 = scmp.eq.s32.totalorder %s1093_s15, 0 }
   0x5   : > { %s1668_s16 = smov (%p35_p0, %s33_s16), 0  ;;  %s1443_s19 = smov [#allocation3]  }
   0x6   : > { %p1487_p3 = pnand %p1095_p1, %p148_p2  ;;  %s164_s20 = sshll.u32 %s1443_s19, 4  ;;  %s165_s20 = int_to_ptr.vmem [resolvable:$true] %s164_s20 }
   0x7   : > { %s1661_s18 = scalar_select %p1491_p4, 1, 0 }
   0x8   : > { %s1660_s17 = scalar_select %p1487_p3, 1, 0 }
   0x9   : > { %p1290_p5 = pneg %p1487_p3  ;;  %s1387_s24 = scalar_lea.hbm %s1654_s1, 2048 }
   0xa   : > { %p1388_p7 = scmp.ne.s32.totalorder %s1654_s1, %s1387_s24  ;;  %p1394_p11 = scmp.lt.u32.totalorder %s1387_s24, %s1654_s1 }
   0xb   : > { %p1499_p6 = pnand %p1491_p4, %p1290_p5 }
   0xd   : > { %p1389_p8 = pneg %p1499_p6 }
   0xf   : > { %p1390_p9 = pnand %p1389_p8, %p1388_p7 }
  0x11   : > { %p1391_p10 = pneg %p1390_p9 }
  0x13   : > { %p1396_p12 = pnand %p1394_p11, %p1391_p10 }
  0x15   : > { %1399 = shalt.err (!%p1396_p12)
}
  0x16   : > { %s1400_s29 = scalar_lea.vmem %s165_s20, 2048  ;;  %p1408_p2 = scmp.lt.s32.totalorder %s165_s20, %s165_s20 }
  0x17   : > { %p1401_p13 = scmp.ne.s32.totalorder %s165_s20, %s1400_s29  ;;  %p1409_p5 = scmp.lt.s32.totalorder %s1400_s29, %s1400_s29 }
  0x19   : > { %p1403_p0 = pnand %p1401_p13, %p1389_p8  ;;  %p1410_p4 = por %p1409_p5, %p1408_p2 }
  0x1b   : > { %p1404_p1 = pneg %p1403_p0 }
  0x1d   : > { %p1411_p3 = pnand %p1410_p4, %p1404_p1 }
  0x1f   : > { %1414 = shalt.err (!%p1411_p3)
}
  0x20   : > { %s1444_s30 = smov 64   ;;  %s1445_s4 = smov 4  }
  0x21   : > { %1293 = dma.hbm_to_vmem [thread:$0]  (!%p1499_p6), %s1654_s1, 2048, %s165_s20, [#allocation4], %s1444_s30, %s1444_s30, %s1445_s4  }
  0x22   : > { %p1663_p7 = scmp.ne.s32.totalorder %s1660_s17, 0 }
  0x23   : > { %p1664_p9 = scmp.ne.s32.totalorder (!%p1663_p7), %s1661_s18, 0 }
  0x24   : > { %201 = sbr.rel (%p1663_p7) target bundleno = 353 (0x161), region = 32 }
  0x2b   : > { %1428 = dma.done.wait (%p1664_p9), [#allocation4], 2048  }
  0x2c   : > { %1430 = vsyncadd (%p1664_p9), [#allocation4], 4294965248  ;;  %v1323_v0 = vld [vmem:[#allocation3 + $0x40] sm:$0xff]   ;;  %s1101_s7 = sshll.u32 %s1433_s12, 5  ;;  %v1325_v2 = vld [vmem:[#allocation3 + $0x48] sm:$0xff]  }
  0x2d   : > { %v1324_v1 = vld [vmem:[#allocation3] sm:$0xff]   ;;  %1158 = vmatprep.subr.bf16.mxu0 %v1323_v0  ;;  %1270 = vmatprep.subr.bf16.mxu1 %v1323_v0  ;;  %v1326_v3 = vld [vmem:[#allocation3 + $0x8] sm:$0xff]   ;;  %p238_p3 = scmp.lt.s32.totalorder %s1101_s7, 63  ;;  %v1327_v4 = vld [vmem:[#allocation3 + $0x50] sm:$0xff]  }
  0x2e   : > { %1159 = vmatpush3.bf16.msra.mxu0 %v1324_v1  ;;  %1278 = vmatpush3.bf16.msra.mxu1 %v1324_v1  ;;  %v1328_v5 = vld [vmem:[#allocation3 + $0x10] sm:$0xff]   ;;  %v1329_v6 = vld [vmem:[#allocation3 + $0x58] sm:$0xff]   ;;  %v1331_v8 = vld [vmem:[#allocation3 + $0x60] sm:$0xff]  }
  0x2f   : > { %1160 = vmatprep.subr.bf16.mxu0 %v1325_v2  ;;  %1271 = vmatprep.subr.bf16.mxu1 %v1325_v2  ;;  %s1670_s7 = smov (!%p238_p3, %s1101_s7), 63  ;;  %v1330_v7 = vld [vmem:[#allocation3 + $0x18] sm:$0xff]   ;;  %v1332_v9 = vld [vmem:[#allocation3 + $0x20] sm:$0xff]   ;;  %v1333_v10 = vld [vmem:[#allocation3 + $0x68] sm:$0xff]  }
  0x30   : > { %s1157_s8 = sshll.u32 %s1670_s7, 3  ;;  %v1334_v13 = vld [vmem:[#allocation3 + $0x28] sm:$0xff]   ;;  %v1335_v14 = vld [vmem:[#allocation3 + $0x70] sm:$0xff]   ;;  %v1337_v16 = vld [vmem:[#allocation3 + $0x78] sm:$0xff]  }
  0x31   : > { %s1534_s11 = scalar_lea.vmem %s1653_s0, %s1157_s8  ;;  %v1336_v15 = vld [vmem:[#allocation3 + $0x30] sm:$0xff]   ;;  %v1338_v17 = vld [vmem:[#allocation3 + $0x38] sm:$0xff]   ;;  %v1571_v51 = vld [vmem:[%s1655_s2] ss:$0 sm:$0xff]  ;;  %s1578_s19 = scalar_lea.vmem %s1656_s3, %s1157_s8 }
  0x32   : > { %1161 = vmatpush3.bf16.msra.mxu0 %v1326_v3  ;;  %1279 = vmatpush3.bf16.msra.mxu1 %v1326_v3  ;;  %v1341_v11 = vld [vmem:[%s1534_s11 + $0x4] ss:$8 sps:$4 sm:$0xff]   ;;  %v1339_v18 = vld [vmem:[%s1534_s11] ss:$8 sps:$4 sm:$0xff]   ;;  %v1345_v20 = vld [vmem:[%s1534_s11 + $0x14] ss:$8 sps:$4 sm:$0xff]  }
  0x33   : > { %1162 = vmatprep.subr.bf16.mxu0 %v1327_v4  ;;  %1272 = vmatprep.subr.bf16.mxu1 %v1327_v4  ;;  %v1344_v12 = vld [vmem:[%s1534_s11 + $0x84] ss:$8 sps:$4 sm:$0xff]   ;;  %v1342_v19 = vld [vmem:[%s1534_s11 + $0x80] ss:$8 sps:$4 sm:$0xff]   ;;  %v1347_v21 = vld [vmem:[%s1534_s11 + $0x94] ss:$8 sps:$4 sm:$0xff]  }
  0x34   : > { %682 = vmatprep.mubr.bf16.mxu0 %v1341_v11  ;;  %746 = vmatprep.mubr.bf16.mxu1 %v1344_v12  ;;  %v1349_v22 = vld [vmem:[%s1534_s11 + $0x10] ss:$8 sps:$4 sm:$0xff]   ;;  %v1351_v24 = vld [vmem:[%s1534_s11 + $0x24] ss:$8 sps:$4 sm:$0xff]   ;;  %v1355_v26 = vld [vmem:[%s1534_s11 + $0x20] ss:$8 sps:$4 sm:$0xff]  }
  0x35   : > { %v1350_v23 = vld [vmem:[%s1534_s11 + $0x90] ss:$8 sps:$4 sm:$0xff]   ;;  %v1353_v25 = vld [vmem:[%s1534_s11 + $0xa4] ss:$8 sps:$4 sm:$0xff]   ;;  %v1356_v27 = vld [vmem:[%s1534_s11 + $0xa0] ss:$8 sps:$4 sm:$0xff]  }
  0x36   : > { %1163 = vmatpush3.bf16.msra.mxu0 %v1328_v5  ;;  %1280 = vmatpush3.bf16.msra.mxu1 %v1328_v5  ;;  %v1357_v28 = vld [vmem:[%s1534_s11 + $0x34] ss:$8 sps:$4 sm:$0xff]   ;;  %v1361_v30 = vld [vmem:[%s1534_s11 + $0x30] ss:$8 sps:$4 sm:$0xff]   ;;  %v1363_v32 = vld [vmem:[%s1534_s11 + $0x44] ss:$8 sps:$4 sm:$0xff]  }
  0x37   : > { %1164 = vmatprep.subr.bf16.mxu0 %v1329_v6  ;;  %1273 = vmatprep.subr.bf16.mxu1 %v1329_v6  ;;  %v1359_v29 = vld [vmem:[%s1534_s11 + $0xb4] ss:$8 sps:$4 sm:$0xff]   ;;  %v1362_v31 = vld [vmem:[%s1534_s11 + $0xb0] ss:$8 sps:$4 sm:$0xff]   ;;  %v1365_v33 = vld [vmem:[%s1534_s11 + $0xc4] ss:$8 sps:$4 sm:$0xff]  }
  0x38   : > { %v1367_v34 = vld [vmem:[%s1534_s11 + $0x40] ss:$8 sps:$4 sm:$0xff]   ;;  %v1369_v36 = vld [vmem:[%s1534_s11 + $0x54] ss:$8 sps:$4 sm:$0xff]   ;;  %v1373_v38 = vld [vmem:[%s1534_s11 + $0x50] ss:$8 sps:$4 sm:$0xff]  }
  0x39   : > { %v1368_v35 = vld [vmem:[%s1534_s11 + $0xc0] ss:$8 sps:$4 sm:$0xff]   ;;  %v1371_v37 = vld [vmem:[%s1534_s11 + $0xd4] ss:$8 sps:$4 sm:$0xff]   ;;  %v1374_v39 = vld [vmem:[%s1534_s11 + $0xd0] ss:$8 sps:$4 sm:$0xff]  }
  0x3a   : > { %1165 = vmatpush3.bf16.msra.mxu0 %v1330_v7  ;;  %1281 = vmatpush3.bf16.msra.mxu1 %v1330_v7  ;;  %v1375_v40 = vld [vmem:[%s1534_s11 + $0x64] ss:$8 sps:$4 sm:$0xff]   ;;  %v1379_v42 = vld [vmem:[%s1534_s11 + $0x60] ss:$8 sps:$4 sm:$0xff]   ;;  %v1381_v44 = vld [vmem:[%s1534_s11 + $0x74] ss:$8 sps:$4 sm:$0xff]  }
  0x3b   : > { %1166 = vmatprep.subr.bf16.mxu0 %v1331_v8  ;;  %1274 = vmatprep.subr.bf16.mxu1 %v1331_v8  ;;  %v1377_v41 = vld [vmem:[%s1534_s11 + $0xe4] ss:$8 sps:$4 sm:$0xff]   ;;  %v1380_v43 = vld [vmem:[%s1534_s11 + $0xe0] ss:$8 sps:$4 sm:$0xff]   ;;  %v1383_v45 = vld [vmem:[%s1534_s11 + $0xf4] ss:$8 sps:$4 sm:$0xff]  }
  0x3c   : > { %v1385_v46 = vld [vmem:[%s1534_s11 + $0x70] ss:$8 sps:$4 sm:$0xff]  }
  0x3d   : > { %v1386_v47 = vld [vmem:[%s1534_s11 + $0xf0] ss:$8 sps:$4 sm:$0xff]  }
  0x3e   : > { %1167 = vmatpush3.bf16.msra.mxu0 %v1332_v9  ;;  %1282 = vmatpush3.bf16.msra.mxu1 %v1332_v9 }
  0x3f   : > { %1168 = vmatprep.subr.bf16.mxu0 %v1333_v10  ;;  %1275 = vmatprep.subr.bf16.mxu1 %v1333_v10 }
  0x42   : > { %1169 = vmatpush3.bf16.msra.mxu0 %v1334_v13  ;;  %1283 = vmatpush3.bf16.msra.mxu1 %v1334_v13 }
  0x43   : > { %1170 = vmatprep.subr.bf16.mxu0 %v1335_v14  ;;  %1276 = vmatprep.subr.bf16.mxu1 %v1335_v14 }
  0x46   : > { %1171 = vmatpush3.bf16.msra.mxu0 %v1336_v15  ;;  %1284 = vmatpush3.bf16.msra.mxu1 %v1336_v15 }
  0x47   : > { %1172 = vmatprep.subr.bf16.mxu0 %v1337_v16  ;;  %1277 = vmatprep.subr.bf16.mxu1 %v1337_v16 }
  0x4a   : > { %1173 = vmatpush3.bf16.msra.mxu0 %v1338_v17  ;;  %1285 = vmatpush3.bf16.msra.mxu1 %v1338_v17 }
  0x4d   : > { %683 = vmatmul.mubr.bf16.vlgmr.msra.gmra.mrb[0].mxu0 %v1339_v18  ;;  %747 = vmatmul.mubr.bf16.vlgmr.msra.gmra.mrb[0].mxu1 %v1342_v19 }
  0x4e   : > { %690 = vmatprep.mubr.bf16.mxu0 %v1345_v20  ;;  %754 = vmatprep.mubr.bf16.mxu1 %v1347_v21 }
  0x55   : > { %691 = vmatmul.mubr.bf16.gmra.mrb[4].mxu0 %v1349_v22  ;;  %755 = vmatmul.mubr.bf16.gmra.mrb[4].mxu1 %v1350_v23 }
  0x56   : > { %698 = vmatprep.mubr.bf16.mxu0 %v1351_v24  ;;  %762 = vmatprep.mubr.bf16.mxu1 %v1353_v25 }
  0x5d   : > { %699 = vmatmul.mubr.bf16.gmra.mrb[8].mxu0 %v1355_v26  ;;  %763 = vmatmul.mubr.bf16.gmra.mrb[8].mxu1 %v1356_v27 }
  0x5e   : > { %706 = vmatprep.mubr.bf16.mxu0 %v1357_v28  ;;  %770 = vmatprep.mubr.bf16.mxu1 %v1359_v29 }
  0x65   : > { %707 = vmatmul.mubr.bf16.gmra.mrb[12].mxu0 %v1361_v30  ;;  %771 = vmatmul.mubr.bf16.gmra.mrb[12].mxu1 %v1362_v31 }
  0x66   : > { %714 = vmatprep.mubr.bf16.mxu0 %v1363_v32  ;;  %778 = vmatprep.mubr.bf16.mxu1 %v1365_v33 }
  0x6d   : > { %715 = vmatmul.mubr.bf16.gmra.mrb[16].mxu0 %v1367_v34  ;;  %779 = vmatmul.mubr.bf16.gmra.mrb[16].mxu1 %v1368_v35 }
  0x6e   : > { %722 = vmatprep.mubr.bf16.mxu0 %v1369_v36  ;;  %786 = vmatprep.mubr.bf16.mxu1 %v1371_v37 }
  0x75   : > { %723 = vmatmul.mubr.bf16.gmra.mrb[20].mxu0 %v1373_v38  ;;  %787 = vmatmul.mubr.bf16.gmra.mrb[20].mxu1 %v1374_v39 }
  0x76   : > { %730 = vmatprep.mubr.bf16.mxu0 %v1375_v40  ;;  %794 = vmatprep.mubr.bf16.mxu1 %v1377_v41 }
  0x7d   : > { %731 = vmatmul.mubr.bf16.gmra.mrb[24].mxu0 %v1379_v42  ;;  %795 = vmatmul.mubr.bf16.gmra.mrb[24].mxu1 %v1380_v43 }
  0x7e   : > { %738 = vmatprep.mubr.bf16.mxu0 %v1381_v44  ;;  %802 = vmatprep.mubr.bf16.mxu1 %v1383_v45 }
  0x85   : > { %739 = vmatmul.mubr.bf16.gmra.mrb[28].mxu0 %v1385_v46  ;;  %803 = vmatmul.mubr.bf16.gmra.mrb[28].mxu1 %v1386_v47 }
 0x120   : > { %v1174_v48 = vpop.f32.mrb[0].mxu0  ;;  %v1222_v49 = vpop.f32.mrb[0].mxu1 }
 0x121   : > { %v1175_v50 = vpop.f32.mrb[1].mxu0  ;;  %v1223_v52 = vpop.f32.mrb[1].mxu1 }
 0x122   : > { %v1176_v53 = vadd.f32 %v1175_v50, %v1174_v48  ;;  %v1224_v54 = vadd.f32 %v1223_v52, %v1222_v49  ;;  %v1177_v55 = vpop.f32.mrb[2].mxu0  ;;  %v1225_v56 = vpop.f32.mrb[2].mxu1 }
 0x123   : > { %v1178_v57 = vpop.f32.mrb[3].mxu0  ;;  %v1226_v58 = vpop.f32.mrb[3].mxu1 }
 0x124   : > { %v917_v59 = vadd.f32 %v1176_v53, %v1571_v51  ;;  %v933_v60 = vadd.f32 %v1224_v54, %v1571_v51  ;;  %v1179_v61 = vadd.f32 %v1178_v57, %v1177_v55  ;;  %v1227_v62 = vadd.f32 %v1226_v58, %v1225_v56 }
 0x126   : > { %949 = vst [vmem:[%s1578_s19] sm:$0xff] %v917_v59  ;;  %965 = vst [vmem:[%s1578_s19 + $0x80] sm:$0xff] %v933_v60  ;;  %v918_v63 = vadd.f32 %v1179_v61, %v1571_v51  ;;  %v934_v0 = vadd.f32 %v1227_v62, %v1571_v51 }
 0x128   : > { %950 = vst [vmem:[%s1578_s19 + $0x8] sm:$0xff] %v918_v63  ;;  %966 = vst [vmem:[%s1578_s19 + $0x88] sm:$0xff] %v934_v0  ;;  %v1180_v1 = vpop.f32.mrb[4].mxu0  ;;  %v1228_v2 = vpop.f32.mrb[4].mxu1 }
 0x129   : > { %v1181_v3 = vpop.f32.mrb[5].mxu0  ;;  %v1229_v4 = vpop.f32.mrb[5].mxu1 }
 0x12a   : > { %v1182_v5 = vadd.f32 %v1181_v3, %v1180_v1  ;;  %v1230_v6 = vadd.f32 %v1229_v4, %v1228_v2  ;;  %v1183_v7 = vpop.f32.mrb[6].mxu0  ;;  %v1231_v8 = vpop.f32.mrb[6].mxu1 }
 0x12b   : > { %v1184_v9 = vpop.f32.mrb[7].mxu0  ;;  %v1232_v10 = vpop.f32.mrb[7].mxu1 }
 0x12c   : > { %v919_v11 = vadd.f32 %v1182_v5, %v1571_v51  ;;  %v935_v12 = vadd.f32 %v1230_v6, %v1571_v51  ;;  %v1185_v13 = vadd.f32 %v1184_v9, %v1183_v7  ;;  %v1233_v14 = vadd.f32 %v1232_v10, %v1231_v8 }
 0x12e   : > { %951 = vst [vmem:[%s1578_s19 + $0x10] sm:$0xff] %v919_v11  ;;  %967 = vst [vmem:[%s1578_s19 + $0x90] sm:$0xff] %v935_v12  ;;  %v920_v15 = vadd.f32 %v1185_v13, %v1571_v51  ;;  %v936_v16 = vadd.f32 %v1233_v14, %v1571_v51 }
 0x130   : > { %952 = vst [vmem:[%s1578_s19 + $0x18] sm:$0xff] %v920_v15  ;;  %968 = vst [vmem:[%s1578_s19 + $0x98] sm:$0xff] %v936_v16  ;;  %v1186_v17 = vpop.f32.mrb[8].mxu0  ;;  %v1234_v18 = vpop.f32.mrb[8].mxu1 }
 0x131   : > { %v1187_v19 = vpop.f32.mrb[9].mxu0  ;;  %v1235_v20 = vpop.f32.mrb[9].mxu1 }
 0x132   : > { %v1188_v21 = vadd.f32 %v1187_v19, %v1186_v17  ;;  %v1236_v22 = vadd.f32 %v1235_v20, %v1234_v18  ;;  %v1189_v23 = vpop.f32.mrb[10].mxu0  ;;  %v1237_v24 = vpop.f32.mrb[10].mxu1 }
 0x133   : > { %v1190_v25 = vpop.f32.mrb[11].mxu0  ;;  %v1238_v26 = vpop.f32.mrb[11].mxu1 }
 0x134   : > { %v921_v27 = vadd.f32 %v1188_v21, %v1571_v51  ;;  %v937_v28 = vadd.f32 %v1236_v22, %v1571_v51  ;;  %v1191_v29 = vadd.f32 %v1190_v25, %v1189_v23  ;;  %v1239_v30 = vadd.f32 %v1238_v26, %v1237_v24 }
 0x136   : > { %953 = vst [vmem:[%s1578_s19 + $0x20] sm:$0xff] %v921_v27  ;;  %969 = vst [vmem:[%s1578_s19 + $0xa0] sm:$0xff] %v937_v28  ;;  %v922_v31 = vadd.f32 %v1191_v29, %v1571_v51  ;;  %v938_v32 = vadd.f32 %v1239_v30, %v1571_v51 }
 0x138   : > { %954 = vst [vmem:[%s1578_s19 + $0x28] sm:$0xff] %v922_v31  ;;  %970 = vst [vmem:[%s1578_s19 + $0xa8] sm:$0xff] %v938_v32  ;;  %v1192_v33 = vpop.f32.mrb[12].mxu0  ;;  %v1240_v34 = vpop.f32.mrb[12].mxu1 }
 0x139   : > { %v1193_v35 = vpop.f32.mrb[13].mxu0  ;;  %v1241_v36 = vpop.f32.mrb[13].mxu1 }
 0x13a   : > { %v1194_v37 = vadd.f32 %v1193_v35, %v1192_v33  ;;  %v1242_v38 = vadd.f32 %v1241_v36, %v1240_v34  ;;  %v1195_v39 = vpop.f32.mrb[14].mxu0  ;;  %v1243_v40 = vpop.f32.mrb[14].mxu1 }
 0x13b   : > { %v1196_v41 = vpop.f32.mrb[15].mxu0  ;;  %v1244_v42 = vpop.f32.mrb[15].mxu1 }
 0x13c   : > { %v923_v43 = vadd.f32 %v1194_v37, %v1571_v51  ;;  %v939_v44 = vadd.f32 %v1242_v38, %v1571_v51  ;;  %v1197_v45 = vadd.f32 %v1196_v41, %v1195_v39  ;;  %v1245_v46 = vadd.f32 %v1244_v42, %v1243_v40 }
 0x13e   : > { %955 = vst [vmem:[%s1578_s19 + $0x30] sm:$0xff] %v923_v43  ;;  %971 = vst [vmem:[%s1578_s19 + $0xb0] sm:$0xff] %v939_v44  ;;  %v924_v47 = vadd.f32 %v1197_v45, %v1571_v51  ;;  %v940_v48 = vadd.f32 %v1245_v46, %v1571_v51 }
 0x140   : > { %956 = vst [vmem:[%s1578_s19 + $0x38] sm:$0xff] %v924_v47  ;;  %972 = vst [vmem:[%s1578_s19 + $0xb8] sm:$0xff] %v940_v48  ;;  %v1198_v49 = vpop.f32.mrb[16].mxu0  ;;  %v1246_v50 = vpop.f32.mrb[16].mxu1 }
 0x141   : > { %v1199_v52 = vpop.f32.mrb[17].mxu0  ;;  %v1247_v53 = vpop.f32.mrb[17].mxu1 }
 0x142   : > { %v1200_v54 = vadd.f32 %v1199_v52, %v1198_v49  ;;  %v1248_v55 = vadd.f32 %v1247_v53, %v1246_v50  ;;  %v1201_v56 = vpop.f32.mrb[18].mxu0  ;;  %v1249_v57 = vpop.f32.mrb[18].mxu1 }
 0x143   : > { %v1202_v58 = vpop.f32.mrb[19].mxu0  ;;  %v1250_v59 = vpop.f32.mrb[19].mxu1 }
 0x144   : > { %v925_v60 = vadd.f32 %v1200_v54, %v1571_v51  ;;  %v941_v61 = vadd.f32 %v1248_v55, %v1571_v51  ;;  %v1203_v62 = vadd.f32 %v1202_v58, %v1201_v56  ;;  %v1251_v63 = vadd.f32 %v1250_v59, %v1249_v57 }
 0x146   : > { %957 = vst [vmem:[%s1578_s19 + $0x40] sm:$0xff] %v925_v60  ;;  %973 = vst [vmem:[%s1578_s19 + $0xc0] sm:$0xff] %v941_v61  ;;  %v926_v0 = vadd.f32 %v1203_v62, %v1571_v51  ;;  %v942_v1 = vadd.f32 %v1251_v63, %v1571_v51 }
 0x148   : > { %958 = vst [vmem:[%s1578_s19 + $0x48] sm:$0xff] %v926_v0  ;;  %974 = vst [vmem:[%s1578_s19 + $0xc8] sm:$0xff] %v942_v1  ;;  %v1204_v2 = vpop.f32.mrb[20].mxu0  ;;  %v1252_v3 = vpop.f32.mrb[20].mxu1 }
 0x149   : > { %v1205_v4 = vpop.f32.mrb[21].mxu0  ;;  %v1253_v5 = vpop.f32.mrb[21].mxu1 }
 0x14a   : > { %v1206_v6 = vadd.f32 %v1205_v4, %v1204_v2  ;;  %v1254_v7 = vadd.f32 %v1253_v5, %v1252_v3  ;;  %v1207_v8 = vpop.f32.mrb[22].mxu0  ;;  %v1255_v9 = vpop.f32.mrb[22].mxu1 }
 0x14b   : > { %v1208_v10 = vpop.f32.mrb[23].mxu0  ;;  %v1256_v11 = vpop.f32.mrb[23].mxu1 }
 0x14c   : > { %v927_v12 = vadd.f32 %v1206_v6, %v1571_v51  ;;  %v943_v13 = vadd.f32 %v1254_v7, %v1571_v51  ;;  %v1209_v14 = vadd.f32 %v1208_v10, %v1207_v8  ;;  %v1257_v15 = vadd.f32 %v1256_v11, %v1255_v9 }
 0x14e   : > { %959 = vst [vmem:[%s1578_s19 + $0x50] sm:$0xff] %v927_v12  ;;  %975 = vst [vmem:[%s1578_s19 + $0xd0] sm:$0xff] %v943_v13  ;;  %v928_v16 = vadd.f32 %v1209_v14, %v1571_v51  ;;  %v944_v17 = vadd.f32 %v1257_v15, %v1571_v51 }
 0x150   : > { %960 = vst [vmem:[%s1578_s19 + $0x58] sm:$0xff] %v928_v16  ;;  %976 = vst [vmem:[%s1578_s19 + $0xd8] sm:$0xff] %v944_v17  ;;  %v1210_v18 = vpop.f32.mrb[24].mxu0  ;;  %v1258_v19 = vpop.f32.mrb[24].mxu1 }
 0x151   : > { %v1211_v20 = vpop.f32.mrb[25].mxu0  ;;  %v1259_v21 = vpop.f32.mrb[25].mxu1 }
 0x152   : > { %v1212_v22 = vadd.f32 %v1211_v20, %v1210_v18  ;;  %v1260_v23 = vadd.f32 %v1259_v21, %v1258_v19  ;;  %v1213_v24 = vpop.f32.mrb[26].mxu0  ;;  %v1261_v25 = vpop.f32.mrb[26].mxu1 }
 0x153   : > { %v1214_v26 = vpop.f32.mrb[27].mxu0  ;;  %v1262_v27 = vpop.f32.mrb[27].mxu1 }
 0x154   : > { %v929_v28 = vadd.f32 %v1212_v22, %v1571_v51  ;;  %v945_v29 = vadd.f32 %v1260_v23, %v1571_v51  ;;  %v1215_v30 = vadd.f32 %v1214_v26, %v1213_v24  ;;  %v1263_v31 = vadd.f32 %v1262_v27, %v1261_v25 }
 0x156   : > { %961 = vst [vmem:[%s1578_s19 + $0x60] sm:$0xff] %v929_v28  ;;  %977 = vst [vmem:[%s1578_s19 + $0xe0] sm:$0xff] %v945_v29  ;;  %v930_v32 = vadd.f32 %v1215_v30, %v1571_v51  ;;  %v946_v33 = vadd.f32 %v1263_v31, %v1571_v51 }
 0x158   : > { %962 = vst [vmem:[%s1578_s19 + $0x68] sm:$0xff] %v930_v32  ;;  %978 = vst [vmem:[%s1578_s19 + $0xe8] sm:$0xff] %v946_v33  ;;  %v1216_v34 = vpop.f32.mrb[28].mxu0  ;;  %v1264_v35 = vpop.f32.mrb[28].mxu1 }
 0x159   : > { %v1217_v36 = vpop.f32.mrb[29].mxu0  ;;  %v1265_v37 = vpop.f32.mrb[29].mxu1 }
 0x15a   : > { %v1218_v38 = vadd.f32 %v1217_v36, %v1216_v34  ;;  %v1266_v39 = vadd.f32 %v1265_v37, %v1264_v35  ;;  %v1219_v40 = vpop.f32.mrb[30].mxu0  ;;  %v1267_v41 = vpop.f32.mrb[30].mxu1 }
 0x15b   : > { %v1220_v42 = vpop.f32.mrb[31].mxu0  ;;  %v1268_v43 = vpop.f32.mrb[31].mxu1 }
 0x15c   : > { %v931_v44 = vadd.f32 %v1218_v38, %v1571_v51  ;;  %v947_v45 = vadd.f32 %v1266_v39, %v1571_v51  ;;  %v1221_v46 = vadd.f32 %v1220_v42, %v1219_v40  ;;  %v1269_v47 = vadd.f32 %v1268_v43, %v1267_v41 }
 0x15e   : > { %963 = vst [vmem:[%s1578_s19 + $0x70] sm:$0xff] %v931_v44  ;;  %979 = vst [vmem:[%s1578_s19 + $0xf0] sm:$0xff] %v947_v45  ;;  %v932_v48 = vadd.f32 %v1221_v46, %v1571_v51  ;;  %v948_v49 = vadd.f32 %v1269_v47, %v1571_v51 }
 0x160   : > { %964 = vst [vmem:[%s1578_s19 + $0x78] sm:$0xff] %v932_v48  ;;  %980 = vst [vmem:[%s1578_s19 + $0xf8] sm:$0xff] %v948_v49 }
 0x161 PF: > { %s14_s14 = sadd.s32 1, %s1441_s14   ;;  %s1665_s12 = smov %s1437_s13 }
 0x162   : > { %p11_p4 = scmp.ge.s32.totalorder %s14_s14, 4   ;;  %s1666_s13 = smov %s1668_s16 }
 0x164   :  { %13 = sbr.rel (!%p11_p4) target bundleno = 2 (0x2), region = 79 }
 0x16b   :  { %1009 = vsyncpa [#allocation4], 1 }
 0x16c   :  { %1011 = vsyncpa [#allocation4 + $0x1], 1 }

// kernel: generator2_forward.12
= control target key start
LH: loop header
LB: loop body
LE: loop exit
PB: predicated region body
PF: predicated region fallthrough
CT: control target
= control target key end

     0   :  { %s1205_s12 = smov 0   ;;  %s1207_s13 = smov 0   ;;  %s1461_s0 = inlined_call_operand.vmem [shape: bf16[128,640], index: 0, kind: input, shape index: {}]   ;;  %s1462_s1 = inlined_call_operand.vmem [shape: bf16[640,256], index: 1, kind: input, shape index: {}]   ;;  %s1463_s2 = inlined_call_operand.vmem [shape: f32[1,256], index: 2, kind: input, shape index: {}]   ;;  %s1464_s3 = inlined_call_operand.vmem [shape: f32[128,256], index: 3, kind: output, shape index: {}]  }
   0x1   :  { %s1209_s14 = smov 0   ;;  %s1211_s15 = smov 0  }
   0x2   :  { %s1213_s16 = smov 0  }
   0x3 LB: > { %s25_s17 = sadd.s32 1, %s1177_s15  ;;  %p48_p1 = scmp.ne.s32.totalorder %s1169_s13, %s1165_s12  ;;  %s1181_s16 = sphi %s1213_s16, %s13_s16   ;;  %s1177_s15 = sphi %s1211_s15, %s1468_s15   ;;  %s1173_s14 = sphi %s1209_s14, %s1467_s14   ;;  %s1169_s13 = sphi %s1207_s13, %s1466_s13   ;;  %s1165_s12 = sphi %s1205_s12, %s1465_s12  }
   0x4   : > { %p26_p0 = scmp.ge.s32.totalorder %s25_s17, 5  ;;  %p49_p2 = scmp.eq.s32.totalorder %s1181_s16, 0 }
   0x5   : > { %s41_s19 = sadd.s32 1, %s1169_s13  ;;  %p1014_p5 = scmp.ge.s32.totalorder %s1181_s16, 5 }
   0x6   : > { %s1470_s17 = smov (%p26_p0, %s25_s17), 0  ;;  %p50_p3 = por %p49_p2, %p48_p1 }
   0x7   : > { %s37_s18 = ssub.s32 %s1177_s15, %s1470_s17  ;;  %164 = sbr.rel (%p1014_p5) target bundleno = 28 (0x1c), region = 20 }
   0x8   : > { %p39_p4 = scmp.eq.s32.totalorder %s37_s18, 0 }
   0xa   : > { %s1240_s20 = scalar_select %p39_p4, %s1169_s13, %s41_s19  }
   0xe   : > { %167 = sbr.rel (!%p50_p3) target bundleno = 28 (0x1c), region = 24  ;;  %s169_s21 = sand.u32 (%p50_p3), 1, %s1169_s13  }
   0xf   : > { %s1016_s22 = sshll.u32 (%p50_p3), %s1177_s15, 2  ;;  %s1015_s23 = sshll.u32 (%p50_p3), %s169_s21, 6 }
  0x10   : > { %s1248_s26 = scalar_lea.vmem (%p50_p3), %s1461_s0, %s1016_s22  ;;  %s171_s27 = scalar_lea.vmem (%p50_p3), [#allocation3], %s1015_s23 }
  0x11   : > { %v192_v0 = vld [vmem:[%s1248_s26] sm:$0xf] (%p50_p3)  ;;  %v194_v1 = vld [vmem:[%s1248_s26 + $0x14] sm:$0xf] (%p50_p3)  ;;  %v196_v2 = vld [vmem:[%s1248_s26 + $0x28] sm:$0xf] (%p50_p3) }
  0x12   : > { %193 = vst [vmem:[%s171_s27] sm:$0xf] (%p50_p3), %v192_v0  ;;  %195 = vst [vmem:[%s171_s27 + $0x4] sm:$0xf] (%p50_p3), %v194_v1  ;;  %v198_v3 = vld [vmem:[%s1248_s26 + $0x3c] sm:$0xf] (%p50_p3) }
  0x13   : > { %v200_v4 = vld [vmem:[%s1248_s26 + $0x50] sm:$0xf] (%p50_p3)  ;;  %197 = vst [vmem:[%s171_s27 + $0x8] sm:$0xf] (%p50_p3), %v196_v2  ;;  %199 = vst [vmem:[%s171_s27 + $0xc] sm:$0xf] (%p50_p3), %v198_v3 }
  0x14   : > { %201 = vst [vmem:[%s171_s27 + $0x10] sm:$0xf] (%p50_p3), %v200_v4  ;;  %v202_v5 = vld [vmem:[%s1248_s26 + $0x64] sm:$0xf] (%p50_p3)  ;;  %v204_v6 = vld [vmem:[%s1248_s26 + $0x78] sm:$0xf] (%p50_p3) }
  0x15   : > { %v206_v7 = vld [vmem:[%s1248_s26 + $0x8c] sm:$0xf]  ;;  %203 = vst [vmem:[%s171_s27 + $0x14] sm:$0xf] %v202_v5  ;;  %205 = vst [vmem:[%s171_s27 + $0x18] sm:$0xf] %v204_v6 }
  0x16   : > { %207 = vst [vmem:[%s171_s27 + $0x1c] sm:$0xf] %v206_v7  ;;  %v208_v8 = vld [vmem:[%s1248_s26 + $0xa0] sm:$0xf]  ;;  %v210_v9 = vld [vmem:[%s1248_s26 + $0xb4] sm:$0xf] }
  0x17   : > { %v212_v10 = vld [vmem:[%s1248_s26 + $0xc8] sm:$0xf]  ;;  %209 = vst [vmem:[%s171_s27 + $0x20] sm:$0xf] %v208_v8  ;;  %211 = vst [vmem:[%s171_s27 + $0x24] sm:$0xf] %v210_v9 }
  0x18   : > { %213 = vst [vmem:[%s171_s27 + $0x28] sm:$0xf] %v212_v10  ;;  %v214_v11 = vld [vmem:[%s1248_s26 + $0xdc] sm:$0xf]  ;;  %v216_v12 = vld [vmem:[%s1248_s26 + $0xf0] sm:$0xf] }
  0x19   : > { %v218_v13 = vld [vmem:[%s1248_s26 + $0x104] sm:$0xf]  ;;  %215 = vst [vmem:[%s171_s27 + $0x2c] sm:$0xf] %v214_v11  ;;  %217 = vst [vmem:[%s171_s27 + $0x30] sm:$0xf] %v216_v12 }
  0x1a   : > { %219 = vst [vmem:[%s171_s27 + $0x34] sm:$0xf] %v218_v13  ;;  %v220_v14 = vld [vmem:[%s1248_s26 + $0x118] sm:$0xf]  ;;  %v222_v15 = vld [vmem:[%s1248_s26 + $0x12c] sm:$0xf] }
  0x1b   : > { %221 = vst [vmem:[%s171_s27 + $0x38] sm:$0xf] %v220_v14  ;;  %223 = vst [vmem:[%s171_s27 + $0x3c] sm:$0xf] %v222_v15 }
  0x1c PF: > { %p1017_p6 = scmp.ge.s32.totalorder %s1181_s16, 1  ;;  %p292_p7 = scmp.lt.s32.totalorder %s1181_s16, 6 }
  0x1e   : > { %p293_p8 = pnand %p1017_p6, %p292_p7 }
  0x1f   : > { %s299_s28 = sand.u32 (!%p293_p8), 1, %s1165_s12   ;;  %s1019_s29 = sshll.u32 (!%p293_p8), %s1173_s14, 4 }
  0x20   : > { %296 = sbr.rel (%p293_p8) target bundleno = 345 (0x159), region = 69  ;;  %s1018_s30 = sshll.u32 (!%p293_p8), %s299_s28, 6 }
  0x21   : > { %p344_p9 = scmp.lt.s32.totalorder (!%p293_p8), %s1019_s29, 79  ;;  %s1275_s8 = scalar_lea.vmem (!%p293_p8), [#allocation3], %s1018_s30 }
  0x22   : > { %p1022_p10 = scmp.ne.s32.totalorder (!%p293_p8), %s1173_s14, 0 }
  0x27   : > { %s1472_s29 = smov (!%p344_p9, %s1019_s29), 79  ;;  %375 = sbr.rel (%p1022_p10) target bundleno = 57 (0x39), region = 77 }
  0x28   : > { %s1052_s4 = sshll.u32 %s1472_s29, 3  ;;  %v1183_v16 = vmov (!%p1022_p10), 0.0  }
  0x29   : > { %s1273_s7 = scalar_lea.vmem %s1462_s1, %s1052_s4  ;;  %376 = vst [vmem:[#allocation2] sm:$0xff] (!%p1022_p10), %v1183_v16  ;;  %377 = vst [vmem:[#allocation2 + $0x8] sm:$0xff] (!%p1022_p10), %v1183_v16 }
  0x2a   : > { %378 = vst [vmem:[#allocation2 + $0x10] sm:$0xff] (!%p1022_p10), %v1183_v16  ;;  %379 = vst [vmem:[#allocation2 + $0x18] sm:$0xff] (!%p1022_p10), %v1183_v16 }
  0x2b   : > { %380 = vst [vmem:[#allocation2 + $0x20] sm:$0xff] (!%p1022_p10), %v1183_v16  ;;  %381 = vst [vmem:[#allocation2 + $0x28] sm:$0xff] (!%p1022_p10), %v1183_v16 }
  0x2c   : > { %382 = vst [vmem:[#allocation2 + $0x30] sm:$0xff] (!%p1022_p10), %v1183_v16  ;;  %383 = vst [vmem:[#allocation2 + $0x38] sm:$0xff] (!%p1022_p10), %v1183_v16 }
  0x2d   : > { %384 = vst [vmem:[#allocation2 + $0x40] sm:$0xff] (!%p1022_p10), %v1183_v16  ;;  %385 = vst [vmem:[#allocation2 + $0x48] sm:$0xff] (!%p1022_p10), %v1183_v16 }
  0x2e   : > { %386 = vst [vmem:[#allocation2 + $0x50] sm:$0xff] %v1183_v16  ;;  %387 = vst [vmem:[#allocation2 + $0x58] sm:$0xff] %v1183_v16 }
  0x2f   : > { %388 = vst [vmem:[#allocation2 + $0x60] sm:$0xff] %v1183_v16  ;;  %389 = vst [vmem:[#allocation2 + $0x68] sm:$0xff] %v1183_v16 }
  0x30   : > { %390 = vst [vmem:[#allocation2 + $0x70] sm:$0xff] %v1183_v16  ;;  %391 = vst [vmem:[#allocation2 + $0x78] sm:$0xff] %v1183_v16 }
  0x31   : > { %392 = vst [vmem:[#allocation2 + $0x80] sm:$0xff] %v1183_v16  ;;  %393 = vst [vmem:[#allocation2 + $0x88] sm:$0xff] %v1183_v16 }
  0x32   : > { %394 = vst [vmem:[#allocation2 + $0x90] sm:$0xff] %v1183_v16  ;;  %395 = vst [vmem:[#allocation2 + $0x98] sm:$0xff] %v1183_v16 }
  0x33   : > { %396 = vst [vmem:[#allocation2 + $0xa0] sm:$0xff] %v1183_v16  ;;  %397 = vst [vmem:[#allocation2 + $0xa8] sm:$0xff] %v1183_v16 }
  0x34   : > { %398 = vst [vmem:[#allocation2 + $0xb0] sm:$0xff] %v1183_v16  ;;  %399 = vst [vmem:[#allocation2 + $0xb8] sm:$0xff] %v1183_v16 }
  0x35   : > { %400 = vst [vmem:[#allocation2 + $0xc0] sm:$0xff] %v1183_v16  ;;  %401 = vst [vmem:[#allocation2 + $0xc8] sm:$0xff] %v1183_v16 }
  0x36   : > { %402 = vst [vmem:[#allocation2 + $0xd0] sm:$0xff] %v1183_v16  ;;  %403 = vst [vmem:[#allocation2 + $0xd8] sm:$0xff] %v1183_v16 }
  0x37   : > { %404 = vst [vmem:[#allocation2 + $0xe0] sm:$0xff] %v1183_v16  ;;  %405 = vst [vmem:[#allocation2 + $0xe8] sm:$0xff] %v1183_v16 }
  0x38   : > { %406 = vst [vmem:[#allocation2 + $0xf0] sm:$0xff] %v1183_v16  ;;  %407 = vst [vmem:[#allocation2 + $0xf8] sm:$0xff] %v1183_v16 }
  0x39 PF: > { %v1111_v17 = vld [vmem:[%s1273_s7 + $0x4] ss:$8 sps:$4 sm:$0xff]   ;;  %v1113_v18 = vld [vmem:[%s1273_s7] ss:$8 sps:$4 sm:$0xff]   ;;  %v1184_v19 = vmov 0   ;;  %v1139_v38 = vld [vmem:[%s1275_s8 + $0x10] sm:$0xff]  }
  0x3a   : > { %632 = vmatprep.mubr.bf16.mxu0 %v1184_v19  ;;  %672 = vmatprep.mubr.bf16.mxu1 %v1184_v19  ;;  %v1114_v20 = vld [vmem:[%s1273_s7 + $0x14] ss:$8 sps:$4 sm:$0xff]   ;;  %v1116_v21 = vld [vmem:[%s1273_s7 + $0x10] ss:$8 sps:$4 sm:$0xff]   ;;  %v1117_v22 = vld [vmem:[%s1273_s7 + $0x24] ss:$8 sps:$4 sm:$0xff]  }
  0x3b   : > { %600 = vmatprep.subr.bf16.mxu0 %v1111_v17  ;;  %1053 = vmatprep.subr.bf16.mxu1 %v1111_v17  ;;  %v1119_v23 = vld [vmem:[%s1273_s7 + $0x20] ss:$8 sps:$4 sm:$0xff]   ;;  %v1120_v24 = vld [vmem:[%s1273_s7 + $0x34] ss:$8 sps:$4 sm:$0xff]   ;;  %v1122_v25 = vld [vmem:[%s1273_s7 + $0x30] ss:$8 sps:$4 sm:$0xff]  }
  0x3c   : > { %601 = vmatpush1.bf16.msra.mxu0 %v1113_v18  ;;  %1061 = vmatpush1.bf16.msra.mxu1 %v1113_v18  ;;  %v1123_v26 = vld [vmem:[%s1273_s7 + $0x44] ss:$8 sps:$4 sm:$0xff]   ;;  %v1125_v27 = vld [vmem:[%s1273_s7 + $0x40] ss:$8 sps:$4 sm:$0xff]   ;;  %v1126_v28 = vld [vmem:[%s1273_s7 + $0x54] ss:$8 sps:$4 sm:$0xff]  }
  0x3d   : > { %602 = vmatprep.subr.bf16.mxu0 %v1114_v20  ;;  %1054 = vmatprep.subr.bf16.mxu1 %v1114_v20  ;;  %v1128_v29 = vld [vmem:[%s1273_s7 + $0x50] ss:$8 sps:$4 sm:$0xff]   ;;  %v1129_v30 = vld [vmem:[%s1273_s7 + $0x64] ss:$8 sps:$4 sm:$0xff]   ;;  %v1131_v31 = vld [vmem:[%s1273_s7 + $0x60] ss:$8 sps:$4 sm:$0xff]  }
  0x3e   : > { %v1132_v32 = vld [vmem:[%s1273_s7 + $0x74] ss:$8 sps:$4 sm:$0xff]   ;;  %v1134_v33 = vld [vmem:[%s1273_s7 + $0x70] ss:$8 sps:$4 sm:$0xff]   ;;  %v1135_v34 = vld [vmem:[%s1275_s8] sm:$0xff]   ;;  %p1047_p11 = scmp.ne.s32.totalorder %s1173_s14, 4 }
  0x3f   : > { %v1136_v35 = vld [vmem:[%s1275_s8 + $0x20] sm:$0xff]   ;;  %v1137_v36 = vld [vmem:[%s1275_s8 + $0x8] sm:$0xff]   ;;  %v1140_v39 = vld [vmem:[%s1275_s8 + $0x30] sm:$0xff]  }
  0x40   : > { %603 = vmatpush1.bf16.msra.mxu0 %v1116_v21  ;;  %1062 = vmatpush1.bf16.msra.mxu1 %v1116_v21  ;;  %v1138_v37 = vld [vmem:[%s1275_s8 + $0x28] sm:$0xff]   ;;  %v1141_v40 = vld [vmem:[%s1275_s8 + $0x18] sm:$0xff]   ;;  %v408_v42 = vld [vmem:[#allocation2] sm:$0xff] }
  0x41   : > { %604 = vmatprep.subr.bf16.mxu0 %v1117_v22  ;;  %1055 = vmatprep.subr.bf16.mxu1 %v1117_v22  ;;  %v1142_v41 = vld [vmem:[%s1275_s8 + $0x38] sm:$0xff]   ;;  %v424_v43 = vld [vmem:[#allocation2 + $0x80] sm:$0xff]  ;;  %v409_v44 = vld [vmem:[#allocation2 + $0x8] sm:$0xff] }
  0x42   : > { %v425_v45 = vld [vmem:[#allocation2 + $0x88] sm:$0xff]  ;;  %v410_v48 = vld [vmem:[#allocation2 + $0x10] sm:$0xff]  ;;  %v411_v54 = vld [vmem:[#allocation2 + $0x18] sm:$0xff] }
  0x43   : > { %v426_v49 = vld [vmem:[#allocation2 + $0x90] sm:$0xff]  ;;  %v427_v55 = vld [vmem:[#allocation2 + $0x98] sm:$0xff]  ;;  %v412_v2 = vld [vmem:[#allocation2 + $0x20] sm:$0xff] }
  0x44   : > { %605 = vmatpush1.bf16.msra.mxu0 %v1119_v23  ;;  %1063 = vmatpush1.bf16.msra.mxu1 %v1119_v23  ;;  %v428_v3 = vld [vmem:[#allocation2 + $0xa0] sm:$0xff]  ;;  %v413_v4 = vld [vmem:[#allocation2 + $0x28] sm:$0xff]  ;;  %v414_v8 = vld [vmem:[#allocation2 + $0x30] sm:$0xff] }
  0x45   : > { %606 = vmatprep.subr.bf16.mxu0 %v1120_v24  ;;  %1056 = vmatprep.subr.bf16.mxu1 %v1120_v24  ;;  %v429_v5 = vld [vmem:[#allocation2 + $0xa8] sm:$0xff]  ;;  %v430_v9 = vld [vmem:[#allocation2 + $0xb0] sm:$0xff]  ;;  %v415_v14 = vld [vmem:[#allocation2 + $0x38] sm:$0xff] }
  0x46   : > { %v431_v15 = vld [vmem:[#allocation2 + $0xb8] sm:$0xff] }
  0x48   : > { %607 = vmatpush1.bf16.msra.mxu0 %v1122_v25  ;;  %1064 = vmatpush1.bf16.msra.mxu1 %v1122_v25 }
  0x49   : > { %608 = vmatprep.subr.bf16.mxu0 %v1123_v26  ;;  %1057 = vmatprep.subr.bf16.mxu1 %v1123_v26  ;;  %v416_v26 = vld [vmem:[#allocation2 + $0x40] sm:$0xff] }
  0x4c   : > { %609 = vmatpush1.bf16.msra.mxu0 %v1125_v27  ;;  %1065 = vmatpush1.bf16.msra.mxu1 %v1125_v27  ;;  %v432_v27 = vld [vmem:[#allocation2 + $0xc0] sm:$0xff] }
  0x4d   : > { %610 = vmatprep.subr.bf16.mxu0 %v1126_v28  ;;  %1058 = vmatprep.subr.bf16.mxu1 %v1126_v28  ;;  %v417_v28 = vld [vmem:[#allocation2 + $0x48] sm:$0xff] }
  0x50   : > { %611 = vmatpush1.bf16.msra.mxu0 %v1128_v29  ;;  %1066 = vmatpush1.bf16.msra.mxu1 %v1128_v29  ;;  %v433_v29 = vld [vmem:[#allocation2 + $0xc8] sm:$0xff] }
  0x51   : > { %612 = vmatprep.subr.bf16.mxu0 %v1129_v30  ;;  %1059 = vmatprep.subr.bf16.mxu1 %v1129_v30 }
  0x54   : > { %613 = vmatpush1.bf16.msra.mxu0 %v1131_v31  ;;  %1067 = vmatpush1.bf16.msra.mxu1 %v1131_v31 }
  0x55   : > { %614 = vmatprep.subr.bf16.mxu0 %v1132_v32  ;;  %1060 = vmatprep.subr.bf16.mxu1 %v1132_v32  ;;  %v418_v32 = vld [vmem:[#allocation2 + $0x50] sm:$0xff] }
  0x58   : > { %615 = vmatpush1.bf16.msra.mxu0 %v1134_v33  ;;  %1068 = vmatpush1.bf16.msra.mxu1 %v1134_v33  ;;  %v434_v33 = vld [vmem:[#allocation2 + $0xd0] sm:$0xff] }
  0x5b   : > { %633 = vmatmul.mubr.bf16.vlgmr.msra.gmra.mrb[0].mxu0 %v1135_v34  ;;  %673 = vmatmul.mubr.bf16.vlgmr.msra.gmra.mrb[0].mxu1 %v1136_v35 }
  0x5c   : > { %642 = vmatprep.mubr.bf16.mxu0 %v1184_v19  ;;  %682 = vmatprep.mubr.bf16.mxu1 %v1184_v19 }
  0x63   : > { %643 = vmatmul.mubr.bf16.gmra.mrb[4].mxu0 %v1137_v36  ;;  %683 = vmatmul.mubr.bf16.gmra.mrb[4].mxu1 %v1138_v37 }
  0x64   : > { %652 = vmatprep.mubr.bf16.mxu0 %v1184_v19  ;;  %692 = vmatprep.mubr.bf16.mxu1 %v1184_v19 }
  0x6b   : > { %653 = vmatmul.mubr.bf16.gmra.mrb[8].mxu0 %v1139_v38  ;;  %693 = vmatmul.mubr.bf16.gmra.mrb[8].mxu1 %v1140_v39  ;;  %v419_v38 = vld [vmem:[#allocation2 + $0x58] sm:$0xff] }
  0x6c   : > { %662 = vmatprep.mubr.bf16.mxu0 %v1184_v19  ;;  %702 = vmatprep.mubr.bf16.mxu1 %v1184_v19  ;;  %v435_v39 = vld [vmem:[#allocation2 + $0xd8] sm:$0xff] }
  0x73   : > { %663 = vmatmul.mubr.bf16.gmra.mrb[12].mxu0 %v1141_v40  ;;  %703 = vmatmul.mubr.bf16.gmra.mrb[12].mxu1 %v1142_v41 }
 0x12e   : > { %v634_v46 = vpop.f32.mrb[0].mxu0  ;;  %v674_v47 = vpop.f32.mrb[0].mxu1 }
 0x12f   : > { %v713_v50 = vadd.f32 %v634_v46, %v408_v42  ;;  %v729_v51 = vadd.f32 %v674_v47, %v424_v43  ;;  %v636_v52 = vpop.f32.mrb[1].mxu0  ;;  %v676_v53 = vpop.f32.mrb[1].mxu1 }
 0x130   : > { %v714_v56 = vadd.f32 %v636_v52, %v409_v44  ;;  %v730_v57 = vadd.f32 %v676_v53, %v425_v45  ;;  %v638_v58 = vpop.f32.mrb[2].mxu0  ;;  %v678_v59 = vpop.f32.mrb[2].mxu1  ;;  %v421_v52 = vld [vmem:[#allocation2 + $0x68] sm:$0xff] }
 0x131   : > { %745 = vst [vmem:[#allocation2] sm:$0xff] %v713_v50  ;;  %761 = vst [vmem:[#allocation2 + $0x80] sm:$0xff] %v729_v51  ;;  %v715_v60 = vadd.f32 %v638_v58, %v410_v48  ;;  %v731_v61 = vadd.f32 %v678_v59, %v426_v49  ;;  %v640_v62 = vpop.f32.mrb[3].mxu0  ;;  %v680_v63 = vpop.f32.mrb[3].mxu1  ;;  %v420_v50 = vld [vmem:[#allocation2 + $0x60] sm:$0xff]  ;;  %v437_v53 = vld [vmem:[#allocation2 + $0xe8] sm:$0xff] }
 0x132   : > { %746 = vst [vmem:[#allocation2 + $0x8] sm:$0xff] %v714_v56  ;;  %762 = vst [vmem:[#allocation2 + $0x88] sm:$0xff] %v730_v57  ;;  %v716_v0 = vadd.f32 %v640_v62, %v411_v54  ;;  %v732_v1 = vadd.f32 %v680_v63, %v427_v55  ;;  %v436_v51 = vld [vmem:[#allocation2 + $0xe0] sm:$0xff]  ;;  %v422_v56 = vld [vmem:[#allocation2 + $0x70] sm:$0xff] }
 0x133   : > { %747 = vst [vmem:[#allocation2 + $0x10] sm:$0xff] %v715_v60  ;;  %763 = vst [vmem:[#allocation2 + $0x90] sm:$0xff] %v731_v61  ;;  %v438_v57 = vld [vmem:[#allocation2 + $0xf0] sm:$0xff]  ;;  %v423_v62 = vld [vmem:[#allocation2 + $0x78] sm:$0xff] }
 0x134   : > { %748 = vst [vmem:[#allocation2 + $0x18] sm:$0xff] %v716_v0  ;;  %764 = vst [vmem:[#allocation2 + $0x98] sm:$0xff] %v732_v1  ;;  %v439_v63 = vld [vmem:[#allocation2 + $0xf8] sm:$0xff] }
 0x136   : > { %v644_v6 = vpop.f32.mrb[4].mxu0  ;;  %v684_v7 = vpop.f32.mrb[4].mxu1 }
 0x137   : > { %v717_v10 = vadd.f32 %v644_v6, %v412_v2  ;;  %v733_v11 = vadd.f32 %v684_v7, %v428_v3  ;;  %v646_v12 = vpop.f32.mrb[5].mxu0  ;;  %v686_v13 = vpop.f32.mrb[5].mxu1 }
 0x138   : > { %v718_v16 = vadd.f32 %v646_v12, %v413_v4  ;;  %v734_v17 = vadd.f32 %v686_v13, %v429_v5  ;;  %v648_v18 = vpop.f32.mrb[6].mxu0  ;;  %v688_v19 = vpop.f32.mrb[6].mxu1  ;;  %v781_v13 = vld [vmem:[#allocation2] sm:$0xff] (!%p1047_p11) }
 0x139   : > { %749 = vst [vmem:[#allocation2 + $0x20] sm:$0xff] %v717_v10  ;;  %765 = vst [vmem:[#allocation2 + $0xa0] sm:$0xff] %v733_v11  ;;  %v719_v20 = vadd.f32 %v648_v18, %v414_v8  ;;  %v735_v21 = vadd.f32 %v688_v19, %v430_v9  ;;  %v650_v22 = vpop.f32.mrb[7].mxu0  ;;  %v690_v23 = vpop.f32.mrb[7].mxu1  ;;  %v815_v10 = vlaneseq (!%p1047_p11)  ;;  %v813_v11 = vld [vmem:[%s1463_s2] sm:$0x3] (!%p1047_p11) }
 0x13a   : > { %750 = vst [vmem:[#allocation2 + $0x28] sm:$0xff] %v718_v16  ;;  %766 = vst [vmem:[#allocation2 + $0xa8] sm:$0xff] %v734_v17  ;;  %v720_v24 = vadd.f32 %v650_v22, %v415_v14  ;;  %v736_v25 = vadd.f32 %v690_v23, %v431_v15  ;;  %v782_v14 = vld [vmem:[#allocation2 + $0x8] sm:$0xff] (!%p1047_p11)  ;;  %v783_v15 = vld [vmem:[#allocation2 + $0x10] sm:$0xff] (!%p1047_p11) }
 0x13b   : > { %751 = vst [vmem:[#allocation2 + $0x30] sm:$0xff] %v719_v20  ;;  %767 = vst [vmem:[#allocation2 + $0xb0] sm:$0xff] %v735_v21  ;;  %v816_v12 = vshrl.u32 (!%p1047_p11), %v815_v10, 7  ;;  %v784_v16 = vld [vmem:[#allocation2 + $0x18] sm:$0xff] (!%p1047_p11) }
 0x13c   : > { %752 = vst [vmem:[#allocation2 + $0x38] sm:$0xff] %v720_v24  ;;  %768 = vst [vmem:[#allocation2 + $0xb8] sm:$0xff] %v736_v25 }
 0x13d   : > { %v817_v17 = vsub.s32 (!%p1047_p11), 0, %v816_v12  ;;  %v821_v18 = vsub.s32 (!%p1047_p11), 1, %v816_v12 }
 0x13e   : > { %v654_v30 = vpop.f32.mrb[8].mxu0  ;;  %v694_v31 = vpop.f32.mrb[8].mxu1 }
 0x13f   : > { %v721_v34 = vadd.f32 %v654_v30, %v416_v26  ;;  %v737_v35 = vadd.f32 %v694_v31, %v432_v27  ;;  %v656_v36 = vpop.f32.mrb[9].mxu0  ;;  %v696_v37 = vpop.f32.mrb[9].mxu1  ;;  %v1314_v26 = vrot.slane (!%p1047_p11), %v813_v11, %v817_v17  ;;  %v1316_v27 = vrot.slane (!%p1047_p11), %v813_v11, %v821_v18 }
 0x140   : > { %v722_v40 = vadd.f32 %v656_v36, %v417_v28  ;;  %v738_v41 = vadd.f32 %v696_v37, %v433_v29  ;;  %v658_v42 = vpop.f32.mrb[10].mxu0  ;;  %v698_v43 = vpop.f32.mrb[10].mxu1  ;;  %v785_v19 = vld [vmem:[#allocation2 + $0x20] sm:$0xff] (!%p1047_p11) }
 0x141   : > { %753 = vst [vmem:[#allocation2 + $0x40] sm:$0xff] %v721_v34  ;;  %769 = vst [vmem:[#allocation2 + $0xc0] sm:$0xff] %v737_v35  ;;  %v723_v44 = vadd.f32 %v658_v42, %v418_v32  ;;  %v739_v45 = vadd.f32 %v698_v43, %v434_v33  ;;  %v660_v46 = vpop.f32.mrb[11].mxu0  ;;  %v700_v47 = vpop.f32.mrb[11].mxu1  ;;  %v786_v20 = vld [vmem:[#allocation2 + $0x28] sm:$0xff] (!%p1047_p11)  ;;  %v797_v33 = vld [vmem:[#allocation2 + $0x80] sm:$0xff] (!%p1047_p11)  ;;  %v825_v34 = vadd.f32 (!%p1047_p11), %v1314_v26, %v781_v13 }
 0x142   : > { %754 = vst [vmem:[#allocation2 + $0x48] sm:$0xff] %v722_v40  ;;  %770 = vst [vmem:[#allocation2 + $0xc8] sm:$0xff] %v738_v41  ;;  %v724_v48 = vadd.f32 %v660_v46, %v419_v38  ;;  %v740_v49 = vadd.f32 %v700_v47, %v435_v39  ;;  %v787_v21 = vld [vmem:[#allocation2 + $0x30] sm:$0xff] (!%p1047_p11)  ;;  %v826_v35 = vadd.f32 (!%p1047_p11), %v1316_v27, %v782_v14  ;;  %v798_v38 = vld [vmem:[#allocation2 + $0x88] sm:$0xff] (!%p1047_p11) }
 0x143   : > { %755 = vst [vmem:[#allocation2 + $0x50] sm:$0xff] %v723_v44  ;;  %771 = vst [vmem:[#allocation2 + $0xd0] sm:$0xff] %v739_v45  ;;  %v788_v22 = vld [vmem:[#allocation2 + $0x38] sm:$0xff] (!%p1047_p11)  ;;  %v827_v36 = vadd.f32 (!%p1047_p11), %v1314_v26, %v783_v15  ;;  %v828_v37 = vadd.f32 (!%p1047_p11), %v1316_v27, %v784_v16  ;;  %v799_v39 = vld [vmem:[#allocation2 + $0x90] sm:$0xff] (!%p1047_p11)  ;;  %v829_v41 = vadd.f32 (!%p1047_p11), %v1314_v26, %v785_v19 }
 0x144   : > { %756 = vst [vmem:[#allocation2 + $0x58] sm:$0xff] %v724_v48  ;;  %772 = vst [vmem:[#allocation2 + $0xd8] sm:$0xff] %v740_v49  ;;  %v800_v40 = vld [vmem:[#allocation2 + $0x98] sm:$0xff] (!%p1047_p11)  ;;  %v830_v42 = vadd.f32 (!%p1047_p11), %v1316_v27, %v786_v20  ;;  %v831_v43 = vadd.f32 (!%p1047_p11), %v1314_v26, %v787_v21  ;;  %v832_v44 = vadd.f32 (!%p1047_p11), %v1316_v27, %v788_v22  ;;  %v801_v45 = vld [vmem:[#allocation2 + $0xa0] sm:$0xff] (!%p1047_p11) }
 0x145   : > { %v802_v46 = vld [vmem:[#allocation2 + $0xa8] sm:$0xff] (!%p1047_p11)  ;;  %v803_v47 = vld [vmem:[#allocation2 + $0xb0] sm:$0xff] (!%p1047_p11)  ;;  %857 = vst [vmem:[%s1464_s3] sm:$0xff] (!%p1047_p11), %v825_v34  ;;  %858 = vst [vmem:[%s1464_s3 + $0x8] sm:$0xff] (!%p1047_p11), %v826_v35 }
 0x146   : > { %v664_v54 = vpop.f32.mrb[12].mxu0  ;;  %v704_v55 = vpop.f32.mrb[12].mxu1  ;;  %780 = sbr.rel (%p1047_p11) target bundleno = 345 (0x159), region = 81  ;;  %859 = vst [vmem:[%s1464_s3 + $0x10] sm:$0xff] (!%p1047_p11), %v827_v36  ;;  %860 = vst [vmem:[%s1464_s3 + $0x18] sm:$0xff] (!%p1047_p11), %v828_v37 }
 0x147   : > { %v725_v58 = vadd.f32 %v664_v54, %v420_v50  ;;  %v741_v59 = vadd.f32 %v704_v55, %v436_v51  ;;  %v666_v60 = vpop.f32.mrb[13].mxu0  ;;  %v706_v61 = vpop.f32.mrb[13].mxu1  ;;  %861 = vst [vmem:[%s1464_s3 + $0x20] sm:$0xff] (!%p1047_p11), %v829_v41  ;;  %862 = vst [vmem:[%s1464_s3 + $0x28] sm:$0xff] (!%p1047_p11), %v830_v42 }
 0x148   : > { %v726_v0 = vadd.f32 %v666_v60, %v421_v52  ;;  %v742_v1 = vadd.f32 %v706_v61, %v437_v53  ;;  %v668_v2 = vpop.f32.mrb[14].mxu0  ;;  %v708_v3 = vpop.f32.mrb[14].mxu1  ;;  %v789_v23 = vld [vmem:[#allocation2 + $0x40] sm:$0xff] (!%p1047_p11)  ;;  %v804_v52 = vld [vmem:[#allocation2 + $0xb8] sm:$0xff] (!%p1047_p11)  ;;  %863 = vst [vmem:[%s1464_s3 + $0x30] sm:$0xff] (!%p1047_p11), %v831_v43  ;;  %864 = vst [vmem:[%s1464_s3 + $0x38] sm:$0xff] (!%p1047_p11), %v832_v44 }
 0x149   : > { %757 = vst [vmem:[#allocation2 + $0x60] sm:$0xff] %v725_v58  ;;  %773 = vst [vmem:[#allocation2 + $0xe0] sm:$0xff] %v741_v59  ;;  %v727_v4 = vadd.f32 %v668_v2, %v422_v56  ;;  %v743_v5 = vadd.f32 %v708_v3, %v438_v57  ;;  %v670_v6 = vpop.f32.mrb[15].mxu0  ;;  %v710_v7 = vpop.f32.mrb[15].mxu1  ;;  %v790_v24 = vld [vmem:[#allocation2 + $0x48] sm:$0xff] (!%p1047_p11)  ;;  %v833_v48 = vadd.f32 (!%p1047_p11), %v1314_v26, %v789_v23  ;;  %v805_v53 = vld [vmem:[#allocation2 + $0xc0] sm:$0xff] (!%p1047_p11) }
 0x14a   : > { %758 = vst [vmem:[#allocation2 + $0x68] sm:$0xff] %v726_v0  ;;  %774 = vst [vmem:[#allocation2 + $0xe8] sm:$0xff] %v742_v1  ;;  %v728_v8 = vadd.f32 %v670_v6, %v423_v62  ;;  %v744_v9 = vadd.f32 %v710_v7, %v439_v63  ;;  %v791_v25 = vld [vmem:[#allocation2 + $0x50] sm:$0xff] (!%p1047_p11)  ;;  %v834_v49 = vadd.f32 (!%p1047_p11), %v1316_v27, %v790_v24  ;;  %v806_v54 = vld [vmem:[#allocation2 + $0xc8] sm:$0xff] (!%p1047_p11) }
 0x14b   : > { %759 = vst [vmem:[#allocation2 + $0x70] sm:$0xff] %v727_v4  ;;  %775 = vst [vmem:[#allocation2 + $0xf0] sm:$0xff] %v743_v5  ;;  %v792_v28 = vld [vmem:[#allocation2 + $0x58] sm:$0xff] (!%p1047_p11)  ;;  %v835_v50 = vadd.f32 (!%p1047_p11), %v1314_v26, %v791_v25  ;;  %v807_v59 = vld [vmem:[#allocation2 + $0xd0] sm:$0xff] (!%p1047_p11)  ;;  %v841_v62 = vadd.f32 (!%p1047_p11), %v1314_v26, %v797_v33  ;;  %v842_v63 = vadd.f32 (!%p1047_p11), %v1316_v27, %v798_v38 }
 0x14c   : > { %760 = vst [vmem:[#allocation2 + $0x78] sm:$0xff] %v728_v8  ;;  %776 = vst [vmem:[#allocation2 + $0xf8] sm:$0xff] %v744_v9  ;;  %v836_v51 = vadd.f32 (!%p1047_p11), %v1316_v27, %v792_v28  ;;  %v808_v60 = vld [vmem:[#allocation2 + $0xd8] sm:$0xff] (!%p1047_p11)  ;;  %v843_v0 = vadd.f32 (!%p1047_p11), %v1314_v26, %v799_v39  ;;  %v844_v1 = vadd.f32 (!%p1047_p11), %v1316_v27, %v800_v40 }
 0x14d   : > { %865 = vst [vmem:[%s1464_s3 + $0x40] sm:$0xff] %v833_v48  ;;  %866 = vst [vmem:[%s1464_s3 + $0x48] sm:$0xff] %v834_v49  ;;  %v845_v5 = vadd.f32 %v1314_v26, %v801_v45  ;;  %v846_v6 = vadd.f32 %v1316_v27, %v802_v46  ;;  %v847_v7 = vadd.f32 %v1314_v26, %v803_v47 }
 0x14e   : > { %867 = vst [vmem:[%s1464_s3 + $0x50] sm:$0xff] %v835_v50  ;;  %868 = vst [vmem:[%s1464_s3 + $0x58] sm:$0xff] %v836_v51  ;;  %v848_v8 = vadd.f32 %v1316_v27, %v804_v52  ;;  %v849_v9 = vadd.f32 %v1314_v26, %v805_v53  ;;  %v850_v10 = vadd.f32 %v1316_v27, %v806_v54 }
 0x14f   : > { %873 = vst [vmem:[%s1464_s3 + $0x80] sm:$0xff] %v841_v62  ;;  %874 = vst [vmem:[%s1464_s3 + $0x88] sm:$0xff] %v842_v63  ;;  %v851_v11 = vadd.f32 %v1314_v26, %v807_v59  ;;  %v852_v12 = vadd.f32 %v1316_v27, %v808_v60 }
 0x150   : > { %v793_v29 = vld [vmem:[#allocation2 + $0x60] sm:$0xff]  ;;  %875 = vst [vmem:[%s1464_s3 + $0x90] sm:$0xff] %v843_v0  ;;  %876 = vst [vmem:[%s1464_s3 + $0x98] sm:$0xff] %v844_v1 }
 0x151   : > { %v794_v30 = vld [vmem:[#allocation2 + $0x68] sm:$0xff]  ;;  %v837_v55 = vadd.f32 %v1314_v26, %v793_v29  ;;  %v809_v61 = vld [vmem:[#allocation2 + $0xe0] sm:$0xff]  ;;  %877 = vst [vmem:[%s1464_s3 + $0xa0] sm:$0xff] %v845_v5  ;;  %878 = vst [vmem:[%s1464_s3 + $0xa8] sm:$0xff] %v846_v6 }
 0x152   : > { %v795_v31 = vld [vmem:[#allocation2 + $0x70] sm:$0xff]  ;;  %v838_v56 = vadd.f32 %v1316_v27, %v794_v30  ;;  %v810_v2 = vld [vmem:[#allocation2 + $0xe8] sm:$0xff]  ;;  %879 = vst [vmem:[%s1464_s3 + $0xb0] sm:$0xff] %v847_v7  ;;  %880 = vst [vmem:[%s1464_s3 + $0xb8] sm:$0xff] %v848_v8  ;;  %v853_v13 = vadd.f32 %v1314_v26, %v809_v61 }
 0x153   : > { %v796_v32 = vld [vmem:[#allocation2 + $0x78] sm:$0xff]  ;;  %v839_v57 = vadd.f32 %v1314_v26, %v795_v31  ;;  %v811_v3 = vld [vmem:[#allocation2 + $0xf0] sm:$0xff]  ;;  %869 = vst [vmem:[%s1464_s3 + $0x60] sm:$0xff] %v837_v55  ;;  %v854_v14 = vadd.f32 %v1316_v27, %v810_v2  ;;  %881 = vst [vmem:[%s1464_s3 + $0xc0] sm:$0xff] %v849_v9 }
 0x154   : > { %v840_v58 = vadd.f32 %v1316_v27, %v796_v32  ;;  %v812_v4 = vld [vmem:[#allocation2 + $0xf8] sm:$0xff]  ;;  %870 = vst [vmem:[%s1464_s3 + $0x68] sm:$0xff] %v838_v56  ;;  %v855_v15 = vadd.f32 %v1314_v26, %v811_v3  ;;  %882 = vst [vmem:[%s1464_s3 + $0xc8] sm:$0xff] %v850_v10 }
 0x155   : > { %871 = vst [vmem:[%s1464_s3 + $0x70] sm:$0xff] %v839_v57  ;;  %v856_v16 = vadd.f32 %v1316_v27, %v812_v4  ;;  %883 = vst [vmem:[%s1464_s3 + $0xd0] sm:$0xff] %v851_v11 }
 0x156   : > { %872 = vst [vmem:[%s1464_s3 + $0x78] sm:$0xff] %v840_v58  ;;  %884 = vst [vmem:[%s1464_s3 + $0xd8] sm:$0xff] %v852_v12 }
 0x157   : > { %885 = vst [vmem:[%s1464_s3 + $0xe0] sm:$0xff] %v853_v13  ;;  %886 = vst [vmem:[%s1464_s3 + $0xe8] sm:$0xff] %v854_v14 }
 0x158   : > { %887 = vst [vmem:[%s1464_s3 + $0xf0] sm:$0xff] %v855_v15  ;;  %888 = vst [vmem:[%s1464_s3 + $0xf8] sm:$0xff] %v856_v16 }
 0x159 PF: > { %s13_s16 = sadd.s32 1, %s1181_s16   ;;  %s1465_s12 = smov %s1169_s13 }
 0x15a   : > { %p10_p12 = scmp.ge.s32.totalorder %s13_s16, 7   ;;  %s1466_s13 = smov %s1240_s20 }
 0x15b   : > { %s1467_s14 = smov %s1177_s15  ;;  %s1468_s15 = smov %s1470_s17 }
 0x15c   :  { %12 = sbr.rel (!%p10_p12) target bundleno = 3 (0x3), region = 122 }

// kernel: generator2_forward.14
= control target key start
LH: loop header
LB: loop body
LE: loop exit
PB: predicated region body
PF: predicated region fallthrough
CT: control target
= control target key end

     0   :  { %s1449_s12 = smov 0   ;;  %s1451_s13 = smov 0   ;;  %s1710_s0 = inlined_call_operand.vmem [shape: bf16[512,640], index: 0, kind: input, shape index: {}]   ;;  %s1711_s1 = inlined_call_operand.vmem [shape: bf16[640,128], index: 1, kind: input, shape index: {}]   ;;  %s1712_s2 = inlined_call_operand.vmem [shape: f32[1,128], index: 2, kind: input, shape index: {}]   ;;  %s1713_s3 = inlined_call_operand.vmem [shape: f32[512,128], index: 3, kind: output, shape index: {}]  }
   0x1   :  { %s1453_s14 = smov 0   ;;  %s1455_s15 = smov 0  }
   0x2   :  { %s1457_s16 = smov 0   ;;  %s1459_s17 = smov 0  }
   0x3   :  { %s1461_s18 = smov 0  }
   0x4 LB: > { %s25_s19 = sadd.s32 1, %s1418_s16  ;;  %s32_s20 = sadd.s32 1, %s1422_s17  ;;  %s1426_s18 = sphi %s1461_s18, %s13_s18   ;;  %s1422_s17 = sphi %s1459_s17, %s1719_s17   ;;  %s1418_s16 = sphi %s1457_s16, %s1718_s16   ;;  %s1414_s15 = sphi %s1455_s15, %s1717_s15   ;;  %s1410_s14 = sphi %s1453_s14, %s1716_s14   ;;  %s1406_s13 = sphi %s1451_s13, %s1715_s13   ;;  %s1402_s12 = sphi %s1449_s12, %s1714_s12  }
   0x5   : > { %p26_p0 = scmp.ge.s32.totalorder %s25_s19, 5  ;;  %p48_p1 = scmp.ne.s32.totalorder %s1406_s13, %s1402_s12 }
   0x6   : > { %p49_p2 = scmp.eq.s32.totalorder %s1426_s18, 0  ;;  %s41_s24 = sadd.s32 1, %s1406_s13 }
   0x7   : > { %s1721_s19 = smov (%p26_p0, %s25_s19), 0  ;;  %s1723_s20 = smov (!%p26_p0, %s32_s20), %s1422_s17 }
   0x8   : > { %p50_p3 = por %p49_p2, %p48_p1  ;;  %p34_p4 = scmp.ge.s32.totalorder %s1723_s20, 2 }
   0x9   : > { %s37_s21 = ssub.s32 %s1418_s16, %s1721_s19  ;;  %p1162_p6 = scmp.ge.s32.totalorder %s1426_s18, 10 }
   0xa   : > { %s1725_s20 = smov (%p34_p4, %s1723_s20), 0 }
   0xb   : > { %s36_s22 = ssub.s32 %s1422_s17, %s1725_s20  ;;  %162 = sbr.rel (%p1162_p6) target bundleno = 46 (0x2e), region = 20 }
   0xc   : > { %s38_s23 = sor.u32 %s37_s21, %s36_s22 }
   0xd   : > { %p39_p5 = scmp.eq.s32.totalorder %s38_s23, 0 }
   0xf   : > { %s1500_s25 = scalar_select %p39_p5, %s1406_s13, %s41_s24  }
  0x12   : > { %165 = sbr.rel (!%p50_p3) target bundleno = 46 (0x2e), region = 24  ;;  %s167_s26 = sand.u32 (%p50_p3), 1, %s1406_s13  }
  0x13   : > { %s1290_s27 = smul.u32 (%p50_p3), 160, %s1422_s17  ;;  %s1163_s28 = sshll.u32 (%p50_p3), %s167_s26, 7 }
  0x14   : > { %s1514_s7 = scalar_lea.vmem (%p50_p3), [#allocation3], %s1163_s28 }
  0x15   : > { %s172_s29 = sadd.s32 (%p50_p3), %s1418_s16, %s1290_s27 }
  0x16   : > { %s1166_s30 = sshll.u32 (%p50_p3), %s172_s29, 2 }
  0x17   : > { %s1509_s6 = scalar_lea.vmem (%p50_p3), %s1710_s0, %s1166_s30 }
  0x18   : > { %v190_v0 = vld [vmem:[%s1509_s6] sm:$0xf] (%p50_p3)  ;;  %v192_v1 = vld [vmem:[%s1509_s6 + $0x14] sm:$0xf] (%p50_p3)  ;;  %v194_v2 = vld [vmem:[%s1509_s6 + $0x28] sm:$0xf] (%p50_p3) }
  0x19   : > { %191 = vst [vmem:[%s1514_s7] sm:$0xf] %v190_v0  ;;  %193 = vst [vmem:[%s1514_s7 + $0x4] sm:$0xf] %v192_v1  ;;  %v196_v3 = vld [vmem:[%s1509_s6 + $0x3c] sm:$0xf] }
  0x1a   : > { %195 = vst [vmem:[%s1514_s7 + $0x8] sm:$0xf] %v194_v2  ;;  %v198_v4 = vld [vmem:[%s1509_s6 + $0x50] sm:$0xf]  ;;  %v200_v5 = vld [vmem:[%s1509_s6 + $0x64] sm:$0xf] }
  0x1b   : > { %197 = vst [vmem:[%s1514_s7 + $0xc] sm:$0xf] %v196_v3  ;;  %199 = vst [vmem:[%s1514_s7 + $0x10] sm:$0xf] %v198_v4  ;;  %v202_v6 = vld [vmem:[%s1509_s6 + $0x78] sm:$0xf] }
  0x1c   : > { %201 = vst [vmem:[%s1514_s7 + $0x14] sm:$0xf] %v200_v5  ;;  %v204_v7 = vld [vmem:[%s1509_s6 + $0x8c] sm:$0xf]  ;;  %v206_v8 = vld [vmem:[%s1509_s6 + $0xa0] sm:$0xf] }
  0x1d   : > { %203 = vst [vmem:[%s1514_s7 + $0x18] sm:$0xf] %v202_v6  ;;  %205 = vst [vmem:[%s1514_s7 + $0x1c] sm:$0xf] %v204_v7  ;;  %v208_v9 = vld [vmem:[%s1509_s6 + $0xb4] sm:$0xf] }
  0x1e   : > { %207 = vst [vmem:[%s1514_s7 + $0x20] sm:$0xf] %v206_v8  ;;  %v210_v10 = vld [vmem:[%s1509_s6 + $0xc8] sm:$0xf]  ;;  %v212_v11 = vld [vmem:[%s1509_s6 + $0xdc] sm:$0xf] }
  0x1f   : > { %209 = vst [vmem:[%s1514_s7 + $0x24] sm:$0xf] %v208_v9  ;;  %211 = vst [vmem:[%s1514_s7 + $0x28] sm:$0xf] %v210_v10  ;;  %v214_v12 = vld [vmem:[%s1509_s6 + $0xf0] sm:$0xf] }
  0x20   : > { %213 = vst [vmem:[%s1514_s7 + $0x2c] sm:$0xf] %v212_v11  ;;  %v216_v13 = vld [vmem:[%s1509_s6 + $0x104] sm:$0xf]  ;;  %v218_v14 = vld [vmem:[%s1509_s6 + $0x118] sm:$0xf] }
  0x21   : > { %215 = vst [vmem:[%s1514_s7 + $0x30] sm:$0xf] %v214_v12  ;;  %217 = vst [vmem:[%s1514_s7 + $0x34] sm:$0xf] %v216_v13  ;;  %v220_v15 = vld [vmem:[%s1509_s6 + $0x12c] sm:$0xf] }
  0x22   : > { %219 = vst [vmem:[%s1514_s7 + $0x38] sm:$0xf] %v218_v14  ;;  %v222_v16 = vld [vmem:[%s1509_s6 + $0x140] sm:$0xf]  ;;  %v224_v17 = vld [vmem:[%s1509_s6 + $0x154] sm:$0xf] }
  0x23   : > { %221 = vst [vmem:[%s1514_s7 + $0x3c] sm:$0xf] %v220_v15  ;;  %223 = vst [vmem:[%s1514_s7 + $0x40] sm:$0xf] %v222_v16  ;;  %v226_v18 = vld [vmem:[%s1509_s6 + $0x168] sm:$0xf] }
  0x24   : > { %225 = vst [vmem:[%s1514_s7 + $0x44] sm:$0xf] %v224_v17  ;;  %v228_v19 = vld [vmem:[%s1509_s6 + $0x17c] sm:$0xf]  ;;  %v230_v20 = vld [vmem:[%s1509_s6 + $0x190] sm:$0xf] }
  0x25   : > { %227 = vst [vmem:[%s1514_s7 + $0x48] sm:$0xf] %v226_v18  ;;  %229 = vst [vmem:[%s1514_s7 + $0x4c] sm:$0xf] %v228_v19  ;;  %v232_v21 = vld [vmem:[%s1509_s6 + $0x1a4] sm:$0xf] }
  0x26   : > { %231 = vst [vmem:[%s1514_s7 + $0x50] sm:$0xf] %v230_v20  ;;  %v234_v22 = vld [vmem:[%s1509_s6 + $0x1b8] sm:$0xf]  ;;  %v236_v23 = vld [vmem:[%s1509_s6 + $0x1cc] sm:$0xf] }
  0x27   : > { %233 = vst [vmem:[%s1514_s7 + $0x54] sm:$0xf] %v232_v21  ;;  %235 = vst [vmem:[%s1514_s7 + $0x58] sm:$0xf] %v234_v22  ;;  %v238_v24 = vld [vmem:[%s1509_s6 + $0x1e0] sm:$0xf] }
  0x28   : > { %237 = vst [vmem:[%s1514_s7 + $0x5c] sm:$0xf] %v236_v23  ;;  %v240_v25 = vld [vmem:[%s1509_s6 + $0x1f4] sm:$0xf]  ;;  %v242_v26 = vld [vmem:[%s1509_s6 + $0x208] sm:$0xf] }
  0x29   : > { %239 = vst [vmem:[%s1514_s7 + $0x60] sm:$0xf] %v238_v24  ;;  %241 = vst [vmem:[%s1514_s7 + $0x64] sm:$0xf] %v240_v25  ;;  %v244_v27 = vld [vmem:[%s1509_s6 + $0x21c] sm:$0xf] }
  0x2a   : > { %243 = vst [vmem:[%s1514_s7 + $0x68] sm:$0xf] %v242_v26  ;;  %v246_v28 = vld [vmem:[%s1509_s6 + $0x230] sm:$0xf]  ;;  %v248_v29 = vld [vmem:[%s1509_s6 + $0x244] sm:$0xf] }
  0x2b   : > { %245 = vst [vmem:[%s1514_s7 + $0x6c] sm:$0xf] %v244_v27  ;;  %247 = vst [vmem:[%s1514_s7 + $0x70] sm:$0xf] %v246_v28  ;;  %v250_v30 = vld [vmem:[%s1509_s6 + $0x258] sm:$0xf] }
  0x2c   : > { %249 = vst [vmem:[%s1514_s7 + $0x74] sm:$0xf] %v248_v29  ;;  %v252_v31 = vld [vmem:[%s1509_s6 + $0x26c] sm:$0xf]  ;;  %251 = vst [vmem:[%s1514_s7 + $0x78] sm:$0xf] %v250_v30 }
  0x2d   : > { %253 = vst [vmem:[%s1514_s7 + $0x7c] sm:$0xf] %v252_v31 }
  0x2e PF: > { %p1167_p7 = scmp.ge.s32.totalorder %s1426_s18, 1  ;;  %p351_p8 = scmp.lt.s32.totalorder %s1426_s18, 11 }
  0x30   : > { %p352_p9 = pnand %p1167_p7, %p351_p8 }
  0x31   : > { %s358_s8 = sand.u32 (!%p352_p9), 1, %s1402_s12   ;;  %s1169_s9 = sshll.u32 (!%p352_p9), %s1410_s14, 4 }
  0x32   : > { %355 = sbr.rel (%p352_p9) target bundleno = 363 (0x16b), region = 69  ;;  %s1168_s10 = sshll.u32 (!%p352_p9), %s358_s8, 7 }
  0x33   : > { %p397_p10 = scmp.lt.s32.totalorder (!%p352_p9), %s1169_s9, 79  ;;  %s1171_s11 = sshll.u32 (!%p352_p9), %s1414_s15, 5 }
  0x34   : > { %p409_p11 = scmp.lt.s32.totalorder (!%p352_p9), %s1171_s11, 63  ;;  %s1592_s12 = scalar_lea.vmem (!%p352_p9), [#allocation3], %s1168_s10 }
  0x35   : > { %p1173_p12 = scmp.ne.s32.totalorder (!%p352_p9), %s1410_s14, 0 }
  0x39   : > { %s1727_s9 = smov (!%p397_p10, %s1169_s9), 79  ;;  %s1729_s11 = smov (!%p409_p11, %s1171_s11), 63 }
  0x3a   : > { %s1170_s21 = sshll.u32 %s1727_s9, 2  ;;  %s1172_s26 = sshll.u32 %s1729_s11, 3  ;;  %v1428_v32 = vmov (!%p1173_p12), 0.0  }
  0x3b   : > { %s1585_s24 = scalar_lea.vmem %s1711_s1, %s1170_s21  ;;  %s1590_s29 = scalar_lea.vmem %s1713_s3, %s1172_s26  ;;  %422 = vst [vmem:[#allocation2] sm:$0xff] (!%p1173_p12), %v1428_v32  ;;  %423 = vst [vmem:[#allocation2 + $0x8] sm:$0xff] (!%p1173_p12), %v1428_v32 }
  0x3c   : > { %421 = sbr.rel (%p1173_p12) target bundleno = 75 (0x4b), region = 77  ;;  %424 = vst [vmem:[#allocation2 + $0x10] sm:$0xff] (!%p1173_p12), %v1428_v32  ;;  %425 = vst [vmem:[#allocation2 + $0x18] sm:$0xff] (!%p1173_p12), %v1428_v32 }
  0x3d   : > { %426 = vst [vmem:[#allocation2 + $0x20] sm:$0xff] (!%p1173_p12), %v1428_v32  ;;  %427 = vst [vmem:[#allocation2 + $0x28] sm:$0xff] (!%p1173_p12), %v1428_v32 }
  0x3e   : > { %428 = vst [vmem:[#allocation2 + $0x30] sm:$0xff] (!%p1173_p12), %v1428_v32  ;;  %429 = vst [vmem:[#allocation2 + $0x38] sm:$0xff] (!%p1173_p12), %v1428_v32 }
  0x3f   : > { %430 = vst [vmem:[#allocation2 + $0x40] sm:$0xff] (!%p1173_p12), %v1428_v32  ;;  %431 = vst [vmem:[#allocation2 + $0x48] sm:$0xff] (!%p1173_p12), %v1428_v32 }
  0x40   : > { %432 = vst [vmem:[#allocation2 + $0x50] sm:$0xff] (!%p1173_p12), %v1428_v32  ;;  %433 = vst [vmem:[#allocation2 + $0x58] sm:$0xff] (!%p1173_p12), %v1428_v32 }
  0x41   : > { %434 = vst [vmem:[#allocation2 + $0x60] sm:$0xff] (!%p1173_p12), %v1428_v32  ;;  %435 = vst [vmem:[#allocation2 + $0x68] sm:$0xff] (!%p1173_p12), %v1428_v32 }
  0x42   : > { %436 = vst [vmem:[#allocation2 + $0x70] sm:$0xff] (!%p1173_p12), %v1428_v32  ;;  %437 = vst [vmem:[#allocation2 + $0x78] sm:$0xff] (!%p1173_p12), %v1428_v32 }
  0x43   : > { %438 = vst [vmem:[#allocation2 + $0x80] sm:$0xff] %v1428_v32  ;;  %439 = vst [vmem:[#allocation2 + $0x88] sm:$0xff] %v1428_v32 }
  0x44   : > { %440 = vst [vmem:[#allocation2 + $0x90] sm:$0xff] %v1428_v32  ;;  %441 = vst [vmem:[#allocation2 + $0x98] sm:$0xff] %v1428_v32 }
  0x45   : > { %442 = vst [vmem:[#allocation2 + $0xa0] sm:$0xff] %v1428_v32  ;;  %443 = vst [vmem:[#allocation2 + $0xa8] sm:$0xff] %v1428_v32 }
  0x46   : > { %444 = vst [vmem:[#allocation2 + $0xb0] sm:$0xff] %v1428_v32  ;;  %445 = vst [vmem:[#allocation2 + $0xb8] sm:$0xff] %v1428_v32 }
  0x47   : > { %446 = vst [vmem:[#allocation2 + $0xc0] sm:$0xff] %v1428_v32  ;;  %447 = vst [vmem:[#allocation2 + $0xc8] sm:$0xff] %v1428_v32 }
  0x48   : > { %448 = vst [vmem:[#allocation2 + $0xd0] sm:$0xff] %v1428_v32  ;;  %449 = vst [vmem:[#allocation2 + $0xd8] sm:$0xff] %v1428_v32 }
  0x49   : > { %450 = vst [vmem:[#allocation2 + $0xe0] sm:$0xff] %v1428_v32  ;;  %451 = vst [vmem:[#allocation2 + $0xe8] sm:$0xff] %v1428_v32 }
  0x4a   : > { %452 = vst [vmem:[#allocation2 + $0xf0] sm:$0xff] %v1428_v32  ;;  %453 = vst [vmem:[#allocation2 + $0xf8] sm:$0xff] %v1428_v32 }
  0x4b PF: > { %v1348_v33 = vld [vmem:[%s1585_s24] sm:$0xff]   ;;  %v1349_v34 = vld [vmem:[%s1585_s24 + $0x8] sm:$0xff]   ;;  %v1350_v35 = vld [vmem:[%s1585_s24 + $0x10] sm:$0xff]   ;;  %p1198_p13 = scmp.ne.s32.totalorder %s1410_s14, 4 }
  0x4c   : > { %1226 = vmatprep.subr.bf16.mxu0 %v1348_v33  ;;  %1274 = vmatprep.subr.bf16.mxu1 %v1348_v33  ;;  %v1351_v36 = vld [vmem:[%s1585_s24 + $0x18] sm:$0xff]   ;;  %v1356_v37 = vld [vmem:[%s1592_s12] sm:$0xff]   ;;  %v1353_v40 = vld [vmem:[%s1585_s24 + $0x28] sm:$0xff]  }
  0x4d   : > { %1227 = vmatpush3.bf16.msra.mxu0 %v1348_v33  ;;  %1282 = vmatpush3.bf16.msra.mxu1 %v1348_v33  ;;  %v1357_v38 = vld [vmem:[%s1592_s12 + $0x40] sm:$0xff]   ;;  %v1354_v41 = vld [vmem:[%s1585_s24 + $0x30] sm:$0xff]   ;;  %v1355_v42 = vld [vmem:[%s1585_s24 + $0x38] sm:$0xff]  }
  0x4e   : > { %1228 = vmatprep.subr.bf16.mxu0 %v1349_v34  ;;  %1275 = vmatprep.subr.bf16.mxu1 %v1349_v34  ;;  %v1352_v39 = vld [vmem:[%s1585_s24 + $0x20] sm:$0xff]   ;;  %v1358_v43 = vld [vmem:[%s1592_s12 + $0x8] sm:$0xff]   ;;  %v1360_v45 = vld [vmem:[%s1592_s12 + $0x10] sm:$0xff]  }
  0x4f   : > { %1242 = vmatprep.mubr.bf16.mxu0 %v1356_v37  ;;  %1258 = vmatprep.mubr.bf16.mxu1 %v1357_v38  ;;  %v1359_v44 = vld [vmem:[%s1592_s12 + $0x48] sm:$0xff]   ;;  %v1361_v46 = vld [vmem:[%s1592_s12 + $0x50] sm:$0xff]   ;;  %v1362_v47 = vld [vmem:[%s1592_s12 + $0x18] sm:$0xff]  }
  0x50   : > { %v1363_v48 = vld [vmem:[%s1592_s12 + $0x58] sm:$0xff]   ;;  %v1364_v49 = vld [vmem:[%s1592_s12 + $0x20] sm:$0xff]   ;;  %v1366_v51 = vld [vmem:[%s1592_s12 + $0x28] sm:$0xff]  }
  0x51   : > { %1229 = vmatpush3.bf16.msra.mxu0 %v1349_v34  ;;  %1283 = vmatpush3.bf16.msra.mxu1 %v1349_v34  ;;  %v1365_v50 = vld [vmem:[%s1592_s12 + $0x60] sm:$0xff]   ;;  %v1367_v52 = vld [vmem:[%s1592_s12 + $0x68] sm:$0xff]   ;;  %v1368_v53 = vld [vmem:[%s1592_s12 + $0x30] sm:$0xff]  }
  0x52   : > { %1230 = vmatprep.subr.bf16.mxu0 %v1350_v35  ;;  %1276 = vmatprep.subr.bf16.mxu1 %v1350_v35  ;;  %v1369_v54 = vld [vmem:[%s1592_s12 + $0x70] sm:$0xff]   ;;  %v1370_v55 = vld [vmem:[%s1592_s12 + $0x38] sm:$0xff]   ;;  %v454_v59 = vld [vmem:[#allocation2] sm:$0xff] }
  0x53   : > { %v1371_v56 = vld [vmem:[%s1592_s12 + $0x78] sm:$0xff]   ;;  %v456_v57 = vld [vmem:[#allocation2 + $0x10] sm:$0xff]  ;;  %v470_v60 = vld [vmem:[#allocation2 + $0x80] sm:$0xff] }
  0x54   : > { %v472_v58 = vld [vmem:[#allocation2 + $0x90] sm:$0xff]  ;;  %v457_v63 = vld [vmem:[#allocation2 + $0x18] sm:$0xff]  ;;  %v455_v5 = vld [vmem:[#allocation2 + $0x8] sm:$0xff] }
  0x55   : > { %1231 = vmatpush3.bf16.msra.mxu0 %v1350_v35  ;;  %1284 = vmatpush3.bf16.msra.mxu1 %v1350_v35  ;;  %v473_v0 = vld [vmem:[#allocation2 + $0x98] sm:$0xff]  ;;  %v471_v6 = vld [vmem:[#allocation2 + $0x88] sm:$0xff]  ;;  %v460_v17 = vld [vmem:[#allocation2 + $0x30] sm:$0xff] }
  0x56   : > { %1232 = vmatprep.subr.bf16.mxu0 %v1351_v36  ;;  %1277 = vmatprep.subr.bf16.mxu1 %v1351_v36  ;;  %v476_v18 = vld [vmem:[#allocation2 + $0xb0] sm:$0xff]  ;;  %v458_v19 = vld [vmem:[#allocation2 + $0x20] sm:$0xff]  ;;  %v461_v23 = vld [vmem:[#allocation2 + $0x38] sm:$0xff] }
  0x57   : > { %v474_v20 = vld [vmem:[#allocation2 + $0xa0] sm:$0xff]  ;;  %v477_v24 = vld [vmem:[#allocation2 + $0xb8] sm:$0xff]  ;;  %v459_v29 = vld [vmem:[#allocation2 + $0x28] sm:$0xff] }
  0x58   : > { %v475_v30 = vld [vmem:[#allocation2 + $0xa8] sm:$0xff] }
  0x59   : > { %1233 = vmatpush3.bf16.msra.mxu0 %v1351_v36  ;;  %1285 = vmatpush3.bf16.msra.mxu1 %v1351_v36 }
  0x5a   : > { %1234 = vmatprep.subr.bf16.mxu0 %v1352_v39  ;;  %1278 = vmatprep.subr.bf16.mxu1 %v1352_v39 }
  0x5d   : > { %1235 = vmatpush3.bf16.msra.mxu0 %v1352_v39  ;;  %1286 = vmatpush3.bf16.msra.mxu1 %v1352_v39 }
  0x5e   : > { %1236 = vmatprep.subr.bf16.mxu0 %v1353_v40  ;;  %1279 = vmatprep.subr.bf16.mxu1 %v1353_v40 }
  0x61   : > { %1237 = vmatpush3.bf16.msra.mxu0 %v1353_v40  ;;  %1287 = vmatpush3.bf16.msra.mxu1 %v1353_v40 }
  0x62   : > { %1238 = vmatprep.subr.bf16.mxu0 %v1354_v41  ;;  %1280 = vmatprep.subr.bf16.mxu1 %v1354_v41 }
  0x65   : > { %1239 = vmatpush3.bf16.msra.mxu0 %v1354_v41  ;;  %1288 = vmatpush3.bf16.msra.mxu1 %v1354_v41  ;;  %v464_v41 = vld [vmem:[#allocation2 + $0x50] sm:$0xff] }
  0x66   : > { %1240 = vmatprep.subr.bf16.mxu0 %v1355_v42  ;;  %1281 = vmatprep.subr.bf16.mxu1 %v1355_v42 }
  0x69   : > { %1241 = vmatpush3.bf16.msra.mxu0 %v1355_v42  ;;  %1289 = vmatpush3.bf16.msra.mxu1 %v1355_v42  ;;  %v480_v42 = vld [vmem:[#allocation2 + $0xd0] sm:$0xff] }
  0x6c   : > { %1243 = vmatmul.mubr.bf16.vlgmr.msra.gmra.mrb[0].mxu0 %v1358_v43  ;;  %1259 = vmatmul.mubr.bf16.vlgmr.msra.gmra.mrb[0].mxu1 %v1359_v44  ;;  %v462_v43 = vld [vmem:[#allocation2 + $0x40] sm:$0xff] }
  0x6d   : > { %1246 = vmatprep.mubr.bf16.mxu0 %v1360_v45  ;;  %1262 = vmatprep.mubr.bf16.mxu1 %v1361_v46  ;;  %v478_v44 = vld [vmem:[#allocation2 + $0xc0] sm:$0xff] }
  0x74   : > { %1247 = vmatmul.mubr.bf16.gmra.mrb[4].mxu0 %v1362_v47  ;;  %1263 = vmatmul.mubr.bf16.gmra.mrb[4].mxu1 %v1363_v48  ;;  %v465_v47 = vld [vmem:[#allocation2 + $0x58] sm:$0xff] }
  0x75   : > { %1250 = vmatprep.mubr.bf16.mxu0 %v1364_v49  ;;  %1266 = vmatprep.mubr.bf16.mxu1 %v1365_v50  ;;  %v481_v48 = vld [vmem:[#allocation2 + $0xd8] sm:$0xff] }
  0x7c   : > { %1251 = vmatmul.mubr.bf16.gmra.mrb[8].mxu0 %v1366_v51  ;;  %1267 = vmatmul.mubr.bf16.gmra.mrb[8].mxu1 %v1367_v52 }
  0x7d   : > { %1254 = vmatprep.mubr.bf16.mxu0 %v1368_v53  ;;  %1270 = vmatprep.mubr.bf16.mxu1 %v1369_v54  ;;  %v463_v53 = vld [vmem:[#allocation2 + $0x48] sm:$0xff] }
  0x7e   : > { %v479_v54 = vld [vmem:[#allocation2 + $0xc8] sm:$0xff] }
  0x84   : > { %1255 = vmatmul.mubr.bf16.gmra.mrb[12].mxu0 %v1370_v55  ;;  %1271 = vmatmul.mubr.bf16.gmra.mrb[12].mxu1 %v1371_v56 }
 0x13f   : > { %v1244_v61 = vpop.f32.mrb[0].mxu0  ;;  %v1260_v62 = vpop.f32.mrb[0].mxu1 }
 0x140   : > { %v841_v1 = vadd.f32 %v1244_v61, %v456_v57  ;;  %v857_v2 = vadd.f32 %v1260_v62, %v472_v58  ;;  %v712_v3 = vpop.f32.mrb[1].mxu0  ;;  %v776_v4 = vpop.f32.mrb[1].mxu1 }
 0x141   : > { %v839_v7 = vadd.f32 %v712_v3, %v454_v59  ;;  %v855_v8 = vadd.f32 %v776_v4, %v470_v60  ;;  %v1245_v9 = vpop.f32.mrb[2].mxu0  ;;  %v1261_v10 = vpop.f32.mrb[2].mxu1  ;;  %v466_v3 = vld [vmem:[#allocation2 + $0x60] sm:$0xff] }
 0x142   : > { %873 = vst [vmem:[#allocation2 + $0x10] sm:$0xff] %v841_v1  ;;  %889 = vst [vmem:[#allocation2 + $0x90] sm:$0xff] %v857_v2  ;;  %v842_v11 = vadd.f32 %v1245_v9, %v457_v63  ;;  %v858_v12 = vadd.f32 %v1261_v10, %v473_v0  ;;  %v715_v13 = vpop.f32.mrb[3].mxu0  ;;  %v779_v14 = vpop.f32.mrb[3].mxu1  ;;  %v468_v1 = vld [vmem:[#allocation2 + $0x70] sm:$0xff]  ;;  %v482_v4 = vld [vmem:[#allocation2 + $0xe0] sm:$0xff] }
 0x143   : > { %871 = vst [vmem:[#allocation2] sm:$0xff] %v839_v7  ;;  %887 = vst [vmem:[#allocation2 + $0x80] sm:$0xff] %v855_v8  ;;  %v840_v15 = vadd.f32 %v715_v13, %v455_v5  ;;  %v856_v16 = vadd.f32 %v779_v14, %v471_v6  ;;  %v484_v2 = vld [vmem:[#allocation2 + $0xf0] sm:$0xff]  ;;  %v469_v7 = vld [vmem:[#allocation2 + $0x78] sm:$0xff] }
 0x144   : > { %874 = vst [vmem:[#allocation2 + $0x18] sm:$0xff] %v842_v11  ;;  %890 = vst [vmem:[#allocation2 + $0x98] sm:$0xff] %v858_v12  ;;  %v485_v8 = vld [vmem:[#allocation2 + $0xf8] sm:$0xff]  ;;  %v467_v13 = vld [vmem:[#allocation2 + $0x68] sm:$0xff] }
 0x145   : > { %872 = vst [vmem:[#allocation2 + $0x8] sm:$0xff] %v840_v15  ;;  %888 = vst [vmem:[#allocation2 + $0x88] sm:$0xff] %v856_v16  ;;  %v483_v14 = vld [vmem:[#allocation2 + $0xe8] sm:$0xff] }
 0x147   : > { %v1248_v21 = vpop.f32.mrb[4].mxu0  ;;  %v1264_v22 = vpop.f32.mrb[4].mxu1 }
 0x148   : > { %v845_v25 = vadd.f32 %v1248_v21, %v460_v17  ;;  %v861_v26 = vadd.f32 %v1264_v22, %v476_v18  ;;  %v728_v27 = vpop.f32.mrb[5].mxu0  ;;  %v792_v28 = vpop.f32.mrb[5].mxu1 }
 0x149   : > { %v843_v31 = vadd.f32 %v728_v27, %v458_v19  ;;  %v859_v32 = vadd.f32 %v792_v28, %v474_v20  ;;  %v1249_v33 = vpop.f32.mrb[6].mxu0  ;;  %v1265_v34 = vpop.f32.mrb[6].mxu1 }
 0x14a   : > { %877 = vst [vmem:[#allocation2 + $0x30] sm:$0xff] %v845_v25  ;;  %893 = vst [vmem:[#allocation2 + $0xb0] sm:$0xff] %v861_v26  ;;  %v846_v35 = vadd.f32 %v1249_v33, %v461_v23  ;;  %v862_v36 = vadd.f32 %v1265_v34, %v477_v24  ;;  %v731_v37 = vpop.f32.mrb[7].mxu0  ;;  %v795_v38 = vpop.f32.mrb[7].mxu1  ;;  %v907_v25 = vld [vmem:[#allocation2] sm:$0xff] (!%p1198_p13) }
 0x14b   : > { %875 = vst [vmem:[#allocation2 + $0x20] sm:$0xff] %v843_v31  ;;  %891 = vst [vmem:[#allocation2 + $0xa0] sm:$0xff] %v859_v32  ;;  %v844_v39 = vadd.f32 %v731_v37, %v459_v29  ;;  %v860_v40 = vadd.f32 %v795_v38, %v475_v30  ;;  %v1623_v26 = vld [vmem:[%s1712_s2] ss:$0 sm:$0xff] (!%p1198_p13)  ;;  %v909_v30 = vld [vmem:[#allocation2 + $0x10] sm:$0xff] (!%p1198_p13) }
 0x14c   : > { %878 = vst [vmem:[#allocation2 + $0x38] sm:$0xff] %v846_v35  ;;  %894 = vst [vmem:[#allocation2 + $0xb8] sm:$0xff] %v862_v36  ;;  %v908_v27 = vld [vmem:[#allocation2 + $0x8] sm:$0xff] (!%p1198_p13)  ;;  %v946_v28 = vadd.f32 (!%p1198_p13), %v1623_v26, %v907_v25  ;;  %v910_v31 = vld [vmem:[#allocation2 + $0x18] sm:$0xff] (!%p1198_p13)  ;;  %v948_v33 = vadd.f32 (!%p1198_p13), %v1623_v26, %v909_v30 }
 0x14d   : > { %876 = vst [vmem:[#allocation2 + $0x28] sm:$0xff] %v844_v39  ;;  %892 = vst [vmem:[#allocation2 + $0xa8] sm:$0xff] %v860_v40  ;;  %v947_v29 = vadd.f32 (!%p1198_p13), %v1623_v26, %v908_v27  ;;  %v949_v34 = vadd.f32 (!%p1198_p13), %v1623_v26, %v910_v31 }
 0x14e   : > { %v978_v39 = vmax.f32 (!%p1198_p13), %v946_v28, 0.0 }
 0x14f   : > { %v1252_v45 = vpop.f32.mrb[8].mxu0  ;;  %v1268_v46 = vpop.f32.mrb[8].mxu1  ;;  %v979_v40 = vmax.f32 (!%p1198_p13), %v947_v29, 0.0 }
 0x150   : > { %v849_v49 = vadd.f32 %v1252_v45, %v464_v41  ;;  %v865_v50 = vadd.f32 %v1268_v46, %v480_v42  ;;  %v744_v51 = vpop.f32.mrb[9].mxu0  ;;  %v808_v52 = vpop.f32.mrb[9].mxu1  ;;  %v980_v46 = vmax.f32 (!%p1198_p13), %v948_v33, 0.0  ;;  %1010 = vst [vmem:[%s1590_s29] sm:$0xff] (!%p1198_p13), %v978_v39 }
 0x151   : > { %v847_v55 = vadd.f32 %v744_v51, %v462_v43  ;;  %v863_v56 = vadd.f32 %v808_v52, %v478_v44  ;;  %v1253_v57 = vpop.f32.mrb[10].mxu0  ;;  %v1269_v58 = vpop.f32.mrb[10].mxu1  ;;  %v913_v37 = vld [vmem:[#allocation2 + $0x30] sm:$0xff] (!%p1198_p13)  ;;  %1011 = vst [vmem:[%s1590_s29 + $0x8] sm:$0xff] (!%p1198_p13), %v979_v40 }
 0x152   : > { %881 = vst [vmem:[#allocation2 + $0x50] sm:$0xff] %v849_v49  ;;  %897 = vst [vmem:[#allocation2 + $0xd0] sm:$0xff] %v865_v50  ;;  %v850_v59 = vadd.f32 %v1253_v57, %v465_v47  ;;  %v866_v60 = vadd.f32 %v1269_v58, %v481_v48  ;;  %v747_v61 = vpop.f32.mrb[11].mxu0  ;;  %v811_v62 = vpop.f32.mrb[11].mxu1  ;;  %v911_v32 = vld [vmem:[#allocation2 + $0x20] sm:$0xff] (!%p1198_p13)  ;;  %v952_v42 = vadd.f32 (!%p1198_p13), %v1623_v26, %v913_v37  ;;  %v981_v47 = vmax.f32 (!%p1198_p13), %v949_v34, 0.0 }
 0x153   : > { %879 = vst [vmem:[#allocation2 + $0x40] sm:$0xff] %v847_v55  ;;  %895 = vst [vmem:[#allocation2 + $0xc0] sm:$0xff] %v863_v56  ;;  %v848_v63 = vadd.f32 %v747_v61, %v463_v53  ;;  %v864_v0 = vadd.f32 %v811_v62, %v479_v54  ;;  %v950_v35 = vadd.f32 (!%p1198_p13), %v1623_v26, %v911_v32  ;;  %v914_v38 = vld [vmem:[#allocation2 + $0x38] sm:$0xff] (!%p1198_p13) }
 0x154   : > { %882 = vst [vmem:[#allocation2 + $0x58] sm:$0xff] %v850_v59  ;;  %898 = vst [vmem:[#allocation2 + $0xd8] sm:$0xff] %v866_v60  ;;  %v912_v36 = vld [vmem:[#allocation2 + $0x28] sm:$0xff] (!%p1198_p13)  ;;  %v953_v49 = vadd.f32 (!%p1198_p13), %v1623_v26, %v914_v38  ;;  %v984_v54 = vmax.f32 (!%p1198_p13), %v952_v42, 0.0 }
 0x155   : > { %880 = vst [vmem:[#allocation2 + $0x48] sm:$0xff] %v848_v63  ;;  %896 = vst [vmem:[#allocation2 + $0xc8] sm:$0xff] %v864_v0  ;;  %v951_v41 = vadd.f32 (!%p1198_p13), %v1623_v26, %v912_v36  ;;  %v982_v48 = vmax.f32 (!%p1198_p13), %v950_v35, 0.0  ;;  %v923_v63 = vld [vmem:[#allocation2 + $0x80] sm:$0xff] (!%p1198_p13)  ;;  %v924_v0 = vld [vmem:[#allocation2 + $0x88] sm:$0xff] (!%p1198_p13) }
 0x156   : > { %1012 = vst [vmem:[%s1590_s29 + $0x10] sm:$0xff] (!%p1198_p13), %v980_v46  ;;  %1013 = vst [vmem:[%s1590_s29 + $0x18] sm:$0xff] (!%p1198_p13), %v981_v47  ;;  %v985_v59 = vmax.f32 (!%p1198_p13), %v953_v49, 0.0 }
 0x157   : > { %v1256_v5 = vpop.f32.mrb[12].mxu0  ;;  %v1272_v6 = vpop.f32.mrb[12].mxu1  ;;  %906 = sbr.rel (%p1198_p13) target bundleno = 363 (0x16b), region = 81  ;;  %v983_v53 = vmax.f32 (!%p1198_p13), %v951_v41, 0.0  ;;  %1014 = vst [vmem:[%s1590_s29 + $0x20] sm:$0xff] (!%p1198_p13), %v982_v48  ;;  %1016 = vst [vmem:[%s1590_s29 + $0x30] sm:$0xff] (!%p1198_p13), %v984_v54 }
 0x158   : > { %v853_v9 = vadd.f32 %v1256_v5, %v468_v1  ;;  %v869_v10 = vadd.f32 %v1272_v6, %v484_v2  ;;  %v760_v11 = vpop.f32.mrb[13].mxu0  ;;  %v824_v12 = vpop.f32.mrb[13].mxu1  ;;  %v925_v5 = vld [vmem:[#allocation2 + $0x90] sm:$0xff] (!%p1198_p13)  ;;  %v926_v6 = vld [vmem:[#allocation2 + $0x98] sm:$0xff] (!%p1198_p13)  ;;  %1017 = vst [vmem:[%s1590_s29 + $0x38] sm:$0xff] (!%p1198_p13), %v985_v59 }
 0x159   : > { %v851_v15 = vadd.f32 %v760_v11, %v466_v3  ;;  %v867_v16 = vadd.f32 %v824_v12, %v482_v4  ;;  %v1257_v17 = vpop.f32.mrb[14].mxu0  ;;  %v1273_v18 = vpop.f32.mrb[14].mxu1  ;;  %v917_v45 = vld [vmem:[#allocation2 + $0x50] sm:$0xff] (!%p1198_p13)  ;;  %1015 = vst [vmem:[%s1590_s29 + $0x28] sm:$0xff] (!%p1198_p13), %v983_v53  ;;  %v928_v12 = vld [vmem:[#allocation2 + $0xa8] sm:$0xff] (!%p1198_p13) }
 0x15a   : > { %885 = vst [vmem:[#allocation2 + $0x70] sm:$0xff] %v853_v9  ;;  %901 = vst [vmem:[#allocation2 + $0xf0] sm:$0xff] %v869_v10  ;;  %v854_v19 = vadd.f32 %v1257_v17, %v469_v7  ;;  %v870_v20 = vadd.f32 %v1273_v18, %v485_v8  ;;  %v763_v21 = vpop.f32.mrb[15].mxu0  ;;  %v827_v22 = vpop.f32.mrb[15].mxu1  ;;  %v915_v43 = vld [vmem:[#allocation2 + $0x40] sm:$0xff] (!%p1198_p13)  ;;  %v956_v60 = vadd.f32 (!%p1198_p13), %v1623_v26, %v917_v45  ;;  %v930_v18 = vld [vmem:[#allocation2 + $0xb8] sm:$0xff] (!%p1198_p13) }
 0x15b   : > { %883 = vst [vmem:[#allocation2 + $0x60] sm:$0xff] %v851_v15  ;;  %899 = vst [vmem:[#allocation2 + $0xe0] sm:$0xff] %v867_v16  ;;  %v852_v23 = vadd.f32 %v763_v21, %v467_v13  ;;  %v868_v24 = vadd.f32 %v827_v22, %v483_v14  ;;  %v918_v50 = vld [vmem:[#allocation2 + $0x58] sm:$0xff] (!%p1198_p13)  ;;  %v954_v55 = vadd.f32 (!%p1198_p13), %v1623_v26, %v915_v43  ;;  %v927_v7 = vld [vmem:[#allocation2 + $0xa0] sm:$0xff] (!%p1198_p13) }
 0x15c   : > { %886 = vst [vmem:[#allocation2 + $0x78] sm:$0xff] %v854_v19  ;;  %902 = vst [vmem:[#allocation2 + $0xf8] sm:$0xff] %v870_v20  ;;  %v916_v44 = vld [vmem:[#allocation2 + $0x48] sm:$0xff] (!%p1198_p13)  ;;  %v957_v61 = vadd.f32 (!%p1198_p13), %v1623_v26, %v918_v50  ;;  %v988_v8 = vmax.f32 (!%p1198_p13), %v956_v60, 0.0  ;;  %v929_v13 = vld [vmem:[#allocation2 + $0xb0] sm:$0xff] (!%p1198_p13)  ;;  %v962_v16 = vadd.f32 (!%p1198_p13), %v1623_v26, %v923_v63  ;;  %v963_v17 = vadd.f32 (!%p1198_p13), %v1623_v26, %v924_v0 }
 0x15d   : > { %884 = vst [vmem:[#allocation2 + $0x68] sm:$0xff] %v852_v23  ;;  %900 = vst [vmem:[#allocation2 + $0xe8] sm:$0xff] %v868_v24  ;;  %v955_v56 = vadd.f32 (!%p1198_p13), %v1623_v26, %v916_v44  ;;  %v986_v1 = vmax.f32 (!%p1198_p13), %v954_v55, 0.0  ;;  %v964_v20 = vadd.f32 (!%p1198_p13), %v1623_v26, %v925_v5  ;;  %v965_v21 = vadd.f32 (!%p1198_p13), %v1623_v26, %v926_v6  ;;  %v931_v23 = vld [vmem:[#allocation2 + $0xc0] sm:$0xff] (!%p1198_p13)  ;;  %v932_v24 = vld [vmem:[#allocation2 + $0xc8] sm:$0xff] (!%p1198_p13) }
 0x15e   : > { %v989_v9 = vmax.f32 %v957_v61, 0.0  ;;  %1020 = vst [vmem:[%s1590_s29 + $0x50] sm:$0xff] %v988_v8  ;;  %v966_v22 = vadd.f32 %v1623_v26, %v927_v7  ;;  %v994_v25 = vmax.f32 %v962_v16, 0.0  ;;  %v995_v27 = vmax.f32 %v963_v17, 0.0  ;;  %v933_v30 = vld [vmem:[#allocation2 + $0xd0] sm:$0xff]  ;;  %v934_v31 = vld [vmem:[#allocation2 + $0xd8] sm:$0xff] }
 0x15f   : > { %v987_v2 = vmax.f32 %v955_v56, 0.0  ;;  %1018 = vst [vmem:[%s1590_s29 + $0x40] sm:$0xff] %v986_v1  ;;  %v967_v28 = vadd.f32 %v1623_v26, %v928_v12  ;;  %v968_v29 = vadd.f32 %v1623_v26, %v929_v13  ;;  %v996_v33 = vmax.f32 %v964_v20, 0.0 }
 0x160   : > { %1021 = vst [vmem:[%s1590_s29 + $0x58] sm:$0xff] %v989_v9  ;;  %v997_v34 = vmax.f32 %v965_v21, 0.0  ;;  %v998_v35 = vmax.f32 %v966_v22, 0.0  ;;  %v969_v36 = vadd.f32 %v1623_v26, %v930_v18  ;;  %1026 = vst [vmem:[%s1590_s29 + $0x80] sm:$0xff] %v994_v25  ;;  %v970_v41 = vadd.f32 %v1623_v26, %v931_v23 }
 0x161   : > { %v921_v57 = vld [vmem:[#allocation2 + $0x70] sm:$0xff]  ;;  %1019 = vst [vmem:[%s1590_s29 + $0x48] sm:$0xff] %v987_v2  ;;  %1027 = vst [vmem:[%s1590_s29 + $0x88] sm:$0xff] %v995_v27  ;;  %v999_v39 = vmax.f32 %v967_v28, 0.0  ;;  %v1000_v40 = vmax.f32 %v968_v29, 0.0  ;;  %v971_v42 = vadd.f32 %v1623_v26, %v932_v24  ;;  %v972_v45 = vadd.f32 %v1623_v26, %v933_v30 }
 0x162   : > { %v919_v51 = vld [vmem:[#allocation2 + $0x60] sm:$0xff]  ;;  %v960_v4 = vadd.f32 %v1623_v26, %v921_v57  ;;  %v937_v38 = vld [vmem:[#allocation2 + $0xf0] sm:$0xff]  ;;  %1028 = vst [vmem:[%s1590_s29 + $0x90] sm:$0xff] %v996_v33  ;;  %1029 = vst [vmem:[%s1590_s29 + $0x98] sm:$0xff] %v997_v34  ;;  %v1001_v44 = vmax.f32 %v969_v36, 0.0  ;;  %v973_v46 = vadd.f32 %v1623_v26, %v934_v31  ;;  %v1002_v48 = vmax.f32 %v970_v41, 0.0 }
 0x163   : > { %v922_v58 = vld [vmem:[#allocation2 + $0x78] sm:$0xff]  ;;  %v958_v62 = vadd.f32 %v1623_v26, %v919_v51  ;;  %v935_v32 = vld [vmem:[#allocation2 + $0xe0] sm:$0xff]  ;;  %1030 = vst [vmem:[%s1590_s29 + $0xa0] sm:$0xff] %v998_v35  ;;  %1031 = vst [vmem:[%s1590_s29 + $0xa8] sm:$0xff] %v999_v39  ;;  %v1003_v49 = vmax.f32 %v971_v42, 0.0  ;;  %v976_v51 = vadd.f32 %v1623_v26, %v937_v38 }
 0x164   : > { %v920_v52 = vld [vmem:[#allocation2 + $0x68] sm:$0xff]  ;;  %v961_v11 = vadd.f32 %v1623_v26, %v922_v58  ;;  %v992_v15 = vmax.f32 %v960_v4, 0.0  ;;  %v938_v43 = vld [vmem:[#allocation2 + $0xf8] sm:$0xff]  ;;  %v974_v47 = vadd.f32 %v1623_v26, %v935_v32  ;;  %1032 = vst [vmem:[%s1590_s29 + $0xb0] sm:$0xff] %v1000_v40  ;;  %1033 = vst [vmem:[%s1590_s29 + $0xb8] sm:$0xff] %v1001_v44  ;;  %v1005_v53 = vmax.f32 %v973_v46, 0.0 }
 0x165   : > { %v959_v3 = vadd.f32 %v1623_v26, %v920_v52  ;;  %v990_v10 = vmax.f32 %v958_v62, 0.0  ;;  %v936_v37 = vld [vmem:[#allocation2 + $0xe8] sm:$0xff]  ;;  %v1004_v52 = vmax.f32 %v972_v45, 0.0  ;;  %v977_v55 = vadd.f32 %v1623_v26, %v938_v43  ;;  %1034 = vst [vmem:[%s1590_s29 + $0xc0] sm:$0xff] %v1002_v48  ;;  %1035 = vst [vmem:[%s1590_s29 + $0xc8] sm:$0xff] %v1003_v49 }
 0x166   : > { %v993_v19 = vmax.f32 %v961_v11, 0.0  ;;  %1024 = vst [vmem:[%s1590_s29 + $0x70] sm:$0xff] %v992_v15  ;;  %v975_v50 = vadd.f32 %v1623_v26, %v936_v37  ;;  %v1006_v54 = vmax.f32 %v974_v47, 0.0  ;;  %v1008_v57 = vmax.f32 %v976_v51, 0.0  ;;  %1037 = vst [vmem:[%s1590_s29 + $0xd8] sm:$0xff] %v1005_v53 }
 0x167   : > { %v991_v14 = vmax.f32 %v959_v3, 0.0  ;;  %1022 = vst [vmem:[%s1590_s29 + $0x60] sm:$0xff] %v990_v10  ;;  %1036 = vst [vmem:[%s1590_s29 + $0xd0] sm:$0xff] %v1004_v52  ;;  %v1009_v58 = vmax.f32 %v977_v55, 0.0 }
 0x168   : > { %1025 = vst [vmem:[%s1590_s29 + $0x78] sm:$0xff] %v993_v19  ;;  %v1007_v56 = vmax.f32 %v975_v50, 0.0  ;;  %1038 = vst [vmem:[%s1590_s29 + $0xe0] sm:$0xff] %v1006_v54 }
 0x169   : > { %1023 = vst [vmem:[%s1590_s29 + $0x68] sm:$0xff] %v991_v14  ;;  %1040 = vst [vmem:[%s1590_s29 + $0xf0] sm:$0xff] %v1008_v57 }
 0x16a   : > { %1039 = vst [vmem:[%s1590_s29 + $0xe8] sm:$0xff] %v1007_v56  ;;  %1041 = vst [vmem:[%s1590_s29 + $0xf8] sm:$0xff] %v1009_v58 }
 0x16b PF: > { %s13_s18 = sadd.s32 1, %s1426_s18   ;;  %s1714_s12 = smov %s1406_s13 }
 0x16c   : > { %p10_p0 = scmp.ge.s32.totalorder %s13_s18, 12   ;;  %s1715_s13 = smov %s1500_s25 }
 0x16d   : > { %s1716_s14 = smov %s1418_s16  ;;  %s1717_s15 = smov %s1422_s17 }
 0x16e   : > { %s1718_s16 = smov %s1721_s19  ;;  %s1719_s17 = smov %s1725_s20 }
 0x16f   :  { %12 = sbr.rel (!%p10_p0) target bundleno = 4 (0x4), region = 122 }

// kernel: generator2_forward.15
= control target key start
LH: loop header
LB: loop body
LE: loop exit
PB: predicated region body
PF: predicated region fallthrough
CT: control target
= control target key end

     0   :  { %s1440_s12 = smov 0   ;;  %s1442_s13 = smov 0   ;;  %s1712_s0 = inlined_call_operand.vmem [shape: bf16[128,1280], index: 0, kind: input, shape index: {}]   ;;  %s1713_s1 = inlined_call_operand.vmem [shape: bf16[1280,256], index: 1, kind: input, shape index: {}]   ;;  %s1714_s2 = inlined_call_operand.vmem [shape: f32[1,256], index: 2, kind: input, shape index: {}]   ;;  %s1715_s3 = inlined_call_operand.vmem [shape: f32[128,256], index: 3, kind: output, shape index: {}]  }
   0x1   :  { %s1444_s14 = smov 0   ;;  %s1446_s15 = smov 0  }
   0x2   :  { %s1448_s16 = smov 0  }
   0x3 LB: > { %s25_s17 = sadd.s32 1, %s1413_s15  ;;  %p48_p1 = scmp.ne.s32.totalorder %s1405_s13, %s1401_s12  ;;  %s1417_s16 = sphi %s1448_s16, %s13_s16   ;;  %s1413_s15 = sphi %s1446_s15, %s1719_s15   ;;  %s1409_s14 = sphi %s1444_s14, %s1718_s14   ;;  %s1405_s13 = sphi %s1442_s13, %s1717_s13   ;;  %s1401_s12 = sphi %s1440_s12, %s1716_s12  }
   0x4   : > { %p26_p0 = scmp.ge.s32.totalorder %s25_s17, 5  ;;  %p49_p2 = scmp.eq.s32.totalorder %s1417_s16, 0 }
   0x5   : > { %s41_s19 = sadd.s32 1, %s1405_s13  ;;  %p1169_p5 = scmp.ge.s32.totalorder %s1417_s16, 5 }
   0x6   : > { %s1721_s17 = smov (%p26_p0, %s25_s17), 0  ;;  %p50_p3 = por %p49_p2, %p48_p1 }
   0x7   : > { %s37_s18 = ssub.s32 %s1413_s15, %s1721_s17  ;;  %164 = sbr.rel (%p1169_p5) target bundleno = 26 (0x1a), region = 20 }
   0x8   : > { %p39_p4 = scmp.eq.s32.totalorder %s37_s18, 0 }
   0xa   : > { %s1475_s20 = scalar_select %p39_p4, %s1405_s13, %s41_s19  }
   0xe   : > { %167 = sbr.rel (!%p50_p3) target bundleno = 26 (0x1a), region = 24  ;;  %s169_s21 = sand.u32 (%p50_p3), 1, %s1405_s13  }
   0xf   : > { %s1232_s22 = sshll.u32 (%p50_p3), %s1413_s15, 3  ;;  %s1170_s23 = sshll.u32 (%p50_p3), %s169_s21, 7 }
  0x10   : > { %s1483_s26 = scalar_lea.vmem (%p50_p3), %s1712_s0, %s1232_s22  ;;  %s171_s27 = scalar_lea.vmem (%p50_p3), [#allocation3], %s1170_s23 }
  0x11   : > { %v235_v0 = vld [vmem:[%s1483_s26] sm:$0xff] (%p50_p3)  ;;  %v237_v1 = vld [vmem:[%s1483_s26 + $0x28] sm:$0xff] (%p50_p3)  ;;  %v239_v2 = vld [vmem:[%s1483_s26 + $0x50] sm:$0xff] (%p50_p3) }
  0x12   : > { %236 = vst [vmem:[%s171_s27] sm:$0xff] (%p50_p3), %v235_v0  ;;  %238 = vst [vmem:[%s171_s27 + $0x8] sm:$0xff] (%p50_p3), %v237_v1  ;;  %v241_v3 = vld [vmem:[%s1483_s26 + $0x78] sm:$0xff] (%p50_p3)  ;;  %v243_v4 = vld [vmem:[%s1483_s26 + $0xa0] sm:$0xff] (%p50_p3) }
  0x13   : > { %240 = vst [vmem:[%s171_s27 + $0x10] sm:$0xff] (%p50_p3), %v239_v2  ;;  %v245_v5 = vld [vmem:[%s1483_s26 + $0xc8] sm:$0xff] (%p50_p3)  ;;  %242 = vst [vmem:[%s171_s27 + $0x18] sm:$0xff] (%p50_p3), %v241_v3  ;;  %v247_v6 = vld [vmem:[%s1483_s26 + $0xf0] sm:$0xff] (%p50_p3) }
  0x14   : > { %244 = vst [vmem:[%s171_s27 + $0x20] sm:$0xff] (%p50_p3), %v243_v4  ;;  %246 = vst [vmem:[%s171_s27 + $0x28] sm:$0xff] (%p50_p3), %v245_v5  ;;  %v249_v7 = vld [vmem:[%s1483_s26 + $0x118] sm:$0xff] (%p50_p3)  ;;  %v251_v8 = vld [vmem:[%s1483_s26 + $0x140] sm:$0xff] (%p50_p3) }
  0x15   : > { %248 = vst [vmem:[%s171_s27 + $0x30] sm:$0xff] %v247_v6  ;;  %250 = vst [vmem:[%s171_s27 + $0x38] sm:$0xff] %v249_v7  ;;  %v253_v9 = vld [vmem:[%s1483_s26 + $0x168] sm:$0xff]  ;;  %v255_v10 = vld [vmem:[%s1483_s26 + $0x190] sm:$0xff] }
  0x16   : > { %252 = vst [vmem:[%s171_s27 + $0x40] sm:$0xff] %v251_v8  ;;  %v257_v11 = vld [vmem:[%s1483_s26 + $0x1b8] sm:$0xff]  ;;  %254 = vst [vmem:[%s171_s27 + $0x48] sm:$0xff] %v253_v9  ;;  %v259_v12 = vld [vmem:[%s1483_s26 + $0x1e0] sm:$0xff] }
  0x17   : > { %256 = vst [vmem:[%s171_s27 + $0x50] sm:$0xff] %v255_v10  ;;  %258 = vst [vmem:[%s171_s27 + $0x58] sm:$0xff] %v257_v11  ;;  %v261_v13 = vld [vmem:[%s1483_s26 + $0x208] sm:$0xff]  ;;  %v263_v14 = vld [vmem:[%s1483_s26 + $0x230] sm:$0xff] }
  0x18   : > { %260 = vst [vmem:[%s171_s27 + $0x60] sm:$0xff] %v259_v12  ;;  %262 = vst [vmem:[%s171_s27 + $0x68] sm:$0xff] %v261_v13  ;;  %v265_v15 = vld [vmem:[%s1483_s26 + $0x258] sm:$0xff] }
  0x19   : > { %264 = vst [vmem:[%s171_s27 + $0x70] sm:$0xff] %v263_v14  ;;  %266 = vst [vmem:[%s171_s27 + $0x78] sm:$0xff] %v265_v15 }
  0x1a PF: > { %p1173_p6 = scmp.ge.s32.totalorder %s1417_s16, 1  ;;  %p286_p7 = scmp.lt.s32.totalorder %s1417_s16, 6 }
  0x1c   : > { %p287_p8 = pnand %p1173_p6, %p286_p7 }
  0x1d   : > { %s293_s28 = sand.u32 (!%p287_p8), 1, %s1401_s12   ;;  %s1175_s29 = sshll.u32 (!%p287_p8), %s1409_s14, 5 }
  0x1e   : > { %290 = sbr.rel (%p287_p8) target bundleno = 376 (0x178), region = 66  ;;  %s1174_s30 = sshll.u32 (!%p287_p8), %s293_s28, 7 }
  0x1f   : > { %p339_p9 = scmp.lt.s32.totalorder (!%p287_p8), %s1175_s29, 159  ;;  %s1510_s8 = scalar_lea.vmem (!%p287_p8), [#allocation3], %s1174_s30 }
  0x20   : > { %p1178_p10 = scmp.ne.s32.totalorder (!%p287_p8), %s1409_s14, 0 }
  0x25   : > { %s1723_s29 = smov (!%p339_p9, %s1175_s29), 159  ;;  %369 = sbr.rel (%p1178_p10) target bundleno = 55 (0x37), region = 74 }
  0x26   : > { %s1233_s4 = sshll.u32 %s1723_s29, 3  ;;  %v1419_v16 = vmov (!%p1178_p10), 0.0  }
  0x27   : > { %s1508_s7 = scalar_lea.vmem %s1713_s1, %s1233_s4  ;;  %370 = vst [vmem:[#allocation2] sm:$0xff] (!%p1178_p10), %v1419_v16  ;;  %371 = vst [vmem:[#allocation2 + $0x8] sm:$0xff] (!%p1178_p10), %v1419_v16 }
  0x28   : > { %372 = vst [vmem:[#allocation2 + $0x10] sm:$0xff] (!%p1178_p10), %v1419_v16  ;;  %373 = vst [vmem:[#allocation2 + $0x18] sm:$0xff] (!%p1178_p10), %v1419_v16 }
  0x29   : > { %374 = vst [vmem:[#allocation2 + $0x20] sm:$0xff] (!%p1178_p10), %v1419_v16  ;;  %375 = vst [vmem:[#allocation2 + $0x28] sm:$0xff] (!%p1178_p10), %v1419_v16 }
  0x2a   : > { %376 = vst [vmem:[#allocation2 + $0x30] sm:$0xff] (!%p1178_p10), %v1419_v16  ;;  %377 = vst [vmem:[#allocation2 + $0x38] sm:$0xff] (!%p1178_p10), %v1419_v16 }
  0x2b   : > { %378 = vst [vmem:[#allocation2 + $0x40] sm:$0xff] (!%p1178_p10), %v1419_v16  ;;  %379 = vst [vmem:[#allocation2 + $0x48] sm:$0xff] (!%p1178_p10), %v1419_v16 }
  0x2c   : > { %380 = vst [vmem:[#allocation2 + $0x50] sm:$0xff] %v1419_v16  ;;  %381 = vst [vmem:[#allocation2 + $0x58] sm:$0xff] %v1419_v16 }
  0x2d   : > { %382 = vst [vmem:[#allocation2 + $0x60] sm:$0xff] %v1419_v16  ;;  %383 = vst [vmem:[#allocation2 + $0x68] sm:$0xff] %v1419_v16 }
  0x2e   : > { %384 = vst [vmem:[#allocation2 + $0x70] sm:$0xff] %v1419_v16  ;;  %385 = vst [vmem:[#allocation2 + $0x78] sm:$0xff] %v1419_v16 }
  0x2f   : > { %386 = vst [vmem:[#allocation2 + $0x80] sm:$0xff] %v1419_v16  ;;  %387 = vst [vmem:[#allocation2 + $0x88] sm:$0xff] %v1419_v16 }
  0x30   : > { %388 = vst [vmem:[#allocation2 + $0x90] sm:$0xff] %v1419_v16  ;;  %389 = vst [vmem:[#allocation2 + $0x98] sm:$0xff] %v1419_v16 }
  0x31   : > { %390 = vst [vmem:[#allocation2 + $0xa0] sm:$0xff] %v1419_v16  ;;  %391 = vst [vmem:[#allocation2 + $0xa8] sm:$0xff] %v1419_v16 }
  0x32   : > { %392 = vst [vmem:[#allocation2 + $0xb0] sm:$0xff] %v1419_v16  ;;  %393 = vst [vmem:[#allocation2 + $0xb8] sm:$0xff] %v1419_v16 }
  0x33   : > { %394 = vst [vmem:[#allocation2 + $0xc0] sm:$0xff] %v1419_v16  ;;  %395 = vst [vmem:[#allocation2 + $0xc8] sm:$0xff] %v1419_v16 }
  0x34   : > { %396 = vst [vmem:[#allocation2 + $0xd0] sm:$0xff] %v1419_v16  ;;  %397 = vst [vmem:[#allocation2 + $0xd8] sm:$0xff] %v1419_v16 }
  0x35   : > { %398 = vst [vmem:[#allocation2 + $0xe0] sm:$0xff] %v1419_v16  ;;  %399 = vst [vmem:[#allocation2 + $0xe8] sm:$0xff] %v1419_v16 }
  0x36   : > { %400 = vst [vmem:[#allocation2 + $0xf0] sm:$0xff] %v1419_v16  ;;  %401 = vst [vmem:[#allocation2 + $0xf8] sm:$0xff] %v1419_v16 }
  0x37 PF: > { %v1307_v17 = vld [vmem:[%s1508_s7 + $0x4] ss:$8 sps:$4 sm:$0xff]   ;;  %v1309_v18 = vld [vmem:[%s1508_s7] ss:$8 sps:$4 sm:$0xff]   ;;  %v1310_v19 = vld [vmem:[%s1508_s7 + $0x14] ss:$8 sps:$4 sm:$0xff]  }
  0x38   : > { %722 = vmatprep.subr.bf16.mxu0 %v1307_v17  ;;  %1234 = vmatprep.subr.bf16.mxu1 %v1307_v17  ;;  %v1312_v20 = vld [vmem:[%s1508_s7 + $0x10] ss:$8 sps:$4 sm:$0xff]   ;;  %v1313_v21 = vld [vmem:[%s1508_s7 + $0x24] ss:$8 sps:$4 sm:$0xff]   ;;  %v1315_v22 = vld [vmem:[%s1508_s7 + $0x20] ss:$8 sps:$4 sm:$0xff]  }
  0x39   : > { %723 = vmatpush1.bf16.msra.mxu0 %v1309_v18  ;;  %1250 = vmatpush1.bf16.msra.mxu1 %v1309_v18  ;;  %v1316_v23 = vld [vmem:[%s1508_s7 + $0x34] ss:$8 sps:$4 sm:$0xff]   ;;  %v1318_v24 = vld [vmem:[%s1508_s7 + $0x30] ss:$8 sps:$4 sm:$0xff]   ;;  %v1319_v25 = vld [vmem:[%s1508_s7 + $0x44] ss:$8 sps:$4 sm:$0xff]  }
  0x3a   : > { %724 = vmatprep.subr.bf16.mxu0 %v1310_v19  ;;  %1235 = vmatprep.subr.bf16.mxu1 %v1310_v19  ;;  %v1321_v26 = vld [vmem:[%s1508_s7 + $0x40] ss:$8 sps:$4 sm:$0xff]   ;;  %v1322_v27 = vld [vmem:[%s1508_s7 + $0x54] ss:$8 sps:$4 sm:$0xff]   ;;  %v1324_v28 = vld [vmem:[%s1508_s7 + $0x50] ss:$8 sps:$4 sm:$0xff]  }
  0x3b   : > { %v1325_v29 = vld [vmem:[%s1508_s7 + $0x64] ss:$8 sps:$4 sm:$0xff]   ;;  %v1327_v31 = vld [vmem:[%s1508_s7 + $0x60] ss:$8 sps:$4 sm:$0xff]   ;;  %v1328_v33 = vld [vmem:[%s1508_s7 + $0x74] ss:$8 sps:$4 sm:$0xff]  }
  0x3c   : > { %v1357_v30 = vld [vmem:[%s1510_s8 + $0x4] ss:$8 sps:$4 sm:$0xff]   ;;  %v1330_v34 = vld [vmem:[%s1508_s7 + $0x70] ss:$8 sps:$4 sm:$0xff]   ;;  %v1333_v36 = vld [vmem:[%s1508_s7 + $0x80] ss:$8 sps:$4 sm:$0xff]  }
  0x3d   : > { %725 = vmatpush1.bf16.msra.mxu0 %v1312_v20  ;;  %1251 = vmatpush1.bf16.msra.mxu1 %v1312_v20  ;;  %v1360_v32 = vld [vmem:[%s1510_s8 + $0x44] ss:$8 sps:$4 sm:$0xff]   ;;  %v1334_v37 = vld [vmem:[%s1508_s7 + $0x94] ss:$8 sps:$4 sm:$0xff]   ;;  %v1336_v38 = vld [vmem:[%s1508_s7 + $0x90] ss:$8 sps:$4 sm:$0xff]  }
  0x3e   : > { %726 = vmatprep.subr.bf16.mxu0 %v1313_v21  ;;  %1236 = vmatprep.subr.bf16.mxu1 %v1313_v21  ;;  %v1331_v35 = vld [vmem:[%s1508_s7 + $0x84] ss:$8 sps:$4 sm:$0xff]   ;;  %v1339_v40 = vld [vmem:[%s1508_s7 + $0xa0] ss:$8 sps:$4 sm:$0xff]   ;;  %v1340_v41 = vld [vmem:[%s1508_s7 + $0xb4] ss:$8 sps:$4 sm:$0xff]  }
  0x3f   : > { %754 = vmatprep.mubr.bf16.mxu0 %v1357_v30  ;;  %794 = vmatprep.mubr.bf16.mxu1 %v1360_v32  ;;  %v1337_v39 = vld [vmem:[%s1508_s7 + $0xa4] ss:$8 sps:$4 sm:$0xff]   ;;  %v1342_v42 = vld [vmem:[%s1508_s7 + $0xb0] ss:$8 sps:$4 sm:$0xff]   ;;  %v1345_v44 = vld [vmem:[%s1508_s7 + $0xc0] ss:$8 sps:$4 sm:$0xff]  }
  0x40   : > { %v1343_v43 = vld [vmem:[%s1508_s7 + $0xc4] ss:$8 sps:$4 sm:$0xff]   ;;  %v1346_v45 = vld [vmem:[%s1508_s7 + $0xd4] ss:$8 sps:$4 sm:$0xff]   ;;  %v1348_v46 = vld [vmem:[%s1508_s7 + $0xd0] ss:$8 sps:$4 sm:$0xff]  }
  0x41   : > { %727 = vmatpush1.bf16.msra.mxu0 %v1315_v22  ;;  %1252 = vmatpush1.bf16.msra.mxu1 %v1315_v22  ;;  %v1349_v47 = vld [vmem:[%s1508_s7 + $0xe4] ss:$8 sps:$4 sm:$0xff]   ;;  %v1351_v48 = vld [vmem:[%s1508_s7 + $0xe0] ss:$8 sps:$4 sm:$0xff]   ;;  %v1352_v49 = vld [vmem:[%s1508_s7 + $0xf4] ss:$8 sps:$4 sm:$0xff]  }
  0x42   : > { %728 = vmatprep.subr.bf16.mxu0 %v1316_v23  ;;  %1237 = vmatprep.subr.bf16.mxu1 %v1316_v23  ;;  %v1354_v50 = vld [vmem:[%s1508_s7 + $0xf0] ss:$8 sps:$4 sm:$0xff]   ;;  %v1355_v51 = vld [vmem:[%s1510_s8] ss:$8 sps:$4 sm:$0xff]   ;;  %v1361_v53 = vld [vmem:[%s1510_s8 + $0x14] ss:$8 sps:$4 sm:$0xff]  }
  0x43   : > { %v1358_v52 = vld [vmem:[%s1510_s8 + $0x40] ss:$8 sps:$4 sm:$0xff]   ;;  %v1363_v54 = vld [vmem:[%s1510_s8 + $0x54] ss:$8 sps:$4 sm:$0xff]   ;;  %v1365_v55 = vld [vmem:[%s1510_s8 + $0x10] ss:$8 sps:$4 sm:$0xff]  }
  0x44   : > { %v1366_v56 = vld [vmem:[%s1510_s8 + $0x50] ss:$8 sps:$4 sm:$0xff]   ;;  %v1367_v57 = vld [vmem:[%s1510_s8 + $0x24] ss:$8 sps:$4 sm:$0xff]   ;;  %v1371_v59 = vld [vmem:[%s1510_s8 + $0x20] ss:$8 sps:$4 sm:$0xff]  }
  0x45   : > { %729 = vmatpush1.bf16.msra.mxu0 %v1318_v24  ;;  %1253 = vmatpush1.bf16.msra.mxu1 %v1318_v24  ;;  %v1369_v58 = vld [vmem:[%s1510_s8 + $0x64] ss:$8 sps:$4 sm:$0xff]   ;;  %v1372_v60 = vld [vmem:[%s1510_s8 + $0x60] ss:$8 sps:$4 sm:$0xff]   ;;  %v1373_v61 = vld [vmem:[%s1510_s8 + $0x34] ss:$8 sps:$4 sm:$0xff]  }
  0x46   : > { %730 = vmatprep.subr.bf16.mxu0 %v1319_v25  ;;  %1238 = vmatprep.subr.bf16.mxu1 %v1319_v25  ;;  %v1375_v62 = vld [vmem:[%s1510_s8 + $0x74] ss:$8 sps:$4 sm:$0xff]   ;;  %v1377_v63 = vld [vmem:[%s1510_s8 + $0x30] ss:$8 sps:$4 sm:$0xff]   ;;  %v402_v1 = vld [vmem:[#allocation2] sm:$0xff]  ;;  %p1227_p11 = scmp.ne.s32.totalorder %s1409_s14, 4 }
  0x47   : > { %v1378_v0 = vld [vmem:[%s1510_s8 + $0x70] ss:$8 sps:$4 sm:$0xff]   ;;  %v418_v2 = vld [vmem:[#allocation2 + $0x80] sm:$0xff]  ;;  %v403_v3 = vld [vmem:[#allocation2 + $0x8] sm:$0xff] }
  0x48   : > { %v419_v4 = vld [vmem:[#allocation2 + $0x88] sm:$0xff]  ;;  %v404_v7 = vld [vmem:[#allocation2 + $0x10] sm:$0xff]  ;;  %v405_v13 = vld [vmem:[#allocation2 + $0x18] sm:$0xff] }
  0x49   : > { %731 = vmatpush1.bf16.msra.mxu0 %v1321_v26  ;;  %1254 = vmatpush1.bf16.msra.mxu1 %v1321_v26  ;;  %v420_v8 = vld [vmem:[#allocation2 + $0x90] sm:$0xff]  ;;  %v421_v14 = vld [vmem:[#allocation2 + $0x98] sm:$0xff]  ;;  %v406_v25 = vld [vmem:[#allocation2 + $0x20] sm:$0xff] }
  0x4a   : > { %732 = vmatprep.subr.bf16.mxu0 %v1322_v27  ;;  %1239 = vmatprep.subr.bf16.mxu1 %v1322_v27  ;;  %v422_v26 = vld [vmem:[#allocation2 + $0xa0] sm:$0xff]  ;;  %v407_v27 = vld [vmem:[#allocation2 + $0x28] sm:$0xff]  ;;  %v424_v32 = vld [vmem:[#allocation2 + $0xb0] sm:$0xff] }
  0x4d   : > { %733 = vmatpush1.bf16.msra.mxu0 %v1324_v28  ;;  %1255 = vmatpush1.bf16.msra.mxu1 %v1324_v28  ;;  %v423_v28 = vld [vmem:[#allocation2 + $0xa8] sm:$0xff] }
  0x4e   : > { %734 = vmatprep.subr.bf16.mxu0 %v1325_v29  ;;  %1240 = vmatprep.subr.bf16.mxu1 %v1325_v29 }
  0x51   : > { %735 = vmatpush1.bf16.msra.mxu0 %v1327_v31  ;;  %1256 = vmatpush1.bf16.msra.mxu1 %v1327_v31  ;;  %v408_v31 = vld [vmem:[#allocation2 + $0x30] sm:$0xff] }
  0x52   : > { %736 = vmatprep.subr.bf16.mxu0 %v1328_v33  ;;  %1241 = vmatprep.subr.bf16.mxu1 %v1328_v33 }
  0x55   : > { %737 = vmatpush1.bf16.msra.mxu0 %v1330_v34  ;;  %1257 = vmatpush1.bf16.msra.mxu1 %v1330_v34 }
  0x56   : > { %738 = vmatprep.subr.bf16.mxu0 %v1331_v35  ;;  %1242 = vmatprep.subr.bf16.mxu1 %v1331_v35 }
  0x59   : > { %739 = vmatpush1.bf16.msra.mxu0 %v1333_v36  ;;  %1258 = vmatpush1.bf16.msra.mxu1 %v1333_v36 }
  0x5a   : > { %740 = vmatprep.subr.bf16.mxu0 %v1334_v37  ;;  %1243 = vmatprep.subr.bf16.mxu1 %v1334_v37  ;;  %v409_v37 = vld [vmem:[#allocation2 + $0x38] sm:$0xff] }
  0x5d   : > { %741 = vmatpush1.bf16.msra.mxu0 %v1336_v38  ;;  %1259 = vmatpush1.bf16.msra.mxu1 %v1336_v38  ;;  %v425_v38 = vld [vmem:[#allocation2 + $0xb8] sm:$0xff] }
  0x5e   : > { %742 = vmatprep.subr.bf16.mxu0 %v1337_v39  ;;  %1244 = vmatprep.subr.bf16.mxu1 %v1337_v39 }
  0x61   : > { %743 = vmatpush1.bf16.msra.mxu0 %v1339_v40  ;;  %1260 = vmatpush1.bf16.msra.mxu1 %v1339_v40 }
  0x62   : > { %744 = vmatprep.subr.bf16.mxu0 %v1340_v41  ;;  %1245 = vmatprep.subr.bf16.mxu1 %v1340_v41 }
  0x65   : > { %745 = vmatpush1.bf16.msra.mxu0 %v1342_v42  ;;  %1261 = vmatpush1.bf16.msra.mxu1 %v1342_v42 }
  0x66   : > { %746 = vmatprep.subr.bf16.mxu0 %v1343_v43  ;;  %1246 = vmatprep.subr.bf16.mxu1 %v1343_v43 }
  0x69   : > { %747 = vmatpush1.bf16.msra.mxu0 %v1345_v44  ;;  %1262 = vmatpush1.bf16.msra.mxu1 %v1345_v44 }
  0x6a   : > { %748 = vmatprep.subr.bf16.mxu0 %v1346_v45  ;;  %1247 = vmatprep.subr.bf16.mxu1 %v1346_v45 }
  0x6d   : > { %749 = vmatpush1.bf16.msra.mxu0 %v1348_v46  ;;  %1263 = vmatpush1.bf16.msra.mxu1 %v1348_v46 }
  0x6e   : > { %750 = vmatprep.subr.bf16.mxu0 %v1349_v47  ;;  %1248 = vmatprep.subr.bf16.mxu1 %v1349_v47 }
  0x71   : > { %751 = vmatpush1.bf16.msra.mxu0 %v1351_v48  ;;  %1264 = vmatpush1.bf16.msra.mxu1 %v1351_v48 }
  0x72   : > { %752 = vmatprep.subr.bf16.mxu0 %v1352_v49  ;;  %1249 = vmatprep.subr.bf16.mxu1 %v1352_v49  ;;  %v410_v49 = vld [vmem:[#allocation2 + $0x40] sm:$0xff] }
  0x75   : > { %753 = vmatpush1.bf16.msra.mxu0 %v1354_v50  ;;  %1265 = vmatpush1.bf16.msra.mxu1 %v1354_v50  ;;  %v426_v50 = vld [vmem:[#allocation2 + $0xc0] sm:$0xff] }
  0x78   : > { %755 = vmatmul.mubr.bf16.vlgmr.msra.gmra.mrb[0].mxu0 %v1355_v51  ;;  %795 = vmatmul.mubr.bf16.vlgmr.msra.gmra.mrb[0].mxu1 %v1358_v52  ;;  %v411_v51 = vld [vmem:[#allocation2 + $0x48] sm:$0xff] }
  0x79   : > { %764 = vmatprep.mubr.bf16.mxu0 %v1361_v53  ;;  %804 = vmatprep.mubr.bf16.mxu1 %v1363_v54  ;;  %v427_v52 = vld [vmem:[#allocation2 + $0xc8] sm:$0xff] }
  0x80   : > { %765 = vmatmul.mubr.bf16.gmra.mrb[4].mxu0 %v1365_v55  ;;  %805 = vmatmul.mubr.bf16.gmra.mrb[4].mxu1 %v1366_v56  ;;  %v412_v55 = vld [vmem:[#allocation2 + $0x50] sm:$0xff] }
  0x81   : > { %774 = vmatprep.mubr.bf16.mxu0 %v1367_v57  ;;  %814 = vmatprep.mubr.bf16.mxu1 %v1369_v58  ;;  %v428_v56 = vld [vmem:[#allocation2 + $0xd0] sm:$0xff] }
  0x88   : > { %775 = vmatmul.mubr.bf16.gmra.mrb[8].mxu0 %v1371_v59  ;;  %815 = vmatmul.mubr.bf16.gmra.mrb[8].mxu1 %v1372_v60 }
  0x89   : > { %784 = vmatprep.mubr.bf16.mxu0 %v1373_v61  ;;  %824 = vmatprep.mubr.bf16.mxu1 %v1375_v62  ;;  %v413_v61 = vld [vmem:[#allocation2 + $0x58] sm:$0xff] }
  0x8a   : > { %v429_v62 = vld [vmem:[#allocation2 + $0xd8] sm:$0xff] }
  0x90   : > { %785 = vmatmul.mubr.bf16.gmra.mrb[12].mxu0 %v1377_v63  ;;  %825 = vmatmul.mubr.bf16.gmra.mrb[12].mxu1 %v1378_v0 }
 0x14b   : > { %v756_v5 = vpop.f32.mrb[0].mxu0  ;;  %v796_v6 = vpop.f32.mrb[0].mxu1 }
 0x14c   : > { %v835_v9 = vadd.f32 %v756_v5, %v402_v1  ;;  %v851_v10 = vadd.f32 %v796_v6, %v418_v2  ;;  %v758_v11 = vpop.f32.mrb[1].mxu0  ;;  %v798_v12 = vpop.f32.mrb[1].mxu1 }
 0x14d   : > { %v836_v15 = vadd.f32 %v758_v11, %v403_v3  ;;  %v852_v16 = vadd.f32 %v798_v12, %v419_v4  ;;  %v760_v17 = vpop.f32.mrb[2].mxu0  ;;  %v800_v18 = vpop.f32.mrb[2].mxu1  ;;  %v415_v11 = vld [vmem:[#allocation2 + $0x68] sm:$0xff] }
 0x14e   : > { %867 = vst [vmem:[#allocation2] sm:$0xff] %v835_v9  ;;  %883 = vst [vmem:[#allocation2 + $0x80] sm:$0xff] %v851_v10  ;;  %v837_v19 = vadd.f32 %v760_v17, %v404_v7  ;;  %v853_v20 = vadd.f32 %v800_v18, %v420_v8  ;;  %v762_v21 = vpop.f32.mrb[3].mxu0  ;;  %v802_v22 = vpop.f32.mrb[3].mxu1  ;;  %v414_v9 = vld [vmem:[#allocation2 + $0x60] sm:$0xff]  ;;  %v431_v12 = vld [vmem:[#allocation2 + $0xe8] sm:$0xff] }
 0x14f   : > { %868 = vst [vmem:[#allocation2 + $0x8] sm:$0xff] %v836_v15  ;;  %884 = vst [vmem:[#allocation2 + $0x88] sm:$0xff] %v852_v16  ;;  %v838_v23 = vadd.f32 %v762_v21, %v405_v13  ;;  %v854_v24 = vadd.f32 %v802_v22, %v421_v14  ;;  %v430_v10 = vld [vmem:[#allocation2 + $0xe0] sm:$0xff]  ;;  %v416_v15 = vld [vmem:[#allocation2 + $0x70] sm:$0xff] }
 0x150   : > { %869 = vst [vmem:[#allocation2 + $0x10] sm:$0xff] %v837_v19  ;;  %885 = vst [vmem:[#allocation2 + $0x90] sm:$0xff] %v853_v20  ;;  %v432_v16 = vld [vmem:[#allocation2 + $0xf0] sm:$0xff]  ;;  %v417_v21 = vld [vmem:[#allocation2 + $0x78] sm:$0xff] }
 0x151   : > { %870 = vst [vmem:[#allocation2 + $0x18] sm:$0xff] %v838_v23  ;;  %886 = vst [vmem:[#allocation2 + $0x98] sm:$0xff] %v854_v24  ;;  %v433_v22 = vld [vmem:[#allocation2 + $0xf8] sm:$0xff] }
 0x153   : > { %v766_v29 = vpop.f32.mrb[4].mxu0  ;;  %v806_v30 = vpop.f32.mrb[4].mxu1 }
 0x154   : > { %v839_v33 = vadd.f32 %v766_v29, %v406_v25  ;;  %v855_v34 = vadd.f32 %v806_v30, %v422_v26  ;;  %v768_v35 = vpop.f32.mrb[5].mxu0  ;;  %v808_v36 = vpop.f32.mrb[5].mxu1 }
 0x155   : > { %v840_v39 = vadd.f32 %v768_v35, %v407_v27  ;;  %v856_v40 = vadd.f32 %v808_v36, %v423_v28  ;;  %v770_v41 = vpop.f32.mrb[6].mxu0  ;;  %v810_v42 = vpop.f32.mrb[6].mxu1  ;;  %v935_v35 = vld [vmem:[%s1714_s2] sm:$0x3] (!%p1227_p11) }
 0x156   : > { %871 = vst [vmem:[#allocation2 + $0x20] sm:$0xff] %v839_v33  ;;  %887 = vst [vmem:[#allocation2 + $0xa0] sm:$0xff] %v855_v34  ;;  %v841_v43 = vadd.f32 %v770_v41, %v408_v31  ;;  %v857_v44 = vadd.f32 %v810_v42, %v424_v32  ;;  %v772_v45 = vpop.f32.mrb[7].mxu0  ;;  %v812_v46 = vpop.f32.mrb[7].mxu1  ;;  %v937_v33 = vlaneseq (!%p1227_p11)  ;;  %v903_v36 = vld [vmem:[#allocation2] sm:$0xff] (!%p1227_p11) }
 0x157   : > { %872 = vst [vmem:[#allocation2 + $0x28] sm:$0xff] %v840_v39  ;;  %888 = vst [vmem:[#allocation2 + $0xa8] sm:$0xff] %v856_v40  ;;  %v842_v47 = vadd.f32 %v772_v45, %v409_v37  ;;  %v858_v48 = vadd.f32 %v812_v46, %v425_v38  ;;  %v904_v38 = vld [vmem:[#allocation2 + $0x8] sm:$0xff] (!%p1227_p11)  ;;  %v905_v40 = vld [vmem:[#allocation2 + $0x10] sm:$0xff] (!%p1227_p11) }
 0x158   : > { %873 = vst [vmem:[#allocation2 + $0x30] sm:$0xff] %v841_v43  ;;  %889 = vst [vmem:[#allocation2 + $0xb0] sm:$0xff] %v857_v44  ;;  %v938_v34 = vshrl.u32 (!%p1227_p11), %v937_v33, 7  ;;  %v906_v41 = vld [vmem:[#allocation2 + $0x18] sm:$0xff] (!%p1227_p11) }
 0x159   : > { %874 = vst [vmem:[#allocation2 + $0x38] sm:$0xff] %v842_v47  ;;  %890 = vst [vmem:[#allocation2 + $0xb8] sm:$0xff] %v858_v48 }
 0x15a   : > { %v939_v37 = vsub.s32 (!%p1227_p11), 0, %v938_v34  ;;  %v943_v39 = vsub.s32 (!%p1227_p11), 1, %v938_v34 }
 0x15b   : > { %v776_v53 = vpop.f32.mrb[8].mxu0  ;;  %v816_v54 = vpop.f32.mrb[8].mxu1 }
 0x15c   : > { %v843_v57 = vadd.f32 %v776_v53, %v410_v49  ;;  %v859_v58 = vadd.f32 %v816_v54, %v426_v50  ;;  %v778_v59 = vpop.f32.mrb[9].mxu0  ;;  %v818_v60 = vpop.f32.mrb[9].mxu1  ;;  %v1565_v43 = vrot.slane (!%p1227_p11), %v935_v35, %v939_v37  ;;  %v1567_v44 = vrot.slane (!%p1227_p11), %v935_v35, %v943_v39 }
 0x15d   : > { %v844_v63 = vadd.f32 %v778_v59, %v411_v51  ;;  %v860_v0 = vadd.f32 %v818_v60, %v427_v52  ;;  %v780_v1 = vpop.f32.mrb[10].mxu0  ;;  %v820_v2 = vpop.f32.mrb[10].mxu1  ;;  %v907_v42 = vld [vmem:[#allocation2 + $0x20] sm:$0xff] (!%p1227_p11) }
 0x15e   : > { %875 = vst [vmem:[#allocation2 + $0x40] sm:$0xff] %v843_v57  ;;  %891 = vst [vmem:[#allocation2 + $0xc0] sm:$0xff] %v859_v58  ;;  %v845_v3 = vadd.f32 %v780_v1, %v412_v55  ;;  %v861_v4 = vadd.f32 %v820_v2, %v428_v56  ;;  %v782_v5 = vpop.f32.mrb[11].mxu0  ;;  %v822_v6 = vpop.f32.mrb[11].mxu1  ;;  %v908_v45 = vld [vmem:[#allocation2 + $0x28] sm:$0xff] (!%p1227_p11)  ;;  %v947_v48 = vadd.f32 (!%p1227_p11), %v1565_v43, %v903_v36 }
 0x15f   : > { %876 = vst [vmem:[#allocation2 + $0x48] sm:$0xff] %v844_v63  ;;  %892 = vst [vmem:[#allocation2 + $0xc8] sm:$0xff] %v860_v0  ;;  %v846_v7 = vadd.f32 %v782_v5, %v413_v61  ;;  %v862_v8 = vadd.f32 %v822_v6, %v429_v62  ;;  %v909_v46 = vld [vmem:[#allocation2 + $0x30] sm:$0xff] (!%p1227_p11)  ;;  %v948_v49 = vadd.f32 (!%p1227_p11), %v1567_v44, %v904_v38 }
 0x160   : > { %877 = vst [vmem:[#allocation2 + $0x50] sm:$0xff] %v845_v3  ;;  %893 = vst [vmem:[#allocation2 + $0xd0] sm:$0xff] %v861_v4  ;;  %v910_v47 = vld [vmem:[#allocation2 + $0x38] sm:$0xff] (!%p1227_p11)  ;;  %v949_v50 = vadd.f32 (!%p1227_p11), %v1565_v43, %v905_v40  ;;  %v950_v51 = vadd.f32 (!%p1227_p11), %v1567_v44, %v906_v41  ;;  %v951_v55 = vadd.f32 (!%p1227_p11), %v1565_v43, %v907_v42  ;;  %v979_v62 = vmax.f32 (!%p1227_p11), %v947_v48, 0.0 }
 0x161   : > { %878 = vst [vmem:[#allocation2 + $0x58] sm:$0xff] %v846_v7  ;;  %894 = vst [vmem:[#allocation2 + $0xd8] sm:$0xff] %v862_v8  ;;  %v952_v56 = vadd.f32 (!%p1227_p11), %v1567_v44, %v908_v45  ;;  %v953_v57 = vadd.f32 (!%p1227_p11), %v1565_v43, %v909_v46  ;;  %v954_v58 = vadd.f32 (!%p1227_p11), %v1567_v44, %v910_v47  ;;  %v980_v63 = vmax.f32 (!%p1227_p11), %v948_v49, 0.0 }
 0x162   : > { %v981_v0 = vmax.f32 (!%p1227_p11), %v949_v50, 0.0  ;;  %v982_v1 = vmax.f32 (!%p1227_p11), %v950_v51, 0.0  ;;  %v983_v4 = vmax.f32 (!%p1227_p11), %v951_v55, 0.0  ;;  %1011 = vst [vmem:[%s1715_s3] sm:$0xff] (!%p1227_p11), %v979_v62 }
 0x163   : > { %v786_v13 = vpop.f32.mrb[12].mxu0  ;;  %v826_v14 = vpop.f32.mrb[12].mxu1  ;;  %902 = sbr.rel (%p1227_p11) target bundleno = 376 (0x178), region = 78  ;;  %v984_v5 = vmax.f32 (!%p1227_p11), %v952_v56, 0.0  ;;  %v985_v6 = vmax.f32 (!%p1227_p11), %v953_v57, 0.0  ;;  %v986_v7 = vmax.f32 (!%p1227_p11), %v954_v58, 0.0 }
 0x164   : > { %v847_v17 = vadd.f32 %v786_v13, %v414_v9  ;;  %v863_v18 = vadd.f32 %v826_v14, %v430_v10  ;;  %v788_v19 = vpop.f32.mrb[13].mxu0  ;;  %v828_v20 = vpop.f32.mrb[13].mxu1  ;;  %1012 = vst [vmem:[%s1715_s3 + $0x8] sm:$0xff] (!%p1227_p11), %v980_v63  ;;  %1013 = vst [vmem:[%s1715_s3 + $0x10] sm:$0xff] (!%p1227_p11), %v981_v0  ;;  %v920_v13 = vld [vmem:[#allocation2 + $0x88] sm:$0xff] (!%p1227_p11)  ;;  %v921_v14 = vld [vmem:[#allocation2 + $0x90] sm:$0xff] (!%p1227_p11) }
 0x165   : > { %v848_v23 = vadd.f32 %v788_v19, %v415_v11  ;;  %v864_v24 = vadd.f32 %v828_v20, %v431_v12  ;;  %v790_v25 = vpop.f32.mrb[14].mxu0  ;;  %v830_v26 = vpop.f32.mrb[14].mxu1  ;;  %v911_v52 = vld [vmem:[#allocation2 + $0x40] sm:$0xff] (!%p1227_p11)  ;;  %1014 = vst [vmem:[%s1715_s3 + $0x18] sm:$0xff] (!%p1227_p11), %v982_v1  ;;  %1015 = vst [vmem:[%s1715_s3 + $0x20] sm:$0xff] (!%p1227_p11), %v983_v4  ;;  %v922_v19 = vld [vmem:[#allocation2 + $0x98] sm:$0xff] (!%p1227_p11)  ;;  %v964_v33 = vadd.f32 (!%p1227_p11), %v1567_v44, %v920_v13 }
 0x166   : > { %879 = vst [vmem:[#allocation2 + $0x60] sm:$0xff] %v847_v17  ;;  %895 = vst [vmem:[#allocation2 + $0xe0] sm:$0xff] %v863_v18  ;;  %v849_v27 = vadd.f32 %v790_v25, %v416_v15  ;;  %v865_v28 = vadd.f32 %v830_v26, %v432_v16  ;;  %v792_v29 = vpop.f32.mrb[15].mxu0  ;;  %v832_v30 = vpop.f32.mrb[15].mxu1  ;;  %v912_v53 = vld [vmem:[#allocation2 + $0x48] sm:$0xff] (!%p1227_p11)  ;;  %v955_v8 = vadd.f32 (!%p1227_p11), %v1565_v43, %v911_v52  ;;  %v919_v12 = vld [vmem:[#allocation2 + $0x80] sm:$0xff] (!%p1227_p11) }
 0x167   : > { %880 = vst [vmem:[#allocation2 + $0x68] sm:$0xff] %v848_v23  ;;  %896 = vst [vmem:[#allocation2 + $0xe8] sm:$0xff] %v864_v24  ;;  %v850_v31 = vadd.f32 %v792_v29, %v417_v21  ;;  %v866_v32 = vadd.f32 %v832_v30, %v433_v22  ;;  %v913_v54 = vld [vmem:[#allocation2 + $0x50] sm:$0xff] (!%p1227_p11)  ;;  %v956_v9 = vadd.f32 (!%p1227_p11), %v1567_v44, %v912_v53  ;;  %v923_v20 = vld [vmem:[#allocation2 + $0xa0] sm:$0xff] (!%p1227_p11)  ;;  %v996_v49 = vmax.f32 (!%p1227_p11), %v964_v33, 0.0 }
 0x168   : > { %881 = vst [vmem:[#allocation2 + $0x70] sm:$0xff] %v849_v27  ;;  %897 = vst [vmem:[#allocation2 + $0xf0] sm:$0xff] %v865_v28  ;;  %v914_v59 = vld [vmem:[#allocation2 + $0x58] sm:$0xff] (!%p1227_p11)  ;;  %v957_v10 = vadd.f32 (!%p1227_p11), %v1565_v43, %v913_v54  ;;  %v924_v21 = vld [vmem:[#allocation2 + $0xa8] sm:$0xff] (!%p1227_p11)  ;;  %v987_v22 = vmax.f32 (!%p1227_p11), %v955_v8, 0.0  ;;  %v965_v34 = vadd.f32 (!%p1227_p11), %v1565_v43, %v921_v14  ;;  %v966_v35 = vadd.f32 (!%p1227_p11), %v1567_v44, %v922_v19 }
 0x169   : > { %882 = vst [vmem:[#allocation2 + $0x78] sm:$0xff] %v850_v31  ;;  %898 = vst [vmem:[#allocation2 + $0xf8] sm:$0xff] %v866_v32  ;;  %v958_v11 = vadd.f32 (!%p1227_p11), %v1567_v44, %v914_v59  ;;  %v988_v23 = vmax.f32 (!%p1227_p11), %v956_v9, 0.0  ;;  %v925_v26 = vld [vmem:[#allocation2 + $0xb0] sm:$0xff] (!%p1227_p11)  ;;  %v926_v27 = vld [vmem:[#allocation2 + $0xb8] sm:$0xff] (!%p1227_p11)  ;;  %v963_v32 = vadd.f32 (!%p1227_p11), %v1565_v43, %v919_v12  ;;  %v967_v39 = vadd.f32 (!%p1227_p11), %v1565_v43, %v923_v20 }
 0x16a   : > { %1016 = vst [vmem:[%s1715_s3 + $0x28] sm:$0xff] %v984_v5  ;;  %1017 = vst [vmem:[%s1715_s3 + $0x30] sm:$0xff] %v985_v6  ;;  %v989_v24 = vmax.f32 %v957_v10, 0.0  ;;  %v927_v36 = vld [vmem:[#allocation2 + $0xc0] sm:$0xff]  ;;  %v928_v37 = vld [vmem:[#allocation2 + $0xc8] sm:$0xff]  ;;  %v968_v40 = vadd.f32 %v1567_v44, %v924_v21  ;;  %v969_v41 = vadd.f32 %v1565_v43, %v925_v26  ;;  %v970_v42 = vadd.f32 %v1567_v44, %v926_v27 }
 0x16b   : > { %1018 = vst [vmem:[%s1715_s3 + $0x38] sm:$0xff] %v986_v7  ;;  %v990_v25 = vmax.f32 %v958_v11, 0.0  ;;  %1019 = vst [vmem:[%s1715_s3 + $0x40] sm:$0xff] %v987_v22  ;;  %v929_v38 = vld [vmem:[#allocation2 + $0xd0] sm:$0xff]  ;;  %v930_v45 = vld [vmem:[#allocation2 + $0xd8] sm:$0xff]  ;;  %v995_v48 = vmax.f32 %v963_v32, 0.0  ;;  %v971_v58 = vadd.f32 %v1565_v43, %v927_v36  ;;  %v972_v59 = vadd.f32 %v1567_v44, %v928_v37 }
 0x16c   : > { %1020 = vst [vmem:[%s1715_s3 + $0x48] sm:$0xff] %v988_v23  ;;  %1021 = vst [vmem:[%s1715_s3 + $0x50] sm:$0xff] %v989_v24  ;;  %v997_v50 = vmax.f32 %v965_v34, 0.0  ;;  %v998_v51 = vmax.f32 %v966_v35, 0.0  ;;  %v999_v54 = vmax.f32 %v967_v39, 0.0  ;;  %v1000_v55 = vmax.f32 %v968_v40, 0.0 }
 0x16d   : > { %v915_v60 = vld [vmem:[#allocation2 + $0x60] sm:$0xff]  ;;  %1022 = vst [vmem:[%s1715_s3 + $0x58] sm:$0xff] %v990_v25  ;;  %v1001_v56 = vmax.f32 %v969_v41, 0.0  ;;  %v1002_v57 = vmax.f32 %v970_v42, 0.0  ;;  %1027 = vst [vmem:[%s1715_s3 + $0x80] sm:$0xff] %v995_v48 }
 0x16e   : > { %v916_v61 = vld [vmem:[#allocation2 + $0x68] sm:$0xff]  ;;  %v959_v15 = vadd.f32 %v1565_v43, %v915_v60  ;;  %v931_v46 = vld [vmem:[#allocation2 + $0xe0] sm:$0xff]  ;;  %1028 = vst [vmem:[%s1715_s3 + $0x88] sm:$0xff] %v996_v49  ;;  %1029 = vst [vmem:[%s1715_s3 + $0x90] sm:$0xff] %v997_v50  ;;  %v973_v60 = vadd.f32 %v1565_v43, %v929_v38 }
 0x16f   : > { %v917_v2 = vld [vmem:[#allocation2 + $0x70] sm:$0xff]  ;;  %v960_v16 = vadd.f32 %v1567_v44, %v916_v61  ;;  %v932_v47 = vld [vmem:[#allocation2 + $0xe8] sm:$0xff]  ;;  %1030 = vst [vmem:[%s1715_s3 + $0x98] sm:$0xff] %v998_v51  ;;  %v974_v61 = vadd.f32 %v1567_v44, %v930_v45  ;;  %1031 = vst [vmem:[%s1715_s3 + $0xa0] sm:$0xff] %v999_v54  ;;  %v975_v62 = vadd.f32 %v1565_v43, %v931_v46 }
 0x170   : > { %v918_v3 = vld [vmem:[#allocation2 + $0x78] sm:$0xff]  ;;  %v961_v17 = vadd.f32 %v1565_v43, %v917_v2  ;;  %v991_v28 = vmax.f32 %v959_v15, 0.0  ;;  %v933_v52 = vld [vmem:[#allocation2 + $0xf0] sm:$0xff]  ;;  %1032 = vst [vmem:[%s1715_s3 + $0xa8] sm:$0xff] %v1000_v55  ;;  %1033 = vst [vmem:[%s1715_s3 + $0xb0] sm:$0xff] %v1001_v56  ;;  %v976_v63 = vadd.f32 %v1567_v44, %v932_v47  ;;  %v1003_v2 = vmax.f32 %v971_v58, 0.0 }
 0x171   : > { %v962_v18 = vadd.f32 %v1567_v44, %v918_v3  ;;  %v992_v29 = vmax.f32 %v960_v16, 0.0  ;;  %v934_v53 = vld [vmem:[#allocation2 + $0xf8] sm:$0xff]  ;;  %1034 = vst [vmem:[%s1715_s3 + $0xb8] sm:$0xff] %v1002_v57  ;;  %v977_v0 = vadd.f32 %v1565_v43, %v933_v52  ;;  %v1004_v3 = vmax.f32 %v972_v59, 0.0 }
 0x172   : > { %v993_v30 = vmax.f32 %v961_v17, 0.0  ;;  %1023 = vst [vmem:[%s1715_s3 + $0x60] sm:$0xff] %v991_v28  ;;  %v978_v1 = vadd.f32 %v1567_v44, %v934_v53  ;;  %v1005_v4 = vmax.f32 %v973_v60, 0.0  ;;  %v1006_v5 = vmax.f32 %v974_v61, 0.0  ;;  %1035 = vst [vmem:[%s1715_s3 + $0xc0] sm:$0xff] %v1003_v2 }
 0x173   : > { %v994_v31 = vmax.f32 %v962_v18, 0.0  ;;  %1024 = vst [vmem:[%s1715_s3 + $0x68] sm:$0xff] %v992_v29  ;;  %v1007_v6 = vmax.f32 %v975_v62, 0.0  ;;  %v1008_v7 = vmax.f32 %v976_v63, 0.0  ;;  %v1009_v8 = vmax.f32 %v977_v0, 0.0  ;;  %1036 = vst [vmem:[%s1715_s3 + $0xc8] sm:$0xff] %v1004_v3 }
 0x174   : > { %1025 = vst [vmem:[%s1715_s3 + $0x70] sm:$0xff] %v993_v30  ;;  %v1010_v9 = vmax.f32 %v978_v1, 0.0  ;;  %1037 = vst [vmem:[%s1715_s3 + $0xd0] sm:$0xff] %v1005_v4 }
 0x175   : > { %1026 = vst [vmem:[%s1715_s3 + $0x78] sm:$0xff] %v994_v31  ;;  %1038 = vst [vmem:[%s1715_s3 + $0xd8] sm:$0xff] %v1006_v5 }
 0x176   : > { %1039 = vst [vmem:[%s1715_s3 + $0xe0] sm:$0xff] %v1007_v6  ;;  %1040 = vst [vmem:[%s1715_s3 + $0xe8] sm:$0xff] %v1008_v7 }
 0x177   : > { %1041 = vst [vmem:[%s1715_s3 + $0xf0] sm:$0xff] %v1009_v8  ;;  %1042 = vst [vmem:[%s1715_s3 + $0xf8] sm:$0xff] %v1010_v9 }
 0x178 PF: > { %s13_s16 = sadd.s32 1, %s1417_s16   ;;  %s1716_s12 = smov %s1405_s13 }
 0x179   : > { %p10_p12 = scmp.ge.s32.totalorder %s13_s16, 7   ;;  %s1717_s13 = smov %s1475_s20 }
 0x17a   : > { %s1718_s14 = smov %s1413_s15  ;;  %s1719_s15 = smov %s1721_s17 }
 0x17b   :  { %12 = sbr.rel (!%p10_p12) target bundleno = 3 (0x3), region = 119 }

// kernel: generator2_forward.18
= control target key start
LH: loop header
LB: loop body
LE: loop exit
PB: predicated region body
PF: predicated region fallthrough
CT: control target
= control target key end

     0   :  { %8 = vsyncpa [#allocation4], 0  ;;  %s2588_s0 = inlined_call_operand.hbm [shape: bf16[2048,3072], index: 0, kind: input, shape index: {}]   ;;  %s2589_s1 = inlined_call_operand.vmem [shape: bf16[3072,128], index: 1, kind: input, shape index: {}]   ;;  %s2590_s2 = inlined_call_operand.vmem [shape: f32[1,128], index: 2, kind: input, shape index: {}]   ;;  %s2591_s3 = inlined_call_operand.vmem [shape: f32[2048,128], index: 3, kind: output, shape index: {}]  }
   0x1   :  { %10 = vsyncpa [#allocation4 + $0x1], 0  ;;  %s2265_s12 = smov 0   ;;  %s2267_s13 = smov 0  }
   0x2   :  { %s2269_s14 = smov 0   ;;  %s2271_s15 = smov 0  }
   0x3   :  { %s2273_s16 = smov 0   ;;  %s2275_s17 = smov 0  }
   0x4   :  { %s2277_s18 = smov 0   ;;  %s2279_s19 = smov 0  }
   0x5 LB: > { %s1597_s20 = sadd.s32 4294967295, %s2238_s19   ;;  %s28_s21 = sadd.s32 1, %s2230_s17  ;;  %s2238_s19 = sphi %s2279_s19, %s16_s19   ;;  %s2234_s18 = sphi %s2277_s18, %s2601_s18   ;;  %s2230_s17 = sphi %s2275_s17, %s2600_s17   ;;  %s2226_s16 = sphi %s2273_s16, %s2599_s16   ;;  %s2222_s15 = sphi %s2271_s15, %s2598_s15   ;;  %s2218_s14 = sphi %s2269_s14, %s2597_s14   ;;  %s2214_s13 = sphi %s2267_s13, %s2596_s13   ;;  %s2210_s12 = sphi %s2265_s12, %s2595_s12  }
   0x6   : > { %p29_p0 = scmp.ge.s32.totalorder %s28_s21, 6  ;;  %s35_s22 = sadd.s32 1, %s2234_s18 }
   0x7   : > { %s44_s23 = sadd.s32 1, %s2218_s14  ;;  %p51_p1 = scmp.ne.s32.totalorder %s2218_s14, %s2214_s13 }
   0x8   : > { %s2603_s21 = smov (%p29_p0, %s28_s21), 0  ;;  %s2605_s22 = smov (!%p29_p0, %s35_s22), %s2234_s18 }
   0x9   : > { %s40_s24 = ssub.s32 %s2230_s17, %s2603_s21  ;;  %p52_p2 = scmp.eq.s32.totalorder %s2238_s19, 0 }
   0xa   : > { %p37_p3 = scmp.ge.s32.totalorder %s2605_s22, 8  ;;  %p57_p4 = scmp.ne.s32.totalorder %s2214_s13, %s2210_s12 }
   0xb   : > { %p2316_p5 = por %p52_p2, %p51_p1  ;;  %p58_p6 = scmp.eq.s32.totalorder %s1597_s20, 0 }
   0xc   : > { %s2607_s22 = smov (%p37_p3, %s2605_s22), 0  ;;  %p1945_p8 = scmp.lt.s32.totalorder %s2238_s19, 48 }
   0xd   : > { %p2322_p7 = por %p58_p6, %p57_p4  ;;  %s39_s27 = ssub.s32 %s2234_s18, %s2607_s22 }
   0xe   : > { %s41_s28 = sor.u32 %s40_s24, %s39_s27  ;;  %s169_s29 = sand.u32 1, %s2218_s14  }
   0xf   : > { %p42_p9 = scmp.eq.s32.totalorder %s41_s28, 0  ;;  %s1602_s30 = sshll.u32 %s169_s29, 9 }
  0x10   : > { %s1604_s4 = sshll.u32 %s2230_s17, 2  ;;  %s1938_s6 = smul.u32 768, %s2234_s18 }
  0x11   : > { %s2332_s5 = scalar_select %p42_p9, %s2218_s14, %s44_s23  }
  0x12   : > { %s173_s7 = scalar_lea.vmem [#allocation3], %s1602_s30  ;;  %p2337_p10 = pnand %p1945_p8, %p2316_p5 }
  0x13   : > { %s183_s8 = sshll.u32 %s173_s7, 4  ;;  %s180_s10 = sadd.s32 %s1938_s6, %s1604_s4  ;;  %s2341_s8 = int_to_ptr.vmem [resolvable:$true] %s183_s8 }
  0x14   : > { %s1606_s11 = sshll.u32 %s180_s10, 6  ;;  %s2348_s23 = scalar_lea.sflag [#allocation4], %s169_s29 }
  0x15   : > { %s2346_s24 = scalar_lea.hbm %s2588_s0, %s1606_s11  ;;  %p2144_p12 = pneg %p2337_p10 }
  0x16   : > { %s2142_s25 = scalar_lea.hbm %s2346_s24, 8192  ;;  %s2147_s30 = scalar_lea.hbm %s2588_s0, 393216 }
  0x17   : > { %p2143_p11 = scmp.ne.s32.totalorder %s2346_s24, %s2142_s25  ;;  %p2148_p1 = scmp.lt.u32.totalorder %s2346_s24, %s2588_s0 }
  0x18   : > { %p2149_p2 = scmp.lt.u32.totalorder %s2147_s30, %s2142_s25  ;;  %p2151_p4 = scmp.lt.u32.totalorder %s2142_s25, %s2346_s24 }
  0x19   : > { %p2145_p13 = pnand %p2144_p12, %p2143_p11 }
  0x1a   : > { %p2150_p3 = por %p2149_p2, %p2148_p1 }
  0x1b   : > { %p2146_p0 = pneg %p2145_p13 }
  0x1c   : > { %p2152_p5 = por %p2151_p4, %p2150_p3 }
  0x1e   : > { %p2153_p6 = pnand %p2152_p5, %p2146_p0 }
  0x20   : > { %2156 = shalt.err (!%p2153_p6)
}
  0x21   : > { %s2157_s29 = scalar_lea.vmem %s2341_s8, 8192  ;;  %s2240_s7 = smov [#allocation3]  }
  0x22   : > { %p2158_p8 = scmp.ne.s32.totalorder %s2341_s8, %s2157_s29  ;;  %s2162_s10 = sshll.u32 %s2240_s7, 4  ;;  %s2163_s10 = int_to_ptr.vmem [resolvable:$false] %s2162_s10 }
  0x23   : > { %s2164_s11 = scalar_lea.vmem %s2163_s10, 16384  ;;  %p2165_p13 = scmp.lt.s32.totalorder %s2341_s8, %s2163_s10 }
  0x24   : > { %p2160_p9 = pnand %p2158_p8, %p2144_p12  ;;  %p2166_p1 = scmp.lt.s32.totalorder %s2164_s11, %s2157_s29 }
  0x26   : > { %p2161_p11 = pneg %p2160_p9  ;;  %p2167_p2 = por %p2166_p1, %p2165_p13 }
  0x28   : > { %p2168_p3 = pnand %p2167_p2, %p2161_p11 }
  0x2a   : > { %2171 = shalt.err (!%p2168_p3)
}
  0x2b   : > { %s2241_s12 = smov 1536   ;;  %s2242_s20 = smov 256  }
  0x2c   : > { %s2243_s25 = smov 16   ;;  %p1607_p12 = scmp.ge.s32.totalorder %s2238_s19, 1 }
  0x2d   : > { %1944 = dma.hbm_to_vmem [thread:$0]  (!%p2337_p10), %s2346_s24, 8192, %s2341_s8, %s2348_s23, %s2241_s12, %s2242_s20, %s2243_s25  }
  0x2e   : > { %p203_p0 = scmp.lt.s32.totalorder %s2238_s19, 49 }
  0x30   : > { %p204_p4 = pnand %p1607_p12, %p203_p0 }
  0x31   : > { %s209_s27 = sand.u32 (!%p204_p4), 1, %s2214_s13  }
  0x32   : > { %207 = sbr.rel (%p204_p4) target bundleno = 466 (0x1d2), region = 32  ;;  %s1608_s28 = sshll.u32 (!%p204_p4), %s209_s27, 9 }
  0x33   : > { %s210_s30 = scalar_lea.sflag (!%p204_p4), [#allocation4], %s209_s27  ;;  %s2379_s4 = scalar_lea.vmem (!%p204_p4), [#allocation3], %s1608_s28 }
  0x39   : > { %2205 = dma.done.wait (%p2322_p7), %s210_s30, 8192  }
  0x3a   : > { %2207 = vsyncadd (%p2322_p7), %s210_s30, 4294959104  ;;  %s1609_s9 = sshll.u32 %s2222_s15, 6  ;;  %s1611_s8 = sshll.u32 %s2226_s16, 5 }
  0x3b   : > { %p253_p10 = scmp.lt.s32.totalorder %s1609_s9, 383  ;;  %p265_p5 = scmp.lt.s32.totalorder %s1611_s8, 255 }
  0x3c   : > { %p1613_p7 = scmp.ne.s32.totalorder %s2222_s15, 0 }
  0x3d   : > { %s2609_s9 = smov (!%p253_p10, %s1609_s9), 383  ;;  %s2611_s8 = smov (!%p265_p5, %s1611_s8), 255 }
  0x3e   : > { %s1610_s24 = sshll.u32 %s2609_s9, 2  ;;  %s1612_s7 = sshll.u32 %s2611_s8, 3  ;;  %v2244_v0 = vmov (!%p1613_p7), 0.0  }
  0x3f   : > { %s2390_s29 = scalar_lea.vmem %s2589_s1, %s1610_s24  ;;  %s2395_s26 = scalar_lea.vmem %s2591_s3, %s1612_s7  ;;  %278 = vst [vmem:[#allocation2] sm:$0xff] (!%p1613_p7), %v2244_v0  ;;  %279 = vst [vmem:[#allocation2 + $0x8] sm:$0xff] (!%p1613_p7), %v2244_v0 }
  0x40   : > { %277 = sbr.rel (%p1613_p7) target bundleno = 79 (0x4f), region = 40  ;;  %280 = vst [vmem:[#allocation2 + $0x10] sm:$0xff] (!%p1613_p7), %v2244_v0  ;;  %281 = vst [vmem:[#allocation2 + $0x18] sm:$0xff] (!%p1613_p7), %v2244_v0 }
  0x41   : > { %282 = vst [vmem:[#allocation2 + $0x20] sm:$0xff] (!%p1613_p7), %v2244_v0  ;;  %283 = vst [vmem:[#allocation2 + $0x28] sm:$0xff] (!%p1613_p7), %v2244_v0 }
  0x42   : > { %284 = vst [vmem:[#allocation2 + $0x30] sm:$0xff] (!%p1613_p7), %v2244_v0  ;;  %285 = vst [vmem:[#allocation2 + $0x38] sm:$0xff] (!%p1613_p7), %v2244_v0 }
  0x43   : > { %286 = vst [vmem:[#allocation2 + $0x40] sm:$0xff] (!%p1613_p7), %v2244_v0  ;;  %287 = vst [vmem:[#allocation2 + $0x48] sm:$0xff] (!%p1613_p7), %v2244_v0 }
  0x44   : > { %288 = vst [vmem:[#allocation2 + $0x50] sm:$0xff] (!%p1613_p7), %v2244_v0  ;;  %289 = vst [vmem:[#allocation2 + $0x58] sm:$0xff] (!%p1613_p7), %v2244_v0 }
  0x45   : > { %290 = vst [vmem:[#allocation2 + $0x60] sm:$0xff] (!%p1613_p7), %v2244_v0  ;;  %291 = vst [vmem:[#allocation2 + $0x68] sm:$0xff] (!%p1613_p7), %v2244_v0 }
  0x46   : > { %292 = vst [vmem:[#allocation2 + $0x70] sm:$0xff] (!%p1613_p7), %v2244_v0  ;;  %293 = vst [vmem:[#allocation2 + $0x78] sm:$0xff] (!%p1613_p7), %v2244_v0 }
  0x47   : > { %294 = vst [vmem:[#allocation2 + $0x80] sm:$0xff] %v2244_v0  ;;  %295 = vst [vmem:[#allocation2 + $0x88] sm:$0xff] %v2244_v0 }
  0x48   : > { %296 = vst [vmem:[#allocation2 + $0x90] sm:$0xff] %v2244_v0  ;;  %297 = vst [vmem:[#allocation2 + $0x98] sm:$0xff] %v2244_v0 }
  0x49   : > { %298 = vst [vmem:[#allocation2 + $0xa0] sm:$0xff] %v2244_v0  ;;  %299 = vst [vmem:[#allocation2 + $0xa8] sm:$0xff] %v2244_v0 }
  0x4a   : > { %300 = vst [vmem:[#allocation2 + $0xb0] sm:$0xff] %v2244_v0  ;;  %301 = vst [vmem:[#allocation2 + $0xb8] sm:$0xff] %v2244_v0 }
  0x4b   : > { %302 = vst [vmem:[#allocation2 + $0xc0] sm:$0xff] %v2244_v0  ;;  %303 = vst [vmem:[#allocation2 + $0xc8] sm:$0xff] %v2244_v0 }
  0x4c   : > { %304 = vst [vmem:[#allocation2 + $0xd0] sm:$0xff] %v2244_v0  ;;  %305 = vst [vmem:[#allocation2 + $0xd8] sm:$0xff] %v2244_v0 }
  0x4d   : > { %306 = vst [vmem:[#allocation2 + $0xe0] sm:$0xff] %v2244_v0  ;;  %307 = vst [vmem:[#allocation2 + $0xe8] sm:$0xff] %v2244_v0 }
  0x4e   : > { %308 = vst [vmem:[#allocation2 + $0xf0] sm:$0xff] %v2244_v0  ;;  %309 = vst [vmem:[#allocation2 + $0xf8] sm:$0xff] %v2244_v0 }
  0x4f PF: > { %v2014_v1 = vld [vmem:[%s2390_s29 + $0x40] sm:$0xff]   ;;  %v2018_v5 = vld [vmem:[%s2390_s29 + $0x48] sm:$0xff]   ;;  %v2022_v9 = vld [vmem:[%s2390_s29 + $0x50] sm:$0xff]   ;;  %p1710_p6 = scmp.ne.s32.totalorder %s2222_s15, 5 }
  0x50   : > { %v2015_v2 = vld [vmem:[%s2390_s29 + $0xc0] sm:$0xff]   ;;  %1714 = vmatprep.subr.bf16.mxu0 %v2014_v1  ;;  %v2019_v6 = vld [vmem:[%s2390_s29 + $0xc8] sm:$0xff]   ;;  %v2023_v10 = vld [vmem:[%s2390_s29 + $0xd0] sm:$0xff]  }
  0x51   : > { %v2016_v3 = vld [vmem:[%s2390_s29] sm:$0xff]   ;;  %1826 = vmatprep.subr.bf16.mxu1 %v2015_v2  ;;  %v2020_v7 = vld [vmem:[%s2390_s29 + $0x8] sm:$0xff]   ;;  %v2024_v11 = vld [vmem:[%s2390_s29 + $0x10] sm:$0xff]  }
  0x52   : > { %v2017_v4 = vld [vmem:[%s2390_s29 + $0x80] sm:$0xff]   ;;  %1715 = vmatpush3.bf16.msra.mxu0 %v2016_v3  ;;  %v2021_v8 = vld [vmem:[%s2390_s29 + $0x88] sm:$0xff]   ;;  %v2025_v12 = vld [vmem:[%s2390_s29 + $0x90] sm:$0xff]  }
  0x53   : > { %1827 = vmatpush3.bf16.msra.mxu1 %v2017_v4  ;;  %1716 = vmatprep.subr.bf16.mxu0 %v2018_v5  ;;  %v2026_v13 = vld [vmem:[%s2390_s29 + $0x58] sm:$0xff]   ;;  %v2030_v17 = vld [vmem:[%s2390_s29 + $0x60] sm:$0xff]   ;;  %v2034_v21 = vld [vmem:[%s2390_s29 + $0x68] sm:$0xff]  }
  0x54   : > { %1828 = vmatprep.subr.bf16.mxu1 %v2019_v6  ;;  %v2027_v14 = vld [vmem:[%s2390_s29 + $0xd8] sm:$0xff]   ;;  %v2031_v18 = vld [vmem:[%s2390_s29 + $0xe0] sm:$0xff]   ;;  %v2035_v22 = vld [vmem:[%s2390_s29 + $0xe8] sm:$0xff]  }
  0x55   : > { %v2028_v15 = vld [vmem:[%s2390_s29 + $0x18] sm:$0xff]   ;;  %v2032_v19 = vld [vmem:[%s2390_s29 + $0x20] sm:$0xff]   ;;  %v2036_v23 = vld [vmem:[%s2390_s29 + $0x28] sm:$0xff]  }
  0x56   : > { %1717 = vmatpush3.bf16.msra.mxu0 %v2020_v7  ;;  %v2029_v16 = vld [vmem:[%s2390_s29 + $0x98] sm:$0xff]   ;;  %v2033_v20 = vld [vmem:[%s2390_s29 + $0xa0] sm:$0xff]   ;;  %v2037_v24 = vld [vmem:[%s2390_s29 + $0xa8] sm:$0xff]  }
  0x57   : > { %1829 = vmatpush3.bf16.msra.mxu1 %v2021_v8  ;;  %1718 = vmatprep.subr.bf16.mxu0 %v2022_v9  ;;  %v2038_v25 = vld [vmem:[%s2390_s29 + $0x70] sm:$0xff]   ;;  %v2042_v29 = vld [vmem:[%s2390_s29 + $0x78] sm:$0xff]  }
  0x58   : > { %1830 = vmatprep.subr.bf16.mxu1 %v2023_v10  ;;  %v2039_v26 = vld [vmem:[%s2390_s29 + $0xf0] sm:$0xff]   ;;  %v2043_v30 = vld [vmem:[%s2390_s29 + $0xf8] sm:$0xff]  }
  0x59   : > { %v2040_v27 = vld [vmem:[%s2390_s29 + $0x30] sm:$0xff]   ;;  %v2044_v31 = vld [vmem:[%s2390_s29 + $0x38] sm:$0xff]  }
  0x5a   : > { %1719 = vmatpush3.bf16.msra.mxu0 %v2024_v11  ;;  %v2041_v28 = vld [vmem:[%s2390_s29 + $0xb0] sm:$0xff]   ;;  %v2045_v32 = vld [vmem:[%s2390_s29 + $0xb8] sm:$0xff]  }
  0x5b   : > { %1831 = vmatpush3.bf16.msra.mxu1 %v2025_v12  ;;  %1720 = vmatprep.subr.bf16.mxu0 %v2026_v13  ;;  %v2046_v33 = vld [vmem:[%s2379_s4] ss:$16 sps:$4 sm:$0xff]   ;;  %v2048_v34 = vld [vmem:[%s2379_s4 + $0x4] ss:$16 sps:$4 sm:$0xff]   ;;  %v2049_v35 = vld [vmem:[%s2379_s4 + $0x8] ss:$16 sps:$4 sm:$0xff]  }
  0x5c   : > { %1832 = vmatprep.subr.bf16.mxu1 %v2027_v14  ;;  %v2051_v36 = vld [vmem:[%s2379_s4 + $0xc] ss:$16 sps:$4 sm:$0xff]   ;;  %1014 = vmatprep.mubr.bf16.mxu0 %v2048_v34  ;;  %v2052_v37 = vld [vmem:[%s2379_s4 + $0x24] ss:$16 sps:$4 sm:$0xff]   ;;  %v2056_v39 = vld [vmem:[%s2379_s4 + $0x20] ss:$16 sps:$4 sm:$0xff]  }
  0x5d   : > { %1175 = vmatprep.mubr.bf16.mxu1 %v2051_v36  ;;  %v2054_v38 = vld [vmem:[%s2379_s4 + $0x2c] ss:$16 sps:$4 sm:$0xff]   ;;  %v2057_v40 = vld [vmem:[%s2379_s4 + $0x28] ss:$16 sps:$4 sm:$0xff]   ;;  %v2058_v41 = vld [vmem:[%s2379_s4 + $0x44] ss:$16 sps:$4 sm:$0xff]  }
  0x5e   : > { %1721 = vmatpush3.bf16.msra.mxu0 %v2028_v15  ;;  %v2060_v42 = vld [vmem:[%s2379_s4 + $0x4c] ss:$16 sps:$4 sm:$0xff]   ;;  %v2062_v43 = vld [vmem:[%s2379_s4 + $0x40] ss:$16 sps:$4 sm:$0xff]   ;;  %v2063_v44 = vld [vmem:[%s2379_s4 + $0x48] ss:$16 sps:$4 sm:$0xff]  }
  0x5f   : > { %1833 = vmatpush3.bf16.msra.mxu1 %v2029_v16  ;;  %1722 = vmatprep.subr.bf16.mxu0 %v2030_v17  ;;  %v2064_v45 = vld [vmem:[%s2379_s4 + $0x64] ss:$16 sps:$4 sm:$0xff]   ;;  %v2066_v46 = vld [vmem:[%s2379_s4 + $0x6c] ss:$16 sps:$4 sm:$0xff]   ;;  %v2068_v47 = vld [vmem:[%s2379_s4 + $0x60] ss:$16 sps:$4 sm:$0xff]  }
  0x60   : > { %1834 = vmatprep.subr.bf16.mxu1 %v2031_v18  ;;  %v2069_v48 = vld [vmem:[%s2379_s4 + $0x68] ss:$16 sps:$4 sm:$0xff]   ;;  %v2070_v49 = vld [vmem:[%s2379_s4 + $0x84] ss:$16 sps:$4 sm:$0xff]   ;;  %v2072_v50 = vld [vmem:[%s2379_s4 + $0x8c] ss:$16 sps:$4 sm:$0xff]  }
  0x61   : > { %v2074_v51 = vld [vmem:[%s2379_s4 + $0x80] ss:$16 sps:$4 sm:$0xff]   ;;  %v2075_v52 = vld [vmem:[%s2379_s4 + $0x88] ss:$16 sps:$4 sm:$0xff]   ;;  %v2076_v53 = vld [vmem:[%s2379_s4 + $0xa4] ss:$16 sps:$4 sm:$0xff]  }
  0x62   : > { %1723 = vmatpush3.bf16.msra.mxu0 %v2032_v19  ;;  %v2078_v54 = vld [vmem:[%s2379_s4 + $0xac] ss:$16 sps:$4 sm:$0xff]   ;;  %v2080_v55 = vld [vmem:[%s2379_s4 + $0xa0] ss:$16 sps:$4 sm:$0xff]   ;;  %v2081_v56 = vld [vmem:[%s2379_s4 + $0xa8] ss:$16 sps:$4 sm:$0xff]  }
  0x63   : > { %1835 = vmatpush3.bf16.msra.mxu1 %v2033_v20  ;;  %1724 = vmatprep.subr.bf16.mxu0 %v2034_v21  ;;  %v2082_v57 = vld [vmem:[%s2379_s4 + $0xc4] ss:$16 sps:$4 sm:$0xff]   ;;  %v2084_v58 = vld [vmem:[%s2379_s4 + $0xcc] ss:$16 sps:$4 sm:$0xff]   ;;  %v2086_v59 = vld [vmem:[%s2379_s4 + $0xc0] ss:$16 sps:$4 sm:$0xff]  }
  0x64   : > { %1836 = vmatprep.subr.bf16.mxu1 %v2035_v22  ;;  %v2087_v60 = vld [vmem:[%s2379_s4 + $0xc8] ss:$16 sps:$4 sm:$0xff]   ;;  %v2088_v61 = vld [vmem:[%s2379_s4 + $0xe4] ss:$16 sps:$4 sm:$0xff]   ;;  %v2090_v62 = vld [vmem:[%s2379_s4 + $0xec] ss:$16 sps:$4 sm:$0xff]  }
  0x65   : > { %v2092_v63 = vld [vmem:[%s2379_s4 + $0xe0] ss:$16 sps:$4 sm:$0xff]   ;;  %v2093_v0 = vld [vmem:[%s2379_s4 + $0xe8] ss:$16 sps:$4 sm:$0xff]   ;;  %v2094_v1 = vld [vmem:[%s2379_s4 + $0x104] ss:$16 sps:$4 sm:$0xff]  }
  0x66   : > { %1725 = vmatpush3.bf16.msra.mxu0 %v2036_v23  ;;  %v2096_v2 = vld [vmem:[%s2379_s4 + $0x10c] ss:$16 sps:$4 sm:$0xff]   ;;  %v2098_v3 = vld [vmem:[%s2379_s4 + $0x100] ss:$16 sps:$4 sm:$0xff]   ;;  %v2099_v4 = vld [vmem:[%s2379_s4 + $0x108] ss:$16 sps:$4 sm:$0xff]  }
  0x67   : > { %1837 = vmatpush3.bf16.msra.mxu1 %v2037_v24  ;;  %1726 = vmatprep.subr.bf16.mxu0 %v2038_v25  ;;  %v2100_v5 = vld [vmem:[%s2379_s4 + $0x124] ss:$16 sps:$4 sm:$0xff]   ;;  %v2102_v6 = vld [vmem:[%s2379_s4 + $0x12c] ss:$16 sps:$4 sm:$0xff]   ;;  %v2104_v7 = vld [vmem:[%s2379_s4 + $0x120] ss:$16 sps:$4 sm:$0xff]  }
  0x68   : > { %1838 = vmatprep.subr.bf16.mxu1 %v2039_v26  ;;  %v2105_v8 = vld [vmem:[%s2379_s4 + $0x128] ss:$16 sps:$4 sm:$0xff]   ;;  %v2106_v9 = vld [vmem:[%s2379_s4 + $0x144] ss:$16 sps:$4 sm:$0xff]   ;;  %v2108_v10 = vld [vmem:[%s2379_s4 + $0x14c] ss:$16 sps:$4 sm:$0xff]  }
  0x69   : > { %v2110_v11 = vld [vmem:[%s2379_s4 + $0x140] ss:$16 sps:$4 sm:$0xff]   ;;  %v2111_v12 = vld [vmem:[%s2379_s4 + $0x148] ss:$16 sps:$4 sm:$0xff]   ;;  %v2112_v13 = vld [vmem:[%s2379_s4 + $0x164] ss:$16 sps:$4 sm:$0xff]  }
  0x6a   : > { %1727 = vmatpush3.bf16.msra.mxu0 %v2040_v27  ;;  %v2114_v14 = vld [vmem:[%s2379_s4 + $0x16c] ss:$16 sps:$4 sm:$0xff]   ;;  %v2116_v15 = vld [vmem:[%s2379_s4 + $0x160] ss:$16 sps:$4 sm:$0xff]   ;;  %v2117_v16 = vld [vmem:[%s2379_s4 + $0x168] ss:$16 sps:$4 sm:$0xff]  }
  0x6b   : > { %1839 = vmatpush3.bf16.msra.mxu1 %v2041_v28  ;;  %1728 = vmatprep.subr.bf16.mxu0 %v2042_v29  ;;  %v2118_v17 = vld [vmem:[%s2379_s4 + $0x184] ss:$16 sps:$4 sm:$0xff]   ;;  %v2120_v18 = vld [vmem:[%s2379_s4 + $0x18c] ss:$16 sps:$4 sm:$0xff]   ;;  %v2122_v19 = vld [vmem:[%s2379_s4 + $0x180] ss:$16 sps:$4 sm:$0xff]  }
  0x6c   : > { %1840 = vmatprep.subr.bf16.mxu1 %v2043_v30  ;;  %v2123_v20 = vld [vmem:[%s2379_s4 + $0x188] ss:$16 sps:$4 sm:$0xff]   ;;  %v2124_v21 = vld [vmem:[%s2379_s4 + $0x1a4] ss:$16 sps:$4 sm:$0xff]   ;;  %v2126_v22 = vld [vmem:[%s2379_s4 + $0x1ac] ss:$16 sps:$4 sm:$0xff]  }
  0x6d   : > { %v2128_v23 = vld [vmem:[%s2379_s4 + $0x1a0] ss:$16 sps:$4 sm:$0xff]   ;;  %v2129_v24 = vld [vmem:[%s2379_s4 + $0x1a8] ss:$16 sps:$4 sm:$0xff]   ;;  %v2130_v25 = vld [vmem:[%s2379_s4 + $0x1c4] ss:$16 sps:$4 sm:$0xff]  }
  0x6e   : > { %1729 = vmatpush3.bf16.msra.mxu0 %v2044_v31  ;;  %v2132_v26 = vld [vmem:[%s2379_s4 + $0x1cc] ss:$16 sps:$4 sm:$0xff]   ;;  %v2134_v27 = vld [vmem:[%s2379_s4 + $0x1c0] ss:$16 sps:$4 sm:$0xff]   ;;  %v2135_v28 = vld [vmem:[%s2379_s4 + $0x1c8] ss:$16 sps:$4 sm:$0xff]  }
  0x6f   : > { %1841 = vmatpush3.bf16.msra.mxu1 %v2045_v32  ;;  %v2136_v29 = vld [vmem:[%s2379_s4 + $0x1e4] ss:$16 sps:$4 sm:$0xff]   ;;  %v2138_v30 = vld [vmem:[%s2379_s4 + $0x1ec] ss:$16 sps:$4 sm:$0xff]   ;;  %v2140_v31 = vld [vmem:[%s2379_s4 + $0x1e0] ss:$16 sps:$4 sm:$0xff]  }
  0x70   : > { %v2141_v32 = vld [vmem:[%s2379_s4 + $0x1e8] ss:$16 sps:$4 sm:$0xff]  }
  0x71   : > { %1015 = vmatmul.mubr.bf16.vlgmr.msra.gmra.mrb[0].mxu0 %v2046_v33 }
  0x72   : > { %1176 = vmatmul.mubr.bf16.vlgmr.msra.gmra.mrb[0].mxu1 %v2049_v35  ;;  %1022 = vmatprep.mubr.bf16.mxu0 %v2052_v37 }
  0x73   : > { %1183 = vmatprep.mubr.bf16.mxu1 %v2054_v38 }
  0x79   : > { %1023 = vmatmul.mubr.bf16.gmra.mrb[4].mxu0 %v2056_v39 }
  0x7a   : > { %1184 = vmatmul.mubr.bf16.gmra.mrb[4].mxu1 %v2057_v40  ;;  %1030 = vmatprep.mubr.bf16.mxu0 %v2058_v41 }
  0x7b   : > { %1191 = vmatprep.mubr.bf16.mxu1 %v2060_v42  ;;  %v310_v42 = vld [vmem:[#allocation2] sm:$0xff] }
  0x81   : > { %1031 = vmatmul.mubr.bf16.gmra.mrb[8].mxu0 %v2062_v43 }
  0x82   : > { %1192 = vmatmul.mubr.bf16.gmra.mrb[8].mxu1 %v2063_v44  ;;  %1038 = vmatprep.mubr.bf16.mxu0 %v2064_v45 }
  0x83   : > { %1199 = vmatprep.mubr.bf16.mxu1 %v2066_v46 }
  0x89   : > { %1039 = vmatmul.mubr.bf16.gmra.mrb[12].mxu0 %v2068_v47  ;;  %v311_v47 = vld [vmem:[#allocation2 + $0x8] sm:$0xff] }
  0x8a   : > { %1200 = vmatmul.mubr.bf16.gmra.mrb[12].mxu1 %v2069_v48  ;;  %1046 = vmatprep.mubr.bf16.mxu0 %v2070_v49 }
  0x8b   : > { %1207 = vmatprep.mubr.bf16.mxu1 %v2072_v50 }
  0x91   : > { %1047 = vmatmul.mubr.bf16.gmra.mrb[16].mxu0 %v2074_v51 }
  0x92   : > { %1208 = vmatmul.mubr.bf16.gmra.mrb[16].mxu1 %v2075_v52  ;;  %1054 = vmatprep.mubr.bf16.mxu0 %v2076_v53 }
  0x93   : > { %1215 = vmatprep.mubr.bf16.mxu1 %v2078_v54 }
  0x99   : > { %1055 = vmatmul.mubr.bf16.gmra.mrb[20].mxu0 %v2080_v55 }
  0x9a   : > { %1216 = vmatmul.mubr.bf16.gmra.mrb[20].mxu1 %v2081_v56  ;;  %1062 = vmatprep.mubr.bf16.mxu0 %v2082_v57 }
  0x9b   : > { %1223 = vmatprep.mubr.bf16.mxu1 %v2084_v58 }
  0xa1   : > { %1063 = vmatmul.mubr.bf16.gmra.mrb[24].mxu0 %v2086_v59 }
  0xa2   : > { %1224 = vmatmul.mubr.bf16.gmra.mrb[24].mxu1 %v2087_v60  ;;  %1070 = vmatprep.mubr.bf16.mxu0 %v2088_v61  ;;  %v312_v60 = vld [vmem:[#allocation2 + $0x10] sm:$0xff] }
  0xa3   : > { %1231 = vmatprep.mubr.bf16.mxu1 %v2090_v62 }
  0xa9   : > { %1071 = vmatmul.mubr.bf16.gmra.mrb[28].mxu0 %v2092_v63 }
  0xaa   : > { %1232 = vmatmul.mubr.bf16.gmra.mrb[28].mxu1 %v2093_v0  ;;  %1078 = vmatprep.mubr.bf16.mxu0 %v2094_v1  ;;  %v313_v1 = vld [vmem:[#allocation2 + $0x18] sm:$0xff] }
  0xab   : > { %1239 = vmatprep.mubr.bf16.mxu1 %v2096_v2 }
  0xb1   : > { %1079 = vmatmul.mubr.bf16.gmra.mrb[32].mxu0 %v2098_v3 }
  0xb2   : > { %1240 = vmatmul.mubr.bf16.gmra.mrb[32].mxu1 %v2099_v4  ;;  %1086 = vmatprep.mubr.bf16.mxu0 %v2100_v5 }
  0xb3   : > { %1247 = vmatprep.mubr.bf16.mxu1 %v2102_v6 }
  0xb9   : > { %1087 = vmatmul.mubr.bf16.gmra.mrb[36].mxu0 %v2104_v7 }
  0xba   : > { %1248 = vmatmul.mubr.bf16.gmra.mrb[36].mxu1 %v2105_v8  ;;  %1094 = vmatprep.mubr.bf16.mxu0 %v2106_v9 }
  0xbb   : > { %1255 = vmatprep.mubr.bf16.mxu1 %v2108_v10 }
  0xc1   : > { %1095 = vmatmul.mubr.bf16.gmra.mrb[40].mxu0 %v2110_v11 }
  0xc2   : > { %1256 = vmatmul.mubr.bf16.gmra.mrb[40].mxu1 %v2111_v12  ;;  %1102 = vmatprep.mubr.bf16.mxu0 %v2112_v13 }
  0xc3   : > { %1263 = vmatprep.mubr.bf16.mxu1 %v2114_v14  ;;  %v314_v14 = vld [vmem:[#allocation2 + $0x20] sm:$0xff] }
  0xc9   : > { %1103 = vmatmul.mubr.bf16.gmra.mrb[44].mxu0 %v2116_v15 }
  0xca   : > { %1264 = vmatmul.mubr.bf16.gmra.mrb[44].mxu1 %v2117_v16  ;;  %1110 = vmatprep.mubr.bf16.mxu0 %v2118_v17 }
  0xcb   : > { %1271 = vmatprep.mubr.bf16.mxu1 %v2120_v18 }
  0xd1   : > { %1111 = vmatmul.mubr.bf16.gmra.mrb[48].mxu0 %v2122_v19  ;;  %v315_v19 = vld [vmem:[#allocation2 + $0x28] sm:$0xff] }
  0xd2   : > { %1272 = vmatmul.mubr.bf16.gmra.mrb[48].mxu1 %v2123_v20  ;;  %1118 = vmatprep.mubr.bf16.mxu0 %v2124_v21 }
  0xd3   : > { %1279 = vmatprep.mubr.bf16.mxu1 %v2126_v22 }
  0xd9   : > { %1119 = vmatmul.mubr.bf16.gmra.mrb[52].mxu0 %v2128_v23 }
  0xda   : > { %1280 = vmatmul.mubr.bf16.gmra.mrb[52].mxu1 %v2129_v24  ;;  %1126 = vmatprep.mubr.bf16.mxu0 %v2130_v25 }
  0xdb   : > { %1287 = vmatprep.mubr.bf16.mxu1 %v2132_v26 }
  0xe1   : > { %1127 = vmatmul.mubr.bf16.gmra.mrb[56].mxu0 %v2134_v27 }
  0xe2   : > { %1288 = vmatmul.mubr.bf16.gmra.mrb[56].mxu1 %v2135_v28  ;;  %1134 = vmatprep.mubr.bf16.mxu0 %v2136_v29 }
  0xe3   : > { %1295 = vmatprep.mubr.bf16.mxu1 %v2138_v30 }
  0xe9   : > { %1135 = vmatmul.mubr.bf16.gmra.mrb[60].mxu0 %v2140_v31 }
  0xea   : > { %1296 = vmatmul.mubr.bf16.gmra.mrb[60].mxu1 %v2141_v32  ;;  %v316_v32 = vld [vmem:[#allocation2 + $0x30] sm:$0xff] }
 0x144   : > { %v1730_v33 = vpop.f32.mrb[0].mxu0 }
 0x145   : > { %v1842_v34 = vpop.f32.mrb[0].mxu1  ;;  %v1731_v35 = vpop.f32.mrb[1].mxu0 }
 0x146   : > { %v1732_v36 = vadd.f32 %v1731_v35, %v1730_v33  ;;  %v1843_v37 = vpop.f32.mrb[1].mxu1  ;;  %v1733_v38 = vpop.f32.mrb[2].mxu0 }
 0x147   : > { %v1844_v39 = vadd.f32 %v1843_v37, %v1842_v34  ;;  %v1845_v40 = vpop.f32.mrb[2].mxu1  ;;  %v1734_v41 = vpop.f32.mrb[3].mxu0  ;;  %v317_v37 = vld [vmem:[#allocation2 + $0x38] sm:$0xff] }
 0x148   : > { %v1735_v43 = vadd.f32 %v1734_v41, %v1733_v38  ;;  %v1846_v44 = vpop.f32.mrb[3].mxu1 }
 0x149   : > { %v1178_v45 = vadd.f32 %v1844_v39, %v1732_v36  ;;  %v1847_v46 = vadd.f32 %v1846_v44, %v1845_v40 }
 0x14b   : > { %v1304_v48 = vadd.f32 %v1178_v45, %v310_v42  ;;  %v1181_v49 = vadd.f32 %v1847_v46, %v1735_v43 }
 0x14c   : > { %v1736_v50 = vpop.f32.mrb[4].mxu0 }
 0x14d   : > { %1336 = vst [vmem:[#allocation2] sm:$0xff] %v1304_v48  ;;  %v1305_v51 = vadd.f32 %v1181_v49, %v311_v47  ;;  %v1848_v52 = vpop.f32.mrb[4].mxu1  ;;  %v1737_v53 = vpop.f32.mrb[5].mxu0 }
 0x14e   : > { %v1738_v54 = vadd.f32 %v1737_v53, %v1736_v50  ;;  %v1849_v55 = vpop.f32.mrb[5].mxu1  ;;  %v1739_v56 = vpop.f32.mrb[6].mxu0  ;;  %v318_v50 = vld [vmem:[#allocation2 + $0x40] sm:$0xff] }
 0x14f   : > { %1337 = vst [vmem:[#allocation2 + $0x8] sm:$0xff] %v1305_v51  ;;  %v1850_v57 = vadd.f32 %v1849_v55, %v1848_v52  ;;  %v1851_v58 = vpop.f32.mrb[6].mxu1  ;;  %v1740_v59 = vpop.f32.mrb[7].mxu0  ;;  %v319_v55 = vld [vmem:[#allocation2 + $0x48] sm:$0xff] }
 0x150   : > { %v1741_v61 = vadd.f32 %v1740_v59, %v1739_v56  ;;  %v1852_v62 = vpop.f32.mrb[7].mxu1 }
 0x151   : > { %v1186_v63 = vadd.f32 %v1850_v57, %v1738_v54  ;;  %v1853_v0 = vadd.f32 %v1852_v62, %v1851_v58 }
 0x153   : > { %v1306_v2 = vadd.f32 %v1186_v63, %v312_v60  ;;  %v1189_v3 = vadd.f32 %v1853_v0, %v1741_v61 }
 0x154   : > { %v1742_v4 = vpop.f32.mrb[8].mxu0 }
 0x155   : > { %1338 = vst [vmem:[#allocation2 + $0x10] sm:$0xff] %v1306_v2  ;;  %v1307_v5 = vadd.f32 %v1189_v3, %v313_v1  ;;  %v1854_v6 = vpop.f32.mrb[8].mxu1  ;;  %v1743_v7 = vpop.f32.mrb[9].mxu0 }
 0x156   : > { %v1744_v8 = vadd.f32 %v1743_v7, %v1742_v4  ;;  %v1855_v9 = vpop.f32.mrb[9].mxu1  ;;  %v1745_v10 = vpop.f32.mrb[10].mxu0  ;;  %v320_v4 = vld [vmem:[#allocation2 + $0x50] sm:$0xff] }
 0x157   : > { %1339 = vst [vmem:[#allocation2 + $0x18] sm:$0xff] %v1307_v5  ;;  %v1856_v11 = vadd.f32 %v1855_v9, %v1854_v6  ;;  %v1857_v12 = vpop.f32.mrb[10].mxu1  ;;  %v1746_v13 = vpop.f32.mrb[11].mxu0  ;;  %v321_v9 = vld [vmem:[#allocation2 + $0x58] sm:$0xff] }
 0x158   : > { %v1747_v15 = vadd.f32 %v1746_v13, %v1745_v10  ;;  %v1858_v16 = vpop.f32.mrb[11].mxu1 }
 0x159   : > { %v1194_v17 = vadd.f32 %v1856_v11, %v1744_v8  ;;  %v1859_v18 = vadd.f32 %v1858_v16, %v1857_v12 }
 0x15b   : > { %v1308_v20 = vadd.f32 %v1194_v17, %v314_v14  ;;  %v1197_v21 = vadd.f32 %v1859_v18, %v1747_v15 }
 0x15c   : > { %v1748_v22 = vpop.f32.mrb[12].mxu0 }
 0x15d   : > { %1340 = vst [vmem:[#allocation2 + $0x20] sm:$0xff] %v1308_v20  ;;  %v1309_v23 = vadd.f32 %v1197_v21, %v315_v19  ;;  %v1860_v24 = vpop.f32.mrb[12].mxu1  ;;  %v1749_v25 = vpop.f32.mrb[13].mxu0 }
 0x15e   : > { %v1750_v26 = vadd.f32 %v1749_v25, %v1748_v22  ;;  %v1861_v27 = vpop.f32.mrb[13].mxu1  ;;  %v1751_v28 = vpop.f32.mrb[14].mxu0  ;;  %v322_v22 = vld [vmem:[#allocation2 + $0x60] sm:$0xff] }
 0x15f   : > { %1341 = vst [vmem:[#allocation2 + $0x28] sm:$0xff] %v1309_v23  ;;  %v1862_v29 = vadd.f32 %v1861_v27, %v1860_v24  ;;  %v1863_v30 = vpop.f32.mrb[14].mxu1  ;;  %v1752_v31 = vpop.f32.mrb[15].mxu0  ;;  %v323_v27 = vld [vmem:[#allocation2 + $0x68] sm:$0xff] }
 0x160   : > { %v1753_v33 = vadd.f32 %v1752_v31, %v1751_v28  ;;  %v1864_v34 = vpop.f32.mrb[15].mxu1 }
 0x161   : > { %v1202_v35 = vadd.f32 %v1862_v29, %v1750_v26  ;;  %v1865_v36 = vadd.f32 %v1864_v34, %v1863_v30 }
 0x163   : > { %v1310_v38 = vadd.f32 %v1202_v35, %v316_v32  ;;  %v1205_v39 = vadd.f32 %v1865_v36, %v1753_v33 }
 0x164   : > { %v1754_v40 = vpop.f32.mrb[16].mxu0 }
 0x165   : > { %1342 = vst [vmem:[#allocation2 + $0x30] sm:$0xff] %v1310_v38  ;;  %v1311_v41 = vadd.f32 %v1205_v39, %v317_v37  ;;  %v1866_v42 = vpop.f32.mrb[16].mxu1  ;;  %v1755_v43 = vpop.f32.mrb[17].mxu0 }
 0x166   : > { %v1756_v44 = vadd.f32 %v1755_v43, %v1754_v40  ;;  %v1867_v45 = vpop.f32.mrb[17].mxu1  ;;  %v1757_v46 = vpop.f32.mrb[18].mxu0  ;;  %v324_v40 = vld [vmem:[#allocation2 + $0x70] sm:$0xff] }
 0x167   : > { %1343 = vst [vmem:[#allocation2 + $0x38] sm:$0xff] %v1311_v41  ;;  %v1868_v47 = vadd.f32 %v1867_v45, %v1866_v42  ;;  %v1869_v48 = vpop.f32.mrb[18].mxu1  ;;  %v1758_v49 = vpop.f32.mrb[19].mxu0  ;;  %v325_v45 = vld [vmem:[#allocation2 + $0x78] sm:$0xff] }
 0x168   : > { %v1759_v51 = vadd.f32 %v1758_v49, %v1757_v46  ;;  %v1870_v52 = vpop.f32.mrb[19].mxu1 }
 0x169   : > { %v1210_v53 = vadd.f32 %v1868_v47, %v1756_v44  ;;  %v1871_v54 = vadd.f32 %v1870_v52, %v1869_v48 }
 0x16b   : > { %v1312_v56 = vadd.f32 %v1210_v53, %v318_v50  ;;  %v1213_v57 = vadd.f32 %v1871_v54, %v1759_v51 }
 0x16c   : > { %v1760_v58 = vpop.f32.mrb[20].mxu0 }
 0x16d   : > { %1344 = vst [vmem:[#allocation2 + $0x40] sm:$0xff] %v1312_v56  ;;  %v1313_v59 = vadd.f32 %v1213_v57, %v319_v55  ;;  %v1872_v60 = vpop.f32.mrb[20].mxu1  ;;  %v1761_v61 = vpop.f32.mrb[21].mxu0 }
 0x16e   : > { %v1762_v62 = vadd.f32 %v1761_v61, %v1760_v58  ;;  %v1873_v63 = vpop.f32.mrb[21].mxu1  ;;  %v1763_v0 = vpop.f32.mrb[22].mxu0  ;;  %v326_v58 = vld [vmem:[#allocation2 + $0x80] sm:$0xff] }
 0x16f   : > { %1345 = vst [vmem:[#allocation2 + $0x48] sm:$0xff] %v1313_v59  ;;  %v1874_v1 = vadd.f32 %v1873_v63, %v1872_v60  ;;  %v1875_v2 = vpop.f32.mrb[22].mxu1  ;;  %v1764_v3 = vpop.f32.mrb[23].mxu0  ;;  %v327_v63 = vld [vmem:[#allocation2 + $0x88] sm:$0xff] }
 0x170   : > { %v1765_v5 = vadd.f32 %v1764_v3, %v1763_v0  ;;  %v1876_v6 = vpop.f32.mrb[23].mxu1 }
 0x171   : > { %v1218_v7 = vadd.f32 %v1874_v1, %v1762_v62  ;;  %v1877_v8 = vadd.f32 %v1876_v6, %v1875_v2 }
 0x173   : > { %v1314_v10 = vadd.f32 %v1218_v7, %v320_v4  ;;  %v1221_v11 = vadd.f32 %v1877_v8, %v1765_v5 }
 0x174   : > { %v1766_v12 = vpop.f32.mrb[24].mxu0 }
 0x175   : > { %1346 = vst [vmem:[#allocation2 + $0x50] sm:$0xff] %v1314_v10  ;;  %v1315_v13 = vadd.f32 %v1221_v11, %v321_v9  ;;  %v1878_v14 = vpop.f32.mrb[24].mxu1  ;;  %v1767_v15 = vpop.f32.mrb[25].mxu0 }
 0x176   : > { %v1768_v16 = vadd.f32 %v1767_v15, %v1766_v12  ;;  %v1879_v17 = vpop.f32.mrb[25].mxu1  ;;  %v1769_v18 = vpop.f32.mrb[26].mxu0  ;;  %v328_v12 = vld [vmem:[#allocation2 + $0x90] sm:$0xff] }
 0x177   : > { %1347 = vst [vmem:[#allocation2 + $0x58] sm:$0xff] %v1315_v13  ;;  %v1880_v19 = vadd.f32 %v1879_v17, %v1878_v14  ;;  %v1881_v20 = vpop.f32.mrb[26].mxu1  ;;  %v1770_v21 = vpop.f32.mrb[27].mxu0  ;;  %v329_v17 = vld [vmem:[#allocation2 + $0x98] sm:$0xff] }
 0x178   : > { %v1771_v23 = vadd.f32 %v1770_v21, %v1769_v18  ;;  %v1882_v24 = vpop.f32.mrb[27].mxu1 }
 0x179   : > { %v1226_v25 = vadd.f32 %v1880_v19, %v1768_v16  ;;  %v1883_v26 = vadd.f32 %v1882_v24, %v1881_v20 }
 0x17b   : > { %v1316_v28 = vadd.f32 %v1226_v25, %v322_v22  ;;  %v1229_v29 = vadd.f32 %v1883_v26, %v1771_v23 }
 0x17c   : > { %v1772_v30 = vpop.f32.mrb[28].mxu0 }
 0x17d   : > { %1348 = vst [vmem:[#allocation2 + $0x60] sm:$0xff] %v1316_v28  ;;  %v1317_v31 = vadd.f32 %v1229_v29, %v323_v27  ;;  %v1884_v32 = vpop.f32.mrb[28].mxu1  ;;  %v1773_v33 = vpop.f32.mrb[29].mxu0 }
 0x17e   : > { %v1774_v34 = vadd.f32 %v1773_v33, %v1772_v30  ;;  %v1885_v35 = vpop.f32.mrb[29].mxu1  ;;  %v1775_v36 = vpop.f32.mrb[30].mxu0  ;;  %v330_v30 = vld [vmem:[#allocation2 + $0xa0] sm:$0xff] }
 0x17f   : > { %1349 = vst [vmem:[#allocation2 + $0x68] sm:$0xff] %v1317_v31  ;;  %v1886_v37 = vadd.f32 %v1885_v35, %v1884_v32  ;;  %v1887_v38 = vpop.f32.mrb[30].mxu1  ;;  %v1776_v39 = vpop.f32.mrb[31].mxu0  ;;  %v331_v35 = vld [vmem:[#allocation2 + $0xa8] sm:$0xff] }
 0x180   : > { %v1777_v41 = vadd.f32 %v1776_v39, %v1775_v36  ;;  %v1888_v42 = vpop.f32.mrb[31].mxu1 }
 0x181   : > { %v1234_v43 = vadd.f32 %v1886_v37, %v1774_v34  ;;  %v1889_v44 = vadd.f32 %v1888_v42, %v1887_v38 }
 0x183   : > { %v1318_v46 = vadd.f32 %v1234_v43, %v324_v40  ;;  %v1237_v47 = vadd.f32 %v1889_v44, %v1777_v41 }
 0x184   : > { %v1778_v48 = vpop.f32.mrb[32].mxu0 }
 0x185   : > { %1350 = vst [vmem:[#allocation2 + $0x70] sm:$0xff] %v1318_v46  ;;  %v1319_v49 = vadd.f32 %v1237_v47, %v325_v45  ;;  %v1890_v50 = vpop.f32.mrb[32].mxu1  ;;  %v1779_v51 = vpop.f32.mrb[33].mxu0 }
 0x186   : > { %v1780_v52 = vadd.f32 %v1779_v51, %v1778_v48  ;;  %v1891_v53 = vpop.f32.mrb[33].mxu1  ;;  %v1781_v54 = vpop.f32.mrb[34].mxu0  ;;  %v332_v48 = vld [vmem:[#allocation2 + $0xb0] sm:$0xff] }
 0x187   : > { %1351 = vst [vmem:[#allocation2 + $0x78] sm:$0xff] %v1319_v49  ;;  %v1892_v55 = vadd.f32 %v1891_v53, %v1890_v50  ;;  %v1893_v56 = vpop.f32.mrb[34].mxu1  ;;  %v1782_v57 = vpop.f32.mrb[35].mxu0  ;;  %v333_v53 = vld [vmem:[#allocation2 + $0xb8] sm:$0xff] }
 0x188   : > { %v1783_v59 = vadd.f32 %v1782_v57, %v1781_v54  ;;  %v1894_v60 = vpop.f32.mrb[35].mxu1 }
 0x189   : > { %v1242_v61 = vadd.f32 %v1892_v55, %v1780_v52  ;;  %v1895_v62 = vadd.f32 %v1894_v60, %v1893_v56 }
 0x18b   : > { %v1320_v0 = vadd.f32 %v1242_v61, %v326_v58  ;;  %v1245_v1 = vadd.f32 %v1895_v62, %v1783_v59 }
 0x18c   : > { %v1784_v2 = vpop.f32.mrb[36].mxu0 }
 0x18d   : > { %1352 = vst [vmem:[#allocation2 + $0x80] sm:$0xff] %v1320_v0  ;;  %v1321_v3 = vadd.f32 %v1245_v1, %v327_v63  ;;  %v1896_v4 = vpop.f32.mrb[36].mxu1  ;;  %v1785_v5 = vpop.f32.mrb[37].mxu0 }
 0x18e   : > { %v1786_v6 = vadd.f32 %v1785_v5, %v1784_v2  ;;  %v1897_v7 = vpop.f32.mrb[37].mxu1  ;;  %v1787_v8 = vpop.f32.mrb[38].mxu0  ;;  %v334_v2 = vld [vmem:[#allocation2 + $0xc0] sm:$0xff] }
 0x18f   : > { %1353 = vst [vmem:[#allocation2 + $0x88] sm:$0xff] %v1321_v3  ;;  %v1898_v9 = vadd.f32 %v1897_v7, %v1896_v4  ;;  %v1899_v10 = vpop.f32.mrb[38].mxu1  ;;  %v1788_v11 = vpop.f32.mrb[39].mxu0  ;;  %v335_v7 = vld [vmem:[#allocation2 + $0xc8] sm:$0xff] }
 0x190   : > { %v1789_v13 = vadd.f32 %v1788_v11, %v1787_v8  ;;  %v1900_v14 = vpop.f32.mrb[39].mxu1 }
 0x191   : > { %v1250_v15 = vadd.f32 %v1898_v9, %v1786_v6  ;;  %v1901_v16 = vadd.f32 %v1900_v14, %v1899_v10 }
 0x193   : > { %v1322_v18 = vadd.f32 %v1250_v15, %v328_v12  ;;  %v1253_v19 = vadd.f32 %v1901_v16, %v1789_v13 }
 0x194   : > { %v1790_v20 = vpop.f32.mrb[40].mxu0 }
 0x195   : > { %1354 = vst [vmem:[#allocation2 + $0x90] sm:$0xff] %v1322_v18  ;;  %v1323_v21 = vadd.f32 %v1253_v19, %v329_v17  ;;  %v1902_v22 = vpop.f32.mrb[40].mxu1  ;;  %v1791_v23 = vpop.f32.mrb[41].mxu0 }
 0x196   : > { %v1792_v24 = vadd.f32 %v1791_v23, %v1790_v20  ;;  %v1903_v25 = vpop.f32.mrb[41].mxu1  ;;  %v1793_v26 = vpop.f32.mrb[42].mxu0  ;;  %v336_v20 = vld [vmem:[#allocation2 + $0xd0] sm:$0xff] }
 0x197   : > { %1355 = vst [vmem:[#allocation2 + $0x98] sm:$0xff] %v1323_v21  ;;  %v1904_v27 = vadd.f32 %v1903_v25, %v1902_v22  ;;  %v1905_v28 = vpop.f32.mrb[42].mxu1  ;;  %v1794_v29 = vpop.f32.mrb[43].mxu0  ;;  %v337_v25 = vld [vmem:[#allocation2 + $0xd8] sm:$0xff] }
 0x198   : > { %v1795_v31 = vadd.f32 %v1794_v29, %v1793_v26  ;;  %v1906_v32 = vpop.f32.mrb[43].mxu1 }
 0x199   : > { %v1258_v33 = vadd.f32 %v1904_v27, %v1792_v24  ;;  %v1907_v34 = vadd.f32 %v1906_v32, %v1905_v28 }
 0x19b   : > { %v1324_v36 = vadd.f32 %v1258_v33, %v330_v30  ;;  %v1261_v37 = vadd.f32 %v1907_v34, %v1795_v31 }
 0x19c   : > { %v1796_v38 = vpop.f32.mrb[44].mxu0 }
 0x19d   : > { %1356 = vst [vmem:[#allocation2 + $0xa0] sm:$0xff] %v1324_v36  ;;  %v1325_v39 = vadd.f32 %v1261_v37, %v331_v35  ;;  %v1908_v40 = vpop.f32.mrb[44].mxu1  ;;  %v1797_v41 = vpop.f32.mrb[45].mxu0 }
 0x19e   : > { %v1798_v42 = vadd.f32 %v1797_v41, %v1796_v38  ;;  %v1909_v43 = vpop.f32.mrb[45].mxu1  ;;  %v1799_v44 = vpop.f32.mrb[46].mxu0  ;;  %v338_v38 = vld [vmem:[#allocation2 + $0xe0] sm:$0xff] }
 0x19f   : > { %1357 = vst [vmem:[#allocation2 + $0xa8] sm:$0xff] %v1325_v39  ;;  %v1910_v45 = vadd.f32 %v1909_v43, %v1908_v40  ;;  %v1911_v46 = vpop.f32.mrb[46].mxu1  ;;  %v1800_v47 = vpop.f32.mrb[47].mxu0  ;;  %v339_v43 = vld [vmem:[#allocation2 + $0xe8] sm:$0xff] }
 0x1a0   : > { %v1801_v49 = vadd.f32 %v1800_v47, %v1799_v44  ;;  %v1912_v50 = vpop.f32.mrb[47].mxu1 }
 0x1a1   : > { %v1266_v51 = vadd.f32 %v1910_v45, %v1798_v42  ;;  %v1913_v52 = vadd.f32 %v1912_v50, %v1911_v46 }
 0x1a3   : > { %v1326_v54 = vadd.f32 %v1266_v51, %v332_v48  ;;  %v1269_v55 = vadd.f32 %v1913_v52, %v1801_v49 }
 0x1a4   : > { %v1802_v56 = vpop.f32.mrb[48].mxu0 }
 0x1a5   : > { %1358 = vst [vmem:[#allocation2 + $0xb0] sm:$0xff] %v1326_v54  ;;  %v1327_v57 = vadd.f32 %v1269_v55, %v333_v53  ;;  %v1914_v58 = vpop.f32.mrb[48].mxu1  ;;  %v1803_v59 = vpop.f32.mrb[49].mxu0 }
 0x1a6   : > { %v1804_v60 = vadd.f32 %v1803_v59, %v1802_v56  ;;  %v1915_v61 = vpop.f32.mrb[49].mxu1  ;;  %v1805_v62 = vpop.f32.mrb[50].mxu0  ;;  %v340_v56 = vld [vmem:[#allocation2 + $0xf0] sm:$0xff] }
 0x1a7   : > { %1359 = vst [vmem:[#allocation2 + $0xb8] sm:$0xff] %v1327_v57  ;;  %v1916_v63 = vadd.f32 %v1915_v61, %v1914_v58  ;;  %v1917_v0 = vpop.f32.mrb[50].mxu1  ;;  %v1806_v1 = vpop.f32.mrb[51].mxu0  ;;  %v341_v61 = vld [vmem:[#allocation2 + $0xf8] sm:$0xff] }
 0x1a8   : > { %v1807_v3 = vadd.f32 %v1806_v1, %v1805_v62  ;;  %v1918_v4 = vpop.f32.mrb[51].mxu1  ;;  %v1372_v1 = vld [vmem:[#allocation2] sm:$0xff] (!%p1710_p6) }
 0x1a9   : > { %v1274_v5 = vadd.f32 %v1916_v63, %v1804_v60  ;;  %v1919_v6 = vadd.f32 %v1918_v4, %v1917_v0 }
 0x1ab   : > { %v1328_v8 = vadd.f32 %v1274_v5, %v334_v2  ;;  %v1277_v9 = vadd.f32 %v1919_v6, %v1807_v3  ;;  %v2498_v2 = vld [vmem:[%s2590_s2] ss:$0 sm:$0xff] (!%p1710_p6)  ;;  %v1373_v3 = vld [vmem:[#allocation2 + $0x8] sm:$0xff] (!%p1710_p6)  ;;  %v1374_v6 = vld [vmem:[#allocation2 + $0x10] sm:$0xff] (!%p1710_p6) }
 0x1ac   : > { %v1808_v10 = vpop.f32.mrb[52].mxu0  ;;  %v1411_v4 = vadd.f32 (!%p1710_p6), %v2498_v2, %v1372_v1  ;;  %v1412_v5 = vadd.f32 (!%p1710_p6), %v2498_v2, %v1373_v3 }
 0x1ad   : > { %1360 = vst [vmem:[#allocation2 + $0xc0] sm:$0xff] %v1328_v8  ;;  %v1329_v11 = vadd.f32 %v1277_v9, %v335_v7  ;;  %v1920_v12 = vpop.f32.mrb[52].mxu1  ;;  %v1809_v13 = vpop.f32.mrb[53].mxu0  ;;  %v1375_v7 = vld [vmem:[#allocation2 + $0x18] sm:$0xff] (!%p1710_p6)  ;;  %v1376_v8 = vld [vmem:[#allocation2 + $0x20] sm:$0xff] (!%p1710_p6)  ;;  %v1413_v9 = vadd.f32 (!%p1710_p6), %v2498_v2, %v1374_v6 }
 0x1ae   : > { %v1810_v14 = vadd.f32 %v1809_v13, %v1808_v10  ;;  %v1921_v15 = vpop.f32.mrb[53].mxu1  ;;  %v1811_v16 = vpop.f32.mrb[54].mxu0  ;;  %v1414_v10 = vadd.f32 (!%p1710_p6), %v2498_v2, %v1375_v7  ;;  %v1378_v13 = vld [vmem:[#allocation2 + $0x30] sm:$0xff] (!%p1710_p6)  ;;  %1443 = vst [vmem:[%s2395_s26] sm:$0xff] (!%p1710_p6), %v1411_v4  ;;  %1444 = vst [vmem:[%s2395_s26 + $0x8] sm:$0xff] (!%p1710_p6), %v1412_v5 }
 0x1af   : > { %1361 = vst [vmem:[#allocation2 + $0xc8] sm:$0xff] %v1329_v11  ;;  %v1922_v17 = vadd.f32 %v1921_v15, %v1920_v12  ;;  %v1923_v18 = vpop.f32.mrb[54].mxu1  ;;  %v1812_v19 = vpop.f32.mrb[55].mxu0  ;;  %v1415_v11 = vadd.f32 (!%p1710_p6), %v2498_v2, %v1376_v8  ;;  %v1377_v12 = vld [vmem:[#allocation2 + $0x28] sm:$0xff] (!%p1710_p6)  ;;  %1445 = vst [vmem:[%s2395_s26 + $0x10] sm:$0xff] (!%p1710_p6), %v1413_v9 }
 0x1b0   : > { %v1813_v21 = vadd.f32 %v1812_v19, %v1811_v16  ;;  %v1924_v22 = vpop.f32.mrb[55].mxu1  ;;  %v1416_v15 = vadd.f32 (!%p1710_p6), %v2498_v2, %v1377_v12  ;;  %v1417_v16 = vadd.f32 (!%p1710_p6), %v2498_v2, %v1378_v13  ;;  %v1381_v19 = vld [vmem:[#allocation2 + $0x48] sm:$0xff] (!%p1710_p6)  ;;  %1446 = vst [vmem:[%s2395_s26 + $0x18] sm:$0xff] (!%p1710_p6), %v1414_v10 }
 0x1b1   : > { %v1282_v23 = vadd.f32 %v1922_v17, %v1810_v14  ;;  %v1925_v24 = vadd.f32 %v1924_v22, %v1923_v18  ;;  %v1379_v14 = vld [vmem:[#allocation2 + $0x38] sm:$0xff] (!%p1710_p6)  ;;  %v1380_v18 = vld [vmem:[#allocation2 + $0x40] sm:$0xff] (!%p1710_p6)  ;;  %1447 = vst [vmem:[%s2395_s26 + $0x20] sm:$0xff] (!%p1710_p6), %v1415_v11  ;;  %v1420_v22 = vadd.f32 (!%p1710_p6), %v2498_v2, %v1381_v19 }
 0x1b2   : > { %v1418_v17 = vadd.f32 (!%p1710_p6), %v2498_v2, %v1379_v14  ;;  %1448 = vst [vmem:[%s2395_s26 + $0x28] sm:$0xff] (!%p1710_p6), %v1416_v15  ;;  %1449 = vst [vmem:[%s2395_s26 + $0x30] sm:$0xff] (!%p1710_p6), %v1417_v16 }
 0x1b3   : > { %v1330_v26 = vadd.f32 %v1282_v23, %v336_v20  ;;  %v1285_v27 = vadd.f32 %v1925_v24, %v1813_v21  ;;  %v1382_v20 = vld [vmem:[#allocation2 + $0x50] sm:$0xff] (!%p1710_p6)  ;;  %v1419_v21 = vadd.f32 (!%p1710_p6), %v2498_v2, %v1380_v18  ;;  %v1383_v24 = vld [vmem:[#allocation2 + $0x58] sm:$0xff] (!%p1710_p6)  ;;  %1452 = vst [vmem:[%s2395_s26 + $0x48] sm:$0xff] (!%p1710_p6), %v1420_v22 }
 0x1b4   : > { %v1814_v28 = vpop.f32.mrb[56].mxu0  ;;  %v1421_v23 = vadd.f32 (!%p1710_p6), %v2498_v2, %v1382_v20  ;;  %1450 = vst [vmem:[%s2395_s26 + $0x38] sm:$0xff] (!%p1710_p6), %v1418_v17 }
 0x1b5   : > { %1362 = vst [vmem:[#allocation2 + $0xd0] sm:$0xff] %v1330_v26  ;;  %v1331_v29 = vadd.f32 %v1285_v27, %v337_v25  ;;  %v1926_v30 = vpop.f32.mrb[56].mxu1  ;;  %v1815_v31 = vpop.f32.mrb[57].mxu0  ;;  %v1384_v25 = vld [vmem:[#allocation2 + $0x60] sm:$0xff] (!%p1710_p6)  ;;  %v1385_v26 = vld [vmem:[#allocation2 + $0x68] sm:$0xff] (!%p1710_p6)  ;;  %v1422_v27 = vadd.f32 (!%p1710_p6), %v2498_v2, %v1383_v24  ;;  %1451 = vst [vmem:[%s2395_s26 + $0x40] sm:$0xff] (!%p1710_p6), %v1419_v21 }
 0x1b6   : > { %v1816_v32 = vadd.f32 %v1815_v31, %v1814_v28  ;;  %v1927_v33 = vpop.f32.mrb[57].mxu1  ;;  %v1817_v34 = vpop.f32.mrb[58].mxu0  ;;  %v1423_v28 = vadd.f32 (!%p1710_p6), %v2498_v2, %v1384_v25  ;;  %v1387_v31 = vld [vmem:[#allocation2 + $0x78] sm:$0xff] (!%p1710_p6)  ;;  %1453 = vst [vmem:[%s2395_s26 + $0x50] sm:$0xff] (!%p1710_p6), %v1421_v23 }
 0x1b7   : > { %1363 = vst [vmem:[#allocation2 + $0xd8] sm:$0xff] %v1331_v29  ;;  %v1928_v35 = vadd.f32 %v1927_v33, %v1926_v30  ;;  %v1929_v36 = vpop.f32.mrb[58].mxu1  ;;  %v1818_v37 = vpop.f32.mrb[59].mxu0  ;;  %v1424_v29 = vadd.f32 (!%p1710_p6), %v2498_v2, %v1385_v26  ;;  %v1386_v30 = vld [vmem:[#allocation2 + $0x70] sm:$0xff] (!%p1710_p6)  ;;  %1454 = vst [vmem:[%s2395_s26 + $0x58] sm:$0xff] (!%p1710_p6), %v1422_v27 }
 0x1b8   : > { %v1819_v39 = vadd.f32 %v1818_v37, %v1817_v34  ;;  %v1930_v40 = vpop.f32.mrb[59].mxu1  ;;  %v1425_v33 = vadd.f32 (!%p1710_p6), %v2498_v2, %v1386_v30  ;;  %v1426_v34 = vadd.f32 (!%p1710_p6), %v2498_v2, %v1387_v31  ;;  %v1390_v37 = vld [vmem:[#allocation2 + $0x90] sm:$0xff] (!%p1710_p6)  ;;  %1455 = vst [vmem:[%s2395_s26 + $0x60] sm:$0xff] (!%p1710_p6), %v1423_v28 }
 0x1b9   : > { %v1290_v41 = vadd.f32 %v1928_v35, %v1816_v32  ;;  %v1931_v42 = vadd.f32 %v1930_v40, %v1929_v36  ;;  %v1388_v32 = vld [vmem:[#allocation2 + $0x80] sm:$0xff] (!%p1710_p6)  ;;  %v1389_v36 = vld [vmem:[#allocation2 + $0x88] sm:$0xff] (!%p1710_p6)  ;;  %1456 = vst [vmem:[%s2395_s26 + $0x68] sm:$0xff] (!%p1710_p6), %v1424_v29  ;;  %v1429_v40 = vadd.f32 (!%p1710_p6), %v2498_v2, %v1390_v37 }
 0x1ba   : > { %v1427_v35 = vadd.f32 (!%p1710_p6), %v2498_v2, %v1388_v32  ;;  %1457 = vst [vmem:[%s2395_s26 + $0x70] sm:$0xff] (!%p1710_p6), %v1425_v33  ;;  %1458 = vst [vmem:[%s2395_s26 + $0x78] sm:$0xff] (!%p1710_p6), %v1426_v34 }
 0x1bb   : > { %v1332_v44 = vadd.f32 %v1290_v41, %v338_v38  ;;  %v1293_v45 = vadd.f32 %v1931_v42, %v1819_v39  ;;  %v1391_v38 = vld [vmem:[#allocation2 + $0x98] sm:$0xff] (!%p1710_p6)  ;;  %v1428_v39 = vadd.f32 (!%p1710_p6), %v2498_v2, %v1389_v36  ;;  %v1392_v42 = vld [vmem:[#allocation2 + $0xa0] sm:$0xff] (!%p1710_p6)  ;;  %1461 = vst [vmem:[%s2395_s26 + $0x90] sm:$0xff] (!%p1710_p6), %v1429_v40 }
 0x1bc   : > { %v1820_v46 = vpop.f32.mrb[60].mxu0  ;;  %v1430_v41 = vadd.f32 (!%p1710_p6), %v2498_v2, %v1391_v38  ;;  %1459 = vst [vmem:[%s2395_s26 + $0x80] sm:$0xff] (!%p1710_p6), %v1427_v35 }
 0x1bd   : > { %1364 = vst [vmem:[#allocation2 + $0xe0] sm:$0xff] %v1332_v44  ;;  %v1333_v47 = vadd.f32 %v1293_v45, %v339_v43  ;;  %v1932_v48 = vpop.f32.mrb[60].mxu1  ;;  %v1821_v49 = vpop.f32.mrb[61].mxu0  ;;  %v1393_v43 = vld [vmem:[#allocation2 + $0xa8] sm:$0xff] (!%p1710_p6)  ;;  %v1394_v44 = vld [vmem:[#allocation2 + $0xb0] sm:$0xff] (!%p1710_p6)  ;;  %v1431_v45 = vadd.f32 (!%p1710_p6), %v2498_v2, %v1392_v42  ;;  %1460 = vst [vmem:[%s2395_s26 + $0x88] sm:$0xff] (!%p1710_p6), %v1428_v39 }
 0x1be   : > { %v1822_v50 = vadd.f32 %v1821_v49, %v1820_v46  ;;  %v1933_v51 = vpop.f32.mrb[61].mxu1  ;;  %v1823_v52 = vpop.f32.mrb[62].mxu0  ;;  %v1432_v46 = vadd.f32 (!%p1710_p6), %v2498_v2, %v1393_v43  ;;  %v1396_v49 = vld [vmem:[#allocation2 + $0xc0] sm:$0xff] (!%p1710_p6)  ;;  %1462 = vst [vmem:[%s2395_s26 + $0x98] sm:$0xff] (!%p1710_p6), %v1430_v41 }
 0x1bf   : > { %1365 = vst [vmem:[#allocation2 + $0xe8] sm:$0xff] %v1333_v47  ;;  %v1934_v53 = vadd.f32 %v1933_v51, %v1932_v48  ;;  %v1935_v54 = vpop.f32.mrb[62].mxu1  ;;  %v1824_v55 = vpop.f32.mrb[63].mxu0  ;;  %v1433_v47 = vadd.f32 (!%p1710_p6), %v2498_v2, %v1394_v44  ;;  %v1395_v48 = vld [vmem:[#allocation2 + $0xb8] sm:$0xff] (!%p1710_p6)  ;;  %1463 = vst [vmem:[%s2395_s26 + $0xa0] sm:$0xff] (!%p1710_p6), %v1431_v45 }
 0x1c0   : > { %v1825_v57 = vadd.f32 %v1824_v55, %v1823_v52  ;;  %v1936_v58 = vpop.f32.mrb[63].mxu1  ;;  %v1434_v51 = vadd.f32 (!%p1710_p6), %v2498_v2, %v1395_v48  ;;  %v1435_v52 = vadd.f32 (!%p1710_p6), %v2498_v2, %v1396_v49  ;;  %v1399_v55 = vld [vmem:[#allocation2 + $0xd8] sm:$0xff] (!%p1710_p6)  ;;  %1464 = vst [vmem:[%s2395_s26 + $0xa8] sm:$0xff] (!%p1710_p6), %v1432_v46 }
 0x1c1   : > { %v1298_v59 = vadd.f32 %v1934_v53, %v1822_v50  ;;  %v1937_v60 = vadd.f32 %v1936_v58, %v1935_v54  ;;  %1371 = sbr.rel (%p1710_p6) target bundleno = 466 (0x1d2), region = 44  ;;  %v1397_v50 = vld [vmem:[#allocation2 + $0xc8] sm:$0xff] (!%p1710_p6)  ;;  %v1398_v54 = vld [vmem:[#allocation2 + $0xd0] sm:$0xff] (!%p1710_p6)  ;;  %1465 = vst [vmem:[%s2395_s26 + $0xb0] sm:$0xff] (!%p1710_p6), %v1433_v47  ;;  %v1438_v58 = vadd.f32 (!%p1710_p6), %v2498_v2, %v1399_v55 }
 0x1c2   : > { %v1436_v53 = vadd.f32 (!%p1710_p6), %v2498_v2, %v1397_v50  ;;  %1466 = vst [vmem:[%s2395_s26 + $0xb8] sm:$0xff] (!%p1710_p6), %v1434_v51  ;;  %1467 = vst [vmem:[%s2395_s26 + $0xc0] sm:$0xff] (!%p1710_p6), %v1435_v52 }
 0x1c3   : > { %v1334_v62 = vadd.f32 %v1298_v59, %v340_v56  ;;  %v1301_v63 = vadd.f32 %v1937_v60, %v1825_v57  ;;  %v1437_v57 = vadd.f32 (!%p1710_p6), %v2498_v2, %v1398_v54  ;;  %1470 = vst [vmem:[%s2395_s26 + $0xd8] sm:$0xff] (!%p1710_p6), %v1438_v58 }
 0x1c4   : > { %v1400_v56 = vld [vmem:[#allocation2 + $0xe0] sm:$0xff] (!%p1710_p6)  ;;  %1468 = vst [vmem:[%s2395_s26 + $0xc8] sm:$0xff] (!%p1710_p6), %v1436_v53 }
 0x1c5   : > { %1366 = vst [vmem:[#allocation2 + $0xf0] sm:$0xff] %v1334_v62  ;;  %v1335_v0 = vadd.f32 %v1301_v63, %v341_v61  ;;  %v1439_v59 = vadd.f32 (!%p1710_p6), %v2498_v2, %v1400_v56  ;;  %1469 = vst [vmem:[%s2395_s26 + $0xd0] sm:$0xff] (!%p1710_p6), %v1437_v57 }
 0x1c6   : > { %v1401_v60 = vld [vmem:[#allocation2 + $0xe8] sm:$0xff] (!%p1710_p6) }
 0x1c7   : > { %1367 = vst [vmem:[#allocation2 + $0xf8] sm:$0xff] %v1335_v0  ;;  %v1440_v63 = vadd.f32 (!%p1710_p6), %v2498_v2, %v1401_v60  ;;  %1471 = vst [vmem:[%s2395_s26 + $0xe0] sm:$0xff] (!%p1710_p6), %v1439_v59 }
 0x1c9   : > { %1472 = vst [vmem:[%s2395_s26 + $0xe8] sm:$0xff] %v1440_v63 }
 0x1cc   : > { %v1402_v61 = vld [vmem:[#allocation2 + $0xf0] sm:$0xff] }
 0x1cd   : > { %v1441_v0 = vadd.f32 %v2498_v2, %v1402_v61 }
 0x1ce   : > { %v1403_v62 = vld [vmem:[#allocation2 + $0xf8] sm:$0xff] }
 0x1cf   : > { %v1442_v1 = vadd.f32 %v2498_v2, %v1403_v62  ;;  %1473 = vst [vmem:[%s2395_s26 + $0xf0] sm:$0xff] %v1441_v0 }
 0x1d1   : > { %1474 = vst [vmem:[%s2395_s26 + $0xf8] sm:$0xff] %v1442_v1 }
 0x1d2 PF: > { %s16_s19 = sadd.s32 1, %s2238_s19   ;;  %s2595_s12 = smov %s2214_s13 }
 0x1d3   : > { %p13_p8 = scmp.ge.s32.totalorder %s16_s19, 50   ;;  %s2596_s13 = smov %s2218_s14 }
 0x1d4   : > { %s2597_s14 = smov %s2332_s5  ;;  %s2598_s15 = smov %s2230_s17 }
 0x1d5   : > { %s2599_s16 = smov %s2234_s18  ;;  %s2600_s17 = smov %s2603_s21 }
 0x1d6   : > { %s2601_s18 = smov %s2607_s22  ;;  %15 = sbr.rel (!%p13_p8) target bundleno = 5 (0x5), region = 86 }
 0x1dd   :  { %1503 = vsyncpa [#allocation4], 1 }
 0x1de   :  { %1505 = vsyncpa [#allocation4 + $0x1], 1 }

// kernel: generator2_forward.13
= control target key start
LH: loop header
LB: loop body
LE: loop exit
PB: predicated region body
PF: predicated region fallthrough
CT: control target
= control target key end

     0   :  { %s1425_s12 = smov 0   ;;  %s1427_s13 = smov 0   ;;  %s1618_s0 = inlined_call_operand.vmem [shape: bf16[512,256], index: 0, kind: input, shape index: {}]   ;;  %s1619_s1 = inlined_call_operand.vmem [shape: bf16[256,128], index: 1, kind: input, shape index: {}]   ;;  %s1620_s2 = inlined_call_operand.vmem [shape: f32[1,128], index: 2, kind: input, shape index: {}]   ;;  %s1621_s3 = inlined_call_operand.vmem [shape: f32[512,128], index: 3, kind: output, shape index: {}]  }
   0x1   :  { %s1429_s14 = smov 0  }
   0x2 LB: > { %s32_s15 = sadd.s32 1, %s1399_s13  ;;  %p1107_p0 = scmp.ge.s32.totalorder %s1403_s14, 1  ;;  %s1403_s14 = sphi %s1429_s14, %s13_s14   ;;  %s1399_s13 = sphi %s1427_s13, %s1623_s13   ;;  %s1395_s12 = sphi %s1425_s12, %s1622_s12  }
   0x3   : > { %p34_p1 = scmp.ge.s32.totalorder %s32_s15, 2  ;;  %p191_p2 = scmp.lt.s32.totalorder %s1403_s14, 3 }
   0x5   : > { %s1625_s15 = smov (%p34_p1, %s32_s15), 0  ;;  %p192_p3 = pnand %p1107_p0, %p191_p2 }
   0x6   : > { %v1317_v0 = vld [vmem:[%s1619_s1 + $0x40] sm:$0xff] (!%p192_p3)   ;;  %s1108_s18 = sshll.u32 (!%p192_p3), %s1395_s12, 5  ;;  %v1319_v2 = vld [vmem:[%s1619_s1 + $0x48] sm:$0xff] (!%p192_p3)   ;;  %v1321_v4 = vld [vmem:[%s1619_s1 + $0x50] sm:$0xff] (!%p192_p3)  }
   0x7   : > { %195 = sbr.rel (%p192_p3) target bundleno = 315 (0x13b), region = 32  ;;  %v1318_v1 = vld [vmem:[%s1619_s1] sm:$0xff] (!%p192_p3)   ;;  %1165 = vmatprep.subr.bf16.mxu0 (!%p192_p3), %v1317_v0  ;;  %1277 = vmatprep.subr.bf16.mxu1 (!%p192_p3), %v1317_v0  ;;  %v1320_v3 = vld [vmem:[%s1619_s1 + $0x8] sm:$0xff] (!%p192_p3)   ;;  %p236_p4 = scmp.lt.s32.totalorder (!%p192_p3), %s1108_s18, 63  ;;  %v1322_v5 = vld [vmem:[%s1619_s1 + $0x10] sm:$0xff] (!%p192_p3)  }
   0x8   : > { %1166 = vmatpush3.bf16.msra.mxu0 (!%p192_p3), %v1318_v1  ;;  %1285 = vmatpush3.bf16.msra.mxu1 (!%p192_p3), %v1318_v1  ;;  %v1323_v6 = vld [vmem:[%s1619_s1 + $0x58] sm:$0xff] (!%p192_p3)   ;;  %v1325_v8 = vld [vmem:[%s1619_s1 + $0x60] sm:$0xff] (!%p192_p3)   ;;  %v1327_v10 = vld [vmem:[%s1619_s1 + $0x68] sm:$0xff] (!%p192_p3)  }
   0x9   : > { %1167 = vmatprep.subr.bf16.mxu0 (!%p192_p3), %v1319_v2  ;;  %1278 = vmatprep.subr.bf16.mxu1 (!%p192_p3), %v1319_v2  ;;  %v1324_v7 = vld [vmem:[%s1619_s1 + $0x18] sm:$0xff] (!%p192_p3)   ;;  %v1326_v9 = vld [vmem:[%s1619_s1 + $0x20] sm:$0xff] (!%p192_p3)   ;;  %v1328_v13 = vld [vmem:[%s1619_s1 + $0x28] sm:$0xff] (!%p192_p3)  }
   0xa   : > { %v1329_v14 = vld [vmem:[%s1619_s1 + $0x70] sm:$0xff] (!%p192_p3)   ;;  %v1331_v16 = vld [vmem:[%s1619_s1 + $0x78] sm:$0xff] (!%p192_p3)   ;;  %v1536_v51 = vld [vmem:[%s1620_s2] ss:$0 sm:$0xff] (!%p192_p3) }
   0xb   : > { %v1330_v15 = vld [vmem:[%s1619_s1 + $0x30] sm:$0xff] (!%p192_p3)   ;;  %v1332_v17 = vld [vmem:[%s1619_s1 + $0x38] sm:$0xff] (!%p192_p3)  }
   0xc   : > { %1168 = vmatpush3.bf16.msra.mxu0 (!%p192_p3), %v1320_v3  ;;  %1286 = vmatpush3.bf16.msra.mxu1 (!%p192_p3), %v1320_v3 }
   0xd   : > { %1169 = vmatprep.subr.bf16.mxu0 (!%p192_p3), %v1321_v4  ;;  %1279 = vmatprep.subr.bf16.mxu1 (!%p192_p3), %v1321_v4 }
   0xe   : > { %s1627_s18 = smov (!%p236_p4, %s1108_s18), 63 }
   0xf   : > { %s1164_s6 = sshll.u32 %s1627_s18, 3 }
  0x10   : > { %1170 = vmatpush3.bf16.msra.mxu0 %v1322_v5  ;;  %1287 = vmatpush3.bf16.msra.mxu1 %v1322_v5  ;;  %s1478_s11 = scalar_lea.vmem %s1618_s0, %s1164_s6  ;;  %s1543_s8 = scalar_lea.vmem %s1621_s3, %s1164_s6 }
  0x11   : > { %1171 = vmatprep.subr.bf16.mxu0 %v1323_v6  ;;  %1280 = vmatprep.subr.bf16.mxu1 %v1323_v6  ;;  %v1335_v11 = vld [vmem:[%s1478_s11 + $0x4] ss:$8 sps:$4 sm:$0xff]   ;;  %v1333_v18 = vld [vmem:[%s1478_s11] ss:$8 sps:$4 sm:$0xff]   ;;  %v1339_v20 = vld [vmem:[%s1478_s11 + $0x14] ss:$8 sps:$4 sm:$0xff]  }
  0x12   : > { %v1338_v12 = vld [vmem:[%s1478_s11 + $0x84] ss:$8 sps:$4 sm:$0xff]   ;;  %688 = vmatprep.mubr.bf16.mxu0 %v1335_v11  ;;  %v1336_v19 = vld [vmem:[%s1478_s11 + $0x80] ss:$8 sps:$4 sm:$0xff]   ;;  %v1341_v21 = vld [vmem:[%s1478_s11 + $0x94] ss:$8 sps:$4 sm:$0xff]  }
  0x13   : > { %752 = vmatprep.mubr.bf16.mxu1 %v1338_v12  ;;  %v1343_v22 = vld [vmem:[%s1478_s11 + $0x10] ss:$8 sps:$4 sm:$0xff]   ;;  %v1345_v24 = vld [vmem:[%s1478_s11 + $0x24] ss:$8 sps:$4 sm:$0xff]   ;;  %v1349_v26 = vld [vmem:[%s1478_s11 + $0x20] ss:$8 sps:$4 sm:$0xff]  }
  0x14   : > { %1172 = vmatpush3.bf16.msra.mxu0 %v1324_v7  ;;  %1288 = vmatpush3.bf16.msra.mxu1 %v1324_v7  ;;  %v1344_v23 = vld [vmem:[%s1478_s11 + $0x90] ss:$8 sps:$4 sm:$0xff]   ;;  %v1347_v25 = vld [vmem:[%s1478_s11 + $0xa4] ss:$8 sps:$4 sm:$0xff]   ;;  %v1350_v27 = vld [vmem:[%s1478_s11 + $0xa0] ss:$8 sps:$4 sm:$0xff]  }
  0x15   : > { %1173 = vmatprep.subr.bf16.mxu0 %v1325_v8  ;;  %1281 = vmatprep.subr.bf16.mxu1 %v1325_v8  ;;  %v1351_v28 = vld [vmem:[%s1478_s11 + $0x34] ss:$8 sps:$4 sm:$0xff]   ;;  %v1355_v30 = vld [vmem:[%s1478_s11 + $0x30] ss:$8 sps:$4 sm:$0xff]   ;;  %v1357_v32 = vld [vmem:[%s1478_s11 + $0x44] ss:$8 sps:$4 sm:$0xff]  }
  0x16   : > { %v1353_v29 = vld [vmem:[%s1478_s11 + $0xb4] ss:$8 sps:$4 sm:$0xff]   ;;  %v1356_v31 = vld [vmem:[%s1478_s11 + $0xb0] ss:$8 sps:$4 sm:$0xff]   ;;  %v1359_v33 = vld [vmem:[%s1478_s11 + $0xc4] ss:$8 sps:$4 sm:$0xff]  }
  0x17   : > { %v1361_v34 = vld [vmem:[%s1478_s11 + $0x40] ss:$8 sps:$4 sm:$0xff]   ;;  %v1363_v36 = vld [vmem:[%s1478_s11 + $0x54] ss:$8 sps:$4 sm:$0xff]   ;;  %v1367_v38 = vld [vmem:[%s1478_s11 + $0x50] ss:$8 sps:$4 sm:$0xff]  }
  0x18   : > { %1174 = vmatpush3.bf16.msra.mxu0 %v1326_v9  ;;  %1289 = vmatpush3.bf16.msra.mxu1 %v1326_v9  ;;  %v1362_v35 = vld [vmem:[%s1478_s11 + $0xc0] ss:$8 sps:$4 sm:$0xff]   ;;  %v1365_v37 = vld [vmem:[%s1478_s11 + $0xd4] ss:$8 sps:$4 sm:$0xff]   ;;  %v1368_v39 = vld [vmem:[%s1478_s11 + $0xd0] ss:$8 sps:$4 sm:$0xff]  }
  0x19   : > { %1175 = vmatprep.subr.bf16.mxu0 %v1327_v10  ;;  %1282 = vmatprep.subr.bf16.mxu1 %v1327_v10  ;;  %v1369_v40 = vld [vmem:[%s1478_s11 + $0x64] ss:$8 sps:$4 sm:$0xff]   ;;  %v1373_v42 = vld [vmem:[%s1478_s11 + $0x60] ss:$8 sps:$4 sm:$0xff]   ;;  %v1375_v44 = vld [vmem:[%s1478_s11 + $0x74] ss:$8 sps:$4 sm:$0xff]  }
  0x1a   : > { %v1371_v41 = vld [vmem:[%s1478_s11 + $0xe4] ss:$8 sps:$4 sm:$0xff]   ;;  %v1374_v43 = vld [vmem:[%s1478_s11 + $0xe0] ss:$8 sps:$4 sm:$0xff]   ;;  %v1377_v45 = vld [vmem:[%s1478_s11 + $0xf4] ss:$8 sps:$4 sm:$0xff]  }
  0x1b   : > { %v1379_v46 = vld [vmem:[%s1478_s11 + $0x70] ss:$8 sps:$4 sm:$0xff]  }
  0x1c   : > { %1176 = vmatpush3.bf16.msra.mxu0 %v1328_v13  ;;  %1290 = vmatpush3.bf16.msra.mxu1 %v1328_v13  ;;  %v1380_v47 = vld [vmem:[%s1478_s11 + $0xf0] ss:$8 sps:$4 sm:$0xff]  }
  0x1d   : > { %1177 = vmatprep.subr.bf16.mxu0 %v1329_v14  ;;  %1283 = vmatprep.subr.bf16.mxu1 %v1329_v14 }
  0x20   : > { %1178 = vmatpush3.bf16.msra.mxu0 %v1330_v15  ;;  %1291 = vmatpush3.bf16.msra.mxu1 %v1330_v15 }
  0x21   : > { %1179 = vmatprep.subr.bf16.mxu0 %v1331_v16  ;;  %1284 = vmatprep.subr.bf16.mxu1 %v1331_v16 }
  0x24   : > { %1180 = vmatpush3.bf16.msra.mxu0 %v1332_v17  ;;  %1292 = vmatpush3.bf16.msra.mxu1 %v1332_v17 }
  0x27   : > { %689 = vmatmul.mubr.bf16.vlgmr.msra.gmra.mrb[0].mxu0 %v1333_v18  ;;  %753 = vmatmul.mubr.bf16.vlgmr.msra.gmra.mrb[0].mxu1 %v1336_v19 }
  0x28   : > { %696 = vmatprep.mubr.bf16.mxu0 %v1339_v20  ;;  %760 = vmatprep.mubr.bf16.mxu1 %v1341_v21 }
  0x2f   : > { %697 = vmatmul.mubr.bf16.gmra.mrb[4].mxu0 %v1343_v22  ;;  %761 = vmatmul.mubr.bf16.gmra.mrb[4].mxu1 %v1344_v23 }
  0x30   : > { %704 = vmatprep.mubr.bf16.mxu0 %v1345_v24  ;;  %768 = vmatprep.mubr.bf16.mxu1 %v1347_v25 }
  0x37   : > { %705 = vmatmul.mubr.bf16.gmra.mrb[8].mxu0 %v1349_v26  ;;  %769 = vmatmul.mubr.bf16.gmra.mrb[8].mxu1 %v1350_v27 }
  0x38   : > { %712 = vmatprep.mubr.bf16.mxu0 %v1351_v28  ;;  %776 = vmatprep.mubr.bf16.mxu1 %v1353_v29 }
  0x3f   : > { %713 = vmatmul.mubr.bf16.gmra.mrb[12].mxu0 %v1355_v30  ;;  %777 = vmatmul.mubr.bf16.gmra.mrb[12].mxu1 %v1356_v31 }
  0x40   : > { %720 = vmatprep.mubr.bf16.mxu0 %v1357_v32  ;;  %784 = vmatprep.mubr.bf16.mxu1 %v1359_v33 }
  0x47   : > { %721 = vmatmul.mubr.bf16.gmra.mrb[16].mxu0 %v1361_v34  ;;  %785 = vmatmul.mubr.bf16.gmra.mrb[16].mxu1 %v1362_v35 }
  0x48   : > { %728 = vmatprep.mubr.bf16.mxu0 %v1363_v36  ;;  %792 = vmatprep.mubr.bf16.mxu1 %v1365_v37 }
  0x4f   : > { %729 = vmatmul.mubr.bf16.gmra.mrb[20].mxu0 %v1367_v38  ;;  %793 = vmatmul.mubr.bf16.gmra.mrb[20].mxu1 %v1368_v39 }
  0x50   : > { %736 = vmatprep.mubr.bf16.mxu0 %v1369_v40  ;;  %800 = vmatprep.mubr.bf16.mxu1 %v1371_v41 }
  0x57   : > { %737 = vmatmul.mubr.bf16.gmra.mrb[24].mxu0 %v1373_v42  ;;  %801 = vmatmul.mubr.bf16.gmra.mrb[24].mxu1 %v1374_v43 }
  0x58   : > { %744 = vmatprep.mubr.bf16.mxu0 %v1375_v44  ;;  %808 = vmatprep.mubr.bf16.mxu1 %v1377_v45 }
  0x5f   : > { %745 = vmatmul.mubr.bf16.gmra.mrb[28].mxu0 %v1379_v46  ;;  %809 = vmatmul.mubr.bf16.gmra.mrb[28].mxu1 %v1380_v47 }
  0xfa   : > { %v1181_v48 = vpop.f32.mrb[0].mxu0  ;;  %v1229_v49 = vpop.f32.mrb[0].mxu1 }
  0xfb   : > { %v1182_v50 = vpop.f32.mrb[1].mxu0  ;;  %v1230_v52 = vpop.f32.mrb[1].mxu1 }
  0xfc   : > { %v1183_v53 = vadd.f32 %v1182_v50, %v1181_v48  ;;  %v1231_v54 = vadd.f32 %v1230_v52, %v1229_v49  ;;  %v1184_v55 = vpop.f32.mrb[2].mxu0  ;;  %v1232_v56 = vpop.f32.mrb[2].mxu1 }
  0xfd   : > { %v1185_v57 = vpop.f32.mrb[3].mxu0  ;;  %v1233_v58 = vpop.f32.mrb[3].mxu1 }
  0xfe   : > { %v923_v59 = vadd.f32 %v1183_v53, %v1536_v51  ;;  %v939_v60 = vadd.f32 %v1231_v54, %v1536_v51  ;;  %v1186_v61 = vadd.f32 %v1185_v57, %v1184_v55  ;;  %v1234_v62 = vadd.f32 %v1233_v58, %v1232_v56 }
 0x100   : > { %955 = vst [vmem:[%s1543_s8] sm:$0xff] %v923_v59  ;;  %971 = vst [vmem:[%s1543_s8 + $0x80] sm:$0xff] %v939_v60  ;;  %v924_v63 = vadd.f32 %v1186_v61, %v1536_v51  ;;  %v940_v0 = vadd.f32 %v1234_v62, %v1536_v51 }
 0x102   : > { %956 = vst [vmem:[%s1543_s8 + $0x8] sm:$0xff] %v924_v63  ;;  %972 = vst [vmem:[%s1543_s8 + $0x88] sm:$0xff] %v940_v0  ;;  %v1187_v1 = vpop.f32.mrb[4].mxu0  ;;  %v1235_v2 = vpop.f32.mrb[4].mxu1 }
 0x103   : > { %v1188_v3 = vpop.f32.mrb[5].mxu0  ;;  %v1236_v4 = vpop.f32.mrb[5].mxu1 }
 0x104   : > { %v1189_v5 = vadd.f32 %v1188_v3, %v1187_v1  ;;  %v1237_v6 = vadd.f32 %v1236_v4, %v1235_v2  ;;  %v1190_v7 = vpop.f32.mrb[6].mxu0  ;;  %v1238_v8 = vpop.f32.mrb[6].mxu1 }
 0x105   : > { %v1191_v9 = vpop.f32.mrb[7].mxu0  ;;  %v1239_v10 = vpop.f32.mrb[7].mxu1 }
 0x106   : > { %v925_v11 = vadd.f32 %v1189_v5, %v1536_v51  ;;  %v941_v12 = vadd.f32 %v1237_v6, %v1536_v51  ;;  %v1192_v13 = vadd.f32 %v1191_v9, %v1190_v7  ;;  %v1240_v14 = vadd.f32 %v1239_v10, %v1238_v8 }
 0x108   : > { %957 = vst [vmem:[%s1543_s8 + $0x10] sm:$0xff] %v925_v11  ;;  %973 = vst [vmem:[%s1543_s8 + $0x90] sm:$0xff] %v941_v12  ;;  %v926_v15 = vadd.f32 %v1192_v13, %v1536_v51  ;;  %v942_v16 = vadd.f32 %v1240_v14, %v1536_v51 }
 0x10a   : > { %958 = vst [vmem:[%s1543_s8 + $0x18] sm:$0xff] %v926_v15  ;;  %974 = vst [vmem:[%s1543_s8 + $0x98] sm:$0xff] %v942_v16  ;;  %v1193_v17 = vpop.f32.mrb[8].mxu0  ;;  %v1241_v18 = vpop.f32.mrb[8].mxu1 }
 0x10b   : > { %v1194_v19 = vpop.f32.mrb[9].mxu0  ;;  %v1242_v20 = vpop.f32.mrb[9].mxu1 }
 0x10c   : > { %v1195_v21 = vadd.f32 %v1194_v19, %v1193_v17  ;;  %v1243_v22 = vadd.f32 %v1242_v20, %v1241_v18  ;;  %v1196_v23 = vpop.f32.mrb[10].mxu0  ;;  %v1244_v24 = vpop.f32.mrb[10].mxu1 }
 0x10d   : > { %v1197_v25 = vpop.f32.mrb[11].mxu0  ;;  %v1245_v26 = vpop.f32.mrb[11].mxu1 }
 0x10e   : > { %v927_v27 = vadd.f32 %v1195_v21, %v1536_v51  ;;  %v943_v28 = vadd.f32 %v1243_v22, %v1536_v51  ;;  %v1198_v29 = vadd.f32 %v1197_v25, %v1196_v23  ;;  %v1246_v30 = vadd.f32 %v1245_v26, %v1244_v24 }
 0x110   : > { %959 = vst [vmem:[%s1543_s8 + $0x20] sm:$0xff] %v927_v27  ;;  %975 = vst [vmem:[%s1543_s8 + $0xa0] sm:$0xff] %v943_v28  ;;  %v928_v31 = vadd.f32 %v1198_v29, %v1536_v51  ;;  %v944_v32 = vadd.f32 %v1246_v30, %v1536_v51 }
 0x112   : > { %960 = vst [vmem:[%s1543_s8 + $0x28] sm:$0xff] %v928_v31  ;;  %976 = vst [vmem:[%s1543_s8 + $0xa8] sm:$0xff] %v944_v32  ;;  %v1199_v33 = vpop.f32.mrb[12].mxu0  ;;  %v1247_v34 = vpop.f32.mrb[12].mxu1 }
 0x113   : > { %v1200_v35 = vpop.f32.mrb[13].mxu0  ;;  %v1248_v36 = vpop.f32.mrb[13].mxu1 }
 0x114   : > { %v1201_v37 = vadd.f32 %v1200_v35, %v1199_v33  ;;  %v1249_v38 = vadd.f32 %v1248_v36, %v1247_v34  ;;  %v1202_v39 = vpop.f32.mrb[14].mxu0  ;;  %v1250_v40 = vpop.f32.mrb[14].mxu1 }
 0x115   : > { %v1203_v41 = vpop.f32.mrb[15].mxu0  ;;  %v1251_v42 = vpop.f32.mrb[15].mxu1 }
 0x116   : > { %v929_v43 = vadd.f32 %v1201_v37, %v1536_v51  ;;  %v945_v44 = vadd.f32 %v1249_v38, %v1536_v51  ;;  %v1204_v45 = vadd.f32 %v1203_v41, %v1202_v39  ;;  %v1252_v46 = vadd.f32 %v1251_v42, %v1250_v40 }
 0x118   : > { %961 = vst [vmem:[%s1543_s8 + $0x30] sm:$0xff] %v929_v43  ;;  %977 = vst [vmem:[%s1543_s8 + $0xb0] sm:$0xff] %v945_v44  ;;  %v930_v47 = vadd.f32 %v1204_v45, %v1536_v51  ;;  %v946_v48 = vadd.f32 %v1252_v46, %v1536_v51 }
 0x11a   : > { %962 = vst [vmem:[%s1543_s8 + $0x38] sm:$0xff] %v930_v47  ;;  %978 = vst [vmem:[%s1543_s8 + $0xb8] sm:$0xff] %v946_v48  ;;  %v1205_v49 = vpop.f32.mrb[16].mxu0  ;;  %v1253_v50 = vpop.f32.mrb[16].mxu1 }
 0x11b   : > { %v1206_v52 = vpop.f32.mrb[17].mxu0  ;;  %v1254_v53 = vpop.f32.mrb[17].mxu1 }
 0x11c   : > { %v1207_v54 = vadd.f32 %v1206_v52, %v1205_v49  ;;  %v1255_v55 = vadd.f32 %v1254_v53, %v1253_v50  ;;  %v1208_v56 = vpop.f32.mrb[18].mxu0  ;;  %v1256_v57 = vpop.f32.mrb[18].mxu1 }
 0x11d   : > { %v1209_v58 = vpop.f32.mrb[19].mxu0  ;;  %v1257_v59 = vpop.f32.mrb[19].mxu1 }
 0x11e   : > { %v931_v60 = vadd.f32 %v1207_v54, %v1536_v51  ;;  %v947_v61 = vadd.f32 %v1255_v55, %v1536_v51  ;;  %v1210_v62 = vadd.f32 %v1209_v58, %v1208_v56  ;;  %v1258_v63 = vadd.f32 %v1257_v59, %v1256_v57 }
 0x120   : > { %963 = vst [vmem:[%s1543_s8 + $0x40] sm:$0xff] %v931_v60  ;;  %979 = vst [vmem:[%s1543_s8 + $0xc0] sm:$0xff] %v947_v61  ;;  %v932_v0 = vadd.f32 %v1210_v62, %v1536_v51  ;;  %v948_v1 = vadd.f32 %v1258_v63, %v1536_v51 }
 0x122   : > { %964 = vst [vmem:[%s1543_s8 + $0x48] sm:$0xff] %v932_v0  ;;  %980 = vst [vmem:[%s1543_s8 + $0xc8] sm:$0xff] %v948_v1  ;;  %v1211_v2 = vpop.f32.mrb[20].mxu0  ;;  %v1259_v3 = vpop.f32.mrb[20].mxu1 }
 0x123   : > { %v1212_v4 = vpop.f32.mrb[21].mxu0  ;;  %v1260_v5 = vpop.f32.mrb[21].mxu1 }
 0x124   : > { %v1213_v6 = vadd.f32 %v1212_v4, %v1211_v2  ;;  %v1261_v7 = vadd.f32 %v1260_v5, %v1259_v3  ;;  %v1214_v8 = vpop.f32.mrb[22].mxu0  ;;  %v1262_v9 = vpop.f32.mrb[22].mxu1 }
 0x125   : > { %v1215_v10 = vpop.f32.mrb[23].mxu0  ;;  %v1263_v11 = vpop.f32.mrb[23].mxu1 }
 0x126   : > { %v933_v12 = vadd.f32 %v1213_v6, %v1536_v51  ;;  %v949_v13 = vadd.f32 %v1261_v7, %v1536_v51  ;;  %v1216_v14 = vadd.f32 %v1215_v10, %v1214_v8  ;;  %v1264_v15 = vadd.f32 %v1263_v11, %v1262_v9 }
 0x128   : > { %965 = vst [vmem:[%s1543_s8 + $0x50] sm:$0xff] %v933_v12  ;;  %981 = vst [vmem:[%s1543_s8 + $0xd0] sm:$0xff] %v949_v13  ;;  %v934_v16 = vadd.f32 %v1216_v14, %v1536_v51  ;;  %v950_v17 = vadd.f32 %v1264_v15, %v1536_v51 }
 0x12a   : > { %966 = vst [vmem:[%s1543_s8 + $0x58] sm:$0xff] %v934_v16  ;;  %982 = vst [vmem:[%s1543_s8 + $0xd8] sm:$0xff] %v950_v17  ;;  %v1217_v18 = vpop.f32.mrb[24].mxu0  ;;  %v1265_v19 = vpop.f32.mrb[24].mxu1 }
 0x12b   : > { %v1218_v20 = vpop.f32.mrb[25].mxu0  ;;  %v1266_v21 = vpop.f32.mrb[25].mxu1 }
 0x12c   : > { %v1219_v22 = vadd.f32 %v1218_v20, %v1217_v18  ;;  %v1267_v23 = vadd.f32 %v1266_v21, %v1265_v19  ;;  %v1220_v24 = vpop.f32.mrb[26].mxu0  ;;  %v1268_v25 = vpop.f32.mrb[26].mxu1 }
 0x12d   : > { %v1221_v26 = vpop.f32.mrb[27].mxu0  ;;  %v1269_v27 = vpop.f32.mrb[27].mxu1 }
 0x12e   : > { %v935_v28 = vadd.f32 %v1219_v22, %v1536_v51  ;;  %v951_v29 = vadd.f32 %v1267_v23, %v1536_v51  ;;  %v1222_v30 = vadd.f32 %v1221_v26, %v1220_v24  ;;  %v1270_v31 = vadd.f32 %v1269_v27, %v1268_v25 }
 0x130   : > { %967 = vst [vmem:[%s1543_s8 + $0x60] sm:$0xff] %v935_v28  ;;  %983 = vst [vmem:[%s1543_s8 + $0xe0] sm:$0xff] %v951_v29  ;;  %v936_v32 = vadd.f32 %v1222_v30, %v1536_v51  ;;  %v952_v33 = vadd.f32 %v1270_v31, %v1536_v51 }
 0x132   : > { %968 = vst [vmem:[%s1543_s8 + $0x68] sm:$0xff] %v936_v32  ;;  %984 = vst [vmem:[%s1543_s8 + $0xe8] sm:$0xff] %v952_v33  ;;  %v1223_v34 = vpop.f32.mrb[28].mxu0  ;;  %v1271_v35 = vpop.f32.mrb[28].mxu1 }
 0x133   : > { %v1224_v36 = vpop.f32.mrb[29].mxu0  ;;  %v1272_v37 = vpop.f32.mrb[29].mxu1 }
 0x134   : > { %v1225_v38 = vadd.f32 %v1224_v36, %v1223_v34  ;;  %v1273_v39 = vadd.f32 %v1272_v37, %v1271_v35  ;;  %v1226_v40 = vpop.f32.mrb[30].mxu0  ;;  %v1274_v41 = vpop.f32.mrb[30].mxu1 }
 0x135   : > { %v1227_v42 = vpop.f32.mrb[31].mxu0  ;;  %v1275_v43 = vpop.f32.mrb[31].mxu1 }
 0x136   : > { %v937_v44 = vadd.f32 %v1225_v38, %v1536_v51  ;;  %v953_v45 = vadd.f32 %v1273_v39, %v1536_v51  ;;  %v1228_v46 = vadd.f32 %v1227_v42, %v1226_v40  ;;  %v1276_v47 = vadd.f32 %v1275_v43, %v1274_v41 }
 0x138   : > { %969 = vst [vmem:[%s1543_s8 + $0x70] sm:$0xff] %v937_v44  ;;  %985 = vst [vmem:[%s1543_s8 + $0xf0] sm:$0xff] %v953_v45  ;;  %v938_v48 = vadd.f32 %v1228_v46, %v1536_v51  ;;  %v954_v49 = vadd.f32 %v1276_v47, %v1536_v51 }
 0x13a   : > { %970 = vst [vmem:[%s1543_s8 + $0x78] sm:$0xff] %v938_v48  ;;  %986 = vst [vmem:[%s1543_s8 + $0xf8] sm:$0xff] %v954_v49 }
 0x13b PF: > { %s13_s14 = sadd.s32 1, %s1403_s14   ;;  %s1622_s12 = smov %s1399_s13 }
 0x13c   : > { %p10_p5 = scmp.ge.s32.totalorder %s13_s14, 4   ;;  %s1623_s13 = smov %s1625_s15 }
 0x13e   :  { %12 = sbr.rel (!%p10_p5) target bundleno = 2 (0x2), region = 76 }

// kernel: generator2_forward.17
= control target key start
LH: loop header
LB: loop body
LE: loop exit
PB: predicated region body
PF: predicated region fallthrough
CT: control target
= control target key end

     0   :  { %s2322_s12 = smov 0   ;;  %s2324_s13 = smov 0   ;;  %s2719_s0 = inlined_call_operand.vmem [shape: bf16[512,6144], index: 0, kind: input, shape index: {}]   ;;  %s2720_s1 = inlined_call_operand.vmem [shape: bf16[6144,128], index: 1, kind: input, shape index: {}]   ;;  %s2721_s2 = inlined_call_operand.vmem [shape: f32[1,128], index: 2, kind: input, shape index: {}]   ;;  %s2722_s3 = inlined_call_operand.vmem [shape: f32[512,128], index: 3, kind: output, shape index: {}]  }
   0x1   :  { %s2326_s14 = smov 0   ;;  %s2328_s15 = smov 0  }
   0x2   :  { %s2330_s16 = smov 0   ;;  %s2332_s17 = smov 0  }
   0x3   :  { %s2334_s18 = smov 0  }
   0x4 LB: > { %s25_s19 = sadd.s32 1, %s2291_s16  ;;  %s32_s20 = sadd.s32 1, %s2295_s17  ;;  %s2299_s18 = sphi %s2334_s18, %s13_s18   ;;  %s2295_s17 = sphi %s2332_s17, %s2728_s17   ;;  %s2291_s16 = sphi %s2330_s16, %s2727_s16   ;;  %s2287_s15 = sphi %s2328_s15, %s2726_s15   ;;  %s2283_s14 = sphi %s2326_s14, %s2725_s14   ;;  %s2279_s13 = sphi %s2324_s13, %s2724_s13   ;;  %s2275_s12 = sphi %s2322_s12, %s2723_s12  }
   0x5   : > { %p26_p0 = scmp.ge.s32.totalorder %s25_s19, 12  ;;  %p48_p1 = scmp.ne.s32.totalorder %s2279_s13, %s2275_s12 }
   0x6   : > { %p49_p2 = scmp.eq.s32.totalorder %s2299_s18, 0  ;;  %s41_s24 = sadd.s32 1, %s2279_s13 }
   0x7   : > { %s2730_s19 = smov (%p26_p0, %s25_s19), 0  ;;  %s2732_s20 = smov (!%p26_p0, %s32_s20), %s2295_s17 }
   0x8   : > { %p50_p3 = por %p49_p2, %p48_p1  ;;  %p34_p4 = scmp.ge.s32.totalorder %s2732_s20, 2 }
   0x9   : > { %s37_s21 = ssub.s32 %s2291_s16, %s2730_s19  ;;  %p1722_p6 = scmp.ge.s32.totalorder %s2299_s18, 24 }
   0xa   : > { %s2734_s20 = smov (%p34_p4, %s2732_s20), 0 }
   0xb   : > { %s36_s22 = ssub.s32 %s2295_s17, %s2734_s20  ;;  %162 = sbr.rel (%p1722_p6) target bundleno = 58 (0x3a), region = 20 }
   0xc   : > { %s38_s23 = sor.u32 %s37_s21, %s36_s22 }
   0xd   : > { %p39_p5 = scmp.eq.s32.totalorder %s38_s23, 0 }
   0xf   : > { %s2373_s25 = scalar_select %p39_p5, %s2279_s13, %s41_s24  }
  0x12   : > { %165 = sbr.rel (!%p50_p3) target bundleno = 58 (0x3a), region = 24  ;;  %s167_s26 = sand.u32 (%p50_p3), 1, %s2279_s13  }
  0x13   : > { %s1725_s27 = sshll.u32 (%p50_p3), %s2291_s16, 2  ;;  %s1723_s28 = sshll.u32 (%p50_p3), %s167_s26, 9 }
  0x14   : > { %s2059_s29 = smul.u32 (%p50_p3), 1536, %s2295_s17  ;;  %s2387_s8 = scalar_lea.vmem (%p50_p3), [#allocation3], %s1723_s28 }
  0x16   : > { %s173_s30 = sadd.s32 (%p50_p3), %s2059_s29, %s1725_s27 }
  0x17   : > { %s1727_s4 = sshll.u32 (%p50_p3), %s173_s30, 2 }
  0x18   : > { %s2382_s7 = scalar_lea.vmem (%p50_p3), %s2719_s0, %s1727_s4 }
  0x19   : > { %v188_v0 = vld [vmem:[%s2382_s7] sm:$0xff]  ;;  %v190_v1 = vld [vmem:[%s2382_s7 + $0x8] sm:$0xff] }
  0x1a   : > { %v192_v2 = vld [vmem:[%s2382_s7 + $0xc0] sm:$0xff]  ;;  %189 = vst [vmem:[%s2387_s8] sm:$0xff] %v188_v0  ;;  %191 = vst [vmem:[%s2387_s8 + $0x8] sm:$0xff] %v190_v1  ;;  %v194_v3 = vld [vmem:[%s2382_s7 + $0xc8] sm:$0xff] }
  0x1b   : > { %193 = vst [vmem:[%s2387_s8 + $0x10] sm:$0xff] %v192_v2  ;;  %v196_v4 = vld [vmem:[%s2382_s7 + $0x180] sm:$0xff]  ;;  %v198_v5 = vld [vmem:[%s2382_s7 + $0x188] sm:$0xff]  ;;  %195 = vst [vmem:[%s2387_s8 + $0x18] sm:$0xff] %v194_v3 }
  0x1c   : > { %197 = vst [vmem:[%s2387_s8 + $0x20] sm:$0xff] %v196_v4  ;;  %199 = vst [vmem:[%s2387_s8 + $0x28] sm:$0xff] %v198_v5  ;;  %v200_v6 = vld [vmem:[%s2382_s7 + $0x240] sm:$0xff]  ;;  %v202_v7 = vld [vmem:[%s2382_s7 + $0x248] sm:$0xff] }
  0x1d   : > { %v204_v8 = vld [vmem:[%s2382_s7 + $0x300] sm:$0xff]  ;;  %201 = vst [vmem:[%s2387_s8 + $0x30] sm:$0xff] %v200_v6  ;;  %203 = vst [vmem:[%s2387_s8 + $0x38] sm:$0xff] %v202_v7  ;;  %v206_v9 = vld [vmem:[%s2382_s7 + $0x308] sm:$0xff] }
  0x1e   : > { %205 = vst [vmem:[%s2387_s8 + $0x40] sm:$0xff] %v204_v8  ;;  %v208_v10 = vld [vmem:[%s2382_s7 + $0x3c0] sm:$0xff]  ;;  %v210_v11 = vld [vmem:[%s2382_s7 + $0x3c8] sm:$0xff]  ;;  %207 = vst [vmem:[%s2387_s8 + $0x48] sm:$0xff] %v206_v9 }
  0x1f   : > { %209 = vst [vmem:[%s2387_s8 + $0x50] sm:$0xff] %v208_v10  ;;  %211 = vst [vmem:[%s2387_s8 + $0x58] sm:$0xff] %v210_v11  ;;  %v212_v12 = vld [vmem:[%s2382_s7 + $0x480] sm:$0xff]  ;;  %v214_v13 = vld [vmem:[%s2382_s7 + $0x488] sm:$0xff] }
  0x20   : > { %v216_v14 = vld [vmem:[%s2382_s7 + $0x540] sm:$0xff]  ;;  %213 = vst [vmem:[%s2387_s8 + $0x60] sm:$0xff] %v212_v12  ;;  %215 = vst [vmem:[%s2387_s8 + $0x68] sm:$0xff] %v214_v13  ;;  %v218_v15 = vld [vmem:[%s2382_s7 + $0x548] sm:$0xff] }
  0x21   : > { %217 = vst [vmem:[%s2387_s8 + $0x70] sm:$0xff] %v216_v14  ;;  %v220_v16 = vld [vmem:[%s2382_s7 + $0x600] sm:$0xff]  ;;  %v222_v17 = vld [vmem:[%s2382_s7 + $0x608] sm:$0xff]  ;;  %219 = vst [vmem:[%s2387_s8 + $0x78] sm:$0xff] %v218_v15 }
  0x22   : > { %221 = vst [vmem:[%s2387_s8 + $0x80] sm:$0xff] %v220_v16  ;;  %223 = vst [vmem:[%s2387_s8 + $0x88] sm:$0xff] %v222_v17  ;;  %v224_v18 = vld [vmem:[%s2382_s7 + $0x6c0] sm:$0xff]  ;;  %v226_v19 = vld [vmem:[%s2382_s7 + $0x6c8] sm:$0xff] }
  0x23   : > { %v228_v20 = vld [vmem:[%s2382_s7 + $0x780] sm:$0xff]  ;;  %225 = vst [vmem:[%s2387_s8 + $0x90] sm:$0xff] %v224_v18  ;;  %227 = vst [vmem:[%s2387_s8 + $0x98] sm:$0xff] %v226_v19  ;;  %v230_v21 = vld [vmem:[%s2382_s7 + $0x788] sm:$0xff] }
  0x24   : > { %229 = vst [vmem:[%s2387_s8 + $0xa0] sm:$0xff] %v228_v20  ;;  %v232_v22 = vld [vmem:[%s2382_s7 + $0x840] sm:$0xff]  ;;  %v234_v23 = vld [vmem:[%s2382_s7 + $0x848] sm:$0xff]  ;;  %231 = vst [vmem:[%s2387_s8 + $0xa8] sm:$0xff] %v230_v21 }
  0x25   : > { %233 = vst [vmem:[%s2387_s8 + $0xb0] sm:$0xff] %v232_v22  ;;  %235 = vst [vmem:[%s2387_s8 + $0xb8] sm:$0xff] %v234_v23  ;;  %v236_v24 = vld [vmem:[%s2382_s7 + $0x900] sm:$0xff]  ;;  %v238_v25 = vld [vmem:[%s2382_s7 + $0x908] sm:$0xff] }
  0x26   : > { %v240_v26 = vld [vmem:[%s2382_s7 + $0x9c0] sm:$0xff]  ;;  %237 = vst [vmem:[%s2387_s8 + $0xc0] sm:$0xff] %v236_v24  ;;  %239 = vst [vmem:[%s2387_s8 + $0xc8] sm:$0xff] %v238_v25  ;;  %v242_v27 = vld [vmem:[%s2382_s7 + $0x9c8] sm:$0xff] }
  0x27   : > { %241 = vst [vmem:[%s2387_s8 + $0xd0] sm:$0xff] %v240_v26  ;;  %v244_v28 = vld [vmem:[%s2382_s7 + $0xa80] sm:$0xff]  ;;  %v246_v29 = vld [vmem:[%s2382_s7 + $0xa88] sm:$0xff]  ;;  %243 = vst [vmem:[%s2387_s8 + $0xd8] sm:$0xff] %v242_v27 }
  0x28   : > { %245 = vst [vmem:[%s2387_s8 + $0xe0] sm:$0xff] %v244_v28  ;;  %247 = vst [vmem:[%s2387_s8 + $0xe8] sm:$0xff] %v246_v29  ;;  %v248_v30 = vld [vmem:[%s2382_s7 + $0xb40] sm:$0xff]  ;;  %v250_v31 = vld [vmem:[%s2382_s7 + $0xb48] sm:$0xff] }
  0x29   : > { %v252_v32 = vld [vmem:[%s2382_s7 + $0xc00] sm:$0xff]  ;;  %249 = vst [vmem:[%s2387_s8 + $0xf0] sm:$0xff] %v248_v30  ;;  %251 = vst [vmem:[%s2387_s8 + $0xf8] sm:$0xff] %v250_v31  ;;  %v254_v33 = vld [vmem:[%s2382_s7 + $0xc08] sm:$0xff] }
  0x2a   : > { %253 = vst [vmem:[%s2387_s8 + $0x100] sm:$0xff] %v252_v32  ;;  %v256_v34 = vld [vmem:[%s2382_s7 + $0xcc0] sm:$0xff]  ;;  %v258_v35 = vld [vmem:[%s2382_s7 + $0xcc8] sm:$0xff]  ;;  %255 = vst [vmem:[%s2387_s8 + $0x108] sm:$0xff] %v254_v33 }
  0x2b   : > { %257 = vst [vmem:[%s2387_s8 + $0x110] sm:$0xff] %v256_v34  ;;  %259 = vst [vmem:[%s2387_s8 + $0x118] sm:$0xff] %v258_v35  ;;  %v260_v36 = vld [vmem:[%s2382_s7 + $0xd80] sm:$0xff]  ;;  %v262_v37 = vld [vmem:[%s2382_s7 + $0xd88] sm:$0xff] }
  0x2c   : > { %v264_v38 = vld [vmem:[%s2382_s7 + $0xe40] sm:$0xff]  ;;  %261 = vst [vmem:[%s2387_s8 + $0x120] sm:$0xff] %v260_v36  ;;  %263 = vst [vmem:[%s2387_s8 + $0x128] sm:$0xff] %v262_v37  ;;  %v266_v39 = vld [vmem:[%s2382_s7 + $0xe48] sm:$0xff] }
  0x2d   : > { %265 = vst [vmem:[%s2387_s8 + $0x130] sm:$0xff] %v264_v38  ;;  %v268_v40 = vld [vmem:[%s2382_s7 + $0xf00] sm:$0xff]  ;;  %v270_v41 = vld [vmem:[%s2382_s7 + $0xf08] sm:$0xff]  ;;  %267 = vst [vmem:[%s2387_s8 + $0x138] sm:$0xff] %v266_v39 }
  0x2e   : > { %269 = vst [vmem:[%s2387_s8 + $0x140] sm:$0xff] %v268_v40  ;;  %271 = vst [vmem:[%s2387_s8 + $0x148] sm:$0xff] %v270_v41  ;;  %v272_v42 = vld [vmem:[%s2382_s7 + $0xfc0] sm:$0xff]  ;;  %v274_v43 = vld [vmem:[%s2382_s7 + $0xfc8] sm:$0xff] }
  0x2f   : > { %v276_v44 = vld [vmem:[%s2382_s7 + $0x1080] sm:$0xff]  ;;  %273 = vst [vmem:[%s2387_s8 + $0x150] sm:$0xff] %v272_v42  ;;  %275 = vst [vmem:[%s2387_s8 + $0x158] sm:$0xff] %v274_v43  ;;  %v278_v45 = vld [vmem:[%s2382_s7 + $0x1088] sm:$0xff] }
  0x30   : > { %277 = vst [vmem:[%s2387_s8 + $0x160] sm:$0xff] %v276_v44  ;;  %v280_v46 = vld [vmem:[%s2382_s7 + $0x1140] sm:$0xff]  ;;  %v282_v47 = vld [vmem:[%s2382_s7 + $0x1148] sm:$0xff]  ;;  %279 = vst [vmem:[%s2387_s8 + $0x168] sm:$0xff] %v278_v45 }
  0x31   : > { %281 = vst [vmem:[%s2387_s8 + $0x170] sm:$0xff] %v280_v46  ;;  %283 = vst [vmem:[%s2387_s8 + $0x178] sm:$0xff] %v282_v47  ;;  %v284_v48 = vld [vmem:[%s2382_s7 + $0x1200] sm:$0xff]  ;;  %v286_v49 = vld [vmem:[%s2382_s7 + $0x1208] sm:$0xff] }
  0x32   : > { %v288_v50 = vld [vmem:[%s2382_s7 + $0x12c0] sm:$0xff]  ;;  %285 = vst [vmem:[%s2387_s8 + $0x180] sm:$0xff] %v284_v48  ;;  %287 = vst [vmem:[%s2387_s8 + $0x188] sm:$0xff] %v286_v49  ;;  %v290_v51 = vld [vmem:[%s2382_s7 + $0x12c8] sm:$0xff] }
  0x33   : > { %289 = vst [vmem:[%s2387_s8 + $0x190] sm:$0xff] %v288_v50  ;;  %v292_v52 = vld [vmem:[%s2382_s7 + $0x1380] sm:$0xff]  ;;  %v294_v53 = vld [vmem:[%s2382_s7 + $0x1388] sm:$0xff]  ;;  %291 = vst [vmem:[%s2387_s8 + $0x198] sm:$0xff] %v290_v51 }
  0x34   : > { %293 = vst [vmem:[%s2387_s8 + $0x1a0] sm:$0xff] %v292_v52  ;;  %295 = vst [vmem:[%s2387_s8 + $0x1a8] sm:$0xff] %v294_v53  ;;  %v296_v54 = vld [vmem:[%s2382_s7 + $0x1440] sm:$0xff]  ;;  %v298_v55 = vld [vmem:[%s2382_s7 + $0x1448] sm:$0xff] }
  0x35   : > { %v300_v56 = vld [vmem:[%s2382_s7 + $0x1500] sm:$0xff]  ;;  %297 = vst [vmem:[%s2387_s8 + $0x1b0] sm:$0xff] %v296_v54  ;;  %299 = vst [vmem:[%s2387_s8 + $0x1b8] sm:$0xff] %v298_v55  ;;  %v302_v57 = vld [vmem:[%s2382_s7 + $0x1508] sm:$0xff] }
  0x36   : > { %301 = vst [vmem:[%s2387_s8 + $0x1c0] sm:$0xff] %v300_v56  ;;  %v304_v58 = vld [vmem:[%s2382_s7 + $0x15c0] sm:$0xff]  ;;  %v306_v59 = vld [vmem:[%s2382_s7 + $0x15c8] sm:$0xff]  ;;  %303 = vst [vmem:[%s2387_s8 + $0x1c8] sm:$0xff] %v302_v57 }
  0x37   : > { %305 = vst [vmem:[%s2387_s8 + $0x1d0] sm:$0xff] %v304_v58  ;;  %307 = vst [vmem:[%s2387_s8 + $0x1d8] sm:$0xff] %v306_v59  ;;  %v308_v60 = vld [vmem:[%s2382_s7 + $0x1680] sm:$0xff]  ;;  %v310_v61 = vld [vmem:[%s2382_s7 + $0x1688] sm:$0xff] }
  0x38   : > { %v312_v62 = vld [vmem:[%s2382_s7 + $0x1740] sm:$0xff]  ;;  %309 = vst [vmem:[%s2387_s8 + $0x1e0] sm:$0xff] %v308_v60  ;;  %311 = vst [vmem:[%s2387_s8 + $0x1e8] sm:$0xff] %v310_v61  ;;  %v314_v63 = vld [vmem:[%s2382_s7 + $0x1748] sm:$0xff] }
  0x39   : > { %313 = vst [vmem:[%s2387_s8 + $0x1f0] sm:$0xff] %v312_v62  ;;  %315 = vst [vmem:[%s2387_s8 + $0x1f8] sm:$0xff] %v314_v63 }
  0x3a PF: > { %p1728_p7 = scmp.ge.s32.totalorder %s2299_s18, 1  ;;  %p332_p8 = scmp.lt.s32.totalorder %s2299_s18, 25 }
  0x3c   : > { %p333_p9 = pnand %p1728_p7, %p332_p8 }
  0x3d   : > { %s339_s9 = sand.u32 (!%p333_p9), 1, %s2275_s12   ;;  %s1730_s10 = sshll.u32 (!%p333_p9), %s2283_s14, 6 }
  0x3e   : > { %336 = sbr.rel (%p333_p9) target bundleno = 474 (0x1da), region = 51  ;;  %s1729_s11 = sshll.u32 (!%p333_p9), %s339_s9, 9 }
  0x3f   : > { %p379_p10 = scmp.lt.s32.totalorder (!%p333_p9), %s1730_s10, 767  ;;  %s1732_s21 = sshll.u32 (!%p333_p9), %s2287_s15, 5 }
  0x40   : > { %p391_p11 = scmp.lt.s32.totalorder (!%p333_p9), %s1732_s21, 63  ;;  %s2529_s12 = scalar_lea.vmem (!%p333_p9), [#allocation3], %s1729_s11 }
  0x41   : > { %p1734_p12 = scmp.ne.s32.totalorder (!%p333_p9), %s2283_s14, 0 }
  0x45   : > { %s2736_s10 = smov (!%p379_p10, %s1730_s10), 767  ;;  %s2738_s21 = smov (!%p391_p11, %s1732_s21), 63 }
  0x46   : > { %s1731_s22 = sshll.u32 %s2736_s10, 2  ;;  %s1733_s27 = sshll.u32 %s2738_s21, 3  ;;  %v2301_v0 = vmov (!%p1734_p12), 0.0  }
  0x47   : > { %s2522_s26 = scalar_lea.vmem %s2720_s1, %s1731_s22  ;;  %s2527_s30 = scalar_lea.vmem %s2722_s3, %s1733_s27  ;;  %404 = vst [vmem:[#allocation2] sm:$0xff] (!%p1734_p12), %v2301_v0  ;;  %405 = vst [vmem:[#allocation2 + $0x8] sm:$0xff] (!%p1734_p12), %v2301_v0 }
  0x48   : > { %403 = sbr.rel (%p1734_p12) target bundleno = 87 (0x57), region = 59  ;;  %406 = vst [vmem:[#allocation2 + $0x10] sm:$0xff] (!%p1734_p12), %v2301_v0  ;;  %407 = vst [vmem:[#allocation2 + $0x18] sm:$0xff] (!%p1734_p12), %v2301_v0 }
  0x49   : > { %408 = vst [vmem:[#allocation2 + $0x20] sm:$0xff] (!%p1734_p12), %v2301_v0  ;;  %409 = vst [vmem:[#allocation2 + $0x28] sm:$0xff] (!%p1734_p12), %v2301_v0 }
  0x4a   : > { %410 = vst [vmem:[#allocation2 + $0x30] sm:$0xff] (!%p1734_p12), %v2301_v0  ;;  %411 = vst [vmem:[#allocation2 + $0x38] sm:$0xff] (!%p1734_p12), %v2301_v0 }
  0x4b   : > { %412 = vst [vmem:[#allocation2 + $0x40] sm:$0xff] (!%p1734_p12), %v2301_v0  ;;  %413 = vst [vmem:[#allocation2 + $0x48] sm:$0xff] (!%p1734_p12), %v2301_v0 }
  0x4c   : > { %414 = vst [vmem:[#allocation2 + $0x50] sm:$0xff] (!%p1734_p12), %v2301_v0  ;;  %415 = vst [vmem:[#allocation2 + $0x58] sm:$0xff] (!%p1734_p12), %v2301_v0 }
  0x4d   : > { %416 = vst [vmem:[#allocation2 + $0x60] sm:$0xff] (!%p1734_p12), %v2301_v0  ;;  %417 = vst [vmem:[#allocation2 + $0x68] sm:$0xff] (!%p1734_p12), %v2301_v0 }
  0x4e   : > { %418 = vst [vmem:[#allocation2 + $0x70] sm:$0xff] (!%p1734_p12), %v2301_v0  ;;  %419 = vst [vmem:[#allocation2 + $0x78] sm:$0xff] (!%p1734_p12), %v2301_v0 }
  0x4f   : > { %420 = vst [vmem:[#allocation2 + $0x80] sm:$0xff] %v2301_v0  ;;  %421 = vst [vmem:[#allocation2 + $0x88] sm:$0xff] %v2301_v0 }
  0x50   : > { %422 = vst [vmem:[#allocation2 + $0x90] sm:$0xff] %v2301_v0  ;;  %423 = vst [vmem:[#allocation2 + $0x98] sm:$0xff] %v2301_v0 }
  0x51   : > { %424 = vst [vmem:[#allocation2 + $0xa0] sm:$0xff] %v2301_v0  ;;  %425 = vst [vmem:[#allocation2 + $0xa8] sm:$0xff] %v2301_v0 }
  0x52   : > { %426 = vst [vmem:[#allocation2 + $0xb0] sm:$0xff] %v2301_v0  ;;  %427 = vst [vmem:[#allocation2 + $0xb8] sm:$0xff] %v2301_v0 }
  0x53   : > { %428 = vst [vmem:[#allocation2 + $0xc0] sm:$0xff] %v2301_v0  ;;  %429 = vst [vmem:[#allocation2 + $0xc8] sm:$0xff] %v2301_v0 }
  0x54   : > { %430 = vst [vmem:[#allocation2 + $0xd0] sm:$0xff] %v2301_v0  ;;  %431 = vst [vmem:[#allocation2 + $0xd8] sm:$0xff] %v2301_v0 }
  0x55   : > { %432 = vst [vmem:[#allocation2 + $0xe0] sm:$0xff] %v2301_v0  ;;  %433 = vst [vmem:[#allocation2 + $0xe8] sm:$0xff] %v2301_v0 }
  0x56   : > { %434 = vst [vmem:[#allocation2 + $0xf0] sm:$0xff] %v2301_v0  ;;  %435 = vst [vmem:[#allocation2 + $0xf8] sm:$0xff] %v2301_v0 }
  0x57 PF: > { %v2117_v1 = vld [vmem:[%s2522_s26 + $0x40] sm:$0xff]   ;;  %v2121_v5 = vld [vmem:[%s2522_s26 + $0x48] sm:$0xff]   ;;  %v2125_v9 = vld [vmem:[%s2522_s26 + $0x50] sm:$0xff]   ;;  %p1831_p13 = scmp.ne.s32.totalorder %s2283_s14, 11 }
  0x58   : > { %v2118_v2 = vld [vmem:[%s2522_s26 + $0xc0] sm:$0xff]   ;;  %1835 = vmatprep.subr.bf16.mxu0 %v2117_v1  ;;  %v2122_v6 = vld [vmem:[%s2522_s26 + $0xc8] sm:$0xff]   ;;  %v2126_v10 = vld [vmem:[%s2522_s26 + $0xd0] sm:$0xff]  }
  0x59   : > { %v2119_v3 = vld [vmem:[%s2522_s26] sm:$0xff]   ;;  %1947 = vmatprep.subr.bf16.mxu1 %v2118_v2  ;;  %v2123_v7 = vld [vmem:[%s2522_s26 + $0x8] sm:$0xff]   ;;  %v2127_v11 = vld [vmem:[%s2522_s26 + $0x10] sm:$0xff]  }
  0x5a   : > { %v2120_v4 = vld [vmem:[%s2522_s26 + $0x80] sm:$0xff]   ;;  %1836 = vmatpush3.bf16.msra.mxu0 %v2119_v3  ;;  %v2124_v8 = vld [vmem:[%s2522_s26 + $0x88] sm:$0xff]   ;;  %v2128_v12 = vld [vmem:[%s2522_s26 + $0x90] sm:$0xff]  }
  0x5b   : > { %1948 = vmatpush3.bf16.msra.mxu1 %v2120_v4  ;;  %1837 = vmatprep.subr.bf16.mxu0 %v2121_v5  ;;  %v2129_v13 = vld [vmem:[%s2522_s26 + $0x58] sm:$0xff]   ;;  %v2133_v17 = vld [vmem:[%s2522_s26 + $0x60] sm:$0xff]   ;;  %v2137_v21 = vld [vmem:[%s2522_s26 + $0x68] sm:$0xff]  }
  0x5c   : > { %1949 = vmatprep.subr.bf16.mxu1 %v2122_v6  ;;  %v2130_v14 = vld [vmem:[%s2522_s26 + $0xd8] sm:$0xff]   ;;  %v2134_v18 = vld [vmem:[%s2522_s26 + $0xe0] sm:$0xff]   ;;  %v2138_v22 = vld [vmem:[%s2522_s26 + $0xe8] sm:$0xff]  }
  0x5d   : > { %v2131_v15 = vld [vmem:[%s2522_s26 + $0x18] sm:$0xff]   ;;  %v2135_v19 = vld [vmem:[%s2522_s26 + $0x20] sm:$0xff]   ;;  %v2139_v23 = vld [vmem:[%s2522_s26 + $0x28] sm:$0xff]  }
  0x5e   : > { %1838 = vmatpush3.bf16.msra.mxu0 %v2123_v7  ;;  %v2132_v16 = vld [vmem:[%s2522_s26 + $0x98] sm:$0xff]   ;;  %v2136_v20 = vld [vmem:[%s2522_s26 + $0xa0] sm:$0xff]   ;;  %v2140_v24 = vld [vmem:[%s2522_s26 + $0xa8] sm:$0xff]  }
  0x5f   : > { %1950 = vmatpush3.bf16.msra.mxu1 %v2124_v8  ;;  %1839 = vmatprep.subr.bf16.mxu0 %v2125_v9  ;;  %v2141_v25 = vld [vmem:[%s2522_s26 + $0x70] sm:$0xff]   ;;  %v2145_v29 = vld [vmem:[%s2522_s26 + $0x78] sm:$0xff]  }
  0x60   : > { %1951 = vmatprep.subr.bf16.mxu1 %v2126_v10  ;;  %v2142_v26 = vld [vmem:[%s2522_s26 + $0xf0] sm:$0xff]   ;;  %v2146_v30 = vld [vmem:[%s2522_s26 + $0xf8] sm:$0xff]  }
  0x61   : > { %v2143_v27 = vld [vmem:[%s2522_s26 + $0x30] sm:$0xff]   ;;  %v2147_v31 = vld [vmem:[%s2522_s26 + $0x38] sm:$0xff]  }
  0x62   : > { %1840 = vmatpush3.bf16.msra.mxu0 %v2127_v11  ;;  %v2144_v28 = vld [vmem:[%s2522_s26 + $0xb0] sm:$0xff]   ;;  %v2148_v32 = vld [vmem:[%s2522_s26 + $0xb8] sm:$0xff]  }
  0x63   : > { %1952 = vmatpush3.bf16.msra.mxu1 %v2128_v12  ;;  %1841 = vmatprep.subr.bf16.mxu0 %v2129_v13  ;;  %v2149_v33 = vld [vmem:[%s2529_s12] ss:$16 sps:$4 sm:$0xff]   ;;  %v2151_v34 = vld [vmem:[%s2529_s12 + $0x4] ss:$16 sps:$4 sm:$0xff]   ;;  %v2152_v35 = vld [vmem:[%s2529_s12 + $0x8] ss:$16 sps:$4 sm:$0xff]  }
  0x64   : > { %1953 = vmatprep.subr.bf16.mxu1 %v2130_v14  ;;  %v2154_v36 = vld [vmem:[%s2529_s12 + $0xc] ss:$16 sps:$4 sm:$0xff]   ;;  %1140 = vmatprep.mubr.bf16.mxu0 %v2151_v34  ;;  %v2155_v37 = vld [vmem:[%s2529_s12 + $0x24] ss:$16 sps:$4 sm:$0xff]   ;;  %v2159_v39 = vld [vmem:[%s2529_s12 + $0x20] ss:$16 sps:$4 sm:$0xff]  }
  0x65   : > { %1301 = vmatprep.mubr.bf16.mxu1 %v2154_v36  ;;  %v2157_v38 = vld [vmem:[%s2529_s12 + $0x2c] ss:$16 sps:$4 sm:$0xff]   ;;  %v2160_v40 = vld [vmem:[%s2529_s12 + $0x28] ss:$16 sps:$4 sm:$0xff]   ;;  %v2161_v41 = vld [vmem:[%s2529_s12 + $0x44] ss:$16 sps:$4 sm:$0xff]  }
  0x66   : > { %1842 = vmatpush3.bf16.msra.mxu0 %v2131_v15  ;;  %v2163_v42 = vld [vmem:[%s2529_s12 + $0x4c] ss:$16 sps:$4 sm:$0xff]   ;;  %v2165_v43 = vld [vmem:[%s2529_s12 + $0x40] ss:$16 sps:$4 sm:$0xff]   ;;  %v2166_v44 = vld [vmem:[%s2529_s12 + $0x48] ss:$16 sps:$4 sm:$0xff]  }
  0x67   : > { %1954 = vmatpush3.bf16.msra.mxu1 %v2132_v16  ;;  %1843 = vmatprep.subr.bf16.mxu0 %v2133_v17  ;;  %v2167_v45 = vld [vmem:[%s2529_s12 + $0x64] ss:$16 sps:$4 sm:$0xff]   ;;  %v2169_v46 = vld [vmem:[%s2529_s12 + $0x6c] ss:$16 sps:$4 sm:$0xff]   ;;  %v2171_v47 = vld [vmem:[%s2529_s12 + $0x60] ss:$16 sps:$4 sm:$0xff]  }
  0x68   : > { %1955 = vmatprep.subr.bf16.mxu1 %v2134_v18  ;;  %v2172_v48 = vld [vmem:[%s2529_s12 + $0x68] ss:$16 sps:$4 sm:$0xff]   ;;  %v2173_v49 = vld [vmem:[%s2529_s12 + $0x84] ss:$16 sps:$4 sm:$0xff]   ;;  %v2175_v50 = vld [vmem:[%s2529_s12 + $0x8c] ss:$16 sps:$4 sm:$0xff]  }
  0x69   : > { %v2177_v51 = vld [vmem:[%s2529_s12 + $0x80] ss:$16 sps:$4 sm:$0xff]   ;;  %v2178_v52 = vld [vmem:[%s2529_s12 + $0x88] ss:$16 sps:$4 sm:$0xff]   ;;  %v2179_v53 = vld [vmem:[%s2529_s12 + $0xa4] ss:$16 sps:$4 sm:$0xff]  }
  0x6a   : > { %1844 = vmatpush3.bf16.msra.mxu0 %v2135_v19  ;;  %v2181_v54 = vld [vmem:[%s2529_s12 + $0xac] ss:$16 sps:$4 sm:$0xff]   ;;  %v2183_v55 = vld [vmem:[%s2529_s12 + $0xa0] ss:$16 sps:$4 sm:$0xff]   ;;  %v2184_v56 = vld [vmem:[%s2529_s12 + $0xa8] ss:$16 sps:$4 sm:$0xff]  }
  0x6b   : > { %1956 = vmatpush3.bf16.msra.mxu1 %v2136_v20  ;;  %1845 = vmatprep.subr.bf16.mxu0 %v2137_v21  ;;  %v2185_v57 = vld [vmem:[%s2529_s12 + $0xc4] ss:$16 sps:$4 sm:$0xff]   ;;  %v2187_v58 = vld [vmem:[%s2529_s12 + $0xcc] ss:$16 sps:$4 sm:$0xff]   ;;  %v2189_v59 = vld [vmem:[%s2529_s12 + $0xc0] ss:$16 sps:$4 sm:$0xff]  }
  0x6c   : > { %1957 = vmatprep.subr.bf16.mxu1 %v2138_v22  ;;  %v2190_v60 = vld [vmem:[%s2529_s12 + $0xc8] ss:$16 sps:$4 sm:$0xff]   ;;  %v2191_v61 = vld [vmem:[%s2529_s12 + $0xe4] ss:$16 sps:$4 sm:$0xff]   ;;  %v2193_v62 = vld [vmem:[%s2529_s12 + $0xec] ss:$16 sps:$4 sm:$0xff]  }
  0x6d   : > { %v2195_v63 = vld [vmem:[%s2529_s12 + $0xe0] ss:$16 sps:$4 sm:$0xff]   ;;  %v2196_v0 = vld [vmem:[%s2529_s12 + $0xe8] ss:$16 sps:$4 sm:$0xff]   ;;  %v2197_v1 = vld [vmem:[%s2529_s12 + $0x104] ss:$16 sps:$4 sm:$0xff]  }
  0x6e   : > { %1846 = vmatpush3.bf16.msra.mxu0 %v2139_v23  ;;  %v2199_v2 = vld [vmem:[%s2529_s12 + $0x10c] ss:$16 sps:$4 sm:$0xff]   ;;  %v2201_v3 = vld [vmem:[%s2529_s12 + $0x100] ss:$16 sps:$4 sm:$0xff]   ;;  %v2202_v4 = vld [vmem:[%s2529_s12 + $0x108] ss:$16 sps:$4 sm:$0xff]  }
  0x6f   : > { %1958 = vmatpush3.bf16.msra.mxu1 %v2140_v24  ;;  %1847 = vmatprep.subr.bf16.mxu0 %v2141_v25  ;;  %v2203_v5 = vld [vmem:[%s2529_s12 + $0x124] ss:$16 sps:$4 sm:$0xff]   ;;  %v2205_v6 = vld [vmem:[%s2529_s12 + $0x12c] ss:$16 sps:$4 sm:$0xff]   ;;  %v2207_v7 = vld [vmem:[%s2529_s12 + $0x120] ss:$16 sps:$4 sm:$0xff]  }
  0x70   : > { %1959 = vmatprep.subr.bf16.mxu1 %v2142_v26  ;;  %v2208_v8 = vld [vmem:[%s2529_s12 + $0x128] ss:$16 sps:$4 sm:$0xff]   ;;  %v2209_v9 = vld [vmem:[%s2529_s12 + $0x144] ss:$16 sps:$4 sm:$0xff]   ;;  %v2211_v10 = vld [vmem:[%s2529_s12 + $0x14c] ss:$16 sps:$4 sm:$0xff]  }
  0x71   : > { %v2213_v11 = vld [vmem:[%s2529_s12 + $0x140] ss:$16 sps:$4 sm:$0xff]   ;;  %v2214_v12 = vld [vmem:[%s2529_s12 + $0x148] ss:$16 sps:$4 sm:$0xff]   ;;  %v2215_v13 = vld [vmem:[%s2529_s12 + $0x164] ss:$16 sps:$4 sm:$0xff]  }
  0x72   : > { %1848 = vmatpush3.bf16.msra.mxu0 %v2143_v27  ;;  %v2217_v14 = vld [vmem:[%s2529_s12 + $0x16c] ss:$16 sps:$4 sm:$0xff]   ;;  %v2219_v15 = vld [vmem:[%s2529_s12 + $0x160] ss:$16 sps:$4 sm:$0xff]   ;;  %v2220_v16 = vld [vmem:[%s2529_s12 + $0x168] ss:$16 sps:$4 sm:$0xff]  }
  0x73   : > { %1960 = vmatpush3.bf16.msra.mxu1 %v2144_v28  ;;  %1849 = vmatprep.subr.bf16.mxu0 %v2145_v29  ;;  %v2221_v17 = vld [vmem:[%s2529_s12 + $0x184] ss:$16 sps:$4 sm:$0xff]   ;;  %v2223_v18 = vld [vmem:[%s2529_s12 + $0x18c] ss:$16 sps:$4 sm:$0xff]   ;;  %v2225_v19 = vld [vmem:[%s2529_s12 + $0x180] ss:$16 sps:$4 sm:$0xff]  }
  0x74   : > { %1961 = vmatprep.subr.bf16.mxu1 %v2146_v30  ;;  %v2226_v20 = vld [vmem:[%s2529_s12 + $0x188] ss:$16 sps:$4 sm:$0xff]   ;;  %v2227_v21 = vld [vmem:[%s2529_s12 + $0x1a4] ss:$16 sps:$4 sm:$0xff]   ;;  %v2229_v22 = vld [vmem:[%s2529_s12 + $0x1ac] ss:$16 sps:$4 sm:$0xff]  }
  0x75   : > { %v2231_v23 = vld [vmem:[%s2529_s12 + $0x1a0] ss:$16 sps:$4 sm:$0xff]   ;;  %v2232_v24 = vld [vmem:[%s2529_s12 + $0x1a8] ss:$16 sps:$4 sm:$0xff]   ;;  %v2233_v25 = vld [vmem:[%s2529_s12 + $0x1c4] ss:$16 sps:$4 sm:$0xff]  }
  0x76   : > { %1850 = vmatpush3.bf16.msra.mxu0 %v2147_v31  ;;  %v2235_v26 = vld [vmem:[%s2529_s12 + $0x1cc] ss:$16 sps:$4 sm:$0xff]   ;;  %v2237_v27 = vld [vmem:[%s2529_s12 + $0x1c0] ss:$16 sps:$4 sm:$0xff]   ;;  %v2238_v28 = vld [vmem:[%s2529_s12 + $0x1c8] ss:$16 sps:$4 sm:$0xff]  }
  0x77   : > { %1962 = vmatpush3.bf16.msra.mxu1 %v2148_v32  ;;  %v2239_v29 = vld [vmem:[%s2529_s12 + $0x1e4] ss:$16 sps:$4 sm:$0xff]   ;;  %v2241_v30 = vld [vmem:[%s2529_s12 + $0x1ec] ss:$16 sps:$4 sm:$0xff]   ;;  %v2243_v31 = vld [vmem:[%s2529_s12 + $0x1e0] ss:$16 sps:$4 sm:$0xff]  }
  0x78   : > { %v2244_v32 = vld [vmem:[%s2529_s12 + $0x1e8] ss:$16 sps:$4 sm:$0xff]  }
  0x79   : > { %1141 = vmatmul.mubr.bf16.vlgmr.msra.gmra.mrb[0].mxu0 %v2149_v33 }
  0x7a   : > { %1302 = vmatmul.mubr.bf16.vlgmr.msra.gmra.mrb[0].mxu1 %v2152_v35  ;;  %1148 = vmatprep.mubr.bf16.mxu0 %v2155_v37 }
  0x7b   : > { %1309 = vmatprep.mubr.bf16.mxu1 %v2157_v38 }
  0x81   : > { %1149 = vmatmul.mubr.bf16.gmra.mrb[4].mxu0 %v2159_v39 }
  0x82   : > { %1310 = vmatmul.mubr.bf16.gmra.mrb[4].mxu1 %v2160_v40  ;;  %1156 = vmatprep.mubr.bf16.mxu0 %v2161_v41 }
  0x83   : > { %1317 = vmatprep.mubr.bf16.mxu1 %v2163_v42  ;;  %v436_v42 = vld [vmem:[#allocation2] sm:$0xff] }
  0x89   : > { %1157 = vmatmul.mubr.bf16.gmra.mrb[8].mxu0 %v2165_v43 }
  0x8a   : > { %1318 = vmatmul.mubr.bf16.gmra.mrb[8].mxu1 %v2166_v44  ;;  %1164 = vmatprep.mubr.bf16.mxu0 %v2167_v45 }
  0x8b   : > { %1325 = vmatprep.mubr.bf16.mxu1 %v2169_v46 }
  0x91   : > { %1165 = vmatmul.mubr.bf16.gmra.mrb[12].mxu0 %v2171_v47  ;;  %v437_v47 = vld [vmem:[#allocation2 + $0x8] sm:$0xff] }
  0x92   : > { %1326 = vmatmul.mubr.bf16.gmra.mrb[12].mxu1 %v2172_v48  ;;  %1172 = vmatprep.mubr.bf16.mxu0 %v2173_v49 }
  0x93   : > { %1333 = vmatprep.mubr.bf16.mxu1 %v2175_v50 }
  0x99   : > { %1173 = vmatmul.mubr.bf16.gmra.mrb[16].mxu0 %v2177_v51 }
  0x9a   : > { %1334 = vmatmul.mubr.bf16.gmra.mrb[16].mxu1 %v2178_v52  ;;  %1180 = vmatprep.mubr.bf16.mxu0 %v2179_v53 }
  0x9b   : > { %1341 = vmatprep.mubr.bf16.mxu1 %v2181_v54 }
  0xa1   : > { %1181 = vmatmul.mubr.bf16.gmra.mrb[20].mxu0 %v2183_v55 }
  0xa2   : > { %1342 = vmatmul.mubr.bf16.gmra.mrb[20].mxu1 %v2184_v56  ;;  %1188 = vmatprep.mubr.bf16.mxu0 %v2185_v57 }
  0xa3   : > { %1349 = vmatprep.mubr.bf16.mxu1 %v2187_v58 }
  0xa9   : > { %1189 = vmatmul.mubr.bf16.gmra.mrb[24].mxu0 %v2189_v59 }
  0xaa   : > { %1350 = vmatmul.mubr.bf16.gmra.mrb[24].mxu1 %v2190_v60  ;;  %1196 = vmatprep.mubr.bf16.mxu0 %v2191_v61  ;;  %v438_v60 = vld [vmem:[#allocation2 + $0x10] sm:$0xff] }
  0xab   : > { %1357 = vmatprep.mubr.bf16.mxu1 %v2193_v62 }
  0xb1   : > { %1197 = vmatmul.mubr.bf16.gmra.mrb[28].mxu0 %v2195_v63 }
  0xb2   : > { %1358 = vmatmul.mubr.bf16.gmra.mrb[28].mxu1 %v2196_v0  ;;  %1204 = vmatprep.mubr.bf16.mxu0 %v2197_v1  ;;  %v439_v1 = vld [vmem:[#allocation2 + $0x18] sm:$0xff] }
  0xb3   : > { %1365 = vmatprep.mubr.bf16.mxu1 %v2199_v2 }
  0xb9   : > { %1205 = vmatmul.mubr.bf16.gmra.mrb[32].mxu0 %v2201_v3 }
  0xba   : > { %1366 = vmatmul.mubr.bf16.gmra.mrb[32].mxu1 %v2202_v4  ;;  %1212 = vmatprep.mubr.bf16.mxu0 %v2203_v5 }
  0xbb   : > { %1373 = vmatprep.mubr.bf16.mxu1 %v2205_v6 }
  0xc1   : > { %1213 = vmatmul.mubr.bf16.gmra.mrb[36].mxu0 %v2207_v7 }
  0xc2   : > { %1374 = vmatmul.mubr.bf16.gmra.mrb[36].mxu1 %v2208_v8  ;;  %1220 = vmatprep.mubr.bf16.mxu0 %v2209_v9 }
  0xc3   : > { %1381 = vmatprep.mubr.bf16.mxu1 %v2211_v10 }
  0xc9   : > { %1221 = vmatmul.mubr.bf16.gmra.mrb[40].mxu0 %v2213_v11 }
  0xca   : > { %1382 = vmatmul.mubr.bf16.gmra.mrb[40].mxu1 %v2214_v12  ;;  %1228 = vmatprep.mubr.bf16.mxu0 %v2215_v13 }
  0xcb   : > { %1389 = vmatprep.mubr.bf16.mxu1 %v2217_v14  ;;  %v440_v14 = vld [vmem:[#allocation2 + $0x20] sm:$0xff] }
  0xd1   : > { %1229 = vmatmul.mubr.bf16.gmra.mrb[44].mxu0 %v2219_v15 }
  0xd2   : > { %1390 = vmatmul.mubr.bf16.gmra.mrb[44].mxu1 %v2220_v16  ;;  %1236 = vmatprep.mubr.bf16.mxu0 %v2221_v17 }
  0xd3   : > { %1397 = vmatprep.mubr.bf16.mxu1 %v2223_v18 }
  0xd9   : > { %1237 = vmatmul.mubr.bf16.gmra.mrb[48].mxu0 %v2225_v19  ;;  %v441_v19 = vld [vmem:[#allocation2 + $0x28] sm:$0xff] }
  0xda   : > { %1398 = vmatmul.mubr.bf16.gmra.mrb[48].mxu1 %v2226_v20  ;;  %1244 = vmatprep.mubr.bf16.mxu0 %v2227_v21 }
  0xdb   : > { %1405 = vmatprep.mubr.bf16.mxu1 %v2229_v22 }
  0xe1   : > { %1245 = vmatmul.mubr.bf16.gmra.mrb[52].mxu0 %v2231_v23 }
  0xe2   : > { %1406 = vmatmul.mubr.bf16.gmra.mrb[52].mxu1 %v2232_v24  ;;  %1252 = vmatprep.mubr.bf16.mxu0 %v2233_v25 }
  0xe3   : > { %1413 = vmatprep.mubr.bf16.mxu1 %v2235_v26 }
  0xe9   : > { %1253 = vmatmul.mubr.bf16.gmra.mrb[56].mxu0 %v2237_v27 }
  0xea   : > { %1414 = vmatmul.mubr.bf16.gmra.mrb[56].mxu1 %v2238_v28  ;;  %1260 = vmatprep.mubr.bf16.mxu0 %v2239_v29 }
  0xeb   : > { %1421 = vmatprep.mubr.bf16.mxu1 %v2241_v30 }
  0xf1   : > { %1261 = vmatmul.mubr.bf16.gmra.mrb[60].mxu0 %v2243_v31 }
  0xf2   : > { %1422 = vmatmul.mubr.bf16.gmra.mrb[60].mxu1 %v2244_v32  ;;  %v442_v32 = vld [vmem:[#allocation2 + $0x30] sm:$0xff] }
 0x14c   : > { %v1851_v33 = vpop.f32.mrb[0].mxu0 }
 0x14d   : > { %v1963_v34 = vpop.f32.mrb[0].mxu1  ;;  %v1852_v35 = vpop.f32.mrb[1].mxu0 }
 0x14e   : > { %v1853_v36 = vadd.f32 %v1852_v35, %v1851_v33  ;;  %v1964_v37 = vpop.f32.mrb[1].mxu1  ;;  %v1854_v38 = vpop.f32.mrb[2].mxu0 }
 0x14f   : > { %v1965_v39 = vadd.f32 %v1964_v37, %v1963_v34  ;;  %v1966_v40 = vpop.f32.mrb[2].mxu1  ;;  %v1855_v41 = vpop.f32.mrb[3].mxu0  ;;  %v443_v37 = vld [vmem:[#allocation2 + $0x38] sm:$0xff] }
 0x150   : > { %v1856_v43 = vadd.f32 %v1855_v41, %v1854_v38  ;;  %v1967_v44 = vpop.f32.mrb[3].mxu1 }
 0x151   : > { %v1304_v45 = vadd.f32 %v1965_v39, %v1853_v36  ;;  %v1968_v46 = vadd.f32 %v1967_v44, %v1966_v40 }
 0x153   : > { %v1430_v48 = vadd.f32 %v1304_v45, %v436_v42  ;;  %v1307_v49 = vadd.f32 %v1968_v46, %v1856_v43 }
 0x154   : > { %v1857_v50 = vpop.f32.mrb[4].mxu0 }
 0x155   : > { %1462 = vst [vmem:[#allocation2] sm:$0xff] %v1430_v48  ;;  %v1431_v51 = vadd.f32 %v1307_v49, %v437_v47  ;;  %v1969_v52 = vpop.f32.mrb[4].mxu1  ;;  %v1858_v53 = vpop.f32.mrb[5].mxu0 }
 0x156   : > { %v1859_v54 = vadd.f32 %v1858_v53, %v1857_v50  ;;  %v1970_v55 = vpop.f32.mrb[5].mxu1  ;;  %v1860_v56 = vpop.f32.mrb[6].mxu0  ;;  %v444_v50 = vld [vmem:[#allocation2 + $0x40] sm:$0xff] }
 0x157   : > { %1463 = vst [vmem:[#allocation2 + $0x8] sm:$0xff] %v1431_v51  ;;  %v1971_v57 = vadd.f32 %v1970_v55, %v1969_v52  ;;  %v1972_v58 = vpop.f32.mrb[6].mxu1  ;;  %v1861_v59 = vpop.f32.mrb[7].mxu0  ;;  %v445_v55 = vld [vmem:[#allocation2 + $0x48] sm:$0xff] }
 0x158   : > { %v1862_v61 = vadd.f32 %v1861_v59, %v1860_v56  ;;  %v1973_v62 = vpop.f32.mrb[7].mxu1 }
 0x159   : > { %v1312_v63 = vadd.f32 %v1971_v57, %v1859_v54  ;;  %v1974_v0 = vadd.f32 %v1973_v62, %v1972_v58 }
 0x15b   : > { %v1432_v2 = vadd.f32 %v1312_v63, %v438_v60  ;;  %v1315_v3 = vadd.f32 %v1974_v0, %v1862_v61 }
 0x15c   : > { %v1863_v4 = vpop.f32.mrb[8].mxu0 }
 0x15d   : > { %1464 = vst [vmem:[#allocation2 + $0x10] sm:$0xff] %v1432_v2  ;;  %v1433_v5 = vadd.f32 %v1315_v3, %v439_v1  ;;  %v1975_v6 = vpop.f32.mrb[8].mxu1  ;;  %v1864_v7 = vpop.f32.mrb[9].mxu0 }
 0x15e   : > { %v1865_v8 = vadd.f32 %v1864_v7, %v1863_v4  ;;  %v1976_v9 = vpop.f32.mrb[9].mxu1  ;;  %v1866_v10 = vpop.f32.mrb[10].mxu0  ;;  %v446_v4 = vld [vmem:[#allocation2 + $0x50] sm:$0xff] }
 0x15f   : > { %1465 = vst [vmem:[#allocation2 + $0x18] sm:$0xff] %v1433_v5  ;;  %v1977_v11 = vadd.f32 %v1976_v9, %v1975_v6  ;;  %v1978_v12 = vpop.f32.mrb[10].mxu1  ;;  %v1867_v13 = vpop.f32.mrb[11].mxu0  ;;  %v447_v9 = vld [vmem:[#allocation2 + $0x58] sm:$0xff] }
 0x160   : > { %v1868_v15 = vadd.f32 %v1867_v13, %v1866_v10  ;;  %v1979_v16 = vpop.f32.mrb[11].mxu1 }
 0x161   : > { %v1320_v17 = vadd.f32 %v1977_v11, %v1865_v8  ;;  %v1980_v18 = vadd.f32 %v1979_v16, %v1978_v12 }
 0x163   : > { %v1434_v20 = vadd.f32 %v1320_v17, %v440_v14  ;;  %v1323_v21 = vadd.f32 %v1980_v18, %v1868_v15 }
 0x164   : > { %v1869_v22 = vpop.f32.mrb[12].mxu0 }
 0x165   : > { %1466 = vst [vmem:[#allocation2 + $0x20] sm:$0xff] %v1434_v20  ;;  %v1435_v23 = vadd.f32 %v1323_v21, %v441_v19  ;;  %v1981_v24 = vpop.f32.mrb[12].mxu1  ;;  %v1870_v25 = vpop.f32.mrb[13].mxu0 }
 0x166   : > { %v1871_v26 = vadd.f32 %v1870_v25, %v1869_v22  ;;  %v1982_v27 = vpop.f32.mrb[13].mxu1  ;;  %v1872_v28 = vpop.f32.mrb[14].mxu0  ;;  %v448_v22 = vld [vmem:[#allocation2 + $0x60] sm:$0xff] }
 0x167   : > { %1467 = vst [vmem:[#allocation2 + $0x28] sm:$0xff] %v1435_v23  ;;  %v1983_v29 = vadd.f32 %v1982_v27, %v1981_v24  ;;  %v1984_v30 = vpop.f32.mrb[14].mxu1  ;;  %v1873_v31 = vpop.f32.mrb[15].mxu0  ;;  %v449_v27 = vld [vmem:[#allocation2 + $0x68] sm:$0xff] }
 0x168   : > { %v1874_v33 = vadd.f32 %v1873_v31, %v1872_v28  ;;  %v1985_v34 = vpop.f32.mrb[15].mxu1 }
 0x169   : > { %v1328_v35 = vadd.f32 %v1983_v29, %v1871_v26  ;;  %v1986_v36 = vadd.f32 %v1985_v34, %v1984_v30 }
 0x16b   : > { %v1436_v38 = vadd.f32 %v1328_v35, %v442_v32  ;;  %v1331_v39 = vadd.f32 %v1986_v36, %v1874_v33 }
 0x16c   : > { %v1875_v40 = vpop.f32.mrb[16].mxu0 }
 0x16d   : > { %1468 = vst [vmem:[#allocation2 + $0x30] sm:$0xff] %v1436_v38  ;;  %v1437_v41 = vadd.f32 %v1331_v39, %v443_v37  ;;  %v1987_v42 = vpop.f32.mrb[16].mxu1  ;;  %v1876_v43 = vpop.f32.mrb[17].mxu0 }
 0x16e   : > { %v1877_v44 = vadd.f32 %v1876_v43, %v1875_v40  ;;  %v1988_v45 = vpop.f32.mrb[17].mxu1  ;;  %v1878_v46 = vpop.f32.mrb[18].mxu0  ;;  %v450_v40 = vld [vmem:[#allocation2 + $0x70] sm:$0xff] }
 0x16f   : > { %1469 = vst [vmem:[#allocation2 + $0x38] sm:$0xff] %v1437_v41  ;;  %v1989_v47 = vadd.f32 %v1988_v45, %v1987_v42  ;;  %v1990_v48 = vpop.f32.mrb[18].mxu1  ;;  %v1879_v49 = vpop.f32.mrb[19].mxu0  ;;  %v451_v45 = vld [vmem:[#allocation2 + $0x78] sm:$0xff] }
 0x170   : > { %v1880_v51 = vadd.f32 %v1879_v49, %v1878_v46  ;;  %v1991_v52 = vpop.f32.mrb[19].mxu1 }
 0x171   : > { %v1336_v53 = vadd.f32 %v1989_v47, %v1877_v44  ;;  %v1992_v54 = vadd.f32 %v1991_v52, %v1990_v48 }
 0x173   : > { %v1438_v56 = vadd.f32 %v1336_v53, %v444_v50  ;;  %v1339_v57 = vadd.f32 %v1992_v54, %v1880_v51 }
 0x174   : > { %v1881_v58 = vpop.f32.mrb[20].mxu0 }
 0x175   : > { %1470 = vst [vmem:[#allocation2 + $0x40] sm:$0xff] %v1438_v56  ;;  %v1439_v59 = vadd.f32 %v1339_v57, %v445_v55  ;;  %v1993_v60 = vpop.f32.mrb[20].mxu1  ;;  %v1882_v61 = vpop.f32.mrb[21].mxu0 }
 0x176   : > { %v1883_v62 = vadd.f32 %v1882_v61, %v1881_v58  ;;  %v1994_v63 = vpop.f32.mrb[21].mxu1  ;;  %v1884_v0 = vpop.f32.mrb[22].mxu0  ;;  %v452_v58 = vld [vmem:[#allocation2 + $0x80] sm:$0xff] }
 0x177   : > { %1471 = vst [vmem:[#allocation2 + $0x48] sm:$0xff] %v1439_v59  ;;  %v1995_v1 = vadd.f32 %v1994_v63, %v1993_v60  ;;  %v1996_v2 = vpop.f32.mrb[22].mxu1  ;;  %v1885_v3 = vpop.f32.mrb[23].mxu0  ;;  %v453_v63 = vld [vmem:[#allocation2 + $0x88] sm:$0xff] }
 0x178   : > { %v1886_v5 = vadd.f32 %v1885_v3, %v1884_v0  ;;  %v1997_v6 = vpop.f32.mrb[23].mxu1 }
 0x179   : > { %v1344_v7 = vadd.f32 %v1995_v1, %v1883_v62  ;;  %v1998_v8 = vadd.f32 %v1997_v6, %v1996_v2 }
 0x17b   : > { %v1440_v10 = vadd.f32 %v1344_v7, %v446_v4  ;;  %v1347_v11 = vadd.f32 %v1998_v8, %v1886_v5 }
 0x17c   : > { %v1887_v12 = vpop.f32.mrb[24].mxu0 }
 0x17d   : > { %1472 = vst [vmem:[#allocation2 + $0x50] sm:$0xff] %v1440_v10  ;;  %v1441_v13 = vadd.f32 %v1347_v11, %v447_v9  ;;  %v1999_v14 = vpop.f32.mrb[24].mxu1  ;;  %v1888_v15 = vpop.f32.mrb[25].mxu0 }
 0x17e   : > { %v1889_v16 = vadd.f32 %v1888_v15, %v1887_v12  ;;  %v2000_v17 = vpop.f32.mrb[25].mxu1  ;;  %v1890_v18 = vpop.f32.mrb[26].mxu0  ;;  %v454_v12 = vld [vmem:[#allocation2 + $0x90] sm:$0xff] }
 0x17f   : > { %1473 = vst [vmem:[#allocation2 + $0x58] sm:$0xff] %v1441_v13  ;;  %v2001_v19 = vadd.f32 %v2000_v17, %v1999_v14  ;;  %v2002_v20 = vpop.f32.mrb[26].mxu1  ;;  %v1891_v21 = vpop.f32.mrb[27].mxu0  ;;  %v455_v17 = vld [vmem:[#allocation2 + $0x98] sm:$0xff] }
 0x180   : > { %v1892_v23 = vadd.f32 %v1891_v21, %v1890_v18  ;;  %v2003_v24 = vpop.f32.mrb[27].mxu1 }
 0x181   : > { %v1352_v25 = vadd.f32 %v2001_v19, %v1889_v16  ;;  %v2004_v26 = vadd.f32 %v2003_v24, %v2002_v20 }
 0x183   : > { %v1442_v28 = vadd.f32 %v1352_v25, %v448_v22  ;;  %v1355_v29 = vadd.f32 %v2004_v26, %v1892_v23 }
 0x184   : > { %v1893_v30 = vpop.f32.mrb[28].mxu0 }
 0x185   : > { %1474 = vst [vmem:[#allocation2 + $0x60] sm:$0xff] %v1442_v28  ;;  %v1443_v31 = vadd.f32 %v1355_v29, %v449_v27  ;;  %v2005_v32 = vpop.f32.mrb[28].mxu1  ;;  %v1894_v33 = vpop.f32.mrb[29].mxu0 }
 0x186   : > { %v1895_v34 = vadd.f32 %v1894_v33, %v1893_v30  ;;  %v2006_v35 = vpop.f32.mrb[29].mxu1  ;;  %v1896_v36 = vpop.f32.mrb[30].mxu0  ;;  %v456_v30 = vld [vmem:[#allocation2 + $0xa0] sm:$0xff] }
 0x187   : > { %1475 = vst [vmem:[#allocation2 + $0x68] sm:$0xff] %v1443_v31  ;;  %v2007_v37 = vadd.f32 %v2006_v35, %v2005_v32  ;;  %v2008_v38 = vpop.f32.mrb[30].mxu1  ;;  %v1897_v39 = vpop.f32.mrb[31].mxu0  ;;  %v457_v35 = vld [vmem:[#allocation2 + $0xa8] sm:$0xff] }
 0x188   : > { %v1898_v41 = vadd.f32 %v1897_v39, %v1896_v36  ;;  %v2009_v42 = vpop.f32.mrb[31].mxu1 }
 0x189   : > { %v1360_v43 = vadd.f32 %v2007_v37, %v1895_v34  ;;  %v2010_v44 = vadd.f32 %v2009_v42, %v2008_v38 }
 0x18b   : > { %v1444_v46 = vadd.f32 %v1360_v43, %v450_v40  ;;  %v1363_v47 = vadd.f32 %v2010_v44, %v1898_v41 }
 0x18c   : > { %v1899_v48 = vpop.f32.mrb[32].mxu0 }
 0x18d   : > { %1476 = vst [vmem:[#allocation2 + $0x70] sm:$0xff] %v1444_v46  ;;  %v1445_v49 = vadd.f32 %v1363_v47, %v451_v45  ;;  %v2011_v50 = vpop.f32.mrb[32].mxu1  ;;  %v1900_v51 = vpop.f32.mrb[33].mxu0 }
 0x18e   : > { %v1901_v52 = vadd.f32 %v1900_v51, %v1899_v48  ;;  %v2012_v53 = vpop.f32.mrb[33].mxu1  ;;  %v1902_v54 = vpop.f32.mrb[34].mxu0  ;;  %v458_v48 = vld [vmem:[#allocation2 + $0xb0] sm:$0xff] }
 0x18f   : > { %1477 = vst [vmem:[#allocation2 + $0x78] sm:$0xff] %v1445_v49  ;;  %v2013_v55 = vadd.f32 %v2012_v53, %v2011_v50  ;;  %v2014_v56 = vpop.f32.mrb[34].mxu1  ;;  %v1903_v57 = vpop.f32.mrb[35].mxu0  ;;  %v459_v53 = vld [vmem:[#allocation2 + $0xb8] sm:$0xff] }
 0x190   : > { %v1904_v59 = vadd.f32 %v1903_v57, %v1902_v54  ;;  %v2015_v60 = vpop.f32.mrb[35].mxu1 }
 0x191   : > { %v1368_v61 = vadd.f32 %v2013_v55, %v1901_v52  ;;  %v2016_v62 = vadd.f32 %v2015_v60, %v2014_v56 }
 0x193   : > { %v1446_v0 = vadd.f32 %v1368_v61, %v452_v58  ;;  %v1371_v1 = vadd.f32 %v2016_v62, %v1904_v59 }
 0x194   : > { %v1905_v2 = vpop.f32.mrb[36].mxu0 }
 0x195   : > { %1478 = vst [vmem:[#allocation2 + $0x80] sm:$0xff] %v1446_v0  ;;  %v1447_v3 = vadd.f32 %v1371_v1, %v453_v63  ;;  %v2017_v4 = vpop.f32.mrb[36].mxu1  ;;  %v1906_v5 = vpop.f32.mrb[37].mxu0 }
 0x196   : > { %v1907_v6 = vadd.f32 %v1906_v5, %v1905_v2  ;;  %v2018_v7 = vpop.f32.mrb[37].mxu1  ;;  %v1908_v8 = vpop.f32.mrb[38].mxu0  ;;  %v460_v2 = vld [vmem:[#allocation2 + $0xc0] sm:$0xff] }
 0x197   : > { %1479 = vst [vmem:[#allocation2 + $0x88] sm:$0xff] %v1447_v3  ;;  %v2019_v9 = vadd.f32 %v2018_v7, %v2017_v4  ;;  %v2020_v10 = vpop.f32.mrb[38].mxu1  ;;  %v1909_v11 = vpop.f32.mrb[39].mxu0  ;;  %v461_v7 = vld [vmem:[#allocation2 + $0xc8] sm:$0xff] }
 0x198   : > { %v1910_v13 = vadd.f32 %v1909_v11, %v1908_v8  ;;  %v2021_v14 = vpop.f32.mrb[39].mxu1 }
 0x199   : > { %v1376_v15 = vadd.f32 %v2019_v9, %v1907_v6  ;;  %v2022_v16 = vadd.f32 %v2021_v14, %v2020_v10 }
 0x19b   : > { %v1448_v18 = vadd.f32 %v1376_v15, %v454_v12  ;;  %v1379_v19 = vadd.f32 %v2022_v16, %v1910_v13 }
 0x19c   : > { %v1911_v20 = vpop.f32.mrb[40].mxu0 }
 0x19d   : > { %1480 = vst [vmem:[#allocation2 + $0x90] sm:$0xff] %v1448_v18  ;;  %v1449_v21 = vadd.f32 %v1379_v19, %v455_v17  ;;  %v2023_v22 = vpop.f32.mrb[40].mxu1  ;;  %v1912_v23 = vpop.f32.mrb[41].mxu0 }
 0x19e   : > { %v1913_v24 = vadd.f32 %v1912_v23, %v1911_v20  ;;  %v2024_v25 = vpop.f32.mrb[41].mxu1  ;;  %v1914_v26 = vpop.f32.mrb[42].mxu0  ;;  %v462_v20 = vld [vmem:[#allocation2 + $0xd0] sm:$0xff] }
 0x19f   : > { %1481 = vst [vmem:[#allocation2 + $0x98] sm:$0xff] %v1449_v21  ;;  %v2025_v27 = vadd.f32 %v2024_v25, %v2023_v22  ;;  %v2026_v28 = vpop.f32.mrb[42].mxu1  ;;  %v1915_v29 = vpop.f32.mrb[43].mxu0  ;;  %v463_v25 = vld [vmem:[#allocation2 + $0xd8] sm:$0xff] }
 0x1a0   : > { %v1916_v31 = vadd.f32 %v1915_v29, %v1914_v26  ;;  %v2027_v32 = vpop.f32.mrb[43].mxu1 }
 0x1a1   : > { %v1384_v33 = vadd.f32 %v2025_v27, %v1913_v24  ;;  %v2028_v34 = vadd.f32 %v2027_v32, %v2026_v28 }
 0x1a3   : > { %v1450_v36 = vadd.f32 %v1384_v33, %v456_v30  ;;  %v1387_v37 = vadd.f32 %v2028_v34, %v1916_v31 }
 0x1a4   : > { %v1917_v38 = vpop.f32.mrb[44].mxu0 }
 0x1a5   : > { %1482 = vst [vmem:[#allocation2 + $0xa0] sm:$0xff] %v1450_v36  ;;  %v1451_v39 = vadd.f32 %v1387_v37, %v457_v35  ;;  %v2029_v40 = vpop.f32.mrb[44].mxu1  ;;  %v1918_v41 = vpop.f32.mrb[45].mxu0 }
 0x1a6   : > { %v1919_v42 = vadd.f32 %v1918_v41, %v1917_v38  ;;  %v2030_v43 = vpop.f32.mrb[45].mxu1  ;;  %v1920_v44 = vpop.f32.mrb[46].mxu0  ;;  %v464_v38 = vld [vmem:[#allocation2 + $0xe0] sm:$0xff] }
 0x1a7   : > { %1483 = vst [vmem:[#allocation2 + $0xa8] sm:$0xff] %v1451_v39  ;;  %v2031_v45 = vadd.f32 %v2030_v43, %v2029_v40  ;;  %v2032_v46 = vpop.f32.mrb[46].mxu1  ;;  %v1921_v47 = vpop.f32.mrb[47].mxu0  ;;  %v465_v43 = vld [vmem:[#allocation2 + $0xe8] sm:$0xff] }
 0x1a8   : > { %v1922_v49 = vadd.f32 %v1921_v47, %v1920_v44  ;;  %v2033_v50 = vpop.f32.mrb[47].mxu1 }
 0x1a9   : > { %v1392_v51 = vadd.f32 %v2031_v45, %v1919_v42  ;;  %v2034_v52 = vadd.f32 %v2033_v50, %v2032_v46 }
 0x1ab   : > { %v1452_v54 = vadd.f32 %v1392_v51, %v458_v48  ;;  %v1395_v55 = vadd.f32 %v2034_v52, %v1922_v49 }
 0x1ac   : > { %v1923_v56 = vpop.f32.mrb[48].mxu0 }
 0x1ad   : > { %1484 = vst [vmem:[#allocation2 + $0xb0] sm:$0xff] %v1452_v54  ;;  %v1453_v57 = vadd.f32 %v1395_v55, %v459_v53  ;;  %v2035_v58 = vpop.f32.mrb[48].mxu1  ;;  %v1924_v59 = vpop.f32.mrb[49].mxu0 }
 0x1ae   : > { %v1925_v60 = vadd.f32 %v1924_v59, %v1923_v56  ;;  %v2036_v61 = vpop.f32.mrb[49].mxu1  ;;  %v1926_v62 = vpop.f32.mrb[50].mxu0  ;;  %v466_v56 = vld [vmem:[#allocation2 + $0xf0] sm:$0xff] }
 0x1af   : > { %1485 = vst [vmem:[#allocation2 + $0xb8] sm:$0xff] %v1453_v57  ;;  %v2037_v63 = vadd.f32 %v2036_v61, %v2035_v58  ;;  %v2038_v0 = vpop.f32.mrb[50].mxu1  ;;  %v1927_v1 = vpop.f32.mrb[51].mxu0  ;;  %v467_v61 = vld [vmem:[#allocation2 + $0xf8] sm:$0xff] }
 0x1b0   : > { %v1928_v3 = vadd.f32 %v1927_v1, %v1926_v62  ;;  %v2039_v4 = vpop.f32.mrb[51].mxu1  ;;  %v1498_v1 = vld [vmem:[#allocation2] sm:$0xff] (!%p1831_p13) }
 0x1b1   : > { %v1400_v5 = vadd.f32 %v2037_v63, %v1925_v60  ;;  %v2040_v6 = vadd.f32 %v2039_v4, %v2038_v0 }
 0x1b3   : > { %v1454_v8 = vadd.f32 %v1400_v5, %v460_v2  ;;  %v1403_v9 = vadd.f32 %v2040_v6, %v1928_v3  ;;  %v2632_v2 = vld [vmem:[%s2721_s2] ss:$0 sm:$0xff] (!%p1831_p13)  ;;  %v1499_v3 = vld [vmem:[#allocation2 + $0x8] sm:$0xff] (!%p1831_p13)  ;;  %v1500_v6 = vld [vmem:[#allocation2 + $0x10] sm:$0xff] (!%p1831_p13) }
 0x1b4   : > { %v1929_v10 = vpop.f32.mrb[52].mxu0  ;;  %v1537_v4 = vadd.f32 (!%p1831_p13), %v2632_v2, %v1498_v1  ;;  %v1538_v5 = vadd.f32 (!%p1831_p13), %v2632_v2, %v1499_v3 }
 0x1b5   : > { %1486 = vst [vmem:[#allocation2 + $0xc0] sm:$0xff] %v1454_v8  ;;  %v1455_v11 = vadd.f32 %v1403_v9, %v461_v7  ;;  %v2041_v12 = vpop.f32.mrb[52].mxu1  ;;  %v1930_v13 = vpop.f32.mrb[53].mxu0  ;;  %v1501_v7 = vld [vmem:[#allocation2 + $0x18] sm:$0xff] (!%p1831_p13)  ;;  %v1502_v8 = vld [vmem:[#allocation2 + $0x20] sm:$0xff] (!%p1831_p13)  ;;  %v1539_v9 = vadd.f32 (!%p1831_p13), %v2632_v2, %v1500_v6 }
 0x1b6   : > { %v1931_v14 = vadd.f32 %v1930_v13, %v1929_v10  ;;  %v2042_v15 = vpop.f32.mrb[53].mxu1  ;;  %v1932_v16 = vpop.f32.mrb[54].mxu0  ;;  %v1540_v10 = vadd.f32 (!%p1831_p13), %v2632_v2, %v1501_v7  ;;  %v1504_v13 = vld [vmem:[#allocation2 + $0x30] sm:$0xff] (!%p1831_p13)  ;;  %1569 = vst [vmem:[%s2527_s30] sm:$0xff] (!%p1831_p13), %v1537_v4  ;;  %1570 = vst [vmem:[%s2527_s30 + $0x8] sm:$0xff] (!%p1831_p13), %v1538_v5 }
 0x1b7   : > { %1487 = vst [vmem:[#allocation2 + $0xc8] sm:$0xff] %v1455_v11  ;;  %v2043_v17 = vadd.f32 %v2042_v15, %v2041_v12  ;;  %v2044_v18 = vpop.f32.mrb[54].mxu1  ;;  %v1933_v19 = vpop.f32.mrb[55].mxu0  ;;  %v1541_v11 = vadd.f32 (!%p1831_p13), %v2632_v2, %v1502_v8  ;;  %v1503_v12 = vld [vmem:[#allocation2 + $0x28] sm:$0xff] (!%p1831_p13)  ;;  %1571 = vst [vmem:[%s2527_s30 + $0x10] sm:$0xff] (!%p1831_p13), %v1539_v9 }
 0x1b8   : > { %v1934_v21 = vadd.f32 %v1933_v19, %v1932_v16  ;;  %v2045_v22 = vpop.f32.mrb[55].mxu1  ;;  %v1542_v15 = vadd.f32 (!%p1831_p13), %v2632_v2, %v1503_v12  ;;  %v1543_v16 = vadd.f32 (!%p1831_p13), %v2632_v2, %v1504_v13  ;;  %v1507_v19 = vld [vmem:[#allocation2 + $0x48] sm:$0xff] (!%p1831_p13)  ;;  %1572 = vst [vmem:[%s2527_s30 + $0x18] sm:$0xff] (!%p1831_p13), %v1540_v10 }
 0x1b9   : > { %v1408_v23 = vadd.f32 %v2043_v17, %v1931_v14  ;;  %v2046_v24 = vadd.f32 %v2045_v22, %v2044_v18  ;;  %v1505_v14 = vld [vmem:[#allocation2 + $0x38] sm:$0xff] (!%p1831_p13)  ;;  %v1506_v18 = vld [vmem:[#allocation2 + $0x40] sm:$0xff] (!%p1831_p13)  ;;  %1573 = vst [vmem:[%s2527_s30 + $0x20] sm:$0xff] (!%p1831_p13), %v1541_v11  ;;  %v1546_v22 = vadd.f32 (!%p1831_p13), %v2632_v2, %v1507_v19 }
 0x1ba   : > { %v1544_v17 = vadd.f32 (!%p1831_p13), %v2632_v2, %v1505_v14  ;;  %1574 = vst [vmem:[%s2527_s30 + $0x28] sm:$0xff] (!%p1831_p13), %v1542_v15  ;;  %1575 = vst [vmem:[%s2527_s30 + $0x30] sm:$0xff] (!%p1831_p13), %v1543_v16 }
 0x1bb   : > { %v1456_v26 = vadd.f32 %v1408_v23, %v462_v20  ;;  %v1411_v27 = vadd.f32 %v2046_v24, %v1934_v21  ;;  %v1508_v20 = vld [vmem:[#allocation2 + $0x50] sm:$0xff] (!%p1831_p13)  ;;  %v1545_v21 = vadd.f32 (!%p1831_p13), %v2632_v2, %v1506_v18  ;;  %v1509_v24 = vld [vmem:[#allocation2 + $0x58] sm:$0xff] (!%p1831_p13)  ;;  %1578 = vst [vmem:[%s2527_s30 + $0x48] sm:$0xff] (!%p1831_p13), %v1546_v22 }
 0x1bc   : > { %v1935_v28 = vpop.f32.mrb[56].mxu0  ;;  %v1547_v23 = vadd.f32 (!%p1831_p13), %v2632_v2, %v1508_v20  ;;  %1576 = vst [vmem:[%s2527_s30 + $0x38] sm:$0xff] (!%p1831_p13), %v1544_v17 }
 0x1bd   : > { %1488 = vst [vmem:[#allocation2 + $0xd0] sm:$0xff] %v1456_v26  ;;  %v1457_v29 = vadd.f32 %v1411_v27, %v463_v25  ;;  %v2047_v30 = vpop.f32.mrb[56].mxu1  ;;  %v1936_v31 = vpop.f32.mrb[57].mxu0  ;;  %v1510_v25 = vld [vmem:[#allocation2 + $0x60] sm:$0xff] (!%p1831_p13)  ;;  %v1511_v26 = vld [vmem:[#allocation2 + $0x68] sm:$0xff] (!%p1831_p13)  ;;  %v1548_v27 = vadd.f32 (!%p1831_p13), %v2632_v2, %v1509_v24  ;;  %1577 = vst [vmem:[%s2527_s30 + $0x40] sm:$0xff] (!%p1831_p13), %v1545_v21 }
 0x1be   : > { %v1937_v32 = vadd.f32 %v1936_v31, %v1935_v28  ;;  %v2048_v33 = vpop.f32.mrb[57].mxu1  ;;  %v1938_v34 = vpop.f32.mrb[58].mxu0  ;;  %v1549_v28 = vadd.f32 (!%p1831_p13), %v2632_v2, %v1510_v25  ;;  %v1513_v31 = vld [vmem:[#allocation2 + $0x78] sm:$0xff] (!%p1831_p13)  ;;  %1579 = vst [vmem:[%s2527_s30 + $0x50] sm:$0xff] (!%p1831_p13), %v1547_v23 }
 0x1bf   : > { %1489 = vst [vmem:[#allocation2 + $0xd8] sm:$0xff] %v1457_v29  ;;  %v2049_v35 = vadd.f32 %v2048_v33, %v2047_v30  ;;  %v2050_v36 = vpop.f32.mrb[58].mxu1  ;;  %v1939_v37 = vpop.f32.mrb[59].mxu0  ;;  %v1550_v29 = vadd.f32 (!%p1831_p13), %v2632_v2, %v1511_v26  ;;  %v1512_v30 = vld [vmem:[#allocation2 + $0x70] sm:$0xff] (!%p1831_p13)  ;;  %1580 = vst [vmem:[%s2527_s30 + $0x58] sm:$0xff] (!%p1831_p13), %v1548_v27 }
 0x1c0   : > { %v1940_v39 = vadd.f32 %v1939_v37, %v1938_v34  ;;  %v2051_v40 = vpop.f32.mrb[59].mxu1  ;;  %v1551_v33 = vadd.f32 (!%p1831_p13), %v2632_v2, %v1512_v30  ;;  %v1552_v34 = vadd.f32 (!%p1831_p13), %v2632_v2, %v1513_v31  ;;  %v1516_v37 = vld [vmem:[#allocation2 + $0x90] sm:$0xff] (!%p1831_p13)  ;;  %1581 = vst [vmem:[%s2527_s30 + $0x60] sm:$0xff] (!%p1831_p13), %v1549_v28 }
 0x1c1   : > { %v1416_v41 = vadd.f32 %v2049_v35, %v1937_v32  ;;  %v2052_v42 = vadd.f32 %v2051_v40, %v2050_v36  ;;  %v1514_v32 = vld [vmem:[#allocation2 + $0x80] sm:$0xff] (!%p1831_p13)  ;;  %v1515_v36 = vld [vmem:[#allocation2 + $0x88] sm:$0xff] (!%p1831_p13)  ;;  %1582 = vst [vmem:[%s2527_s30 + $0x68] sm:$0xff] (!%p1831_p13), %v1550_v29  ;;  %v1555_v40 = vadd.f32 (!%p1831_p13), %v2632_v2, %v1516_v37 }
 0x1c2   : > { %v1553_v35 = vadd.f32 (!%p1831_p13), %v2632_v2, %v1514_v32  ;;  %1583 = vst [vmem:[%s2527_s30 + $0x70] sm:$0xff] (!%p1831_p13), %v1551_v33  ;;  %1584 = vst [vmem:[%s2527_s30 + $0x78] sm:$0xff] (!%p1831_p13), %v1552_v34 }
 0x1c3   : > { %v1458_v44 = vadd.f32 %v1416_v41, %v464_v38  ;;  %v1419_v45 = vadd.f32 %v2052_v42, %v1940_v39  ;;  %v1517_v38 = vld [vmem:[#allocation2 + $0x98] sm:$0xff] (!%p1831_p13)  ;;  %v1554_v39 = vadd.f32 (!%p1831_p13), %v2632_v2, %v1515_v36  ;;  %v1518_v42 = vld [vmem:[#allocation2 + $0xa0] sm:$0xff] (!%p1831_p13)  ;;  %1587 = vst [vmem:[%s2527_s30 + $0x90] sm:$0xff] (!%p1831_p13), %v1555_v40 }
 0x1c4   : > { %v1941_v46 = vpop.f32.mrb[60].mxu0  ;;  %v1556_v41 = vadd.f32 (!%p1831_p13), %v2632_v2, %v1517_v38  ;;  %1585 = vst [vmem:[%s2527_s30 + $0x80] sm:$0xff] (!%p1831_p13), %v1553_v35 }
 0x1c5   : > { %1490 = vst [vmem:[#allocation2 + $0xe0] sm:$0xff] %v1458_v44  ;;  %v1459_v47 = vadd.f32 %v1419_v45, %v465_v43  ;;  %v2053_v48 = vpop.f32.mrb[60].mxu1  ;;  %v1942_v49 = vpop.f32.mrb[61].mxu0  ;;  %v1519_v43 = vld [vmem:[#allocation2 + $0xa8] sm:$0xff] (!%p1831_p13)  ;;  %v1520_v44 = vld [vmem:[#allocation2 + $0xb0] sm:$0xff] (!%p1831_p13)  ;;  %v1557_v45 = vadd.f32 (!%p1831_p13), %v2632_v2, %v1518_v42  ;;  %1586 = vst [vmem:[%s2527_s30 + $0x88] sm:$0xff] (!%p1831_p13), %v1554_v39 }
 0x1c6   : > { %v1943_v50 = vadd.f32 %v1942_v49, %v1941_v46  ;;  %v2054_v51 = vpop.f32.mrb[61].mxu1  ;;  %v1944_v52 = vpop.f32.mrb[62].mxu0  ;;  %v1558_v46 = vadd.f32 (!%p1831_p13), %v2632_v2, %v1519_v43  ;;  %v1522_v49 = vld [vmem:[#allocation2 + $0xc0] sm:$0xff] (!%p1831_p13)  ;;  %1588 = vst [vmem:[%s2527_s30 + $0x98] sm:$0xff] (!%p1831_p13), %v1556_v41 }
 0x1c7   : > { %1491 = vst [vmem:[#allocation2 + $0xe8] sm:$0xff] %v1459_v47  ;;  %v2055_v53 = vadd.f32 %v2054_v51, %v2053_v48  ;;  %v2056_v54 = vpop.f32.mrb[62].mxu1  ;;  %v1945_v55 = vpop.f32.mrb[63].mxu0  ;;  %v1559_v47 = vadd.f32 (!%p1831_p13), %v2632_v2, %v1520_v44  ;;  %v1521_v48 = vld [vmem:[#allocation2 + $0xb8] sm:$0xff] (!%p1831_p13)  ;;  %1589 = vst [vmem:[%s2527_s30 + $0xa0] sm:$0xff] (!%p1831_p13), %v1557_v45 }
 0x1c8   : > { %v1946_v57 = vadd.f32 %v1945_v55, %v1944_v52  ;;  %v2057_v58 = vpop.f32.mrb[63].mxu1  ;;  %v1560_v51 = vadd.f32 (!%p1831_p13), %v2632_v2, %v1521_v48  ;;  %v1561_v52 = vadd.f32 (!%p1831_p13), %v2632_v2, %v1522_v49  ;;  %v1525_v55 = vld [vmem:[#allocation2 + $0xd8] sm:$0xff] (!%p1831_p13)  ;;  %1590 = vst [vmem:[%s2527_s30 + $0xa8] sm:$0xff] (!%p1831_p13), %v1558_v46 }
 0x1c9   : > { %v1424_v59 = vadd.f32 %v2055_v53, %v1943_v50  ;;  %v2058_v60 = vadd.f32 %v2057_v58, %v2056_v54  ;;  %1497 = sbr.rel (%p1831_p13) target bundleno = 474 (0x1da), region = 63  ;;  %v1523_v50 = vld [vmem:[#allocation2 + $0xc8] sm:$0xff] (!%p1831_p13)  ;;  %v1524_v54 = vld [vmem:[#allocation2 + $0xd0] sm:$0xff] (!%p1831_p13)  ;;  %1591 = vst [vmem:[%s2527_s30 + $0xb0] sm:$0xff] (!%p1831_p13), %v1559_v47  ;;  %v1564_v58 = vadd.f32 (!%p1831_p13), %v2632_v2, %v1525_v55 }
 0x1ca   : > { %v1562_v53 = vadd.f32 (!%p1831_p13), %v2632_v2, %v1523_v50  ;;  %1592 = vst [vmem:[%s2527_s30 + $0xb8] sm:$0xff] (!%p1831_p13), %v1560_v51  ;;  %1593 = vst [vmem:[%s2527_s30 + $0xc0] sm:$0xff] (!%p1831_p13), %v1561_v52 }
 0x1cb   : > { %v1460_v62 = vadd.f32 %v1424_v59, %v466_v56  ;;  %v1427_v63 = vadd.f32 %v2058_v60, %v1946_v57  ;;  %v1563_v57 = vadd.f32 (!%p1831_p13), %v2632_v2, %v1524_v54  ;;  %1596 = vst [vmem:[%s2527_s30 + $0xd8] sm:$0xff] (!%p1831_p13), %v1564_v58 }
 0x1cc   : > { %v1526_v56 = vld [vmem:[#allocation2 + $0xe0] sm:$0xff] (!%p1831_p13)  ;;  %1594 = vst [vmem:[%s2527_s30 + $0xc8] sm:$0xff] (!%p1831_p13), %v1562_v53 }
 0x1cd   : > { %1492 = vst [vmem:[#allocation2 + $0xf0] sm:$0xff] %v1460_v62  ;;  %v1461_v0 = vadd.f32 %v1427_v63, %v467_v61  ;;  %v1565_v59 = vadd.f32 (!%p1831_p13), %v2632_v2, %v1526_v56  ;;  %1595 = vst [vmem:[%s2527_s30 + $0xd0] sm:$0xff] (!%p1831_p13), %v1563_v57 }
 0x1ce   : > { %v1527_v60 = vld [vmem:[#allocation2 + $0xe8] sm:$0xff] (!%p1831_p13) }
 0x1cf   : > { %1493 = vst [vmem:[#allocation2 + $0xf8] sm:$0xff] %v1461_v0  ;;  %v1566_v63 = vadd.f32 (!%p1831_p13), %v2632_v2, %v1527_v60  ;;  %1597 = vst [vmem:[%s2527_s30 + $0xe0] sm:$0xff] (!%p1831_p13), %v1565_v59 }
 0x1d1   : > { %1598 = vst [vmem:[%s2527_s30 + $0xe8] sm:$0xff] %v1566_v63 }
 0x1d4   : > { %v1528_v61 = vld [vmem:[#allocation2 + $0xf0] sm:$0xff] }
 0x1d5   : > { %v1567_v0 = vadd.f32 %v2632_v2, %v1528_v61 }
 0x1d6   : > { %v1529_v62 = vld [vmem:[#allocation2 + $0xf8] sm:$0xff] }
 0x1d7   : > { %v1568_v1 = vadd.f32 %v2632_v2, %v1529_v62  ;;  %1599 = vst [vmem:[%s2527_s30 + $0xf0] sm:$0xff] %v1567_v0 }
 0x1d9   : > { %1600 = vst [vmem:[%s2527_s30 + $0xf8] sm:$0xff] %v1568_v1 }
 0x1da PF: > { %s13_s18 = sadd.s32 1, %s2299_s18   ;;  %s2723_s12 = smov %s2279_s13 }
 0x1db   : > { %p10_p0 = scmp.ge.s32.totalorder %s13_s18, 26   ;;  %s2724_s13 = smov %s2373_s25 }
 0x1dc   : > { %s2725_s14 = smov %s2291_s16  ;;  %s2726_s15 = smov %s2295_s17 }
 0x1dd   : > { %s2727_s16 = smov %s2730_s19  ;;  %s2728_s17 = smov %s2734_s20 }
 0x1de   :  { %12 = sbr.rel (!%p10_p0) target bundleno = 4 (0x4), region = 104 }

// kernel: generator2_forward.16
= control target key start
LH: loop header
LB: loop body
LE: loop exit
PB: predicated region body
PF: predicated region fallthrough
CT: control target
= control target key end

     0   :  { %s1916_s12 = smov 0   ;;  %s1918_s13 = smov 0   ;;  %s2286_s0 = inlined_call_operand.vmem [shape: bf16[128,11776], index: 0, kind: input, shape index: {}]   ;;  %s2287_s1 = inlined_call_operand.vmem [shape: bf16[11776,256], index: 1, kind: input, shape index: {}]   ;;  %s2288_s2 = inlined_call_operand.vmem [shape: f32[1,256], index: 2, kind: input, shape index: {}]   ;;  %s2289_s3 = inlined_call_operand.vmem [shape: f32[128,256], index: 3, kind: output, shape index: {}]  }
   0x1   :  { %s1920_s14 = smov 0   ;;  %s1922_s15 = smov 0  }
   0x2   :  { %s1924_s16 = smov 0  }
   0x3 LB: > { %s25_s17 = sadd.s32 1, %s1889_s15  ;;  %p48_p1 = scmp.ne.s32.totalorder %s1881_s13, %s1877_s12  ;;  %s1893_s16 = sphi %s1924_s16, %s13_s16   ;;  %s1889_s15 = sphi %s1922_s15, %s2293_s15   ;;  %s1885_s14 = sphi %s1920_s14, %s2292_s14   ;;  %s1881_s13 = sphi %s1918_s13, %s2291_s13   ;;  %s1877_s12 = sphi %s1916_s12, %s2290_s12  }
   0x4   : > { %p26_p0 = scmp.ge.s32.totalorder %s25_s17, 23  ;;  %p49_p2 = scmp.eq.s32.totalorder %s1893_s16, 0 }
   0x5   : > { %s41_s19 = sadd.s32 1, %s1881_s13  ;;  %p1525_p5 = scmp.ge.s32.totalorder %s1893_s16, 23 }
   0x6   : > { %s2295_s17 = smov (%p26_p0, %s25_s17), 0  ;;  %p50_p3 = por %p49_p2, %p48_p1 }
   0x7   : > { %s37_s18 = ssub.s32 %s1889_s15, %s2295_s17  ;;  %164 = sbr.rel (%p1525_p5) target bundleno = 34 (0x22), region = 20 }
   0x8   : > { %p39_p4 = scmp.eq.s32.totalorder %s37_s18, 0 }
   0xa   : > { %s1951_s20 = scalar_select %p39_p4, %s1881_s13, %s41_s19  }
   0xe   : > { %167 = sbr.rel (!%p50_p3) target bundleno = 34 (0x22), region = 24  ;;  %s169_s21 = sand.u32 (%p50_p3), 1, %s1881_s13  }
   0xf   : > { %s1636_s22 = sshll.u32 (%p50_p3), %s1889_s15, 4  ;;  %s1526_s23 = sshll.u32 (%p50_p3), %s169_s21, 8 }
  0x10   : > { %s1959_s26 = scalar_lea.vmem (%p50_p3), %s2286_s0, %s1636_s22  ;;  %s1964_s27 = scalar_lea.vmem (%p50_p3), [#allocation3], %s1526_s23 }
  0x11   : > { %v190_v0 = vld [vmem:[%s1959_s26] sm:$0xff] (%p50_p3)  ;;  %v192_v1 = vld [vmem:[%s1959_s26 + $0x8] sm:$0xff] (%p50_p3)  ;;  %v194_v2 = vld [vmem:[%s1959_s26 + $0x170] sm:$0xff] (%p50_p3) }
  0x12   : > { %191 = vst [vmem:[%s1964_s27] sm:$0xff] (%p50_p3), %v190_v0  ;;  %193 = vst [vmem:[%s1964_s27 + $0x8] sm:$0xff] (%p50_p3), %v192_v1  ;;  %v196_v3 = vld [vmem:[%s1959_s26 + $0x178] sm:$0xff] (%p50_p3)  ;;  %v198_v4 = vld [vmem:[%s1959_s26 + $0x2e0] sm:$0xff] (%p50_p3) }
  0x13   : > { %195 = vst [vmem:[%s1964_s27 + $0x10] sm:$0xff] (%p50_p3), %v194_v2  ;;  %v200_v5 = vld [vmem:[%s1959_s26 + $0x2e8] sm:$0xff] (%p50_p3)  ;;  %197 = vst [vmem:[%s1964_s27 + $0x18] sm:$0xff] (%p50_p3), %v196_v3  ;;  %v202_v6 = vld [vmem:[%s1959_s26 + $0x450] sm:$0xff] (%p50_p3) }
  0x14   : > { %199 = vst [vmem:[%s1964_s27 + $0x20] sm:$0xff] (%p50_p3), %v198_v4  ;;  %201 = vst [vmem:[%s1964_s27 + $0x28] sm:$0xff] (%p50_p3), %v200_v5  ;;  %v204_v7 = vld [vmem:[%s1959_s26 + $0x458] sm:$0xff] (%p50_p3)  ;;  %v206_v8 = vld [vmem:[%s1959_s26 + $0x5c0] sm:$0xff] (%p50_p3) }
  0x15   : > { %203 = vst [vmem:[%s1964_s27 + $0x30] sm:$0xff] %v202_v6  ;;  %205 = vst [vmem:[%s1964_s27 + $0x38] sm:$0xff] %v204_v7  ;;  %v208_v9 = vld [vmem:[%s1959_s26 + $0x5c8] sm:$0xff]  ;;  %v210_v10 = vld [vmem:[%s1959_s26 + $0x730] sm:$0xff] }
  0x16   : > { %207 = vst [vmem:[%s1964_s27 + $0x40] sm:$0xff] %v206_v8  ;;  %v212_v11 = vld [vmem:[%s1959_s26 + $0x738] sm:$0xff]  ;;  %209 = vst [vmem:[%s1964_s27 + $0x48] sm:$0xff] %v208_v9  ;;  %v214_v12 = vld [vmem:[%s1959_s26 + $0x8a0] sm:$0xff] }
  0x17   : > { %211 = vst [vmem:[%s1964_s27 + $0x50] sm:$0xff] %v210_v10  ;;  %213 = vst [vmem:[%s1964_s27 + $0x58] sm:$0xff] %v212_v11  ;;  %v216_v13 = vld [vmem:[%s1959_s26 + $0x8a8] sm:$0xff]  ;;  %v218_v14 = vld [vmem:[%s1959_s26 + $0xa10] sm:$0xff] }
  0x18   : > { %215 = vst [vmem:[%s1964_s27 + $0x60] sm:$0xff] %v214_v12  ;;  %217 = vst [vmem:[%s1964_s27 + $0x68] sm:$0xff] %v216_v13  ;;  %v220_v15 = vld [vmem:[%s1959_s26 + $0xa18] sm:$0xff]  ;;  %v222_v16 = vld [vmem:[%s1959_s26 + $0xb80] sm:$0xff] }
  0x19   : > { %219 = vst [vmem:[%s1964_s27 + $0x70] sm:$0xff] %v218_v14  ;;  %v224_v17 = vld [vmem:[%s1959_s26 + $0xb88] sm:$0xff]  ;;  %221 = vst [vmem:[%s1964_s27 + $0x78] sm:$0xff] %v220_v15  ;;  %v226_v18 = vld [vmem:[%s1959_s26 + $0xcf0] sm:$0xff] }
  0x1a   : > { %223 = vst [vmem:[%s1964_s27 + $0x80] sm:$0xff] %v222_v16  ;;  %225 = vst [vmem:[%s1964_s27 + $0x88] sm:$0xff] %v224_v17  ;;  %v228_v19 = vld [vmem:[%s1959_s26 + $0xcf8] sm:$0xff]  ;;  %v230_v20 = vld [vmem:[%s1959_s26 + $0xe60] sm:$0xff] }
  0x1b   : > { %227 = vst [vmem:[%s1964_s27 + $0x90] sm:$0xff] %v226_v18  ;;  %229 = vst [vmem:[%s1964_s27 + $0x98] sm:$0xff] %v228_v19  ;;  %v232_v21 = vld [vmem:[%s1959_s26 + $0xe68] sm:$0xff]  ;;  %v234_v22 = vld [vmem:[%s1959_s26 + $0xfd0] sm:$0xff] }
  0x1c   : > { %231 = vst [vmem:[%s1964_s27 + $0xa0] sm:$0xff] %v230_v20  ;;  %v236_v23 = vld [vmem:[%s1959_s26 + $0xfd8] sm:$0xff]  ;;  %233 = vst [vmem:[%s1964_s27 + $0xa8] sm:$0xff] %v232_v21  ;;  %v238_v24 = vld [vmem:[%s1959_s26 + $0x1140] sm:$0xff] }
  0x1d   : > { %235 = vst [vmem:[%s1964_s27 + $0xb0] sm:$0xff] %v234_v22  ;;  %237 = vst [vmem:[%s1964_s27 + $0xb8] sm:$0xff] %v236_v23  ;;  %v240_v25 = vld [vmem:[%s1959_s26 + $0x1148] sm:$0xff]  ;;  %v242_v26 = vld [vmem:[%s1959_s26 + $0x12b0] sm:$0xff] }
  0x1e   : > { %239 = vst [vmem:[%s1964_s27 + $0xc0] sm:$0xff] %v238_v24  ;;  %241 = vst [vmem:[%s1964_s27 + $0xc8] sm:$0xff] %v240_v25  ;;  %v244_v27 = vld [vmem:[%s1959_s26 + $0x12b8] sm:$0xff]  ;;  %v246_v28 = vld [vmem:[%s1959_s26 + $0x1420] sm:$0xff] }
  0x1f   : > { %243 = vst [vmem:[%s1964_s27 + $0xd0] sm:$0xff] %v242_v26  ;;  %v248_v29 = vld [vmem:[%s1959_s26 + $0x1428] sm:$0xff]  ;;  %245 = vst [vmem:[%s1964_s27 + $0xd8] sm:$0xff] %v244_v27  ;;  %v250_v30 = vld [vmem:[%s1959_s26 + $0x1590] sm:$0xff] }
  0x20   : > { %247 = vst [vmem:[%s1964_s27 + $0xe0] sm:$0xff] %v246_v28  ;;  %249 = vst [vmem:[%s1964_s27 + $0xe8] sm:$0xff] %v248_v29  ;;  %v252_v31 = vld [vmem:[%s1959_s26 + $0x1598] sm:$0xff] }
  0x21   : > { %251 = vst [vmem:[%s1964_s27 + $0xf0] sm:$0xff] %v250_v30  ;;  %253 = vst [vmem:[%s1964_s27 + $0xf8] sm:$0xff] %v252_v31 }
  0x22 PF: > { %p1529_p6 = scmp.ge.s32.totalorder %s1893_s16, 1  ;;  %p273_p7 = scmp.lt.s32.totalorder %s1893_s16, 24 }
  0x24   : > { %p274_p8 = pnand %p1529_p6, %p273_p7 }
  0x25   : > { %s280_s28 = sand.u32 (!%p274_p8), 1, %s1877_s12   ;;  %s1531_s29 = sshll.u32 (!%p274_p8), %s1885_s14, 6 }
  0x26   : > { %277 = sbr.rel (%p274_p8) target bundleno = 415 (0x19f), region = 51  ;;  %s1530_s30 = sshll.u32 (!%p274_p8), %s280_s28, 8 }
  0x27   : > { %p326_p9 = scmp.lt.s32.totalorder (!%p274_p8), %s1531_s29, 1471  ;;  %s2036_s8 = scalar_lea.vmem (!%p274_p8), [#allocation3], %s1530_s30 }
  0x28   : > { %p1534_p10 = scmp.ne.s32.totalorder (!%p274_p8), %s1885_s14, 0 }
  0x2d   : > { %s2297_s29 = smov (!%p326_p9, %s1531_s29), 1471  ;;  %356 = sbr.rel (%p1534_p10) target bundleno = 63 (0x3f), region = 59 }
  0x2e   : > { %s1637_s4 = sshll.u32 %s2297_s29, 3  ;;  %v1895_v32 = vmov (!%p1534_p10), 0.0  }
  0x2f   : > { %s2034_s7 = scalar_lea.vmem %s2287_s1, %s1637_s4  ;;  %357 = vst [vmem:[#allocation2] sm:$0xff] (!%p1534_p10), %v1895_v32  ;;  %358 = vst [vmem:[#allocation2 + $0x8] sm:$0xff] (!%p1534_p10), %v1895_v32 }
  0x30   : > { %359 = vst [vmem:[#allocation2 + $0x10] sm:$0xff] (!%p1534_p10), %v1895_v32  ;;  %360 = vst [vmem:[#allocation2 + $0x18] sm:$0xff] (!%p1534_p10), %v1895_v32 }
  0x31   : > { %361 = vst [vmem:[#allocation2 + $0x20] sm:$0xff] (!%p1534_p10), %v1895_v32  ;;  %362 = vst [vmem:[#allocation2 + $0x28] sm:$0xff] (!%p1534_p10), %v1895_v32 }
  0x32   : > { %363 = vst [vmem:[#allocation2 + $0x30] sm:$0xff] (!%p1534_p10), %v1895_v32  ;;  %364 = vst [vmem:[#allocation2 + $0x38] sm:$0xff] (!%p1534_p10), %v1895_v32 }
  0x33   : > { %365 = vst [vmem:[#allocation2 + $0x40] sm:$0xff] (!%p1534_p10), %v1895_v32  ;;  %366 = vst [vmem:[#allocation2 + $0x48] sm:$0xff] (!%p1534_p10), %v1895_v32 }
  0x34   : > { %367 = vst [vmem:[#allocation2 + $0x50] sm:$0xff] %v1895_v32  ;;  %368 = vst [vmem:[#allocation2 + $0x58] sm:$0xff] %v1895_v32 }
  0x35   : > { %369 = vst [vmem:[#allocation2 + $0x60] sm:$0xff] %v1895_v32  ;;  %370 = vst [vmem:[#allocation2 + $0x68] sm:$0xff] %v1895_v32 }
  0x36   : > { %371 = vst [vmem:[#allocation2 + $0x70] sm:$0xff] %v1895_v32  ;;  %372 = vst [vmem:[#allocation2 + $0x78] sm:$0xff] %v1895_v32 }
  0x37   : > { %373 = vst [vmem:[#allocation2 + $0x80] sm:$0xff] %v1895_v32  ;;  %374 = vst [vmem:[#allocation2 + $0x88] sm:$0xff] %v1895_v32 }
  0x38   : > { %375 = vst [vmem:[#allocation2 + $0x90] sm:$0xff] %v1895_v32  ;;  %376 = vst [vmem:[#allocation2 + $0x98] sm:$0xff] %v1895_v32 }
  0x39   : > { %377 = vst [vmem:[#allocation2 + $0xa0] sm:$0xff] %v1895_v32  ;;  %378 = vst [vmem:[#allocation2 + $0xa8] sm:$0xff] %v1895_v32 }
  0x3a   : > { %379 = vst [vmem:[#allocation2 + $0xb0] sm:$0xff] %v1895_v32  ;;  %380 = vst [vmem:[#allocation2 + $0xb8] sm:$0xff] %v1895_v32 }
  0x3b   : > { %381 = vst [vmem:[#allocation2 + $0xc0] sm:$0xff] %v1895_v32  ;;  %382 = vst [vmem:[#allocation2 + $0xc8] sm:$0xff] %v1895_v32 }
  0x3c   : > { %383 = vst [vmem:[#allocation2 + $0xd0] sm:$0xff] %v1895_v32  ;;  %384 = vst [vmem:[#allocation2 + $0xd8] sm:$0xff] %v1895_v32 }
  0x3d   : > { %385 = vst [vmem:[#allocation2 + $0xe0] sm:$0xff] %v1895_v32  ;;  %386 = vst [vmem:[#allocation2 + $0xe8] sm:$0xff] %v1895_v32 }
  0x3e   : > { %387 = vst [vmem:[#allocation2 + $0xf0] sm:$0xff] %v1895_v32  ;;  %388 = vst [vmem:[#allocation2 + $0xf8] sm:$0xff] %v1895_v32 }
  0x3f PF: > { %v1711_v33 = vld [vmem:[%s2034_s7 + $0x4] ss:$8 sps:$4 sm:$0xff]   ;;  %v1715_v35 = vld [vmem:[%s2034_s7] ss:$8 sps:$4 sm:$0xff]   ;;  %v1717_v37 = vld [vmem:[%s2034_s7 + $0x14] ss:$8 sps:$4 sm:$0xff]  }
  0x40   : > { %v1713_v34 = vld [vmem:[%s2034_s7 + $0x104] ss:$8 sps:$4 sm:$0xff]   ;;  %997 = vmatprep.subr.bf16.mxu1 %v1711_v33  ;;  %v1716_v36 = vld [vmem:[%s2034_s7 + $0x100] ss:$8 sps:$4 sm:$0xff]   ;;  %v1719_v38 = vld [vmem:[%s2034_s7 + $0x114] ss:$8 sps:$4 sm:$0xff]  }
  0x41   : > { %1110 = vmatprep.subr.bf16.mxu0 %v1713_v34  ;;  %998 = vmatpush1.bf16.msra.mxu1 %v1715_v35  ;;  %v1721_v39 = vld [vmem:[%s2034_s7 + $0x10] ss:$8 sps:$4 sm:$0xff]   ;;  %v1723_v41 = vld [vmem:[%s2034_s7 + $0x24] ss:$8 sps:$4 sm:$0xff]   ;;  %v1727_v43 = vld [vmem:[%s2034_s7 + $0x20] ss:$8 sps:$4 sm:$0xff]  }
  0x42   : > { %1111 = vmatpush1.bf16.msra.mxu0 %v1716_v36  ;;  %999 = vmatprep.subr.bf16.mxu1 %v1717_v37  ;;  %v1722_v40 = vld [vmem:[%s2034_s7 + $0x110] ss:$8 sps:$4 sm:$0xff]   ;;  %v1725_v42 = vld [vmem:[%s2034_s7 + $0x124] ss:$8 sps:$4 sm:$0xff]   ;;  %v1728_v44 = vld [vmem:[%s2034_s7 + $0x120] ss:$8 sps:$4 sm:$0xff]  }
  0x43   : > { %1112 = vmatprep.subr.bf16.mxu0 %v1719_v38  ;;  %v1729_v45 = vld [vmem:[%s2034_s7 + $0x34] ss:$8 sps:$4 sm:$0xff]   ;;  %v1733_v47 = vld [vmem:[%s2034_s7 + $0x30] ss:$8 sps:$4 sm:$0xff]   ;;  %v1735_v49 = vld [vmem:[%s2034_s7 + $0x44] ss:$8 sps:$4 sm:$0xff]  }
  0x44   : > { %v1731_v46 = vld [vmem:[%s2034_s7 + $0x134] ss:$8 sps:$4 sm:$0xff]   ;;  %v1734_v48 = vld [vmem:[%s2034_s7 + $0x130] ss:$8 sps:$4 sm:$0xff]   ;;  %v1737_v50 = vld [vmem:[%s2034_s7 + $0x144] ss:$8 sps:$4 sm:$0xff]  }
  0x45   : > { %1000 = vmatpush1.bf16.msra.mxu1 %v1721_v39  ;;  %v1739_v51 = vld [vmem:[%s2034_s7 + $0x40] ss:$8 sps:$4 sm:$0xff]   ;;  %v1741_v53 = vld [vmem:[%s2034_s7 + $0x54] ss:$8 sps:$4 sm:$0xff]   ;;  %v1745_v55 = vld [vmem:[%s2034_s7 + $0x50] ss:$8 sps:$4 sm:$0xff]  }
  0x46   : > { %1113 = vmatpush1.bf16.msra.mxu0 %v1722_v40  ;;  %1001 = vmatprep.subr.bf16.mxu1 %v1723_v41  ;;  %v1740_v52 = vld [vmem:[%s2034_s7 + $0x140] ss:$8 sps:$4 sm:$0xff]   ;;  %v1743_v54 = vld [vmem:[%s2034_s7 + $0x154] ss:$8 sps:$4 sm:$0xff]   ;;  %v1746_v56 = vld [vmem:[%s2034_s7 + $0x150] ss:$8 sps:$4 sm:$0xff]  }
  0x47   : > { %1114 = vmatprep.subr.bf16.mxu0 %v1725_v42  ;;  %v1747_v57 = vld [vmem:[%s2034_s7 + $0x64] ss:$8 sps:$4 sm:$0xff]   ;;  %v1751_v59 = vld [vmem:[%s2034_s7 + $0x60] ss:$8 sps:$4 sm:$0xff]   ;;  %v1753_v61 = vld [vmem:[%s2034_s7 + $0x74] ss:$8 sps:$4 sm:$0xff]  }
  0x48   : > { %v1749_v58 = vld [vmem:[%s2034_s7 + $0x164] ss:$8 sps:$4 sm:$0xff]   ;;  %v1752_v60 = vld [vmem:[%s2034_s7 + $0x160] ss:$8 sps:$4 sm:$0xff]   ;;  %v1755_v62 = vld [vmem:[%s2034_s7 + $0x174] ss:$8 sps:$4 sm:$0xff]  }
  0x49   : > { %1002 = vmatpush1.bf16.msra.mxu1 %v1727_v43  ;;  %v1757_v63 = vld [vmem:[%s2034_s7 + $0x70] ss:$8 sps:$4 sm:$0xff]   ;;  %v1759_v1 = vld [vmem:[%s2034_s7 + $0x84] ss:$8 sps:$4 sm:$0xff]   ;;  %v1763_v3 = vld [vmem:[%s2034_s7 + $0x80] ss:$8 sps:$4 sm:$0xff]  }
  0x4a   : > { %1115 = vmatpush1.bf16.msra.mxu0 %v1728_v44  ;;  %1003 = vmatprep.subr.bf16.mxu1 %v1729_v45  ;;  %v1758_v0 = vld [vmem:[%s2034_s7 + $0x170] ss:$8 sps:$4 sm:$0xff]   ;;  %v1761_v2 = vld [vmem:[%s2034_s7 + $0x184] ss:$8 sps:$4 sm:$0xff]   ;;  %v1764_v4 = vld [vmem:[%s2034_s7 + $0x180] ss:$8 sps:$4 sm:$0xff]  }
  0x4b   : > { %1116 = vmatprep.subr.bf16.mxu0 %v1731_v46  ;;  %v1765_v5 = vld [vmem:[%s2034_s7 + $0x94] ss:$8 sps:$4 sm:$0xff]   ;;  %v1769_v7 = vld [vmem:[%s2034_s7 + $0x90] ss:$8 sps:$4 sm:$0xff]   ;;  %v1771_v9 = vld [vmem:[%s2034_s7 + $0xa4] ss:$8 sps:$4 sm:$0xff]  }
  0x4c   : > { %v1767_v6 = vld [vmem:[%s2034_s7 + $0x194] ss:$8 sps:$4 sm:$0xff]   ;;  %v1770_v8 = vld [vmem:[%s2034_s7 + $0x190] ss:$8 sps:$4 sm:$0xff]   ;;  %v1773_v10 = vld [vmem:[%s2034_s7 + $0x1a4] ss:$8 sps:$4 sm:$0xff]  }
  0x4d   : > { %1004 = vmatpush1.bf16.msra.mxu1 %v1733_v47  ;;  %v1775_v11 = vld [vmem:[%s2034_s7 + $0xa0] ss:$8 sps:$4 sm:$0xff]   ;;  %v1777_v13 = vld [vmem:[%s2034_s7 + $0xb4] ss:$8 sps:$4 sm:$0xff]   ;;  %v1781_v15 = vld [vmem:[%s2034_s7 + $0xb0] ss:$8 sps:$4 sm:$0xff]  }
  0x4e   : > { %1117 = vmatpush1.bf16.msra.mxu0 %v1734_v48  ;;  %1005 = vmatprep.subr.bf16.mxu1 %v1735_v49  ;;  %v1776_v12 = vld [vmem:[%s2034_s7 + $0x1a0] ss:$8 sps:$4 sm:$0xff]   ;;  %v1779_v14 = vld [vmem:[%s2034_s7 + $0x1b4] ss:$8 sps:$4 sm:$0xff]   ;;  %v1782_v16 = vld [vmem:[%s2034_s7 + $0x1b0] ss:$8 sps:$4 sm:$0xff]  }
  0x4f   : > { %1118 = vmatprep.subr.bf16.mxu0 %v1737_v50  ;;  %v1783_v17 = vld [vmem:[%s2034_s7 + $0xc4] ss:$8 sps:$4 sm:$0xff]   ;;  %v1787_v21 = vld [vmem:[%s2034_s7 + $0xc0] ss:$8 sps:$4 sm:$0xff]   ;;  %v1789_v23 = vld [vmem:[%s2034_s7 + $0xd4] ss:$8 sps:$4 sm:$0xff]  }
  0x50   : > { %v1809_v18 = vld [vmem:[%s2036_s8 + $0x4] ss:$16 sps:$4 sm:$0xff]   ;;  %v1812_v20 = vld [vmem:[%s2036_s8 + $0xc] ss:$16 sps:$4 sm:$0xff]   ;;  %v1788_v22 = vld [vmem:[%s2034_s7 + $0x1c0] ss:$8 sps:$4 sm:$0xff]  }
  0x51   : > { %1006 = vmatpush1.bf16.msra.mxu1 %v1739_v51  ;;  %v1785_v19 = vld [vmem:[%s2034_s7 + $0x1c4] ss:$8 sps:$4 sm:$0xff]   ;;  %1029 = vmatprep.mubr.bf16.mxu1 %v1809_v18  ;;  %v1791_v24 = vld [vmem:[%s2034_s7 + $0x1d4] ss:$8 sps:$4 sm:$0xff]   ;;  %v1793_v25 = vld [vmem:[%s2034_s7 + $0xd0] ss:$8 sps:$4 sm:$0xff]  }
  0x52   : > { %1119 = vmatpush1.bf16.msra.mxu0 %v1740_v52  ;;  %1007 = vmatprep.subr.bf16.mxu1 %v1741_v53  ;;  %v1794_v26 = vld [vmem:[%s2034_s7 + $0x1d0] ss:$8 sps:$4 sm:$0xff]   ;;  %v1795_v27 = vld [vmem:[%s2034_s7 + $0xe4] ss:$8 sps:$4 sm:$0xff]   ;;  %v1799_v29 = vld [vmem:[%s2034_s7 + $0xe0] ss:$8 sps:$4 sm:$0xff]  }
  0x53   : > { %1120 = vmatprep.subr.bf16.mxu0 %v1743_v54  ;;  %1142 = vmatprep.mubr.bf16.mxu0 %v1812_v20  ;;  %v1797_v28 = vld [vmem:[%s2034_s7 + $0x1e4] ss:$8 sps:$4 sm:$0xff]   ;;  %v1800_v30 = vld [vmem:[%s2034_s7 + $0x1e0] ss:$8 sps:$4 sm:$0xff]   ;;  %v1801_v31 = vld [vmem:[%s2034_s7 + $0xf4] ss:$8 sps:$4 sm:$0xff]  }
  0x54   : > { %v1803_v32 = vld [vmem:[%s2034_s7 + $0x1f4] ss:$8 sps:$4 sm:$0xff]   ;;  %v1805_v33 = vld [vmem:[%s2034_s7 + $0xf0] ss:$8 sps:$4 sm:$0xff]   ;;  %p1631_p11 = scmp.ne.s32.totalorder %s1885_s14, 22 }
  0x55   : > { %1008 = vmatpush1.bf16.msra.mxu1 %v1745_v55  ;;  %v1806_v34 = vld [vmem:[%s2034_s7 + $0x1f0] ss:$8 sps:$4 sm:$0xff]   ;;  %v1813_v37 = vld [vmem:[%s2036_s8 + $0x24] ss:$16 sps:$4 sm:$0xff]   ;;  %v1815_v38 = vld [vmem:[%s2036_s8 + $0x2c] ss:$16 sps:$4 sm:$0xff]  }
  0x56   : > { %1121 = vmatpush1.bf16.msra.mxu0 %v1746_v56  ;;  %1009 = vmatprep.subr.bf16.mxu1 %v1747_v57  ;;  %v1807_v35 = vld [vmem:[%s2036_s8] ss:$16 sps:$4 sm:$0xff]   ;;  %v1810_v36 = vld [vmem:[%s2036_s8 + $0x8] ss:$16 sps:$4 sm:$0xff]   ;;  %v1819_v41 = vld [vmem:[%s2036_s8 + $0x44] ss:$16 sps:$4 sm:$0xff]  }
  0x57   : > { %1122 = vmatprep.subr.bf16.mxu0 %v1749_v58  ;;  %v1817_v39 = vld [vmem:[%s2036_s8 + $0x20] ss:$16 sps:$4 sm:$0xff]   ;;  %v1818_v40 = vld [vmem:[%s2036_s8 + $0x28] ss:$16 sps:$4 sm:$0xff]   ;;  %v1821_v42 = vld [vmem:[%s2036_s8 + $0x4c] ss:$16 sps:$4 sm:$0xff]  }
  0x58   : > { %v1823_v43 = vld [vmem:[%s2036_s8 + $0x40] ss:$16 sps:$4 sm:$0xff]   ;;  %v1824_v44 = vld [vmem:[%s2036_s8 + $0x48] ss:$16 sps:$4 sm:$0xff]   ;;  %v1825_v45 = vld [vmem:[%s2036_s8 + $0x64] ss:$16 sps:$4 sm:$0xff]  }
  0x59   : > { %1010 = vmatpush1.bf16.msra.mxu1 %v1751_v59  ;;  %v1827_v46 = vld [vmem:[%s2036_s8 + $0x6c] ss:$16 sps:$4 sm:$0xff]   ;;  %v1829_v47 = vld [vmem:[%s2036_s8 + $0x60] ss:$16 sps:$4 sm:$0xff]   ;;  %v1830_v48 = vld [vmem:[%s2036_s8 + $0x68] ss:$16 sps:$4 sm:$0xff]  }
  0x5a   : > { %1123 = vmatpush1.bf16.msra.mxu0 %v1752_v60  ;;  %1011 = vmatprep.subr.bf16.mxu1 %v1753_v61  ;;  %v1831_v49 = vld [vmem:[%s2036_s8 + $0x84] ss:$16 sps:$4 sm:$0xff]   ;;  %v1833_v50 = vld [vmem:[%s2036_s8 + $0x8c] ss:$16 sps:$4 sm:$0xff]   ;;  %v1835_v51 = vld [vmem:[%s2036_s8 + $0x80] ss:$16 sps:$4 sm:$0xff]  }
  0x5b   : > { %1124 = vmatprep.subr.bf16.mxu0 %v1755_v62  ;;  %v1836_v52 = vld [vmem:[%s2036_s8 + $0x88] ss:$16 sps:$4 sm:$0xff]   ;;  %v1837_v53 = vld [vmem:[%s2036_s8 + $0xa4] ss:$16 sps:$4 sm:$0xff]   ;;  %v1839_v54 = vld [vmem:[%s2036_s8 + $0xac] ss:$16 sps:$4 sm:$0xff]  }
  0x5c   : > { %v1841_v55 = vld [vmem:[%s2036_s8 + $0xa0] ss:$16 sps:$4 sm:$0xff]   ;;  %v1842_v56 = vld [vmem:[%s2036_s8 + $0xa8] ss:$16 sps:$4 sm:$0xff]   ;;  %v1843_v57 = vld [vmem:[%s2036_s8 + $0xc4] ss:$16 sps:$4 sm:$0xff]  }
  0x5d   : > { %1012 = vmatpush1.bf16.msra.mxu1 %v1757_v63  ;;  %v1845_v58 = vld [vmem:[%s2036_s8 + $0xcc] ss:$16 sps:$4 sm:$0xff]   ;;  %v1847_v59 = vld [vmem:[%s2036_s8 + $0xc0] ss:$16 sps:$4 sm:$0xff]   ;;  %v1848_v60 = vld [vmem:[%s2036_s8 + $0xc8] ss:$16 sps:$4 sm:$0xff]  }
  0x5e   : > { %1125 = vmatpush1.bf16.msra.mxu0 %v1758_v0  ;;  %1013 = vmatprep.subr.bf16.mxu1 %v1759_v1  ;;  %v1849_v61 = vld [vmem:[%s2036_s8 + $0xe4] ss:$16 sps:$4 sm:$0xff]   ;;  %v1851_v62 = vld [vmem:[%s2036_s8 + $0xec] ss:$16 sps:$4 sm:$0xff]   ;;  %v1853_v63 = vld [vmem:[%s2036_s8 + $0xe0] ss:$16 sps:$4 sm:$0xff]  }
  0x5f   : > { %1126 = vmatprep.subr.bf16.mxu0 %v1761_v2  ;;  %v1854_v0 = vld [vmem:[%s2036_s8 + $0xe8] ss:$16 sps:$4 sm:$0xff]   ;;  %v389_v2 = vld [vmem:[#allocation2] sm:$0xff] }
  0x61   : > { %1014 = vmatpush1.bf16.msra.mxu1 %v1763_v3 }
  0x62   : > { %1127 = vmatpush1.bf16.msra.mxu0 %v1764_v4  ;;  %1015 = vmatprep.subr.bf16.mxu1 %v1765_v5 }
  0x63   : > { %1128 = vmatprep.subr.bf16.mxu0 %v1767_v6  ;;  %v390_v6 = vld [vmem:[#allocation2 + $0x8] sm:$0xff] }
  0x65   : > { %1016 = vmatpush1.bf16.msra.mxu1 %v1769_v7 }
  0x66   : > { %1129 = vmatpush1.bf16.msra.mxu0 %v1770_v8  ;;  %1017 = vmatprep.subr.bf16.mxu1 %v1771_v9 }
  0x67   : > { %1130 = vmatprep.subr.bf16.mxu0 %v1773_v10  ;;  %v391_v10 = vld [vmem:[#allocation2 + $0x10] sm:$0xff] }
  0x69   : > { %1018 = vmatpush1.bf16.msra.mxu1 %v1775_v11 }
  0x6a   : > { %1131 = vmatpush1.bf16.msra.mxu0 %v1776_v12  ;;  %1019 = vmatprep.subr.bf16.mxu1 %v1777_v13 }
  0x6b   : > { %1132 = vmatprep.subr.bf16.mxu0 %v1779_v14 }
  0x6d   : > { %1020 = vmatpush1.bf16.msra.mxu1 %v1781_v15  ;;  %v392_v15 = vld [vmem:[#allocation2 + $0x18] sm:$0xff] }
  0x6e   : > { %1133 = vmatpush1.bf16.msra.mxu0 %v1782_v16  ;;  %1021 = vmatprep.subr.bf16.mxu1 %v1783_v17 }
  0x6f   : > { %1134 = vmatprep.subr.bf16.mxu0 %v1785_v19 }
  0x71   : > { %1022 = vmatpush1.bf16.msra.mxu1 %v1787_v21 }
  0x72   : > { %1135 = vmatpush1.bf16.msra.mxu0 %v1788_v22  ;;  %1023 = vmatprep.subr.bf16.mxu1 %v1789_v23  ;;  %v393_v22 = vld [vmem:[#allocation2 + $0x20] sm:$0xff] }
  0x73   : > { %1136 = vmatprep.subr.bf16.mxu0 %v1791_v24 }
  0x75   : > { %1024 = vmatpush1.bf16.msra.mxu1 %v1793_v25 }
  0x76   : > { %1137 = vmatpush1.bf16.msra.mxu0 %v1794_v26  ;;  %1025 = vmatprep.subr.bf16.mxu1 %v1795_v27  ;;  %v394_v26 = vld [vmem:[#allocation2 + $0x28] sm:$0xff] }
  0x77   : > { %1138 = vmatprep.subr.bf16.mxu0 %v1797_v28 }
  0x79   : > { %1026 = vmatpush1.bf16.msra.mxu1 %v1799_v29 }
  0x7a   : > { %1139 = vmatpush1.bf16.msra.mxu0 %v1800_v30  ;;  %1027 = vmatprep.subr.bf16.mxu1 %v1801_v31  ;;  %v395_v30 = vld [vmem:[#allocation2 + $0x30] sm:$0xff] }
  0x7b   : > { %1140 = vmatprep.subr.bf16.mxu0 %v1803_v32 }
  0x7d   : > { %1028 = vmatpush1.bf16.msra.mxu1 %v1805_v33 }
  0x7e   : > { %1141 = vmatpush1.bf16.msra.mxu0 %v1806_v34 }
  0x80   : > { %1030 = vmatmul.mubr.bf16.vlgmr.msra.gmra.mrb[0].mxu1 %v1807_v35  ;;  %v396_v35 = vld [vmem:[#allocation2 + $0x38] sm:$0xff] }
  0x81   : > { %1143 = vmatmul.mubr.bf16.vlgmr.msra.gmra.mrb[0].mxu0 %v1810_v36  ;;  %1039 = vmatprep.mubr.bf16.mxu1 %v1813_v37 }
  0x82   : > { %1152 = vmatprep.mubr.bf16.mxu0 %v1815_v38 }
  0x88   : > { %1040 = vmatmul.mubr.bf16.gmra.mrb[4].mxu1 %v1817_v39 }
  0x89   : > { %1153 = vmatmul.mubr.bf16.gmra.mrb[4].mxu0 %v1818_v40  ;;  %1049 = vmatprep.mubr.bf16.mxu1 %v1819_v41 }
  0x8a   : > { %1162 = vmatprep.mubr.bf16.mxu0 %v1821_v42  ;;  %v397_v42 = vld [vmem:[#allocation2 + $0x40] sm:$0xff] }
  0x90   : > { %1050 = vmatmul.mubr.bf16.gmra.mrb[8].mxu1 %v1823_v43 }
  0x91   : > { %1163 = vmatmul.mubr.bf16.gmra.mrb[8].mxu0 %v1824_v44  ;;  %1059 = vmatprep.mubr.bf16.mxu1 %v1825_v45 }
  0x92   : > { %1172 = vmatprep.mubr.bf16.mxu0 %v1827_v46  ;;  %v398_v46 = vld [vmem:[#allocation2 + $0x48] sm:$0xff] }
  0x98   : > { %1060 = vmatmul.mubr.bf16.gmra.mrb[12].mxu1 %v1829_v47 }
  0x99   : > { %1173 = vmatmul.mubr.bf16.gmra.mrb[12].mxu0 %v1830_v48  ;;  %1069 = vmatprep.mubr.bf16.mxu1 %v1831_v49 }
  0x9a   : > { %1182 = vmatprep.mubr.bf16.mxu0 %v1833_v50  ;;  %v399_v50 = vld [vmem:[#allocation2 + $0x50] sm:$0xff] }
  0xa0   : > { %1070 = vmatmul.mubr.bf16.gmra.mrb[16].mxu1 %v1835_v51 }
  0xa1   : > { %1183 = vmatmul.mubr.bf16.gmra.mrb[16].mxu0 %v1836_v52  ;;  %1079 = vmatprep.mubr.bf16.mxu1 %v1837_v53 }
  0xa2   : > { %1192 = vmatprep.mubr.bf16.mxu0 %v1839_v54 }
  0xa8   : > { %1080 = vmatmul.mubr.bf16.gmra.mrb[20].mxu1 %v1841_v55  ;;  %v400_v55 = vld [vmem:[#allocation2 + $0x58] sm:$0xff] }
  0xa9   : > { %1193 = vmatmul.mubr.bf16.gmra.mrb[20].mxu0 %v1842_v56  ;;  %1089 = vmatprep.mubr.bf16.mxu1 %v1843_v57 }
  0xaa   : > { %1202 = vmatprep.mubr.bf16.mxu0 %v1845_v58 }
  0xb0   : > { %1090 = vmatmul.mubr.bf16.gmra.mrb[24].mxu1 %v1847_v59 }
  0xb1   : > { %1203 = vmatmul.mubr.bf16.gmra.mrb[24].mxu0 %v1848_v60  ;;  %1099 = vmatprep.mubr.bf16.mxu1 %v1849_v61 }
  0xb2   : > { %1212 = vmatprep.mubr.bf16.mxu0 %v1851_v62  ;;  %v401_v62 = vld [vmem:[#allocation2 + $0x60] sm:$0xff] }
  0xb8   : > { %1100 = vmatmul.mubr.bf16.gmra.mrb[28].mxu1 %v1853_v63 }
  0xb9   : > { %1213 = vmatmul.mubr.bf16.gmra.mrb[28].mxu0 %v1854_v0 }
 0x153   : > { %v1031_v1 = vpop.f32.mrb[0].mxu1 }
 0x154   : > { %v1144_v3 = vpop.f32.mrb[0].mxu0  ;;  %v1033_v5 = vpop.f32.mrb[1].mxu1 }
 0x155   : > { %v1145_v4 = vadd.f32 %v1144_v3, %v1031_v1  ;;  %v1146_v7 = vpop.f32.mrb[1].mxu0  ;;  %v1035_v9 = vpop.f32.mrb[2].mxu1 }
 0x156   : > { %v1147_v8 = vadd.f32 %v1146_v7, %v1033_v5  ;;  %v1148_v11 = vpop.f32.mrb[2].mxu0  ;;  %v1037_v14 = vpop.f32.mrb[3].mxu1 }
 0x157   : > { %v1223_v12 = vadd.f32 %v1145_v4, %v389_v2  ;;  %v1149_v13 = vadd.f32 %v1148_v11, %v1035_v9  ;;  %v1150_v16 = vpop.f32.mrb[3].mxu0  ;;  %v402_v2 = vld [vmem:[#allocation2 + $0x68] sm:$0xff]  ;;  %v404_v11 = vld [vmem:[#allocation2 + $0x78] sm:$0xff] }
 0x158   : > { %v1224_v17 = vadd.f32 %v1147_v8, %v390_v6  ;;  %v1151_v18 = vadd.f32 %v1150_v16, %v1037_v14  ;;  %v403_v6 = vld [vmem:[#allocation2 + $0x70] sm:$0xff] }
 0x159   : > { %1255 = vst [vmem:[#allocation2] sm:$0xff] %v1223_v12  ;;  %v1225_v19 = vadd.f32 %v1149_v13, %v391_v10 }
 0x15a   : > { %1256 = vst [vmem:[#allocation2 + $0x8] sm:$0xff] %v1224_v17  ;;  %v1226_v20 = vadd.f32 %v1151_v18, %v392_v15  ;;  %v405_v18 = vld [vmem:[#allocation2 + $0x80] sm:$0xff] }
 0x15b   : > { %1257 = vst [vmem:[#allocation2 + $0x10] sm:$0xff] %v1225_v19  ;;  %v1041_v21 = vpop.f32.mrb[4].mxu1 }
 0x15c   : > { %1258 = vst [vmem:[#allocation2 + $0x18] sm:$0xff] %v1226_v20  ;;  %v1154_v23 = vpop.f32.mrb[4].mxu0  ;;  %v1043_v25 = vpop.f32.mrb[5].mxu1 }
 0x15d   : > { %v1155_v24 = vadd.f32 %v1154_v23, %v1041_v21  ;;  %v1156_v27 = vpop.f32.mrb[5].mxu0  ;;  %v1045_v29 = vpop.f32.mrb[6].mxu1 }
 0x15e   : > { %v1157_v28 = vadd.f32 %v1156_v27, %v1043_v25  ;;  %v1158_v31 = vpop.f32.mrb[6].mxu0  ;;  %v1047_v34 = vpop.f32.mrb[7].mxu1 }
 0x15f   : > { %v1227_v32 = vadd.f32 %v1155_v24, %v393_v22  ;;  %v1159_v33 = vadd.f32 %v1158_v31, %v1045_v29  ;;  %v1160_v36 = vpop.f32.mrb[7].mxu0  ;;  %v406_v22 = vld [vmem:[#allocation2 + $0x88] sm:$0xff]  ;;  %v408_v31 = vld [vmem:[#allocation2 + $0x98] sm:$0xff] }
 0x160   : > { %v1228_v37 = vadd.f32 %v1157_v28, %v394_v26  ;;  %v1161_v38 = vadd.f32 %v1160_v36, %v1047_v34  ;;  %v407_v26 = vld [vmem:[#allocation2 + $0x90] sm:$0xff] }
 0x161   : > { %1259 = vst [vmem:[#allocation2 + $0x20] sm:$0xff] %v1227_v32  ;;  %v1229_v39 = vadd.f32 %v1159_v33, %v395_v30 }
 0x162   : > { %1260 = vst [vmem:[#allocation2 + $0x28] sm:$0xff] %v1228_v37  ;;  %v1230_v40 = vadd.f32 %v1161_v38, %v396_v35  ;;  %v409_v38 = vld [vmem:[#allocation2 + $0xa0] sm:$0xff] }
 0x163   : > { %1261 = vst [vmem:[#allocation2 + $0x30] sm:$0xff] %v1229_v39  ;;  %v1051_v41 = vpop.f32.mrb[8].mxu1 }
 0x164   : > { %1262 = vst [vmem:[#allocation2 + $0x38] sm:$0xff] %v1230_v40  ;;  %v1164_v43 = vpop.f32.mrb[8].mxu0  ;;  %v1053_v45 = vpop.f32.mrb[9].mxu1 }
 0x165   : > { %v1165_v44 = vadd.f32 %v1164_v43, %v1051_v41  ;;  %v1166_v47 = vpop.f32.mrb[9].mxu0  ;;  %v1055_v49 = vpop.f32.mrb[10].mxu1 }
 0x166   : > { %v1167_v48 = vadd.f32 %v1166_v47, %v1053_v45  ;;  %v1168_v51 = vpop.f32.mrb[10].mxu0  ;;  %v1057_v54 = vpop.f32.mrb[11].mxu1 }
 0x167   : > { %v1231_v52 = vadd.f32 %v1165_v44, %v397_v42  ;;  %v1169_v53 = vadd.f32 %v1168_v51, %v1055_v49  ;;  %v1170_v56 = vpop.f32.mrb[11].mxu0  ;;  %v410_v42 = vld [vmem:[#allocation2 + $0xa8] sm:$0xff]  ;;  %v412_v51 = vld [vmem:[#allocation2 + $0xb8] sm:$0xff] }
 0x168   : > { %v1232_v57 = vadd.f32 %v1167_v48, %v398_v46  ;;  %v1171_v58 = vadd.f32 %v1170_v56, %v1057_v54  ;;  %v411_v46 = vld [vmem:[#allocation2 + $0xb0] sm:$0xff] }
 0x169   : > { %1263 = vst [vmem:[#allocation2 + $0x40] sm:$0xff] %v1231_v52  ;;  %v1233_v59 = vadd.f32 %v1169_v53, %v399_v50 }
 0x16a   : > { %1264 = vst [vmem:[#allocation2 + $0x48] sm:$0xff] %v1232_v57  ;;  %v1234_v60 = vadd.f32 %v1171_v58, %v400_v55  ;;  %v413_v58 = vld [vmem:[#allocation2 + $0xc0] sm:$0xff] }
 0x16b   : > { %1265 = vst [vmem:[#allocation2 + $0x50] sm:$0xff] %v1233_v59  ;;  %v1061_v61 = vpop.f32.mrb[12].mxu1 }
 0x16c   : > { %1266 = vst [vmem:[#allocation2 + $0x58] sm:$0xff] %v1234_v60  ;;  %v1174_v63 = vpop.f32.mrb[12].mxu0  ;;  %v1063_v1 = vpop.f32.mrb[13].mxu1 }
 0x16d   : > { %v1175_v0 = vadd.f32 %v1174_v63, %v1061_v61  ;;  %v1176_v3 = vpop.f32.mrb[13].mxu0  ;;  %v1065_v5 = vpop.f32.mrb[14].mxu1 }
 0x16e   : > { %v1177_v4 = vadd.f32 %v1176_v3, %v1063_v1  ;;  %v1178_v7 = vpop.f32.mrb[14].mxu0  ;;  %v1067_v10 = vpop.f32.mrb[15].mxu1 }
 0x16f   : > { %v1235_v8 = vadd.f32 %v1175_v0, %v401_v62  ;;  %v1179_v9 = vadd.f32 %v1178_v7, %v1065_v5  ;;  %v1180_v12 = vpop.f32.mrb[15].mxu0  ;;  %v414_v62 = vld [vmem:[#allocation2 + $0xc8] sm:$0xff]  ;;  %v416_v7 = vld [vmem:[#allocation2 + $0xd8] sm:$0xff] }
 0x170   : > { %v1236_v13 = vadd.f32 %v1177_v4, %v402_v2  ;;  %v1181_v14 = vadd.f32 %v1180_v12, %v1067_v10  ;;  %v415_v2 = vld [vmem:[#allocation2 + $0xd0] sm:$0xff] }
 0x171   : > { %1267 = vst [vmem:[#allocation2 + $0x60] sm:$0xff] %v1235_v8  ;;  %v1237_v15 = vadd.f32 %v1179_v9, %v403_v6 }
 0x172   : > { %1268 = vst [vmem:[#allocation2 + $0x68] sm:$0xff] %v1236_v13  ;;  %v1238_v16 = vadd.f32 %v1181_v14, %v404_v11  ;;  %v417_v14 = vld [vmem:[#allocation2 + $0xe0] sm:$0xff] }
 0x173   : > { %1269 = vst [vmem:[#allocation2 + $0x70] sm:$0xff] %v1237_v15  ;;  %v1071_v17 = vpop.f32.mrb[16].mxu1 }
 0x174   : > { %1270 = vst [vmem:[#allocation2 + $0x78] sm:$0xff] %v1238_v16  ;;  %v1184_v19 = vpop.f32.mrb[16].mxu0  ;;  %v1073_v21 = vpop.f32.mrb[17].mxu1 }
 0x175   : > { %v1185_v20 = vadd.f32 %v1184_v19, %v1071_v17  ;;  %v1186_v23 = vpop.f32.mrb[17].mxu0  ;;  %v1075_v25 = vpop.f32.mrb[18].mxu1 }
 0x176   : > { %v1187_v24 = vadd.f32 %v1186_v23, %v1073_v21  ;;  %v1188_v27 = vpop.f32.mrb[18].mxu0  ;;  %v1077_v30 = vpop.f32.mrb[19].mxu1 }
 0x177   : > { %v1239_v28 = vadd.f32 %v1185_v20, %v405_v18  ;;  %v1189_v29 = vadd.f32 %v1188_v27, %v1075_v25  ;;  %v1190_v32 = vpop.f32.mrb[19].mxu0  ;;  %v418_v18 = vld [vmem:[#allocation2 + $0xe8] sm:$0xff]  ;;  %v420_v27 = vld [vmem:[#allocation2 + $0xf8] sm:$0xff] }
 0x178   : > { %v1240_v33 = vadd.f32 %v1187_v24, %v406_v22  ;;  %v1191_v34 = vadd.f32 %v1190_v32, %v1077_v30  ;;  %v419_v22 = vld [vmem:[#allocation2 + $0xf0] sm:$0xff] }
 0x179   : > { %1271 = vst [vmem:[#allocation2 + $0x80] sm:$0xff] %v1239_v28  ;;  %v1241_v35 = vadd.f32 %v1189_v29, %v407_v26 }
 0x17a   : > { %1272 = vst [vmem:[#allocation2 + $0x88] sm:$0xff] %v1240_v33  ;;  %v1242_v36 = vadd.f32 %v1191_v34, %v408_v31  ;;  %v1325_v33 = vlaneseq (!%p1631_p11)  ;;  %v1323_v34 = vld [vmem:[%s2288_s2] sm:$0x3] (!%p1631_p11) }
 0x17b   : > { %1273 = vst [vmem:[#allocation2 + $0x90] sm:$0xff] %v1241_v35  ;;  %v1081_v37 = vpop.f32.mrb[20].mxu1 }
 0x17c   : > { %1274 = vst [vmem:[#allocation2 + $0x98] sm:$0xff] %v1242_v36  ;;  %v1194_v39 = vpop.f32.mrb[20].mxu0  ;;  %v1083_v41 = vpop.f32.mrb[21].mxu1  ;;  %v1326_v35 = vshrl.u32 (!%p1631_p11), %v1325_v33, 7  ;;  %v1291_v36 = vld [vmem:[#allocation2] sm:$0xff] (!%p1631_p11) }
 0x17d   : > { %v1195_v40 = vadd.f32 %v1194_v39, %v1081_v37  ;;  %v1196_v43 = vpop.f32.mrb[21].mxu0  ;;  %v1085_v45 = vpop.f32.mrb[22].mxu1  ;;  %v1292_v37 = vld [vmem:[#allocation2 + $0x8] sm:$0xff] (!%p1631_p11)  ;;  %v1294_v39 = vld [vmem:[#allocation2 + $0x18] sm:$0xff] (!%p1631_p11) }
 0x17e   : > { %v1197_v44 = vadd.f32 %v1196_v43, %v1083_v41  ;;  %v1198_v47 = vpop.f32.mrb[22].mxu0  ;;  %v1087_v50 = vpop.f32.mrb[23].mxu1  ;;  %v1331_v41 = vsub.s32 (!%p1631_p11), 1, %v1326_v35  ;;  %v1296_v43 = vld [vmem:[#allocation2 + $0x28] sm:$0xff] (!%p1631_p11) }
 0x17f   : > { %v1243_v48 = vadd.f32 %v1195_v40, %v409_v38  ;;  %v1199_v49 = vadd.f32 %v1198_v47, %v1085_v45  ;;  %v1200_v52 = vpop.f32.mrb[23].mxu0  ;;  %v1293_v38 = vld [vmem:[#allocation2 + $0x10] sm:$0xff] (!%p1631_p11)  ;;  %v1327_v40 = vsub.s32 (!%p1631_p11), 0, %v1326_v35  ;;  %v1298_v45 = vld [vmem:[#allocation2 + $0x38] sm:$0xff] (!%p1631_p11)  ;;  %v1300_v47 = vld [vmem:[#allocation2 + $0x48] sm:$0xff] (!%p1631_p11) }
 0x180   : > { %v1244_v53 = vadd.f32 %v1197_v44, %v410_v42  ;;  %v1201_v54 = vadd.f32 %v1200_v52, %v1087_v50  ;;  %v1295_v42 = vld [vmem:[#allocation2 + $0x20] sm:$0xff] (!%p1631_p11)  ;;  %v1297_v44 = vld [vmem:[#allocation2 + $0x30] sm:$0xff] (!%p1631_p11)  ;;  %v2141_v50 = vrot.slane (!%p1631_p11), %v1323_v34, %v1331_v41 }
 0x181   : > { %1275 = vst [vmem:[#allocation2 + $0xa0] sm:$0xff] %v1243_v48  ;;  %v1245_v55 = vadd.f32 %v1199_v49, %v411_v46  ;;  %v1299_v46 = vld [vmem:[#allocation2 + $0x40] sm:$0xff] (!%p1631_p11)  ;;  %v1301_v48 = vld [vmem:[#allocation2 + $0x50] sm:$0xff] (!%p1631_p11)  ;;  %v2139_v49 = vrot.slane (!%p1631_p11), %v1323_v34, %v1327_v40 }
 0x182   : > { %1276 = vst [vmem:[#allocation2 + $0xa8] sm:$0xff] %v1244_v53  ;;  %v1246_v56 = vadd.f32 %v1201_v54, %v412_v51  ;;  %v1302_v51 = vld [vmem:[#allocation2 + $0x58] sm:$0xff] (!%p1631_p11)  ;;  %v1303_v52 = vld [vmem:[#allocation2 + $0x60] sm:$0xff] (!%p1631_p11)  ;;  %v1304_v53 = vld [vmem:[#allocation2 + $0x68] sm:$0xff] (!%p1631_p11) }
 0x183   : > { %1277 = vst [vmem:[#allocation2 + $0xb0] sm:$0xff] %v1245_v55  ;;  %v1091_v57 = vpop.f32.mrb[24].mxu1  ;;  %v1305_v54 = vld [vmem:[#allocation2 + $0x70] sm:$0xff] (!%p1631_p11)  ;;  %v1306_v55 = vld [vmem:[#allocation2 + $0x78] sm:$0xff] (!%p1631_p11) }
 0x184   : > { %1278 = vst [vmem:[#allocation2 + $0xb8] sm:$0xff] %v1246_v56  ;;  %v1204_v59 = vpop.f32.mrb[24].mxu0  ;;  %v1093_v61 = vpop.f32.mrb[25].mxu1  ;;  %v1307_v56 = vld [vmem:[#allocation2 + $0x80] sm:$0xff] (!%p1631_p11) }
 0x185   : > { %v1205_v60 = vadd.f32 %v1204_v59, %v1091_v57  ;;  %v1206_v63 = vpop.f32.mrb[25].mxu0  ;;  %v1095_v1 = vpop.f32.mrb[26].mxu1  ;;  %v1335_v57 = vadd.f32 (!%p1631_p11), %v2139_v49, %v1291_v36  ;;  %v1337_v59 = vadd.f32 (!%p1631_p11), %v2139_v49, %v1293_v38 }
 0x186   : > { %v1207_v0 = vadd.f32 %v1206_v63, %v1093_v61  ;;  %v1208_v3 = vpop.f32.mrb[26].mxu0  ;;  %v1097_v6 = vpop.f32.mrb[27].mxu1  ;;  %v1308_v61 = vld [vmem:[#allocation2 + $0x88] sm:$0xff] (!%p1631_p11)  ;;  %v1310_v63 = vld [vmem:[#allocation2 + $0x98] sm:$0xff] (!%p1631_p11) }
 0x187   : > { %v1247_v4 = vadd.f32 %v1205_v60, %v413_v58  ;;  %v1209_v5 = vadd.f32 %v1208_v3, %v1095_v1  ;;  %v1210_v8 = vpop.f32.mrb[27].mxu0  ;;  %v1336_v58 = vadd.f32 (!%p1631_p11), %v2141_v50, %v1292_v37  ;;  %v1338_v60 = vadd.f32 (!%p1631_p11), %v2141_v50, %v1294_v39  ;;  %1367 = vst [vmem:[%s2289_s3] sm:$0xff] (!%p1631_p11), %v1335_v57 }
 0x188   : > { %v1248_v9 = vadd.f32 %v1207_v0, %v414_v62  ;;  %v1211_v10 = vadd.f32 %v1210_v8, %v1097_v6  ;;  %v1309_v62 = vld [vmem:[#allocation2 + $0x90] sm:$0xff] (!%p1631_p11)  ;;  %v1339_v0 = vadd.f32 (!%p1631_p11), %v2139_v49, %v1295_v42  ;;  %v1340_v1 = vadd.f32 (!%p1631_p11), %v2141_v50, %v1296_v43  ;;  %1369 = vst [vmem:[%s2289_s3 + $0x10] sm:$0xff] (!%p1631_p11), %v1337_v59 }
 0x189   : > { %1279 = vst [vmem:[#allocation2 + $0xc0] sm:$0xff] %v1247_v4  ;;  %v1249_v11 = vadd.f32 %v1209_v5, %v415_v2  ;;  %v1341_v2 = vadd.f32 (!%p1631_p11), %v2139_v49, %v1297_v44  ;;  %v1342_v3 = vadd.f32 (!%p1631_p11), %v2141_v50, %v1298_v45  ;;  %v1311_v4 = vld [vmem:[#allocation2 + $0xa0] sm:$0xff] (!%p1631_p11)  ;;  %v1312_v5 = vld [vmem:[#allocation2 + $0xa8] sm:$0xff] (!%p1631_p11)  ;;  %1368 = vst [vmem:[%s2289_s3 + $0x8] sm:$0xff] (!%p1631_p11), %v1336_v58 }
 0x18a   : > { %1280 = vst [vmem:[#allocation2 + $0xc8] sm:$0xff] %v1248_v9  ;;  %v1250_v12 = vadd.f32 %v1211_v10, %v416_v7  ;;  %v1313_v6 = vld [vmem:[#allocation2 + $0xb0] sm:$0xff] (!%p1631_p11)  ;;  %1370 = vst [vmem:[%s2289_s3 + $0x18] sm:$0xff] (!%p1631_p11), %v1338_v60  ;;  %v1343_v7 = vadd.f32 (!%p1631_p11), %v2139_v49, %v1299_v46  ;;  %v1344_v8 = vadd.f32 (!%p1631_p11), %v2141_v50, %v1300_v47 }
 0x18b   : > { %1281 = vst [vmem:[#allocation2 + $0xd0] sm:$0xff] %v1249_v11  ;;  %v1101_v13 = vpop.f32.mrb[28].mxu1  ;;  %v1345_v9 = vadd.f32 (!%p1631_p11), %v2139_v49, %v1301_v48  ;;  %v1346_v10 = vadd.f32 (!%p1631_p11), %v2141_v50, %v1302_v51  ;;  %v1314_v11 = vld [vmem:[#allocation2 + $0xb8] sm:$0xff] (!%p1631_p11)  ;;  %1371 = vst [vmem:[%s2289_s3 + $0x20] sm:$0xff] (!%p1631_p11), %v1339_v0 }
 0x18c   : > { %1282 = vst [vmem:[#allocation2 + $0xd8] sm:$0xff] %v1250_v12  ;;  %v1214_v15 = vpop.f32.mrb[28].mxu0  ;;  %v1103_v17 = vpop.f32.mrb[29].mxu1  ;;  %1372 = vst [vmem:[%s2289_s3 + $0x28] sm:$0xff] (!%p1631_p11), %v1340_v1 }
 0x18d   : > { %v1215_v16 = vadd.f32 %v1214_v15, %v1101_v13  ;;  %v1216_v19 = vpop.f32.mrb[29].mxu0  ;;  %v1105_v21 = vpop.f32.mrb[30].mxu1  ;;  %1373 = vst [vmem:[%s2289_s3 + $0x30] sm:$0xff] (!%p1631_p11), %v1341_v2  ;;  %1374 = vst [vmem:[%s2289_s3 + $0x38] sm:$0xff] (!%p1631_p11), %v1342_v3  ;;  %v1348_v15 = vadd.f32 (!%p1631_p11), %v2141_v50, %v1304_v53 }
 0x18e   : > { %v1217_v20 = vadd.f32 %v1216_v19, %v1103_v17  ;;  %v1218_v23 = vpop.f32.mrb[30].mxu0  ;;  %v1107_v26 = vpop.f32.mrb[31].mxu1  ;;  %1290 = sbr.rel (%p1631_p11) target bundleno = 415 (0x19f), region = 63  ;;  %v1350_v17 = vadd.f32 (!%p1631_p11), %v2141_v50, %v1306_v55  ;;  %1375 = vst [vmem:[%s2289_s3 + $0x40] sm:$0xff] (!%p1631_p11), %v1343_v7  ;;  %1376 = vst [vmem:[%s2289_s3 + $0x48] sm:$0xff] (!%p1631_p11), %v1344_v8 }
 0x18f   : > { %v1251_v24 = vadd.f32 %v1215_v16, %v417_v14  ;;  %v1219_v25 = vadd.f32 %v1218_v23, %v1105_v21  ;;  %v1220_v28 = vpop.f32.mrb[31].mxu0  ;;  %v1347_v14 = vadd.f32 (!%p1631_p11), %v2139_v49, %v1303_v52  ;;  %v1349_v16 = vadd.f32 (!%p1631_p11), %v2139_v49, %v1305_v54  ;;  %1377 = vst [vmem:[%s2289_s3 + $0x50] sm:$0xff] (!%p1631_p11), %v1345_v9 }
 0x190   : > { %v1252_v29 = vadd.f32 %v1217_v20, %v418_v18  ;;  %v1221_v30 = vadd.f32 %v1220_v28, %v1107_v26  ;;  %v1315_v12 = vld [vmem:[#allocation2 + $0xc0] sm:$0xff] (!%p1631_p11)  ;;  %1378 = vst [vmem:[%s2289_s3 + $0x58] sm:$0xff] (!%p1631_p11), %v1346_v10  ;;  %v1351_v21 = vadd.f32 (!%p1631_p11), %v2139_v49, %v1307_v56  ;;  %v1353_v23 = vadd.f32 (!%p1631_p11), %v2139_v49, %v1309_v62 }
 0x191   : > { %1283 = vst [vmem:[#allocation2 + $0xe0] sm:$0xff] %v1251_v24  ;;  %v1253_v31 = vadd.f32 %v1219_v25, %v419_v22  ;;  %v1316_v13 = vld [vmem:[#allocation2 + $0xc8] sm:$0xff] (!%p1631_p11)  ;;  %v1352_v22 = vadd.f32 (!%p1631_p11), %v2141_v50, %v1308_v61  ;;  %v1354_v24 = vadd.f32 (!%p1631_p11), %v2141_v50, %v1310_v63  ;;  %1379 = vst [vmem:[%s2289_s3 + $0x60] sm:$0xff] (!%p1631_p11), %v1347_v14 }
 0x192   : > { %1284 = vst [vmem:[#allocation2 + $0xe8] sm:$0xff] %v1252_v29  ;;  %v1254_v32 = vadd.f32 %v1221_v30, %v420_v27  ;;  %v1317_v18 = vld [vmem:[#allocation2 + $0xd0] sm:$0xff] (!%p1631_p11)  ;;  %1380 = vst [vmem:[%s2289_s3 + $0x68] sm:$0xff] (!%p1631_p11), %v1348_v15  ;;  %v1355_v28 = vadd.f32 (!%p1631_p11), %v2139_v49, %v1311_v4  ;;  %v1356_v29 = vadd.f32 (!%p1631_p11), %v2141_v50, %v1312_v5 }
 0x193   : > { %1285 = vst [vmem:[#allocation2 + $0xf0] sm:$0xff] %v1253_v31  ;;  %v1318_v19 = vld [vmem:[#allocation2 + $0xd8] sm:$0xff] (!%p1631_p11)  ;;  %1381 = vst [vmem:[%s2289_s3 + $0x70] sm:$0xff] (!%p1631_p11), %v1349_v16  ;;  %v1357_v30 = vadd.f32 (!%p1631_p11), %v2139_v49, %v1313_v6  ;;  %v1358_v31 = vadd.f32 (!%p1631_p11), %v2141_v50, %v1314_v11  ;;  %v1360_v33 = vadd.f32 (!%p1631_p11), %v2141_v50, %v1316_v13 }
 0x194   : > { %1286 = vst [vmem:[#allocation2 + $0xf8] sm:$0xff] %v1254_v32  ;;  %1382 = vst [vmem:[%s2289_s3 + $0x78] sm:$0xff] (!%p1631_p11), %v1350_v17  ;;  %v1359_v32 = vadd.f32 (!%p1631_p11), %v2139_v49, %v1315_v12  ;;  %v1361_v34 = vadd.f32 (!%p1631_p11), %v2139_v49, %v1317_v18  ;;  %v1362_v35 = vadd.f32 (!%p1631_p11), %v2141_v50, %v1318_v19 }
 0x195   : > { %1383 = vst [vmem:[%s2289_s3 + $0x80] sm:$0xff] %v1351_v21  ;;  %1384 = vst [vmem:[%s2289_s3 + $0x88] sm:$0xff] %v1352_v22 }
 0x196   : > { %1385 = vst [vmem:[%s2289_s3 + $0x90] sm:$0xff] %v1353_v23  ;;  %1386 = vst [vmem:[%s2289_s3 + $0x98] sm:$0xff] %v1354_v24 }
 0x197   : > { %1387 = vst [vmem:[%s2289_s3 + $0xa0] sm:$0xff] %v1355_v28  ;;  %1388 = vst [vmem:[%s2289_s3 + $0xa8] sm:$0xff] %v1356_v29 }
 0x198   : > { %v1319_v20 = vld [vmem:[#allocation2 + $0xe0] sm:$0xff]  ;;  %1389 = vst [vmem:[%s2289_s3 + $0xb0] sm:$0xff] %v1357_v30  ;;  %1390 = vst [vmem:[%s2289_s3 + $0xb8] sm:$0xff] %v1358_v31 }
 0x199   : > { %v1320_v25 = vld [vmem:[#allocation2 + $0xe8] sm:$0xff]  ;;  %v1363_v36 = vadd.f32 %v2139_v49, %v1319_v20  ;;  %1391 = vst [vmem:[%s2289_s3 + $0xc0] sm:$0xff] %v1359_v32  ;;  %1392 = vst [vmem:[%s2289_s3 + $0xc8] sm:$0xff] %v1360_v33 }
 0x19a   : > { %v1321_v26 = vld [vmem:[#allocation2 + $0xf0] sm:$0xff]  ;;  %v1364_v37 = vadd.f32 %v2141_v50, %v1320_v25  ;;  %1393 = vst [vmem:[%s2289_s3 + $0xd0] sm:$0xff] %v1361_v34  ;;  %1394 = vst [vmem:[%s2289_s3 + $0xd8] sm:$0xff] %v1362_v35 }
 0x19b   : > { %v1322_v27 = vld [vmem:[#allocation2 + $0xf8] sm:$0xff]  ;;  %v1365_v38 = vadd.f32 %v2139_v49, %v1321_v26  ;;  %1395 = vst [vmem:[%s2289_s3 + $0xe0] sm:$0xff] %v1363_v36 }
 0x19c   : > { %v1366_v39 = vadd.f32 %v2141_v50, %v1322_v27  ;;  %1396 = vst [vmem:[%s2289_s3 + $0xe8] sm:$0xff] %v1364_v37 }
 0x19d   : > { %1397 = vst [vmem:[%s2289_s3 + $0xf0] sm:$0xff] %v1365_v38 }
 0x19e   : > { %1398 = vst [vmem:[%s2289_s3 + $0xf8] sm:$0xff] %v1366_v39 }
 0x19f PF: > { %s13_s16 = sadd.s32 1, %s1893_s16   ;;  %s2290_s12 = smov %s1881_s13 }
 0x1a0   : > { %p10_p12 = scmp.ge.s32.totalorder %s13_s16, 25   ;;  %s2291_s13 = smov %s1951_s20 }
 0x1a1   : > { %s2292_s14 = smov %s1889_s15  ;;  %s2293_s15 = smov %s2295_s17 }
 0x1a2   :  { %12 = sbr.rel (!%p10_p12) target bundleno = 3 (0x3), region = 104 }

// kernel: generator2_forward.19
= control target key start
LH: loop header
LB: loop body
LE: loop exit
PB: predicated region body
PF: predicated region fallthrough
CT: control target
= control target key end

     0   :  { %s1425_s12 = smov 0   ;;  %s1427_s13 = smov 0   ;;  %s1618_s0 = inlined_call_operand.vmem [shape: bf16[2048,256], index: 0, kind: input, shape index: {}]   ;;  %s1619_s1 = inlined_call_operand.vmem [shape: bf16[256,128], index: 1, kind: input, shape index: {}]   ;;  %s1620_s2 = inlined_call_operand.vmem [shape: f32[1,128], index: 2, kind: input, shape index: {}]   ;;  %s1621_s3 = inlined_call_operand.vmem [shape: f32[2048,128], index: 3, kind: output, shape index: {}]  }
   0x1   :  { %s1429_s14 = smov 0  }
   0x2 LB: > { %s32_s15 = sadd.s32 1, %s1399_s13  ;;  %p1107_p0 = scmp.ge.s32.totalorder %s1403_s14, 1  ;;  %s1403_s14 = sphi %s1429_s14, %s13_s14   ;;  %s1399_s13 = sphi %s1427_s13, %s1623_s13   ;;  %s1395_s12 = sphi %s1425_s12, %s1622_s12  }
   0x3   : > { %p34_p1 = scmp.ge.s32.totalorder %s32_s15, 8  ;;  %p191_p2 = scmp.lt.s32.totalorder %s1403_s14, 9 }
   0x5   : > { %s1625_s15 = smov (%p34_p1, %s32_s15), 0  ;;  %p192_p3 = pnand %p1107_p0, %p191_p2 }
   0x6   : > { %v1317_v0 = vld [vmem:[%s1619_s1 + $0x40] sm:$0xff] (!%p192_p3)   ;;  %s1108_s18 = sshll.u32 (!%p192_p3), %s1395_s12, 5  ;;  %v1319_v2 = vld [vmem:[%s1619_s1 + $0x48] sm:$0xff] (!%p192_p3)   ;;  %v1321_v4 = vld [vmem:[%s1619_s1 + $0x50] sm:$0xff] (!%p192_p3)  }
   0x7   : > { %195 = sbr.rel (%p192_p3) target bundleno = 315 (0x13b), region = 32  ;;  %v1318_v1 = vld [vmem:[%s1619_s1] sm:$0xff] (!%p192_p3)   ;;  %1165 = vmatprep.subr.bf16.mxu0 (!%p192_p3), %v1317_v0  ;;  %1277 = vmatprep.subr.bf16.mxu1 (!%p192_p3), %v1317_v0  ;;  %v1320_v3 = vld [vmem:[%s1619_s1 + $0x8] sm:$0xff] (!%p192_p3)   ;;  %p236_p4 = scmp.lt.s32.totalorder (!%p192_p3), %s1108_s18, 255  ;;  %v1322_v5 = vld [vmem:[%s1619_s1 + $0x10] sm:$0xff] (!%p192_p3)  }
   0x8   : > { %1166 = vmatpush3.bf16.msra.mxu0 (!%p192_p3), %v1318_v1  ;;  %1285 = vmatpush3.bf16.msra.mxu1 (!%p192_p3), %v1318_v1  ;;  %v1323_v6 = vld [vmem:[%s1619_s1 + $0x58] sm:$0xff] (!%p192_p3)   ;;  %v1325_v8 = vld [vmem:[%s1619_s1 + $0x60] sm:$0xff] (!%p192_p3)   ;;  %v1327_v10 = vld [vmem:[%s1619_s1 + $0x68] sm:$0xff] (!%p192_p3)  }
   0x9   : > { %1167 = vmatprep.subr.bf16.mxu0 (!%p192_p3), %v1319_v2  ;;  %1278 = vmatprep.subr.bf16.mxu1 (!%p192_p3), %v1319_v2  ;;  %v1324_v7 = vld [vmem:[%s1619_s1 + $0x18] sm:$0xff] (!%p192_p3)   ;;  %v1326_v9 = vld [vmem:[%s1619_s1 + $0x20] sm:$0xff] (!%p192_p3)   ;;  %v1328_v13 = vld [vmem:[%s1619_s1 + $0x28] sm:$0xff] (!%p192_p3)  }
   0xa   : > { %v1329_v14 = vld [vmem:[%s1619_s1 + $0x70] sm:$0xff] (!%p192_p3)   ;;  %v1331_v16 = vld [vmem:[%s1619_s1 + $0x78] sm:$0xff] (!%p192_p3)   ;;  %v1536_v51 = vld [vmem:[%s1620_s2] ss:$0 sm:$0xff] (!%p192_p3) }
   0xb   : > { %v1330_v15 = vld [vmem:[%s1619_s1 + $0x30] sm:$0xff] (!%p192_p3)   ;;  %v1332_v17 = vld [vmem:[%s1619_s1 + $0x38] sm:$0xff] (!%p192_p3)  }
   0xc   : > { %1168 = vmatpush3.bf16.msra.mxu0 (!%p192_p3), %v1320_v3  ;;  %1286 = vmatpush3.bf16.msra.mxu1 (!%p192_p3), %v1320_v3 }
   0xd   : > { %1169 = vmatprep.subr.bf16.mxu0 (!%p192_p3), %v1321_v4  ;;  %1279 = vmatprep.subr.bf16.mxu1 (!%p192_p3), %v1321_v4 }
   0xe   : > { %s1627_s18 = smov (!%p236_p4, %s1108_s18), 255 }
   0xf   : > { %s1164_s6 = sshll.u32 %s1627_s18, 3 }
  0x10   : > { %1170 = vmatpush3.bf16.msra.mxu0 %v1322_v5  ;;  %1287 = vmatpush3.bf16.msra.mxu1 %v1322_v5  ;;  %s1478_s11 = scalar_lea.vmem %s1618_s0, %s1164_s6  ;;  %s1543_s8 = scalar_lea.vmem %s1621_s3, %s1164_s6 }
  0x11   : > { %1171 = vmatprep.subr.bf16.mxu0 %v1323_v6  ;;  %1280 = vmatprep.subr.bf16.mxu1 %v1323_v6  ;;  %v1335_v11 = vld [vmem:[%s1478_s11 + $0x4] ss:$8 sps:$4 sm:$0xff]   ;;  %v1333_v18 = vld [vmem:[%s1478_s11] ss:$8 sps:$4 sm:$0xff]   ;;  %v1339_v20 = vld [vmem:[%s1478_s11 + $0x14] ss:$8 sps:$4 sm:$0xff]  }
  0x12   : > { %v1338_v12 = vld [vmem:[%s1478_s11 + $0x84] ss:$8 sps:$4 sm:$0xff]   ;;  %688 = vmatprep.mubr.bf16.mxu0 %v1335_v11  ;;  %v1336_v19 = vld [vmem:[%s1478_s11 + $0x80] ss:$8 sps:$4 sm:$0xff]   ;;  %v1341_v21 = vld [vmem:[%s1478_s11 + $0x94] ss:$8 sps:$4 sm:$0xff]  }
  0x13   : > { %752 = vmatprep.mubr.bf16.mxu1 %v1338_v12  ;;  %v1343_v22 = vld [vmem:[%s1478_s11 + $0x10] ss:$8 sps:$4 sm:$0xff]   ;;  %v1345_v24 = vld [vmem:[%s1478_s11 + $0x24] ss:$8 sps:$4 sm:$0xff]   ;;  %v1349_v26 = vld [vmem:[%s1478_s11 + $0x20] ss:$8 sps:$4 sm:$0xff]  }
  0x14   : > { %1172 = vmatpush3.bf16.msra.mxu0 %v1324_v7  ;;  %1288 = vmatpush3.bf16.msra.mxu1 %v1324_v7  ;;  %v1344_v23 = vld [vmem:[%s1478_s11 + $0x90] ss:$8 sps:$4 sm:$0xff]   ;;  %v1347_v25 = vld [vmem:[%s1478_s11 + $0xa4] ss:$8 sps:$4 sm:$0xff]   ;;  %v1350_v27 = vld [vmem:[%s1478_s11 + $0xa0] ss:$8 sps:$4 sm:$0xff]  }
  0x15   : > { %1173 = vmatprep.subr.bf16.mxu0 %v1325_v8  ;;  %1281 = vmatprep.subr.bf16.mxu1 %v1325_v8  ;;  %v1351_v28 = vld [vmem:[%s1478_s11 + $0x34] ss:$8 sps:$4 sm:$0xff]   ;;  %v1355_v30 = vld [vmem:[%s1478_s11 + $0x30] ss:$8 sps:$4 sm:$0xff]   ;;  %v1357_v32 = vld [vmem:[%s1478_s11 + $0x44] ss:$8 sps:$4 sm:$0xff]  }
  0x16   : > { %v1353_v29 = vld [vmem:[%s1478_s11 + $0xb4] ss:$8 sps:$4 sm:$0xff]   ;;  %v1356_v31 = vld [vmem:[%s1478_s11 + $0xb0] ss:$8 sps:$4 sm:$0xff]   ;;  %v1359_v33 = vld [vmem:[%s1478_s11 + $0xc4] ss:$8 sps:$4 sm:$0xff]  }
  0x17   : > { %v1361_v34 = vld [vmem:[%s1478_s11 + $0x40] ss:$8 sps:$4 sm:$0xff]   ;;  %v1363_v36 = vld [vmem:[%s1478_s11 + $0x54] ss:$8 sps:$4 sm:$0xff]   ;;  %v1367_v38 = vld [vmem:[%s1478_s11 + $0x50] ss:$8 sps:$4 sm:$0xff]  }
  0x18   : > { %1174 = vmatpush3.bf16.msra.mxu0 %v1326_v9  ;;  %1289 = vmatpush3.bf16.msra.mxu1 %v1326_v9  ;;  %v1362_v35 = vld [vmem:[%s1478_s11 + $0xc0] ss:$8 sps:$4 sm:$0xff]   ;;  %v1365_v37 = vld [vmem:[%s1478_s11 + $0xd4] ss:$8 sps:$4 sm:$0xff]   ;;  %v1368_v39 = vld [vmem:[%s1478_s11 + $0xd0] ss:$8 sps:$4 sm:$0xff]  }
  0x19   : > { %1175 = vmatprep.subr.bf16.mxu0 %v1327_v10  ;;  %1282 = vmatprep.subr.bf16.mxu1 %v1327_v10  ;;  %v1369_v40 = vld [vmem:[%s1478_s11 + $0x64] ss:$8 sps:$4 sm:$0xff]   ;;  %v1373_v42 = vld [vmem:[%s1478_s11 + $0x60] ss:$8 sps:$4 sm:$0xff]   ;;  %v1375_v44 = vld [vmem:[%s1478_s11 + $0x74] ss:$8 sps:$4 sm:$0xff]  }
  0x1a   : > { %v1371_v41 = vld [vmem:[%s1478_s11 + $0xe4] ss:$8 sps:$4 sm:$0xff]   ;;  %v1374_v43 = vld [vmem:[%s1478_s11 + $0xe0] ss:$8 sps:$4 sm:$0xff]   ;;  %v1377_v45 = vld [vmem:[%s1478_s11 + $0xf4] ss:$8 sps:$4 sm:$0xff]  }
  0x1b   : > { %v1379_v46 = vld [vmem:[%s1478_s11 + $0x70] ss:$8 sps:$4 sm:$0xff]  }
  0x1c   : > { %1176 = vmatpush3.bf16.msra.mxu0 %v1328_v13  ;;  %1290 = vmatpush3.bf16.msra.mxu1 %v1328_v13  ;;  %v1380_v47 = vld [vmem:[%s1478_s11 + $0xf0] ss:$8 sps:$4 sm:$0xff]  }
  0x1d   : > { %1177 = vmatprep.subr.bf16.mxu0 %v1329_v14  ;;  %1283 = vmatprep.subr.bf16.mxu1 %v1329_v14 }
  0x20   : > { %1178 = vmatpush3.bf16.msra.mxu0 %v1330_v15  ;;  %1291 = vmatpush3.bf16.msra.mxu1 %v1330_v15 }
  0x21   : > { %1179 = vmatprep.subr.bf16.mxu0 %v1331_v16  ;;  %1284 = vmatprep.subr.bf16.mxu1 %v1331_v16 }
  0x24   : > { %1180 = vmatpush3.bf16.msra.mxu0 %v1332_v17  ;;  %1292 = vmatpush3.bf16.msra.mxu1 %v1332_v17 }
  0x27   : > { %689 = vmatmul.mubr.bf16.vlgmr.msra.gmra.mrb[0].mxu0 %v1333_v18  ;;  %753 = vmatmul.mubr.bf16.vlgmr.msra.gmra.mrb[0].mxu1 %v1336_v19 }
  0x28   : > { %696 = vmatprep.mubr.bf16.mxu0 %v1339_v20  ;;  %760 = vmatprep.mubr.bf16.mxu1 %v1341_v21 }
  0x2f   : > { %697 = vmatmul.mubr.bf16.gmra.mrb[4].mxu0 %v1343_v22  ;;  %761 = vmatmul.mubr.bf16.gmra.mrb[4].mxu1 %v1344_v23 }
  0x30   : > { %704 = vmatprep.mubr.bf16.mxu0 %v1345_v24  ;;  %768 = vmatprep.mubr.bf16.mxu1 %v1347_v25 }
  0x37   : > { %705 = vmatmul.mubr.bf16.gmra.mrb[8].mxu0 %v1349_v26  ;;  %769 = vmatmul.mubr.bf16.gmra.mrb[8].mxu1 %v1350_v27 }
  0x38   : > { %712 = vmatprep.mubr.bf16.mxu0 %v1351_v28  ;;  %776 = vmatprep.mubr.bf16.mxu1 %v1353_v29 }
  0x3f   : > { %713 = vmatmul.mubr.bf16.gmra.mrb[12].mxu0 %v1355_v30  ;;  %777 = vmatmul.mubr.bf16.gmra.mrb[12].mxu1 %v1356_v31 }
  0x40   : > { %720 = vmatprep.mubr.bf16.mxu0 %v1357_v32  ;;  %784 = vmatprep.mubr.bf16.mxu1 %v1359_v33 }
  0x47   : > { %721 = vmatmul.mubr.bf16.gmra.mrb[16].mxu0 %v1361_v34  ;;  %785 = vmatmul.mubr.bf16.gmra.mrb[16].mxu1 %v1362_v35 }
  0x48   : > { %728 = vmatprep.mubr.bf16.mxu0 %v1363_v36  ;;  %792 = vmatprep.mubr.bf16.mxu1 %v1365_v37 }
  0x4f   : > { %729 = vmatmul.mubr.bf16.gmra.mrb[20].mxu0 %v1367_v38  ;;  %793 = vmatmul.mubr.bf16.gmra.mrb[20].mxu1 %v1368_v39 }
  0x50   : > { %736 = vmatprep.mubr.bf16.mxu0 %v1369_v40  ;;  %800 = vmatprep.mubr.bf16.mxu1 %v1371_v41 }
  0x57   : > { %737 = vmatmul.mubr.bf16.gmra.mrb[24].mxu0 %v1373_v42  ;;  %801 = vmatmul.mubr.bf16.gmra.mrb[24].mxu1 %v1374_v43 }
  0x58   : > { %744 = vmatprep.mubr.bf16.mxu0 %v1375_v44  ;;  %808 = vmatprep.mubr.bf16.mxu1 %v1377_v45 }
  0x5f   : > { %745 = vmatmul.mubr.bf16.gmra.mrb[28].mxu0 %v1379_v46  ;;  %809 = vmatmul.mubr.bf16.gmra.mrb[28].mxu1 %v1380_v47 }
  0xfa   : > { %v1181_v48 = vpop.f32.mrb[0].mxu0  ;;  %v1229_v49 = vpop.f32.mrb[0].mxu1 }
  0xfb   : > { %v1182_v50 = vpop.f32.mrb[1].mxu0  ;;  %v1230_v52 = vpop.f32.mrb[1].mxu1 }
  0xfc   : > { %v1183_v53 = vadd.f32 %v1182_v50, %v1181_v48  ;;  %v1231_v54 = vadd.f32 %v1230_v52, %v1229_v49  ;;  %v1184_v55 = vpop.f32.mrb[2].mxu0  ;;  %v1232_v56 = vpop.f32.mrb[2].mxu1 }
  0xfd   : > { %v1185_v57 = vpop.f32.mrb[3].mxu0  ;;  %v1233_v58 = vpop.f32.mrb[3].mxu1 }
  0xfe   : > { %v923_v59 = vadd.f32 %v1183_v53, %v1536_v51  ;;  %v939_v60 = vadd.f32 %v1231_v54, %v1536_v51  ;;  %v1186_v61 = vadd.f32 %v1185_v57, %v1184_v55  ;;  %v1234_v62 = vadd.f32 %v1233_v58, %v1232_v56 }
 0x100   : > { %955 = vst [vmem:[%s1543_s8] sm:$0xff] %v923_v59  ;;  %971 = vst [vmem:[%s1543_s8 + $0x80] sm:$0xff] %v939_v60  ;;  %v924_v63 = vadd.f32 %v1186_v61, %v1536_v51  ;;  %v940_v0 = vadd.f32 %v1234_v62, %v1536_v51 }
 0x102   : > { %956 = vst [vmem:[%s1543_s8 + $0x8] sm:$0xff] %v924_v63  ;;  %972 = vst [vmem:[%s1543_s8 + $0x88] sm:$0xff] %v940_v0  ;;  %v1187_v1 = vpop.f32.mrb[4].mxu0  ;;  %v1235_v2 = vpop.f32.mrb[4].mxu1 }
 0x103   : > { %v1188_v3 = vpop.f32.mrb[5].mxu0  ;;  %v1236_v4 = vpop.f32.mrb[5].mxu1 }
 0x104   : > { %v1189_v5 = vadd.f32 %v1188_v3, %v1187_v1  ;;  %v1237_v6 = vadd.f32 %v1236_v4, %v1235_v2  ;;  %v1190_v7 = vpop.f32.mrb[6].mxu0  ;;  %v1238_v8 = vpop.f32.mrb[6].mxu1 }
 0x105   : > { %v1191_v9 = vpop.f32.mrb[7].mxu0  ;;  %v1239_v10 = vpop.f32.mrb[7].mxu1 }
 0x106   : > { %v925_v11 = vadd.f32 %v1189_v5, %v1536_v51  ;;  %v941_v12 = vadd.f32 %v1237_v6, %v1536_v51  ;;  %v1192_v13 = vadd.f32 %v1191_v9, %v1190_v7  ;;  %v1240_v14 = vadd.f32 %v1239_v10, %v1238_v8 }
 0x108   : > { %957 = vst [vmem:[%s1543_s8 + $0x10] sm:$0xff] %v925_v11  ;;  %973 = vst [vmem:[%s1543_s8 + $0x90] sm:$0xff] %v941_v12  ;;  %v926_v15 = vadd.f32 %v1192_v13, %v1536_v51  ;;  %v942_v16 = vadd.f32 %v1240_v14, %v1536_v51 }
 0x10a   : > { %958 = vst [vmem:[%s1543_s8 + $0x18] sm:$0xff] %v926_v15  ;;  %974 = vst [vmem:[%s1543_s8 + $0x98] sm:$0xff] %v942_v16  ;;  %v1193_v17 = vpop.f32.mrb[8].mxu0  ;;  %v1241_v18 = vpop.f32.mrb[8].mxu1 }
 0x10b   : > { %v1194_v19 = vpop.f32.mrb[9].mxu0  ;;  %v1242_v20 = vpop.f32.mrb[9].mxu1 }
 0x10c   : > { %v1195_v21 = vadd.f32 %v1194_v19, %v1193_v17  ;;  %v1243_v22 = vadd.f32 %v1242_v20, %v1241_v18  ;;  %v1196_v23 = vpop.f32.mrb[10].mxu0  ;;  %v1244_v24 = vpop.f32.mrb[10].mxu1 }
 0x10d   : > { %v1197_v25 = vpop.f32.mrb[11].mxu0  ;;  %v1245_v26 = vpop.f32.mrb[11].mxu1 }
 0x10e   : > { %v927_v27 = vadd.f32 %v1195_v21, %v1536_v51  ;;  %v943_v28 = vadd.f32 %v1243_v22, %v1536_v51  ;;  %v1198_v29 = vadd.f32 %v1197_v25, %v1196_v23  ;;  %v1246_v30 = vadd.f32 %v1245_v26, %v1244_v24 }
 0x110   : > { %959 = vst [vmem:[%s1543_s8 + $0x20] sm:$0xff] %v927_v27  ;;  %975 = vst [vmem:[%s1543_s8 + $0xa0] sm:$0xff] %v943_v28  ;;  %v928_v31 = vadd.f32 %v1198_v29, %v1536_v51  ;;  %v944_v32 = vadd.f32 %v1246_v30, %v1536_v51 }
 0x112   : > { %960 = vst [vmem:[%s1543_s8 + $0x28] sm:$0xff] %v928_v31  ;;  %976 = vst [vmem:[%s1543_s8 + $0xa8] sm:$0xff] %v944_v32  ;;  %v1199_v33 = vpop.f32.mrb[12].mxu0  ;;  %v1247_v34 = vpop.f32.mrb[12].mxu1 }
 0x113   : > { %v1200_v35 = vpop.f32.mrb[13].mxu0  ;;  %v1248_v36 = vpop.f32.mrb[13].mxu1 }
 0x114   : > { %v1201_v37 = vadd.f32 %v1200_v35, %v1199_v33  ;;  %v1249_v38 = vadd.f32 %v1248_v36, %v1247_v34  ;;  %v1202_v39 = vpop.f32.mrb[14].mxu0  ;;  %v1250_v40 = vpop.f32.mrb[14].mxu1 }
 0x115   : > { %v1203_v41 = vpop.f32.mrb[15].mxu0  ;;  %v1251_v42 = vpop.f32.mrb[15].mxu1 }
 0x116   : > { %v929_v43 = vadd.f32 %v1201_v37, %v1536_v51  ;;  %v945_v44 = vadd.f32 %v1249_v38, %v1536_v51  ;;  %v1204_v45 = vadd.f32 %v1203_v41, %v1202_v39  ;;  %v1252_v46 = vadd.f32 %v1251_v42, %v1250_v40 }
 0x118   : > { %961 = vst [vmem:[%s1543_s8 + $0x30] sm:$0xff] %v929_v43  ;;  %977 = vst [vmem:[%s1543_s8 + $0xb0] sm:$0xff] %v945_v44  ;;  %v930_v47 = vadd.f32 %v1204_v45, %v1536_v51  ;;  %v946_v48 = vadd.f32 %v1252_v46, %v1536_v51 }
 0x11a   : > { %962 = vst [vmem:[%s1543_s8 + $0x38] sm:$0xff] %v930_v47  ;;  %978 = vst [vmem:[%s1543_s8 + $0xb8] sm:$0xff] %v946_v48  ;;  %v1205_v49 = vpop.f32.mrb[16].mxu0  ;;  %v1253_v50 = vpop.f32.mrb[16].mxu1 }
 0x11b   : > { %v1206_v52 = vpop.f32.mrb[17].mxu0  ;;  %v1254_v53 = vpop.f32.mrb[17].mxu1 }
 0x11c   : > { %v1207_v54 = vadd.f32 %v1206_v52, %v1205_v49  ;;  %v1255_v55 = vadd.f32 %v1254_v53, %v1253_v50  ;;  %v1208_v56 = vpop.f32.mrb[18].mxu0  ;;  %v1256_v57 = vpop.f32.mrb[18].mxu1 }
 0x11d   : > { %v1209_v58 = vpop.f32.mrb[19].mxu0  ;;  %v1257_v59 = vpop.f32.mrb[19].mxu1 }
 0x11e   : > { %v931_v60 = vadd.f32 %v1207_v54, %v1536_v51  ;;  %v947_v61 = vadd.f32 %v1255_v55, %v1536_v51  ;;  %v1210_v62 = vadd.f32 %v1209_v58, %v1208_v56  ;;  %v1258_v63 = vadd.f32 %v1257_v59, %v1256_v57 }
 0x120   : > { %963 = vst [vmem:[%s1543_s8 + $0x40] sm:$0xff] %v931_v60  ;;  %979 = vst [vmem:[%s1543_s8 + $0xc0] sm:$0xff] %v947_v61  ;;  %v932_v0 = vadd.f32 %v1210_v62, %v1536_v51  ;;  %v948_v1 = vadd.f32 %v1258_v63, %v1536_v51 }
 0x122   : > { %964 = vst [vmem:[%s1543_s8 + $0x48] sm:$0xff] %v932_v0  ;;  %980 = vst [vmem:[%s1543_s8 + $0xc8] sm:$0xff] %v948_v1  ;;  %v1211_v2 = vpop.f32.mrb[20].mxu0  ;;  %v1259_v3 = vpop.f32.mrb[20].mxu1 }
 0x123   : > { %v1212_v4 = vpop.f32.mrb[21].mxu0  ;;  %v1260_v5 = vpop.f32.mrb[21].mxu1 }
 0x124   : > { %v1213_v6 = vadd.f32 %v1212_v4, %v1211_v2  ;;  %v1261_v7 = vadd.f32 %v1260_v5, %v1259_v3  ;;  %v1214_v8 = vpop.f32.mrb[22].mxu0  ;;  %v1262_v9 = vpop.f32.mrb[22].mxu1 }
 0x125   : > { %v1215_v10 = vpop.f32.mrb[23].mxu0  ;;  %v1263_v11 = vpop.f32.mrb[23].mxu1 }
 0x126   : > { %v933_v12 = vadd.f32 %v1213_v6, %v1536_v51  ;;  %v949_v13 = vadd.f32 %v1261_v7, %v1536_v51  ;;  %v1216_v14 = vadd.f32 %v1215_v10, %v1214_v8  ;;  %v1264_v15 = vadd.f32 %v1263_v11, %v1262_v9 }
 0x128   : > { %965 = vst [vmem:[%s1543_s8 + $0x50] sm:$0xff] %v933_v12  ;;  %981 = vst [vmem:[%s1543_s8 + $0xd0] sm:$0xff] %v949_v13  ;;  %v934_v16 = vadd.f32 %v1216_v14, %v1536_v51  ;;  %v950_v17 = vadd.f32 %v1264_v15, %v1536_v51 }
 0x12a   : > { %966 = vst [vmem:[%s1543_s8 + $0x58] sm:$0xff] %v934_v16  ;;  %982 = vst [vmem:[%s1543_s8 + $0xd8] sm:$0xff] %v950_v17  ;;  %v1217_v18 = vpop.f32.mrb[24].mxu0  ;;  %v1265_v19 = vpop.f32.mrb[24].mxu1 }
 0x12b   : > { %v1218_v20 = vpop.f32.mrb[25].mxu0  ;;  %v1266_v21 = vpop.f32.mrb[25].mxu1 }
 0x12c   : > { %v1219_v22 = vadd.f32 %v1218_v20, %v1217_v18  ;;  %v1267_v23 = vadd.f32 %v1266_v21, %v1265_v19  ;;  %v1220_v24 = vpop.f32.mrb[26].mxu0  ;;  %v1268_v25 = vpop.f32.mrb[26].mxu1 }
 0x12d   : > { %v1221_v26 = vpop.f32.mrb[27].mxu0  ;;  %v1269_v27 = vpop.f32.mrb[27].mxu1 }
 0x12e   : > { %v935_v28 = vadd.f32 %v1219_v22, %v1536_v51  ;;  %v951_v29 = vadd.f32 %v1267_v23, %v1536_v51  ;;  %v1222_v30 = vadd.f32 %v1221_v26, %v1220_v24  ;;  %v1270_v31 = vadd.f32 %v1269_v27, %v1268_v25 }
 0x130   : > { %967 = vst [vmem:[%s1543_s8 + $0x60] sm:$0xff] %v935_v28  ;;  %983 = vst [vmem:[%s1543_s8 + $0xe0] sm:$0xff] %v951_v29  ;;  %v936_v32 = vadd.f32 %v1222_v30, %v1536_v51  ;;  %v952_v33 = vadd.f32 %v1270_v31, %v1536_v51 }
 0x132   : > { %968 = vst [vmem:[%s1543_s8 + $0x68] sm:$0xff] %v936_v32  ;;  %984 = vst [vmem:[%s1543_s8 + $0xe8] sm:$0xff] %v952_v33  ;;  %v1223_v34 = vpop.f32.mrb[28].mxu0  ;;  %v1271_v35 = vpop.f32.mrb[28].mxu1 }
 0x133   : > { %v1224_v36 = vpop.f32.mrb[29].mxu0  ;;  %v1272_v37 = vpop.f32.mrb[29].mxu1 }
 0x134   : > { %v1225_v38 = vadd.f32 %v1224_v36, %v1223_v34  ;;  %v1273_v39 = vadd.f32 %v1272_v37, %v1271_v35  ;;  %v1226_v40 = vpop.f32.mrb[30].mxu0  ;;  %v1274_v41 = vpop.f32.mrb[30].mxu1 }
 0x135   : > { %v1227_v42 = vpop.f32.mrb[31].mxu0  ;;  %v1275_v43 = vpop.f32.mrb[31].mxu1 }
 0x136   : > { %v937_v44 = vadd.f32 %v1225_v38, %v1536_v51  ;;  %v953_v45 = vadd.f32 %v1273_v39, %v1536_v51  ;;  %v1228_v46 = vadd.f32 %v1227_v42, %v1226_v40  ;;  %v1276_v47 = vadd.f32 %v1275_v43, %v1274_v41 }
 0x138   : > { %969 = vst [vmem:[%s1543_s8 + $0x70] sm:$0xff] %v937_v44  ;;  %985 = vst [vmem:[%s1543_s8 + $0xf0] sm:$0xff] %v953_v45  ;;  %v938_v48 = vadd.f32 %v1228_v46, %v1536_v51  ;;  %v954_v49 = vadd.f32 %v1276_v47, %v1536_v51 }
 0x13a   : > { %970 = vst [vmem:[%s1543_s8 + $0x78] sm:$0xff] %v938_v48  ;;  %986 = vst [vmem:[%s1543_s8 + $0xf8] sm:$0xff] %v954_v49 }
 0x13b PF: > { %s13_s14 = sadd.s32 1, %s1403_s14   ;;  %s1622_s12 = smov %s1399_s13 }
 0x13c   : > { %p10_p5 = scmp.ge.s32.totalorder %s13_s14, 10   ;;  %s1623_s13 = smov %s1625_s15 }
 0x13e   :  { %12 = sbr.rel (!%p10_p5) target bundleno = 2 (0x2), region = 76 }

</bundles_post_ra>
